<compile_context>
chip_gen: v6e
topology: v6e:2x2x1
jax: 0.10.0
libtpu: 0.0.40
codegen_flags: <defaults>
</compile_context>

<pallas_src>
import jax
import jax.numpy as jnp
import numpy as np
from jax.experimental import pallas as pl
from jax.experimental.pallas import tpu as pltpu

_BN_EPS = 1e-5
_LANE = 128
_WL = 8          # left-halo width in columns; 8-aligned interior stores


def _round_up(n, m):
    return ((n + m - 1) // m) * m


# ----------------------------------------------------------------------------
# Fused BasicBlock kernel
# ----------------------------------------------------------------------------
def _make_block_kernel(H, W, cin, cout, stride, has_sc_conv):
    s = stride
    ho = (H - 1) // s + 1
    wo = (W - 1) // s + 1

    def taps_row(ref, dy, st):
        """Three dx taps of kernel row dy, sliced directly from the ref."""
        taps = []
        for dx in range(3):
            c0 = _WL - 1 + dx
            if st == 1:
                taps.append(ref[dy:dy + ho, c0:c0 + wo, :])
            else:  # stride handled with strided ds reads (no reshape subsample)
                taps.append(ref[pl.ds(dy, ho, stride=st),
                                pl.ds(c0, wo, stride=st), :])
        return taps

    def conv3x3(ref, wk_ref, st, ci):
        """3x3 conv = 3 MXU matmuls with K = 3*ci (dx taps fused into K)."""
        acc = None
        for dy in range(3):
            pat = jnp.concatenate(taps_row(ref, dy, st), axis=-1)
            pat = pat.reshape(ho * wo, 3 * ci)
            term = jnp.dot(pat, wk_ref[dy], preferred_element_type=jnp.float32)
            acc = term if acc is None else acc + term
        return acc

    def zero_halo_ring(ref, h_in, w_in):
        """Zero only the 1-wide halo ring the taps read; the interior store
        never touches these cells and padded weight/scale/bias lanes are
        exactly zero, so nothing stale can leak into real output channels."""
        dt = ref.dtype
        wp = ref.shape[1]
        c = ref.shape[2]
        zrow = jnp.zeros((1, wp, c), dt)
        ref[0:1, :, :] = zrow                                    # top row
        ref[h_in + 1:h_in + 2, :, :] = zrow                      # bottom row
        zcol = jnp.zeros((h_in, 1, c), dt)
        ref[1:h_in + 1, _WL - 1:_WL, :] = zcol                   # left column
        ref[1:h_in + 1, _WL + w_in:_WL + w_in + 1, :] = zcol     # right column

    def kernel(*refs):
        if has_sc_conv:
            (x_ref, w1_ref, s1_ref, b1_ref, w2_ref, s2_ref, b2_ref,
             wsc_ref, ssc_ref, bsc_ref, o_ref, xpad_ref, mpad_ref) = refs
        else:
            (x_ref, w1_ref, s1_ref, b1_ref, w2_ref, s2_ref, b2_ref,
             o_ref, xpad_ref, mpad_ref) = refs

        # ---- stage x: thin halo ring of zeros + sublane-aligned interior ----
        zero_halo_ring(xpad_ref, H, W)
        xpad_ref[1:H + 1, _WL:_WL + W, :] = x_ref[0]

        # ---- conv1 (stride in-kernel) + bn1 + relu ---------------------------
        acc1 = conv3x3(xpad_ref, w1_ref, s, cin)
        out1 = jnp.maximum(acc1 * s1_ref[...] + b1_ref[...], 0.0)   # f32

        # ---- stage conv1 output (bf16) for conv2 -----------------------------
        zero_halo_ring(mpad_ref, ho, wo)
        mpad_ref[1:ho + 1, _WL:_WL + wo, :] = (
            out1.reshape(ho, wo, cout).astype(mpad_ref.dtype))

        # ---- conv2 + bn2 ------------------------------------------------------
        acc2 = conv3x3(mpad_ref, w2_ref, 1, cout)
        out2 = acc2 * s2_ref[...] + b2_ref[...]

        # ---- shortcut: reuses the x tile already staged in VMEM --------------
        if has_sc_conv:
            if s == 1:
                ctr = xpad_ref[1:1 + ho, _WL:_WL + wo, :]
            else:
                ctr = xpad_ref[pl.ds(1, ho, stride=s),
                               pl.ds(_WL, wo, stride=s), :]
            sc = jnp.dot(ctr.reshape(ho * wo, cin), wsc_ref[...],
                         preferred_element_type=jnp.float32)
            sc = sc * ssc_ref[...] + bsc_ref[...]
        else:
            # identity shortcut (stride == 1 and cin == cout)
            sc = xpad_ref[1:H + 1, _WL:_WL + W, :].reshape(
                ho * wo, cout).astype(jnp.float32)

        # ---- residual add + relu, lane-dense bf16 store -----------------------
        out = jnp.maximum(out2 + sc, 0.0)
        o_ref[0] = out.reshape(ho, wo, cout).astype(o_ref.dtype)

    return kernel


# ----------------------------------------------------------------------------
# Parameter init (deterministic; shapes dictated by BasicBlock.__init__)
# ----------------------------------------------------------------------------
def _bn_params(key, planes):
    k1, k2, k3, k4 = jax.random.split(key, 4)
    gamma = 1.0 + 0.1 * jax.random.normal(k1, (planes,), jnp.float32)
    beta = 0.1 * jax.random.normal(k2, (planes,), jnp.float32)
    mean = 0.1 * jax.random.normal(k3, (planes,), jnp.float32)
    var = jnp.abs(jax.random.normal(k4, (planes,), jnp.float32)) + 0.5
    return {"gamma": gamma, "beta": beta, "mean": mean, "var": var}


def _fold_bn(bn):
    scale = bn["gamma"] * jax.lax.rsqrt(bn["var"] + _BN_EPS)
    bias = bn["beta"] - bn["mean"] * scale
    return scale, bias


def init_basic_block_params(key, in_planes, planes, stride):
    ks = jax.random.split(key, 6)
    p = {
        "w1": 0.1 * jax.random.normal(ks[0], (3, 3, in_planes, planes), jnp.float32),
        "bn1": _bn_params(ks[1], planes),
        "w2": 0.1 * jax.random.normal(ks[2], (3, 3, planes, planes), jnp.float32),
        "bn2": _bn_params(ks[3], planes),
    }
    if stride != 1 or in_planes != planes:
        p["w_sc"] = 0.1 * jax.random.normal(ks[4], (1, 1, in_planes, planes), jnp.float32)
        p["bn_sc"] = _bn_params(ks[5], planes)
    return p


# ----------------------------------------------------------------------------
# Host-side packing helpers
# ----------------------------------------------------------------------------
def _pad_vec(v, cp):
    # Zero padding keeps padded output channels exactly 0 (no stale-lane leak).
    return jnp.pad(v, (0, cp - v.shape[0])).reshape(1, cp).astype(jnp.float32)


def _pack_conv3x3(w, cin_p, cout_p):
    """(3,3,cin,cout) -> (3, 3*cin_p, cout_p) bf16; dx taps stacked into K."""
    cin, cout = w.shape[2], w.shape[3]
    w = jnp.pad(w, ((0, 0), (0, 0), (0, cin_p - cin), (0, cout_p - cout)))
    return w.reshape(3, 3 * cin_p, cout_p).astype(jnp.bfloat16)


# ----------------------------------------------------------------------------
# BasicBlock forward, NHWC channel-padded bf16 in / out (block-chaining form)
# ----------------------------------------------------------------------------
def basic_block_forward_nhwc(x_nhwc, params, in_planes, planes, stride=1):
    """x_nhwc: (N, H, W, cin_p) bf16, channels zero-padded to the 128-lane
    width.  Returns (N, ho, wo, cout_p) bf16 in the same convention so stacked
    blocks chain without NCHW<->NHWC transposes or channel re-padding."""
    N, H, W, cin_p = x_nhwc.shape
    assert cin_p == _round_up(in_planes, _LANE)
    cout_p = _round_up(planes, _LANE)
    ho = (H - 1) // stride + 1
    wo = (W - 1) // stride + 1
    has_sc_conv = (stride != 1) or (in_planes != planes)
    if not has_sc_conv:
        assert cin_p == cout_p

    s1, b1 = _fold_bn(params["bn1"])
    s2, b2 = _fold_bn(params["bn2"])
    w1 = _pack_conv3x3(params["w1"], cin_p, cout_p)
    w2 = _pack_conv3x3(params["w2"], cout_p, cout_p)

    args = [x_nhwc, w1, _pad_vec(s1, cout_p), _pad_vec(b1, cout_p),
            w2, _pad_vec(s2, cout_p), _pad_vec(b2, cout_p)]

    # Weight / BN blocks never change across the grid -> single-buffer them.
    const_blk = dict(pipeline_mode=pl.Buffered(1))
    in_specs = [
        pl.BlockSpec((1, H, W, cin_p), lambda n: (n, 0, 0, 0)),
        pl.BlockSpec((3, 3 * cin_p, cout_p), lambda n: (0, 0, 0), **const_blk),
        pl.BlockSpec((1, cout_p), lambda n: (0, 0), **const_blk),
        pl.BlockSpec((1, cout_p), lambda n: (0, 0), **const_blk),
        pl.BlockSpec((3, 3 * cout_p, cout_p), lambda n: (0, 0, 0), **const_blk),
        pl.BlockSpec((1, cout_p), lambda n: (0, 0), **const_blk),
        pl.BlockSpec((1, cout_p), lambda n: (0, 0), **const_blk),
    ]
    if has_sc_conv:
        ssc, bsc = _fold_bn(params["bn_sc"])
        wsc = params["w_sc"].reshape(in_planes, planes)
        wsc = jnp.pad(wsc, ((0, cin_p - in_planes), (0, cout_p - planes))
                      ).astype(jnp.bfloat16)
        args += [wsc, _pad_vec(ssc, cout_p), _pad_vec(bsc, cout_p)]
        in_specs += [
            pl.BlockSpec((cin_p, cout_p), lambda n: (0, 0), **const_blk),
            pl.BlockSpec((1, cout_p), lambda n: (0, 0), **const_blk),
            pl.BlockSpec((1, cout_p), lambda n: (0, 0), **const_blk),
        ]

    # Padded staging buffer extents (1 top row + interior + halo, 8-col left pad).
    hp1 = max(stride * (ho - 1) + 3, H + 2)
    wp1 = _round_up(max(_WL + 1 + stride * (wo - 1), _WL + W) + 1, 8)
    hp2 = ho + 2
    wp2 = _round_up(_WL + wo + 1, 8)

    kernel = _make_block_kernel(H, W, cin_p, cout_p, stride, has_sc_conv)

    flops = 2 * N * ho * wo * (9 * cin_p * cout_p + 9 * cout_p * cout_p
                               + (cin_p * cout_p if has_sc_conv else 0))
    bytes_accessed = (int(x_nhwc.size) * 2 + int(w1.size) * 2 + int(w2.size) * 2
                      + N * ho * wo * cout_p * 2)

    return pl.pallas_call(
        kernel,
        out_shape=jax.ShapeDtypeStruct((N, ho, wo, cout_p), jnp.bfloat16),
        grid=(N,),
        in_specs=in_specs,
        out_specs=pl.BlockSpec((1, ho, wo, cout_p), lambda n: (n, 0, 0, 0)),
        scratch_shapes=[
            pltpu.VMEM((hp1, wp1, cin_p), jnp.bfloat16),   # padded x tile
            pltpu.VMEM((hp2, wp2, cout_p), jnp.bfloat16),  # padded conv1 out
        ],
        compiler_params=pltpu.CompilerParams(
            dimension_semantics=("parallel",),
            vmem_limit_bytes=64 * 1024 * 1024),
        cost_estimate=pl.CostEstimate(flops=flops, transcendentals=0,
                                      bytes_accessed=bytes_accessed),
    )(*args)


# ----------------------------------------------------------------------------
# Convenience wrapper matching the PyTorch module layout (NCHW f32 in / out)
# ----------------------------------------------------------------------------
def basic_block_forward(x_nchw, params, in_planes, planes, stride=1):
    N, cin, H, W = x_nchw.shape
    assert cin == in_planes
    cin_p = _round_up(in_planes, _LANE)
    x = jnp.transpose(x_nchw, (0, 2, 3, 1)).astype(jnp.bfloat16)
    x = jnp.pad(x, ((0, 0), (0, 0), (0, 0), (0, cin_p - in_planes)))
    y = basic_block_forward_nhwc(x, params, in_planes, planes, stride)
    return jnp.transpose(y[..., :planes].astype(jnp.float32), (0, 3, 1, 2))


# ----------------------------------------------------------------------------
# Plain-JAX reference mirroring the kernel numerics (bf16 operands / output,
# f32 accumulation)
# ----------------------------------------------------------------------------
def _ref_conv(x, w, stride, pad):
    return jax.lax.conv_general_dilated(
        x, w, window_strides=(stride, stride),
        padding=[(pad, pad), (pad, pad)],
        dimension_numbers=("NHWC", "HWIO", "NHWC"))


def ref_forward(x_nchw, params, in_planes, planes, stride=1):
    q = lambda a: a.astype(jnp.bfloat16).astype(jnp.float32)
    x = jnp.transpose(x_nchw, (0, 2, 3, 1)).astype(jnp.float32)
    s1, b1 = _fold_bn(params["bn1"])
    s2, b2 = _fold_bn(params["bn2"])

    out = jax.nn.relu(_ref_conv(q(x), q(params["w1"]), stride, 1) * s1 + b1)
    out = _ref_conv(q(out), q(params["w2"]), 1, 1) * s2 + b2

    if stride != 1 or in_planes != planes:
        ssc, bsc = _fold_bn(params["bn_sc"])
        sc = _ref_conv(q(x), q(params["w_sc"]), stride, 0) * ssc + bsc
    else:
        sc = q(x)

    out = q(jax.nn.relu(out + sc))          # kernel writes bf16
    return jnp.transpose(out, (0, 3, 1, 2))


# ----------------------------------------------------------------------------
if __name__ == "__main__":
    key = jax.random.PRNGKey(0)
    kx1, kp1, kx2, kp2 = jax.random.split(key, 4)

    # Tolerances cover one bf16 ULP of the bf16 kernel output.
    TOL = dict(atol=1e-2, rtol=1e-2)

    # Case 1: projection shortcut (in_planes != planes), stride 1.
    N, in_planes, planes, H, W, stride = 2, 4, 8, 16, 16, 1
    x = jax.random.normal(kx1, (N, in_planes, H, W), jnp.float32)
    params = init_basic_block_params(kp1, in_planes, planes, stride)
    y = jax.block_until_ready(
        basic_block_forward(x, params, in_planes, planes, stride))
    y_ref = ref_forward(x, params, in_planes, planes, stride)
    assert y.shape == (N, planes, H, W)
    np.testing.assert_allclose(np.asarray(y), np.asarray(y_ref), **TOL)

    # Case 2: identity shortcut (in_planes == planes, stride 1).
    x2 = jax.random.normal(kx2, (2, 8, 16, 16), jnp.float32)
    params2 = init_basic_block_params(kp2, 8, 8, 1)
    y2 = jax.block_until_ready(basic_block_forward(x2, params2, 8, 8, 1))
    y2_ref = ref_forward(x2, params2, 8, 8, 1)
    np.testing.assert_allclose(np.asarray(y2), np.asarray(y2_ref), **TOL)

    print("KERNEL_OK")
</pallas_src>

<mosaic_0001>
module attributes {stable_mosaic.version = 11 : i64} {
  func.func @kernel(%arg0: i32, %arg1: memref<1x16x16x128xbf16, #tpu.memory_space<vmem>>, %arg2: memref<3x384x128xbf16, #tpu.memory_space<vmem>>, %arg3: memref<1x128xf32, #tpu.memory_space<vmem>>, %arg4: memref<1x128xf32, #tpu.memory_space<vmem>>, %arg5: memref<3x384x128xbf16, #tpu.memory_space<vmem>>, %arg6: memref<1x128xf32, #tpu.memory_space<vmem>>, %arg7: memref<1x128xf32, #tpu.memory_space<vmem>>, %arg8: memref<128x128xbf16, #tpu.memory_space<vmem>>, %arg9: memref<1x128xf32, #tpu.memory_space<vmem>>, %arg10: memref<1x128xf32, #tpu.memory_space<vmem>>, %arg11: memref<1x16x16x128xbf16, #tpu.memory_space<vmem>>, %arg12: memref<18x32x128xbf16, #tpu.memory_space<vmem>>, %arg13: memref<18x32x128xbf16, #tpu.memory_space<vmem>>) attributes {dimension_semantics = [#tpu.dimension_semantics<parallel>], iteration_bounds = array<i64: 2>, scalar_prefetch = 0 : i64, scratch_operands = 2 : i64, tpu.core_type = #tpu.core_type<tc>, window_params = [{transform_indices = @transform_0, window_bounds = array<i64: 1, 16, 16, 128>}, {pipeline_mode = #tpu.pipeline_mode<synchronous>, transform_indices = @transform_1, window_bounds = array<i64: 3, 384, 128>}, {pipeline_mode = #tpu.pipeline_mode<synchronous>, transform_indices = @transform_2, window_bounds = array<i64: 1, 128>}, {pipeline_mode = #tpu.pipeline_mode<synchronous>, transform_indices = @transform_3, window_bounds = array<i64: 1, 128>}, {pipeline_mode = #tpu.pipeline_mode<synchronous>, transform_indices = @transform_4, window_bounds = array<i64: 3, 384, 128>}, {pipeline_mode = #tpu.pipeline_mode<synchronous>, transform_indices = @transform_5, window_bounds = array<i64: 1, 128>}, {pipeline_mode = #tpu.pipeline_mode<synchronous>, transform_indices = @transform_6, window_bounds = array<i64: 1, 128>}, {pipeline_mode = #tpu.pipeline_mode<synchronous>, transform_indices = @transform_7, window_bounds = array<i64: 128, 128>}, {pipeline_mode = #tpu.pipeline_mode<synchronous>, transform_indices = @transform_8, window_bounds = array<i64: 1, 128>}, {pipeline_mode = #tpu.pipeline_mode<synchronous>, transform_indices = @transform_9, window_bounds = array<i64: 1, 128>}, {transform_indices = @transform_10, window_bounds = array<i64: 1, 16, 16, 128>}]} {
    %cst = arith.constant 0.000000e+00 : bf16
    %0 = vector.broadcast %cst : bf16 to vector<1x32x128xbf16>
    %c0 = arith.constant 0 : index
    %c0_0 = arith.constant 0 : index
    %c0_1 = arith.constant 0 : index
    %1 = vector.load %arg12[%c0, %c0_0, %c0_1] : memref<18x32x128xbf16, #tpu.memory_space<vmem>>, vector<1x32x128xbf16>
    tpu.vector_store %arg12[%c0, %c0_0, %c0_1], %0 {strides = array<i32>} : memref<18x32x128xbf16, #tpu.memory_space<vmem>>, vector<1x32x128xbf16>,
    %c17 = arith.constant 17 : index
    %c0_2 = arith.constant 0 : index
    %c0_3 = arith.constant 0 : index
    %2 = vector.load %arg12[%c17, %c0_2, %c0_3] : memref<18x32x128xbf16, #tpu.memory_space<vmem>>, vector<1x32x128xbf16>
    tpu.vector_store %arg12[%c17, %c0_2, %c0_3], %0 {strides = array<i32>} : memref<18x32x128xbf16, #tpu.memory_space<vmem>>, vector<1x32x128xbf16>,
    %cst_4 = arith.constant 0.000000e+00 : bf16
    %3 = vector.broadcast %cst_4 : bf16 to vector<16x1x128xbf16>
    %c1 = arith.constant 1 : index
    %c7 = arith.constant 7 : index
    %c0_5 = arith.constant 0 : index
    %4 = vector.load %arg12[%c1, %c7, %c0_5] : memref<18x32x128xbf16, #tpu.memory_space<vmem>>, vector<16x1x128xbf16>
    tpu.vector_store %arg12[%c1, %c7, %c0_5], %3 {strides = array<i32>} : memref<18x32x128xbf16, #tpu.memory_space<vmem>>, vector<16x1x128xbf16>,
    %c1_6 = arith.constant 1 : index
    %c24 = arith.constant 24 : index
    %c0_7 = arith.constant 0 : index
    %5 = vector.load %arg12[%c1_6, %c24, %c0_7] : memref<18x32x128xbf16, #tpu.memory_space<vmem>>, vector<16x1x128xbf16>
    tpu.vector_store %arg12[%c1_6, %c24, %c0_7], %3 {strides = array<i32>} : memref<18x32x128xbf16, #tpu.memory_space<vmem>>, vector<16x1x128xbf16>,
    %c0_8 = arith.constant 0 : index
    %c0_9 = arith.constant 0 : index
    %c0_10 = arith.constant 0 : index
    %c0_11 = arith.constant 0 : index
    %6 = vector.load %arg1[%c0_8, %c0_9, %c0_10, %c0_11] : memref<1x16x16x128xbf16, #tpu.memory_space<vmem>>, vector<1x16x16x128xbf16>
    %7 = vector.shape_cast %6 : vector<1x16x16x128xbf16> to vector<16x16x128xbf16>
    %c1_12 = arith.constant 1 : index
    %c8 = arith.constant 8 : index
    %c0_13 = arith.constant 0 : index
    %8 = vector.load %arg12[%c1_12, %c8, %c0_13] : memref<18x32x128xbf16, #tpu.memory_space<vmem>>, vector<16x16x128xbf16>
    tpu.vector_store %arg12[%c1_12, %c8, %c0_13], %7 {strides = array<i32>} : memref<18x32x128xbf16, #tpu.memory_space<vmem>>, vector<16x16x128xbf16>,
    %c0_14 = arith.constant 0 : index
    %c7_15 = arith.constant 7 : index
    %c0_16 = arith.constant 0 : index
    %9 = vector.load %arg12[%c0_14, %c7_15, %c0_16] : memref<18x32x128xbf16, #tpu.memory_space<vmem>>, vector<16x16x128xbf16>
    %c0_17 = arith.constant 0 : index
    %c8_18 = arith.constant 8 : index
    %c0_19 = arith.constant 0 : index
    %10 = vector.load %arg12[%c0_17, %c8_18, %c0_19] : memref<18x32x128xbf16, #tpu.memory_space<vmem>>, vector<16x16x128xbf16>
    %c0_20 = arith.constant 0 : index
    %c9 = arith.constant 9 : index
    %c0_21 = arith.constant 0 : index
    %11 = vector.load %arg12[%c0_20, %c9, %c0_21] : memref<18x32x128xbf16, #tpu.memory_space<vmem>>, vector<16x16x128xbf16>
    %12 = tpu.concatenate %9, %10, %11 in 2 : vector<16x16x128xbf16>, vector<16x16x128xbf16>, vector<16x16x128xbf16> -> vector<16x16x384xbf16>
    %13 = vector.shape_cast %12 : vector<16x16x384xbf16> to vector<256x384xbf16>
    %c0_22 = arith.constant 0 : index
    %c0_23 = arith.constant 0 : index
    %c0_24 = arith.constant 0 : index
    %14 = vector.load %arg2[%c0_22, %c0_23, %c0_24] : memref<3x384x128xbf16, #tpu.memory_space<vmem>>, vector<1x384x128xbf16>
    %15 = vector.shape_cast %14 : vector<1x384x128xbf16> to vector<384x128xbf16>
    %cst_25 = arith.constant dense<0.000000e+00> : vector<256x128xf32>
    %16 = tpu.matmul %13, %15, %cst_25 {dimension_numbers = #tpu.dot_dimension_numbers<[1], [0], [0], [1], [0, 0, 1, 1], [], []>} : vector<256x384xbf16>, vector<384x128xbf16>, vector<256x128xf32> -> vector<256x128xf32>
    %c1_26 = arith.constant 1 : index
    %c7_27 = arith.constant 7 : index
    %c0_28 = arith.constant 0 : index
    %17 = vector.load %arg12[%c1_26, %c7_27, %c0_28] : memref<18x32x128xbf16, #tpu.memory_space<vmem>>, vector<16x16x128xbf16>
    %c1_29 = arith.constant 1 : index
    %c8_30 = arith.constant 8 : index
    %c0_31 = arith.constant 0 : index
    %18 = vector.load %arg12[%c1_29, %c8_30, %c0_31] : memref<18x32x128xbf16, #tpu.memory_space<vmem>>, vector<16x16x128xbf16>
    %c1_32 = arith.constant 1 : index
    %c9_33 = arith.constant 9 : index
    %c0_34 = arith.constant 0 : index
    %19 = vector.load %arg12[%c1_32, %c9_33, %c0_34] : memref<18x32x128xbf16, #tpu.memory_space<vmem>>, vector<16x16x128xbf16>
    %20 = tpu.concatenate %17, %18, %19 in 2 : vector<16x16x128xbf16>, vector<16x16x128xbf16>, vector<16x16x128xbf16> -> vector<16x16x384xbf16>
    %21 = vector.shape_cast %20 : vector<16x16x384xbf16> to vector<256x384xbf16>
    %c1_35 = arith.constant 1 : index
    %c0_36 = arith.constant 0 : index
    %c0_37 = arith.constant 0 : index
    %22 = vector.load %arg2[%c1_35, %c0_36, %c0_37] : memref<3x384x128xbf16, #tpu.memory_space<vmem>>, vector<1x384x128xbf16>
    %23 = vector.shape_cast %22 : vector<1x384x128xbf16> to vector<384x128xbf16>
    %cst_38 = arith.constant dense<0.000000e+00> : vector<256x128xf32>
    %24 = tpu.matmul %21, %23, %cst_38 {dimension_numbers = #tpu.dot_dimension_numbers<[1], [0], [0], [1], [0, 0, 1, 1], [], []>} : vector<256x384xbf16>, vector<384x128xbf16>, vector<256x128xf32> -> vector<256x128xf32>
    %25 = arith.addf %16, %24 : vector<256x128xf32>
    %c2 = arith.constant 2 : index
    %c7_39 = arith.constant 7 : index
    %c0_40 = arith.constant 0 : index
    %26 = vector.load %arg12[%c2, %c7_39, %c0_40] : memref<18x32x128xbf16, #tpu.memory_space<vmem>>, vector<16x16x128xbf16>
    %c2_41 = arith.constant 2 : index
    %c8_42 = arith.constant 8 : index
    %c0_43 = arith.constant 0 : index
    %27 = vector.load %arg12[%c2_41, %c8_42, %c0_43] : memref<18x32x128xbf16, #tpu.memory_space<vmem>>, vector<16x16x128xbf16>
    %c2_44 = arith.constant 2 : index
    %c9_45 = arith.constant 9 : index
    %c0_46 = arith.constant 0 : index
    %28 = vector.load %arg12[%c2_44, %c9_45, %c0_46] : memref<18x32x128xbf16, #tpu.memory_space<vmem>>, vector<16x16x128xbf16>
    %29 = tpu.concatenate %26, %27, %28 in 2 : vector<16x16x128xbf16>, vector<16x16x128xbf16>, vector<16x16x128xbf16> -> vector<16x16x384xbf16>
    %30 = vector.shape_cast %29 : vector<16x16x384xbf16> to vector<256x384xbf16>
    %c2_47 = arith.constant 2 : index
    %c0_48 = arith.constant 0 : index
    %c0_49 = arith.constant 0 : index
    %31 = vector.load %arg2[%c2_47, %c0_48, %c0_49] : memref<3x384x128xbf16, #tpu.memory_space<vmem>>, vector<1x384x128xbf16>
    %32 = vector.shape_cast %31 : vector<1x384x128xbf16> to vector<384x128xbf16>
    %cst_50 = arith.constant dense<0.000000e+00> : vector<256x128xf32>
    %33 = tpu.matmul %30, %32, %cst_50 {dimension_numbers = #tpu.dot_dimension_numbers<[1], [0], [0], [1], [0, 0, 1, 1], [], []>} : vector<256x384xbf16>, vector<384x128xbf16>, vector<256x128xf32> -> vector<256x128xf32>
    %34 = arith.addf %25, %33 : vector<256x128xf32>
    %c0_51 = arith.constant 0 : index
    %c0_52 = arith.constant 0 : index
    %35 = vector.load %arg3[%c0_51, %c0_52] : memref<1x128xf32, #tpu.memory_space<vmem>>, vector<1x128xf32>
    %36 = vector.broadcast %35 : vector<1x128xf32> to vector<256x128xf32>
    %37 = arith.mulf %34, %36 : vector<256x128xf32>
    %c0_53 = arith.constant 0 : index
    %c0_54 = arith.constant 0 : index
    %38 = vector.load %arg4[%c0_53, %c0_54] : memref<1x128xf32, #tpu.memory_space<vmem>>, vector<1x128xf32>
    %39 = vector.broadcast %38 : vector<1x128xf32> to vector<256x128xf32>
    %40 = arith.addf %37, %39 : vector<256x128xf32>
    %cst_55 = arith.constant 0.000000e+00 : f32
    %41 = vector.broadcast %cst_55 : f32 to vector<256x128xf32>
    %42 = arith.maximumf %40, %41 : vector<256x128xf32>
    %cst_56 = arith.constant 0.000000e+00 : bf16
    %43 = vector.broadcast %cst_56 : bf16 to vector<1x32x128xbf16>
    %c0_57 = arith.constant 0 : index
    %c0_58 = arith.constant 0 : index
    %c0_59 = arith.constant 0 : index
    %44 = vector.load %arg13[%c0_57, %c0_58, %c0_59] : memref<18x32x128xbf16, #tpu.memory_space<vmem>>, vector<1x32x128xbf16>
    tpu.vector_store %arg13[%c0_57, %c0_58, %c0_59], %43 {strides = array<i32>} : memref<18x32x128xbf16, #tpu.memory_space<vmem>>, vector<1x32x128xbf16>,
    %c17_60 = arith.constant 17 : index
    %c0_61 = arith.constant 0 : index
    %c0_62 = arith.constant 0 : index
    %45 = vector.load %arg13[%c17_60, %c0_61, %c0_62] : memref<18x32x128xbf16, #tpu.memory_space<vmem>>, vector<1x32x128xbf16>
    tpu.vector_store %arg13[%c17_60, %c0_61, %c0_62], %43 {strides = array<i32>} : memref<18x32x128xbf16, #tpu.memory_space<vmem>>, vector<1x32x128xbf16>,
    %cst_63 = arith.constant 0.000000e+00 : bf16
    %46 = vector.broadcast %cst_63 : bf16 to vector<16x1x128xbf16>
    %c1_64 = arith.constant 1 : index
    %c7_65 = arith.constant 7 : index
    %c0_66 = arith.constant 0 : index
    %47 = vector.load %arg13[%c1_64, %c7_65, %c0_66] : memref<18x32x128xbf16, #tpu.memory_space<vmem>>, vector<16x1x128xbf16>
    tpu.vector_store %arg13[%c1_64, %c7_65, %c0_66], %46 {strides = array<i32>} : memref<18x32x128xbf16, #tpu.memory_space<vmem>>, vector<16x1x128xbf16>,
    %c1_67 = arith.constant 1 : index
    %c24_68 = arith.constant 24 : index
    %c0_69 = arith.constant 0 : index
    %48 = vector.load %arg13[%c1_67, %c24_68, %c0_69] : memref<18x32x128xbf16, #tpu.memory_space<vmem>>, vector<16x1x128xbf16>
    tpu.vector_store %arg13[%c1_67, %c24_68, %c0_69], %46 {strides = array<i32>} : memref<18x32x128xbf16, #tpu.memory_space<vmem>>, vector<16x1x128xbf16>,
    %49 = vector.shape_cast %42 : vector<256x128xf32> to vector<16x16x128xf32>
    %50 = arith.truncf %49 : vector<16x16x128xf32> to vector<16x16x128xbf16>
    %c1_70 = arith.constant 1 : index
    %c8_71 = arith.constant 8 : index
    %c0_72 = arith.constant 0 : index
    %51 = vector.load %arg13[%c1_70, %c8_71, %c0_72] : memref<18x32x128xbf16, #tpu.memory_space<vmem>>, vector<16x16x128xbf16>
    tpu.vector_store %arg13[%c1_70, %c8_71, %c0_72], %50 {strides = array<i32>} : memref<18x32x128xbf16, #tpu.memory_space<vmem>>, vector<16x16x128xbf16>,
    %c0_73 = arith.constant 0 : index
    %c7_74 = arith.constant 7 : index
    %c0_75 = arith.constant 0 : index
    %52 = vector.load %arg13[%c0_73, %c7_74, %c0_75] : memref<18x32x128xbf16, #tpu.memory_space<vmem>>, vector<16x16x128xbf16>
    %c0_76 = arith.constant 0 : index
    %c8_77 = arith.constant 8 : index
    %c0_78 = arith.constant 0 : index
    %53 = vector.load %arg13[%c0_76, %c8_77, %c0_78] : memref<18x32x128xbf16, #tpu.memory_space<vmem>>, vector<16x16x128xbf16>
    %c0_79 = arith.constant 0 : index
    %c9_80 = arith.constant 9 : index
    %c0_81 = arith.constant 0 : index
    %54 = vector.load %arg13[%c0_79, %c9_80, %c0_81] : memref<18x32x128xbf16, #tpu.memory_space<vmem>>, vector<16x16x128xbf16>
    %55 = tpu.concatenate %52, %53, %54 in 2 : vector<16x16x128xbf16>, vector<16x16x128xbf16>, vector<16x16x128xbf16> -> vector<16x16x384xbf16>
    %56 = vector.shape_cast %55 : vector<16x16x384xbf16> to vector<256x384xbf16>
    %c0_82 = arith.constant 0 : index
    %c0_83 = arith.constant 0 : index
    %c0_84 = arith.constant 0 : index
    %57 = vector.load %arg5[%c0_82, %c0_83, %c0_84] : memref<3x384x128xbf16, #tpu.memory_space<vmem>>, vector<1x384x128xbf16>
    %58 = vector.shape_cast %57 : vector<1x384x128xbf16> to vector<384x128xbf16>
    %cst_85 = arith.constant dense<0.000000e+00> : vector<256x128xf32>
    %59 = tpu.matmul %56, %58, %cst_85 {dimension_numbers = #tpu.dot_dimension_numbers<[1], [0], [0], [1], [0, 0, 1, 1], [], []>} : vector<256x384xbf16>, vector<384x128xbf16>, vector<256x128xf32> -> vector<256x128xf32>
    %c1_86 = arith.constant 1 : index
    %c7_87 = arith.constant 7 : index
    %c0_88 = arith.constant 0 : index
    %60 = vector.load %arg13[%c1_86, %c7_87, %c0_88] : memref<18x32x128xbf16, #tpu.memory_space<vmem>>, vector<16x16x128xbf16>
    %c1_89 = arith.constant 1 : index
    %c8_90 = arith.constant 8 : index
    %c0_91 = arith.constant 0 : index
    %61 = vector.load %arg13[%c1_89, %c8_90, %c0_91] : memref<18x32x128xbf16, #tpu.memory_space<vmem>>, vector<16x16x128xbf16>
    %c1_92 = arith.constant 1 : index
    %c9_93 = arith.constant 9 : index
    %c0_94 = arith.constant 0 : index
    %62 = vector.load %arg13[%c1_92, %c9_93, %c0_94] : memref<18x32x128xbf16, #tpu.memory_space<vmem>>, vector<16x16x128xbf16>
    %63 = tpu.concatenate %60, %61, %62 in 2 : vector<16x16x128xbf16>, vector<16x16x128xbf16>, vector<16x16x128xbf16> -> vector<16x16x384xbf16>
    %64 = vector.shape_cast %63 : vector<16x16x384xbf16> to vector<256x384xbf16>
    %c1_95 = arith.constant 1 : index
    %c0_96 = arith.constant 0 : index
    %c0_97 = arith.constant 0 : index
    %65 = vector.load %arg5[%c1_95, %c0_96, %c0_97] : memref<3x384x128xbf16, #tpu.memory_space<vmem>>, vector<1x384x128xbf16>
    %66 = vector.shape_cast %65 : vector<1x384x128xbf16> to vector<384x128xbf16>
    %cst_98 = arith.constant dense<0.000000e+00> : vector<256x128xf32>
    %67 = tpu.matmul %64, %66, %cst_98 {dimension_numbers = #tpu.dot_dimension_numbers<[1], [0], [0], [1], [0, 0, 1, 1], [], []>} : vector<256x384xbf16>, vector<384x128xbf16>, vector<256x128xf32> -> vector<256x128xf32>
    %68 = arith.addf %59, %67 : vector<256x128xf32>
    %c2_99 = arith.constant 2 : index
    %c7_100 = arith.constant 7 : index
    %c0_101 = arith.constant 0 : index
    %69 = vector.load %arg13[%c2_99, %c7_100, %c0_101] : memref<18x32x128xbf16, #tpu.memory_space<vmem>>, vector<16x16x128xbf16>
    %c2_102 = arith.constant 2 : index
    %c8_103 = arith.constant 8 : index
    %c0_104 = arith.constant 0 : index
    %70 = vector.load %arg13[%c2_102, %c8_103, %c0_104] : memref<18x32x128xbf16, #tpu.memory_space<vmem>>, vector<16x16x128xbf16>
    %c2_105 = arith.constant 2 : index
    %c9_106 = arith.constant 9 : index
    %c0_107 = arith.constant 0 : index
    %71 = vector.load %arg13[%c2_105, %c9_106, %c0_107] : memref<18x32x128xbf16, #tpu.memory_space<vmem>>, vector<16x16x128xbf16>
    %72 = tpu.concatenate %69, %70, %71 in 2 : vector<16x16x128xbf16>, vector<16x16x128xbf16>, vector<16x16x128xbf16> -> vector<16x16x384xbf16>
    %73 = vector.shape_cast %72 : vector<16x16x384xbf16> to vector<256x384xbf16>
    %c2_108 = arith.constant 2 : index
    %c0_109 = arith.constant 0 : index
    %c0_110 = arith.constant 0 : index
    %74 = vector.load %arg5[%c2_108, %c0_109, %c0_110] : memref<3x384x128xbf16, #tpu.memory_space<vmem>>, vector<1x384x128xbf16>
    %75 = vector.shape_cast %74 : vector<1x384x128xbf16> to vector<384x128xbf16>
    %cst_111 = arith.constant dense<0.000000e+00> : vector<256x128xf32>
    %76 = tpu.matmul %73, %75, %cst_111 {dimension_numbers = #tpu.dot_dimension_numbers<[1], [0], [0], [1], [0, 0, 1, 1], [], []>} : vector<256x384xbf16>, vector<384x128xbf16>, vector<256x128xf32> -> vector<256x128xf32>
    %77 = arith.addf %68, %76 : vector<256x128xf32>
    %c0_112 = arith.constant 0 : index
    %c0_113 = arith.constant 0 : index
    %78 = vector.load %arg6[%c0_112, %c0_113] : memref<1x128xf32, #tpu.memory_space<vmem>>, vector<1x128xf32>
    %79 = vector.broadcast %78 : vector<1x128xf32> to vector<256x128xf32>
    %80 = arith.mulf %77, %79 : vector<256x128xf32>
    %c0_114 = arith.constant 0 : index
    %c0_115 = arith.constant 0 : index
    %81 = vector.load %arg7[%c0_114, %c0_115] : memref<1x128xf32, #tpu.memory_space<vmem>>, vector<1x128xf32>
    %82 = vector.broadcast %81 : vector<1x128xf32> to vector<256x128xf32>
    %83 = arith.addf %80, %82 : vector<256x128xf32>
    %c1_116 = arith.constant 1 : index
    %c8_117 = arith.constant 8 : index
    %c0_118 = arith.constant 0 : index
    %84 = vector.load %arg12[%c1_116, %c8_117, %c0_118] : memref<18x32x128xbf16, #tpu.memory_space<vmem>>, vector<16x16x128xbf16>
    %85 = vector.shape_cast %84 : vector<16x16x128xbf16> to vector<256x128xbf16>
    %c0_119 = arith.constant 0 : index
    %c0_120 = arith.constant 0 : index
    %86 = vector.load %arg8[%c0_119, %c0_120] : memref<128x128xbf16, #tpu.memory_space<vmem>>, vector<128x128xbf16>
    %cst_121 = arith.constant dense<0.000000e+00> : vector<256x128xf32>
    %87 = tpu.matmul %85, %86, %cst_121 {dimension_numbers = #tpu.dot_dimension_numbers<[1], [0], [0], [1], [0, 0, 1, 1], [], []>} : vector<256x128xbf16>, vector<128x128xbf16>, vector<256x128xf32> -> vector<256x128xf32>
    %c0_122 = arith.constant 0 : index
    %c0_123 = arith.constant 0 : index
    %88 = vector.load %arg9[%c0_122, %c0_123] : memref<1x128xf32, #tpu.memory_space<vmem>>, vector<1x128xf32>
    %89 = vector.broadcast %88 : vector<1x128xf32> to vector<256x128xf32>
    %90 = arith.mulf %87, %89 : vector<256x128xf32>
    %c0_124 = arith.constant 0 : index
    %c0_125 = arith.constant 0 : index
    %91 = vector.load %arg10[%c0_124, %c0_125] : memref<1x128xf32, #tpu.memory_space<vmem>>, vector<1x128xf32>
    %92 = vector.broadcast %91 : vector<1x128xf32> to vector<256x128xf32>
    %93 = arith.addf %90, %92 : vector<256x128xf32>
    %94 = arith.addf %83, %93 : vector<256x128xf32>
    %cst_126 = arith.constant 0.000000e+00 : f32
    %95 = vector.broadcast %cst_126 : f32 to vector<256x128xf32>
    %96 = arith.maximumf %94, %95 : vector<256x128xf32>
    %97 = vector.shape_cast %96 : vector<256x128xf32> to vector<16x16x128xf32>
    %98 = arith.truncf %97 : vector<16x16x128xf32> to vector<16x16x128xbf16>
    %c0_127 = arith.constant 0 : index
    %c0_128 = arith.constant 0 : index
    %c0_129 = arith.constant 0 : index
    %c0_130 = arith.constant 0 : index
    %99 = vector.load %arg11[%c0_127, %c0_128, %c0_129, %c0_130] : memref<1x16x16x128xbf16, #tpu.memory_space<vmem>>, vector<1x16x16x128xbf16>
    %100 = vector.shape_cast %99 : vector<1x16x16x128xbf16> to vector<16x16x128xbf16>
    %101 = vector.shape_cast %98 : vector<16x16x128xbf16> to vector<1x16x16x128xbf16>
    tpu.vector_store %arg11[%c0_127, %c0_128, %c0_129, %c0_130], %101 {strides = array<i32>} : memref<1x16x16x128xbf16, #tpu.memory_space<vmem>>, vector<1x16x16x128xbf16>,
    return
  }
  func.func @transform_0(%arg0: i32) -> (i32, i32, i32, i32) {
    %c0_i32 = arith.constant 0 : i32
    %c0_i32_0 = arith.constant 0 : i32
    %c0_i32_1 = arith.constant 0 : i32
    %c0_i32_2 = arith.constant 0 : i32
    return %arg0, %c0_i32, %c0_i32_0, %c0_i32_1 : i32, i32, i32, i32
  }
  func.func @transform_1(%arg0: i32) -> (i32, i32, i32) {
    %c0_i32 = arith.constant 0 : i32
    %c0_i32_0 = arith.constant 0 : i32
    %c0_i32_1 = arith.constant 0 : i32
    %c0_i32_2 = arith.constant 0 : i32
    return %c0_i32, %c0_i32_0, %c0_i32_1 : i32, i32, i32
  }
  func.func @transform_2(%arg0: i32) -> (i32, i32) {
    %c0_i32 = arith.constant 0 : i32
    %c0_i32_0 = arith.constant 0 : i32
    %c0_i32_1 = arith.constant 0 : i32
    return %c0_i32, %c0_i32_0 : i32, i32
  }
  func.func @transform_3(%arg0: i32) -> (i32, i32) {
    %c0_i32 = arith.constant 0 : i32
    %c0_i32_0 = arith.constant 0 : i32
    %c0_i32_1 = arith.constant 0 : i32
    return %c0_i32, %c0_i32_0 : i32, i32
  }
  func.func @transform_4(%arg0: i32) -> (i32, i32, i32) {
    %c0_i32 = arith.constant 0 : i32
    %c0_i32_0 = arith.constant 0 : i32
    %c0_i32_1 = arith.constant 0 : i32
    %c0_i32_2 = arith.constant 0 : i32
    return %c0_i32, %c0_i32_0, %c0_i32_1 : i32, i32, i32
  }
  func.func @transform_5(%arg0: i32) -> (i32, i32) {
    %c0_i32 = arith.constant 0 : i32
    %c0_i32_0 = arith.constant 0 : i32
    %c0_i32_1 = arith.constant 0 : i32
    return %c0_i32, %c0_i32_0 : i32, i32
  }
  func.func @transform_6(%arg0: i32) -> (i32, i32) {
    %c0_i32 = arith.constant 0 : i32
    %c0_i32_0 = arith.constant 0 : i32
    %c0_i32_1 = arith.constant 0 : i32
    return %c0_i32, %c0_i32_0 : i32, i32
  }
  func.func @transform_7(%arg0: i32) -> (i32, i32) {
    %c0_i32 = arith.constant 0 : i32
    %c0_i32_0 = arith.constant 0 : i32
    %c0_i32_1 = arith.constant 0 : i32
    return %c0_i32, %c0_i32_0 : i32, i32
  }
  func.func @transform_8(%arg0: i32) -> (i32, i32) {
    %c0_i32 = arith.constant 0 : i32
    %c0_i32_0 = arith.constant 0 : i32
    %c0_i32_1 = arith.constant 0 : i32
    return %c0_i32, %c0_i32_0 : i32, i32
  }
  func.func @transform_9(%arg0: i32) -> (i32, i32) {
    %c0_i32 = arith.constant 0 : i32
    %c0_i32_0 = arith.constant 0 : i32
    %c0_i32_1 = arith.constant 0 : i32
    return %c0_i32, %c0_i32_0 : i32, i32
  }
  func.func @transform_10(%arg0: i32) -> (i32, i32, i32, i32) {
    %c0_i32 = arith.constant 0 : i32
    %c0_i32_0 = arith.constant 0 : i32
    %c0_i32_1 = arith.constant 0 : i32
    %c0_i32_2 = arith.constant 0 : i32
    return %arg0, %c0_i32, %c0_i32_0, %c0_i32_1 : i32, i32, i32, i32
  }
}

</mosaic_0001>

<bundles_post_ra>
// kernel: tpu_custom_call.1
= control target key start
LH: loop header
LB: loop body
LE: loop exit
PB: predicated region body
PF: predicated region fallthrough
CT: control target
= control target key end

     0   :  { %s18720_s0 = inlined_call_operand.hbm [shape: bf16[2,16,16,128], index: 0, kind: input, shape index: {}]   ;;  %s18721_s1 = inlined_call_operand.hbm [shape: bf16[3,384,128], index: 1, kind: input, shape index: {}]   ;;  %s18722_s2 = inlined_call_operand.vmem [shape: f32[1,128], index: 2, kind: input, shape index: {}]   ;;  %s18723_s3 = inlined_call_operand.vmem [shape: f32[1,128], index: 3, kind: input, shape index: {}]   ;;  %s18724_s4 = inlined_call_operand.hbm [shape: bf16[3,384,128], index: 4, kind: input, shape index: {}]   ;;  %s18725_s5 = inlined_call_operand.vmem [shape: f32[1,128], index: 5, kind: input, shape index: {}]   ;;  %s18726_s6 = inlined_call_operand.vmem [shape: f32[1,128], index: 6, kind: input, shape index: {}]   ;;  %s18727_s7 = inlined_call_operand.hbm [shape: bf16[128,128], index: 7, kind: input, shape index: {}]   ;;  %s18728_s8 = inlined_call_operand.vmem [shape: f32[1,128], index: 8, kind: input, shape index: {}]   ;;  %s18729_s9 = inlined_call_operand.vmem [shape: f32[1,128], index: 9, kind: input, shape index: {}]   ;;  %s18730_s10 = inlined_call_operand.hbm [shape: bf16[2,16,16,128], index: 10, kind: output, shape index: {}]  }
   0x1   :  { %18746 = sst [smem:[#allocation178_spill]] %s18721_s1 }
   0x2   :  { %18747 = sst [smem:[#allocation179_spill]] %s18724_s4 }
   0x3   :  { %18748 = sst [smem:[#allocation180_spill]] %s18727_s7 }
   0x4   :  { %15 = vsyncpa [#allocation5], 0 }
   0x5   :  { %17 = vsyncpa [#allocation5 + $0x1], 0 }
   0x6   :  { %18 = vsyncpa [#allocation8], 0 }
   0x7   :  { %19 = vsyncpa [#allocation11], 0 }
   0x8   :  { %20 = vsyncpa [#allocation6], 0 }
   0x9   :  { %22 = vsyncpa [#allocation6 + $0x1], 0  ;;  %s14841_s13 = smov 0   ;;  %s14843_s14 = smov 0  }
   0xa   :  { %s14845_s15 = smov 0   ;;  %s14847_s16 = smov 0  }
   0xb LB: > { %s14862_s17 = sadd.s32 4294967295, %s14774_s16   ;;  %s11988_s18 = sadd.s32 4294967294, %s14774_s16   ;;  %s14774_s16 = sphi %s14847_s16, %s19491_s16   ;;  %s14770_s15 = sphi %s14845_s15, %s19490_s15   ;;  %s14766_s14 = sphi %s14843_s14, %s19489_s14   ;;  %s14762_s13 = sphi %s14841_s13, %s19488_s13  }
   0xc   : > { %p48_p0 = scmp.ne.s32.totalorder %s14766_s14, %s14762_s13  ;;  %p18731_p1 = scmp.eq.s32.totalorder %s14862_s17, 0 }
   0xd   : > { %p261_p2 = scmp.eq.s32.totalorder %s14862_s17, 1  ;;  %p267_p3 = scmp.eq.s32.totalorder %s11988_s18, 1 }
   0xe   : > { %p14871_p4 = por %p18731_p1, %p48_p0  ;;  %p11989_p5 = scmp.ge.s32.totalorder %s14774_s16, 1 }
   0xf   : > { %p14876_p6 = por %p267_p3, %p48_p0  ;;  %p274_p7 = scmp.lt.s32.totalorder %s14774_s16, 3 }
  0x10   : > { %s18749_s19 = scalar_select %p14871_p4, 1, 0 }
  0x11   : > { %s18750_s20 = scalar_select %p14876_p6, 1, 0 }
  0x12   : > { %p14881_p8 = pnand %p11989_p5, %p274_p7  ;;  %s14776_s22 = smov [#allocation7]  }
  0x13   : > { %s286_s23 = sshll.u32 %s14776_s22, 4  ;;  %s14777_s25 = smov [#allocation9]   ;;  %s287_s23 = int_to_ptr.vmem [resolvable:$true] %s286_s23 }
  0x14   : > { %s18751_s21 = scalar_select %p14881_p8, 1, 0 }
  0x15   : > { %p13999_p9 = pneg %p14881_p8  ;;  %s305_s26 = sshll.u32 %s14777_s25, 4  ;;  %s306_s26 = int_to_ptr.vmem [resolvable:$true] %s305_s26 }
  0x16   : > { %s14778_s27 = smov [#allocation10]   ;;  %s14607_s29 = scalar_lea.vmem %s287_s23, 9216 }
  0x17   : > { %p14890_p11 = pnand %p13999_p9, %p18731_p1  ;;  %s324_s28 = sshll.u32 %s14778_s27, 4  ;;  %s325_s28 = int_to_ptr.vmem [resolvable:$true] %s324_s28 }
  0x18   : > { %p14608_p13 = scmp.ne.s32.totalorder %s287_s23, %s14607_s29  ;;  %p14615_p5 = scmp.lt.s32.totalorder %s287_s23, %s287_s23 }
  0x19   : > { %p14598_p12 = pneg %p14890_p11  ;;  %p14616_p7 = scmp.lt.s32.totalorder %s14607_s29, %s14607_s29 }
  0x1b   : > { %p14610_p0 = pnand %p14608_p13, %p14598_p12  ;;  %p14617_p9 = por %p14616_p7, %p14615_p5 }
  0x1d   : > { %p14611_p3 = pneg %p14610_p0 }
  0x1f   : > { %p14618_p10 = pnand %p14617_p9, %p14611_p3 }
  0x21   : > { %14621 = shalt.err (!%p14618_p10)
}
  0x22   : > { %s18732_s30 = smov 64   ;;  %s18733_s11 = smov 4  }
  0x23   : > { %s18753_s1 = sld [smem:[#allocation178_spill]]  ;;  %s14633_s22 = scalar_lea.vmem %s306_s26, 9216 }
  0x24   : > { %p14634_p13 = scmp.ne.s32.totalorder %s306_s26, %s14633_s22  ;;  %p14641_p3 = scmp.lt.s32.totalorder %s306_s26, %s306_s26 }
  0x25   : > { %p14642_p10 = scmp.lt.s32.totalorder %s14633_s22, %s14633_s22 }
  0x26   : > { %p14636_p0 = pnand %p14634_p13, %p14598_p12 }
  0x27   : > { %p14643_p7 = por %p14642_p10, %p14641_p3 }
  0x28   : > { %p14637_p5 = pneg %p14636_p0 }
  0x29   : > { %14002 = dma.hbm_to_vmem [thread:$0]  (!%p14890_p11), %s18753_s1, 9216, %s287_s23, [#allocation8], %s18732_s30, %s18732_s30, %s18733_s11  }
  0x2a   : > { %p14644_p9 = pnand %p14643_p7, %p14637_p5 }
  0x2c   : > { %14647 = shalt.err (!%p14644_p9)
}
  0x2d   : > { %s18754_s4 = sld [smem:[#allocation179_spill]]  ;;  %s14659_s23 = scalar_lea.vmem %s325_s28, 1024 }
  0x2e   : > { %p14660_p1 = scmp.ne.s32.totalorder %s325_s28, %s14659_s23  ;;  %p14667_p3 = scmp.lt.s32.totalorder %s325_s28, %s325_s28 }
  0x2f   : > { %p14668_p5 = scmp.lt.s32.totalorder %s14659_s23, %s14659_s23 }
  0x30   : > { %p14662_p13 = pnand %p14660_p1, %p14598_p12 }
  0x31   : > { %p14669_p10 = por %p14668_p5, %p14667_p3 }
  0x32   : > { %p14663_p0 = pneg %p14662_p13 }
  0x33   : > { %14005 = dma.hbm_to_vmem [thread:$0]  (!%p14890_p11), %s18754_s4, 9216, %s306_s26, [#allocation8], %s18732_s30, %s18732_s30, %s18733_s11  }
  0x34   : > { %p14670_p7 = pnand %p14669_p10, %p14663_p0 }
  0x36   : > { %14673 = shalt.err (!%p14670_p7)
}
  0x37   : > { %s18755_s7 = sld [smem:[#allocation180_spill]]  ;;  %s14930_s26 = sadd.s32 1, %s14774_s16  }
  0x38   : > { %s32_s24 = ssub.s32 %s14774_s16, %s14930_s26  ;;  %s35_s18 = sadd.s32 1, %s14770_s15 }
  0x39   : > { %p33_p1 = scmp.eq.s32.totalorder %s32_s24, 0  ;;  %p42_p12 = scmp.ne.s32.totalorder %s14770_s15, %s14766_s14 }
  0x3a   : > { %p43_p9 = scmp.eq.s32.totalorder %s14774_s16, 0  ;;  %p14020_p13 = scmp.lt.s32.totalorder %s14774_s16, 2 }
  0x3b   : > { %s14940_s22 = scalar_select %p33_p1, %s14770_s15, %s35_s18  }
  0x3c   : > { %p44_p0 = por %p43_p9, %p42_p12  ;;  %p14944_p3 = por %p261_p2, %p42_p12 }
  0x3d   : > { %14008 = dma.hbm_to_vmem [thread:$0]  (!%p14890_p11), %s18755_s7, 1024, %s325_s28, [#allocation11], %s18732_s30, %s18732_s30, %s18733_s11  }
  0x3e   : > { %18756 = sst [smem:[#allocation17_spill]] %s14940_s22  ;;  %s344_s27 = sand.u32 1, %s14770_s15  }
  0x3f   : > { %s18757_s25 = scalar_select %p14944_p3, 1, 0 }
  0x40   : > { %s12630_s23 = sshll.u32 %s14774_s16, 11  ;;  %s11994_s28 = sshll.u32 %s344_s27, 7 }
  0x41   : > { %s14953_s30 = scalar_lea.hbm %s18720_s0, %s12630_s23  ;;  %s348_s24 = scalar_lea.vmem [#allocation4], %s11994_s28 }
  0x42   : > { %s355_s18 = sshll.u32 %s348_s24, 4  ;;  %p14955_p11 = pnand %p14020_p13, %p44_p0  ;;  %s14959_s18 = int_to_ptr.vmem [resolvable:$true] %s355_s18 }
  0x43   : > { %s14961_s1 = scalar_lea.sflag [#allocation5], %s344_s27  ;;  %s14674_s4 = scalar_lea.hbm %s14953_s30, 2048 }
  0x44   : > { %p14675_p2 = scmp.ne.s32.totalorder %s14953_s30, %s14674_s4  ;;  %p14676_p5 = pneg %p14955_p11 }
  0x45   : > { %s14679_s28 = scalar_lea.hbm %s18720_s0, 4096  ;;  %p14680_p1 = scmp.lt.s32.totalorder %s14953_s30, %s18720_s0 }
  0x46   : > { %p14677_p10 = pnand %p14676_p5, %p14675_p2  ;;  %p14681_p12 = scmp.lt.s32.totalorder %s14679_s28, %s14674_s4 }
  0x48   : > { %p14678_p7 = pneg %p14677_p10  ;;  %p14682_p9 = por %p14681_p12, %p14680_p1 }
  0x4a   : > { %p14683_p13 = pnand %p14682_p9, %p14678_p7 }
  0x4c   : > { %14686 = shalt.err (!%p14683_p13)
}
  0x4d   : > { %s14687_s27 = scalar_lea.vmem %s14959_s18, 2048  ;;  %s14781_s7 = smov [#allocation4]  }
  0x4e   : > { %p14688_p0 = scmp.ne.s32.totalorder %s14959_s18, %s14687_s27  ;;  %s14692_s22 = sshll.u32 %s14781_s7, 4  ;;  %s14693_s22 = int_to_ptr.vmem [resolvable:$false] %s14692_s22 }
  0x4f   : > { %s14694_s23 = scalar_lea.vmem %s14693_s22, 4096  ;;  %p14695_p10 = scmp.lt.s32.totalorder %s14959_s18, %s14693_s22 }
  0x50   : > { %p14690_p6 = pnand %p14688_p0, %p14676_p5  ;;  %p14696_p3 = scmp.lt.s32.totalorder %s14694_s23, %s14687_s27 }
  0x52   : > { %p14691_p2 = pneg %p14690_p6  ;;  %p14697_p4 = por %p14696_p3, %p14695_p10 }
  0x54   : > { %p14698_p8 = pnand %p14697_p4, %p14691_p2 }
  0x56   : > { %14701 = shalt.err (!%p14698_p8)
}
  0x57   : > { %s18759_s4 = smov 4   ;;  %s18760_s29 = smov 64  }
  0x58   : > { %14012 = dma.hbm_to_vmem [thread:$0]  (!%p14955_p11), %s14953_s30, 2048, %s14959_s18, %s14961_s1, %s18760_s29, %s18760_s29, %s18759_s4  }
  0x59   : > { %p18761_p6 = scmp.ne.s32.totalorder %s18751_s21, 0 }
  0x5b   : > { %367 = sbr.rel (%p18761_p6) target bundleno = 1486 (0x5ce), region = 60 }
  0x60   : > { %s14988_s7 = sand.u32 1, %s14766_s14   ;;  %p18762_p4 = scmp.ne.s32.totalorder %s18749_s19, 0 }
  0x61   : > { %s11998_s22 = sshll.u32 %s14988_s7, 7  ;;  %s370_s28 = scalar_lea.sflag [#allocation5], %s14988_s7 }
  0x62   : > { %s14994_s11 = scalar_lea.vmem [#allocation4], %s11998_s22 }
  0x63   : > { %14745 = dma.done.wait (%p18762_p4), %s370_s28, 2048  }
  0x64   : > { %14747 = vsyncadd (%p18762_p4), %s370_s28, 4294965248  ;;  %p18763_p8 = scmp.eq.s32.totalorder %s14862_s17, 0 }
  0x66   : > { %14749 = dma.done.wait (%p18763_p8), [#allocation8], 18432   ;;  %p18764_p3 = pmov %p18763_p8 }
  0x68   : > { %14751 = vsyncadd (%p18764_p3), [#allocation8], 4294948864  ;;  %p18765_p11 = pmov %p18764_p3 }
  0x69   : > { %p18766_p5 = pmov %p18764_p3 }
  0x6a   : > { %14753 = dma.done.wait (%p18765_p11), [#allocation11], 1024  }
  0x6b   : > { %14755 = vsyncadd (%p18766_p5), [#allocation11], 4294966272  ;;  %v14065_v0 = vld [vmem:[#allocation7 + $0x138] sm:$0xff]   ;;  %v14067_v2 = vld [vmem:[#allocation7 + $0x130] sm:$0xff]   ;;  %vm433_vm0 = vcmask 1043459   ;;  %v18767_v9 = vmov 0 }
  0x6c   : > { %v14066_v1 = vld [vmem:[#allocation7 + $0xf8] sm:$0xff]   ;;  %12791 = vmatprep.subr.bf16.mxu0 %v14065_v0  ;;  %13967 = vmatprep.subr.bf16.mxu1 %v14065_v0  ;;  %v14068_v3 = vld [vmem:[#allocation7 + $0xf0] sm:$0xff]   ;;  %v14069_v4 = vld [vmem:[#allocation7 + $0x128] sm:$0xff]   ;;  %vm434_vm1 = vsmask.f32 7950  ;;  %vm484_vm4 = vcmask 1040384  }
  0x6d   : > { %12792 = vmatpush3.bf16.msra.mxu0 %v14066_v1  ;;  %13975 = vmatpush3.bf16.msra.mxu1 %v14066_v1  ;;  %v14070_v5 = vld [vmem:[#allocation7 + $0xe8] sm:$0xff]   ;;  %v14071_v6 = vld [vmem:[#allocation7 + $0x120] sm:$0xff]   ;;  %v14073_v8 = vld [vmem:[#allocation7 + $0x118] sm:$0xff]   ;;  %vm1032_vm3 = vsmask.f32 4352  ;;  %vm983_vm7 = vcmask 1042432  }
  0x6e   : > { %12793 = vmatprep.subr.bf16.mxu0 %v14067_v2  ;;  %13968 = vmatprep.subr.bf16.mxu1 %v14067_v2  ;;  %v14072_v7 = vld [vmem:[#allocation7 + $0xe0] sm:$0xff]   ;;  %vm15008_vm2 = vmand %vm433_vm0, %vm434_vm1  ;;  %v14074_v10 = vld [vmem:[#allocation7 + $0xd8] sm:$0xff]   ;;  %vm485_vm5 = vsmask.f32 256  ;;  %s18515_s30 = scalar_lea.vmem [#allocation12], %s11998_s22  ;;  %s12695_s22 = sshll.u32 %s14862_s17, 11 }
  0x6f   : > { %v18768_v9 = vsel %vm15008_vm2, 4294967295, %v18767_v9  ;;  %v14075_v11 = vld [vmem:[#allocation7 + $0x110] sm:$0xff]   ;;  %v535_v12 = vld [vmem:[%s14994_s11] sm:$0xff]   ;;  %v537_v19 = vld [vmem:[%s14994_s11 + $0x8] sm:$0xff]   ;;  %s11886_s18 = sshll.u32 %s18515_s30, 4  ;;  %s18674_s27 = scalar_lea.hbm %s18730_s10, %s12695_s22  ;;  %s18676_s18 = int_to_ptr.vmem [resolvable:$true] %s11886_s18 }
  0x70   : > { %18769 = vst [vmem:[#allocation18_spill] sm:$0xff] %v18768_v9  ;;  %v559_v13 = vld [vmem:[%s14994_s11 + $0x60] sm:$0xff]   ;;  %v436_v14 = vld [vmem:[#allocation2 + $0x10] sm:$0x8]  ;;  %567 = vst [vmem:[#allocation2 + $0x14] sm:$0xff] %v535_v12   ;;  %s11873_s23 = scalar_lea.sflag [#allocation6], %s14988_s7 }
  0x71   : > { %12794 = vmatpush3.bf16.msra.mxu0 %v14068_v3  ;;  %13976 = vmatpush3.bf16.msra.mxu1 %v14068_v3  ;;  %591 = vst [vmem:[#allocation2 + $0xd4] sm:$0xff] %v559_v13   ;;  %v437_v15 = vsel %vm15008_vm2, 0, %v436_v14  ;;  %v472_v16 = vld [vmem:[#allocation2 + $0xd0] sm:$0x8]  ;;  %v561_v20 = vld [vmem:[%s14994_s11 + $0x68] sm:$0xff]   ;;  %569 = vst [vmem:[#allocation2 + $0x24] sm:$0xff] %v537_v19  }
  0x72   : > { %12795 = vmatprep.subr.bf16.mxu0 %v14069_v4  ;;  %13969 = vmatprep.subr.bf16.mxu1 %v14069_v4  ;;  %v14076_v17 = vld [vmem:[#allocation7 + $0xd0] sm:$0xff]   ;;  %438 = vst [vmem:[#allocation2 + $0x10] sm:$0x8] %v437_v15  ;;  %v473_v18 = vsel %vm15008_vm2, 0, %v472_v16  ;;  %v14077_v21 = vld [vmem:[#allocation7 + $0x108] sm:$0xff]   ;;  %593 = vst [vmem:[#allocation2 + $0xe4] sm:$0xff] %v561_v20  }
  0x73   : > { %474 = vst [vmem:[#allocation2 + $0xd0] sm:$0x8] %v473_v18  ;;  %v439_v22 = vld [vmem:[#allocation2 + $0x20] sm:$0x8]  ;;  %v14078_v24 = vld [vmem:[#allocation7 + $0xc8] sm:$0xff]   ;;  %v539_v28 = vld [vmem:[%s14994_s11 + $0x10] sm:$0xff]  }
  0x74   : > { %v475_v23 = vld [vmem:[#allocation2 + $0xe0] sm:$0x8]  ;;  %v440_v26 = vsel %vm15008_vm2, 0, %v439_v22  ;;  %571 = vst [vmem:[#allocation2 + $0x34] sm:$0xff] %v539_v28   ;;  %v563_v36 = vld [vmem:[%s14994_s11 + $0x70] sm:$0xff]   ;;  %v15030_v41 = vld [vmem:[#allocation7 + $0x178] sm:$0xff]  }
  0x75   : > { %12796 = vmatpush3.bf16.msra.mxu0 %v14070_v5  ;;  %13977 = vmatpush3.bf16.msra.mxu1 %v14070_v5  ;;  %v14079_v25 = vld [vmem:[#allocation7 + $0x100] sm:$0xff]   ;;  %v476_v27 = vsel %vm15008_vm2, 0, %v475_v23  ;;  %441 = vst [vmem:[#allocation2 + $0x20] sm:$0x8] %v440_v26  ;;  %v15032_v42 = vld [vmem:[#allocation7 + $0xb8] sm:$0xff]   ;;  %595 = vst [vmem:[#allocation2 + $0xf4] sm:$0xff] %v563_v36  }
  0x76   : > { %12797 = vmatprep.subr.bf16.mxu0 %v14071_v6  ;;  %13970 = vmatprep.subr.bf16.mxu1 %v14071_v6  ;;  %477 = vst [vmem:[#allocation2 + $0xe0] sm:$0x8] %v476_v27  ;;  %v14080_v37 = vld [vmem:[#allocation7 + $0xc0] sm:$0xff]   ;;  %v14099_v27 = vld [vmem:[#allocation7 + $0xb0] sm:$0xff]   ;;  %vm15131_vm6 = vmand %vm484_vm4, %vm485_vm5  ;;  %s14702_s4 = scalar_lea.vmem %s18676_s18, 2048  ;;  %p19484_p1 = scmp.ne.s32.totalorder %s18757_s25, 0 }
  0x77   : > { %v1818_v29 = vld [vmem:[#allocation2 + $0x14] sm:$0xf]  ;;  %v1819_v30 = vld [vmem:[#allocation2 + $0x18] sm:$0xf]  ;;  %p14703_p7 = scmp.ne.s32.totalorder %s18676_s18, %s14702_s4  ;;  %s14783_s17 = smov [#allocation12]  }
  0x78   : > { %v1854_v31 = vld [vmem:[#allocation2 + $0xd4] sm:$0xf]  ;;  %v15025_v32 = vcombine.low %v1818_v29, %v1819_v30  ;;  %v1855_v33 = vld [vmem:[#allocation2 + $0xd8] sm:$0xf]  ;;  %v12068_v35 = vcombine.low %v1819_v30, %v1819_v30  ;;  %v1821_v52 = vld [vmem:[#allocation2 + $0x24] sm:$0xf] }
  0x79   : > { %12798 = vmatpush3.bf16.msra.mxu0 %v14072_v7  ;;  %13978 = vmatpush3.bf16.msra.mxu1 %v14072_v7  ;;  %v1817_v34 = vld [vmem:[#allocation2 + $0x10] sm:$0x8]  ;;  %v15028_v38 = vcombine.low %v1854_v31, %v1855_v33  ;;  %v12092_v40 = vcombine.low %v1855_v33, %v1855_v33  ;;  %v1822_v57 = vld [vmem:[#allocation2 + $0x28] sm:$0xf]  ;;  %v1857_v6 = vld [vmem:[#allocation2 + $0xe4] sm:$0xf]  ;;  %p14704_p12 = pnand %p14703_p7, %p19484_p1 }
  0x7a   : > { %12799 = vmatprep.subr.bf16.mxu0 %v14073_v8  ;;  %13971 = vmatprep.subr.bf16.mxu1 %v14073_v8  ;;  %v12067_v39 = vcombine.low %v1817_v34, %v1818_v29  ;;  %v2026_v43 = vshrl.u32 %v15025_v32, 16  ;;  %v2029_v44 = vshll.u32 %v15025_v32, 16  ;;  %v2258_v45 = vshrl.u32 %v12068_v35, 16  ;;  %v1853_v47 = vld [vmem:[#allocation2 + $0xd0] sm:$0x8]  ;;  %v541_v33 = vld [vmem:[%s14994_s11 + $0x18] sm:$0xff]  }
  0x7b   : > { %v2261_v46 = vshll.u32 %v12068_v35, 16  ;;  %v2122_v48 = vshrl.u32 %v15028_v38, 16  ;;  %v2125_v49 = vshll.u32 %v15028_v38, 16  ;;  %v12091_v0 = vcombine.low %v1853_v47, %v1854_v31  ;;  %v1858_v12 = vld [vmem:[#allocation2 + $0xe8] sm:$0xf]  ;;  %573 = vst [vmem:[#allocation2 + $0x44] sm:$0xff] %v541_v33   ;;  %p14705_p9 = pneg %p14704_p12 }
  0x7c   : > { %v2250_v50 = vshrl.u32 %v12067_v39, 16  ;;  %v2253_v51 = vshll.u32 %v12067_v39, 16  ;;  %v2028_v53 = vrot.slane %v2026_v43, 4  ;;  %v2031_v54 = vrot.slane %v2029_v44, 5  ;;  %v565_v39 = vld [vmem:[%s14994_s11 + $0x78] sm:$0xff]   ;;  %s14706_s29 = sshll.u32 %s14783_s17, 4  ;;  %s14707_s29 = int_to_ptr.vmem [resolvable:$false] %s14706_s29 }
  0x7d   : > { %12800 = vmatpush3.bf16.msra.mxu0 %v14074_v10  ;;  %13979 = vmatpush3.bf16.msra.mxu1 %v14074_v10  ;;  %v2260_v55 = vrot.slane %v2258_v45, 3  ;;  %v2263_v56 = vrot.slane %v2261_v46, 4  ;;  %v2124_v58 = vrot.slane %v2122_v48, 4  ;;  %v2127_v59 = vrot.slane %v2125_v49, 5  ;;  %v1856_v22 = vld [vmem:[#allocation2 + $0xe0] sm:$0x8]  ;;  %p14709_p13 = scmp.lt.s32.totalorder %s18676_s18, %s14707_s29 }
  0x7e   : > { %12801 = vmatprep.subr.bf16.mxu0 %v14075_v11  ;;  %13972 = vmatprep.subr.bf16.mxu1 %v14075_v11  ;;  %v2252_v60 = vrot.slane %v2250_v50, 3  ;;  %v2255_v61 = vrot.slane %v2253_v51, 4  ;;  %v2032_v62 = vor.u32 %v2031_v54, %v2028_v53  ;;  %v2774_v1 = vshrl.u32 %v12092_v40, 16  ;;  %597 = vst [vmem:[#allocation2 + $0x104] sm:$0xff] %v565_v39   ;;  %s14708_s28 = scalar_lea.vmem %s14707_s29, 4096 }
  0x7f   : > { %v2264_v63 = vor.u32 %v2263_v56, %v2260_v55  ;;  %v2128_v2 = vor.u32 %v2127_v59, %v2124_v58  ;;  %v2777_v4 = vshll.u32 %v12092_v40, 16  ;;  %v15039_v5 = vcombine.low %v1821_v52, %v1822_v57  ;;  %v14086_v40 = vld [vmem:[#allocation7 + $0x170] sm:$0xff]   ;;  %v14092_v55 = vld [vmem:[#allocation7 + $0x168] sm:$0xff]   ;;  %p14710_p0 = scmp.lt.s32.totalorder %s14708_s28, %s14702_s4 }
  0x80   : > { %v2256_v3 = vor.u32 %v2255_v61, %v2252_v60  ;;  %v2267_v7 = vshrl.u32 %v2032_v62, 16  ;;  %v2270_v8 = vshll.u32 %v2032_v62, 16  ;;  %v2766_v10 = vshrl.u32 %v12091_v0, 16  ;;  %v543_v60 = vld [vmem:[%s14994_s11 + $0x20] sm:$0xff]  }
  0x81   : > { %12802 = vmatpush3.bf16.msra.mxu0 %v14076_v17  ;;  %13980 = vmatpush3.bf16.msra.mxu1 %v14076_v17  ;;  %v2769_v11 = vshll.u32 %v12091_v0, 16  ;;  %v2783_v13 = vshrl.u32 %v2128_v2, 16  ;;  %v2786_v14 = vshll.u32 %v2128_v2, 16  ;;  %v2776_v16 = vrot.slane %v2774_v1, 3  ;;  %v1820_v17 = vld [vmem:[#allocation2 + $0x20] sm:$0x8]  ;;  %p14711_p2 = por %p14710_p0, %p14709_p13 }
  0x82   : > { %12803 = vmatprep.subr.bf16.mxu0 %v14077_v21  ;;  %13973 = vmatprep.subr.bf16.mxu1 %v14077_v21  ;;  %v2265_v15 = vsel %vm1032_vm3, %v2256_v3, %v2264_v63  ;;  %v2269_v18 = vrot.slane %v2267_v7, 3  ;;  %v2272_v19 = vrot.slane %v2270_v8, 4  ;;  %v2768_v20 = vrot.slane %v2766_v10, 3  ;;  %v15055_v1 = vld [vmem:[#allocation2 + $0x34] sm:$0xf]  ;;  %575 = vst [vmem:[#allocation2 + $0x54] sm:$0xff] %v543_v60  }
  0x83   : > { %v2771_v21 = vrot.slane %v2769_v11, 4  ;;  %v2785_v23 = vrot.slane %v2783_v13, 3  ;;  %v2034_v26 = vshrl.u32 %v15039_v5, 16  ;;  %v2037_v30 = vshll.u32 %v15039_v5, 16  ;;  %v14109_v2 = vld [vmem:[#allocation7 + $0xa8] sm:$0xff]   ;;  %v14120_v60 = vld [vmem:[#allocation7 + $0xa0] sm:$0xff]   ;;  %p14712_p10 = pnand %p14711_p2, %p14705_p9 }
  0x84   : > { %v2273_v28 = vor.u32 %v2272_v19, %v2269_v18  ;;  %v15045_v31 = vcombine.low %v1857_v6, %v1858_v12  ;;  %v12070_v46 = vcombine.low %v1822_v57, %v1822_v57  ;;  %v12093_v50 = vcombine.low %v1856_v22, %v1857_v6  ;;  %v442_v7 = vld [vmem:[#allocation2 + $0x30] sm:$0x8]  ;;  %v15057_v13 = vld [vmem:[#allocation2 + $0xf4] sm:$0xf]  ;;  %v14093_v18 = vld [vmem:[#allocation7 + $0x160] sm:$0xff]  }
  0x85   : > { %12804 = vmatpush3.bf16.msra.mxu0 %v14078_v24  ;;  %13981 = vmatpush3.bf16.msra.mxu1 %v14078_v24  ;;  %v2788_v24 = vrot.slane %v2786_v14, 4  ;;  %v2772_v29 = vor.u32 %v2771_v21, %v2768_v20  ;;  %v2036_v36 = vrot.slane %v2034_v26, 4  ;;  %v2039_v43 = vrot.slane %v2037_v30, 5  ;;  %v1861_v19 = vld [vmem:[#allocation2 + $0xf8] sm:$0xf] }
  0x86   : > { %12805 = vmatprep.subr.bf16.mxu0 %v14079_v25  ;;  %13974 = vmatprep.subr.bf16.mxu1 %v14079_v25  ;;  %v2779_v25 = vrot.slane %v2777_v4, 4  ;;  %v2130_v44 = vshrl.u32 %v15045_v31, 16  ;;  %v2133_v45 = vshll.u32 %v15045_v31, 16  ;;  %v2301_v54 = vshrl.u32 %v12070_v46, 16 }
  0x87   : > { %v2789_v34 = vor.u32 %v2788_v24, %v2785_v23  ;;  %3210 = vmatprep.mubr.bf16.mxu0 %v2273_v28  ;;  %v2040_v51 = vor.u32 %v2039_v43, %v2036_v36  ;;  %v2304_v58 = vshll.u32 %v12070_v46, 16  ;;  %v12094_v59 = vcombine.low %v1858_v12, %v1858_v12  ;;  %v478_v24 = vld [vmem:[#allocation2 + $0xf0] sm:$0x8]  ;;  %v14098_v43 = vld [vmem:[#allocation7 + $0x158] sm:$0xff]  }
  0x88   : > { %v2780_v35 = vor.u32 %v2779_v25, %v2776_v16  ;;  %v2135_v53 = vrot.slane %v2133_v45, 5  ;;  %v2303_v0 = vrot.slane %v2301_v54, 3  ;;  %v2812_v6 = vshll.u32 %v12093_v50, 16  ;;  %v545_v25 = vld [vmem:[%s14994_s11 + $0x28] sm:$0xff]  }
  0x89   : > { %12806 = vmatpush3.bf16.msra.mxu0 %v14080_v37  ;;  %13982 = vmatpush3.bf16.msra.mxu1 %v14080_v37  ;;  %v12069_v37 = vcombine.low %v1820_v17, %v1821_v52  ;;  %v2132_v52 = vrot.slane %v2130_v44, 4  ;;  %v2310_v61 = vshrl.u32 %v2040_v51, 16  ;;  %v2313_v62 = vshll.u32 %v2040_v51, 16  ;;  %577 = vst [vmem:[#allocation2 + $0x64] sm:$0xff] %v545_v25   ;;  %v15073_v44 = vld [vmem:[#allocation2 + $0x44] sm:$0xf] }
  0x8a   : > { %13631 = vmatprep.subr.bf16.mxu1 %v15030_v41  ;;  %13679 = vmatprep.subr.bf16.mxu0 %v15032_v42  ;;  %v2781_v47 = vsel %vm1032_vm3, %v2772_v29, %v2780_v35  ;;  %v2306_v4 = vrot.slane %v2304_v58, 4  ;;  %v2814_v16 = vrot.slane %v2812_v6, 4  ;;  %v2817_v17 = vshrl.u32 %v12094_v59, 16  ;;  %v15075_v45 = vld [vmem:[#allocation2 + $0x48] sm:$0xf] }
  0x8b   : > { %3306 = vmatprep.mubr.bf16.mxu1 %v2789_v34  ;;  %v2293_v48 = vshrl.u32 %v12069_v37, 16  ;;  %v2296_v49 = vshll.u32 %v12069_v37, 16  ;;  %v2136_v63 = vor.u32 %v2135_v53, %v2132_v52  ;;  %v2312_v8 = vrot.slane %v2310_v61, 3  ;;  %v15081_v51 = vld [vmem:[#allocation2 + $0x108] sm:$0xf] }
  0x8c   : > { %3211 = vmatmul.mubr.bf16.vlgmr.msra.gmra.mxu0 %v2265_v15  ;;  %3307 = vmatmul.mubr.bf16.vlgmr.msra.gmra.mxu1 %v2781_v47  ;;  %v2315_v10 = vrot.slane %v2313_v62, 4  ;;  %v2307_v14 = vor.u32 %v2306_v4, %v2303_v0  ;;  %v2820_v23 = vshll.u32 %v12094_v59, 16  ;;  %v2819_v29 = vrot.slane %v2817_v17, 3 }
  0x8d   : > { %13680 = vmatpush3.bf16.msra.mxu0 %v15032_v42  ;;  %13632 = vmatpush3.bf16.msra.mxu1 %v15030_v41  ;;  %v2295_v56 = vrot.slane %v2293_v48, 3  ;;  %v2298_v57 = vrot.slane %v2296_v49, 4  ;;  %v2809_v42 = vshrl.u32 %v12093_v50, 16  ;;  %v1825_v41 = vld [vmem:[#allocation2 + $0x38] sm:$0xf]  ;;  %v2826_v11 = vshrl.u32 %v2136_v63, 16 }
  0x8e   : > { %13681 = vmatprep.subr.bf16.mxu0 %v14099_v27  ;;  %13633 = vmatprep.subr.bf16.mxu1 %v14086_v40  ;;  %v2829_v12 = vshll.u32 %v2136_v63, 16  ;;  %v2316_v20 = vor.u32 %v2315_v10, %v2312_v8  ;;  %v2822_v33 = vrot.slane %v2820_v23, 4  ;;  %v15065_v34 = vcombine.low %v15057_v13, %v1861_v19  ;;  %v15079_v50 = vld [vmem:[#allocation2 + $0x104] sm:$0xf]  ;;  %v445_v23 = vld [vmem:[#allocation2 + $0x40] sm:$0x8] }
  0x8f   : > { %v2299_v3 = vor.u32 %v2298_v57, %v2295_v56  ;;  %v2811_v15 = vrot.slane %v2809_v42, 3  ;;  %v2828_v21 = vrot.slane %v2826_v11, 3  ;;  %v443_v35 = vsel %vm15008_vm2, 0, %v442_v7  ;;  %v14100_v11 = vld [vmem:[#allocation7 + $0x150] sm:$0xff]  }
  0x90   : > { %v2831_v22 = vrot.slane %v2829_v12, 4  ;;  %3218 = vmatprep.mubr.bf16.mxu0 %v2316_v20  ;;  %444 = vst [vmem:[#allocation2 + $0x30] sm:$0x8] %v443_v35  ;;  %v12072_v39 = vcombine.low %v1825_v41, %v1825_v41  ;;  %v2823_v46 = vor.u32 %v2822_v33, %v2819_v29  ;;  %v2138_v47 = vshrl.u32 %v15065_v34, 16  ;;  %v14105_v29 = vld [vmem:[#allocation7 + $0x148] sm:$0xff]  }
  0x91   : > { %13682 = vmatpush3.bf16.msra.mxu0 %v14099_v27  ;;  %13634 = vmatpush3.bf16.msra.mxu1 %v14086_v40  ;;  %v2308_v26 = vsel %vm1032_vm3, %v2299_v3, %v2307_v14  ;;  %v2815_v28 = vor.u32 %v2814_v16, %v2811_v15  ;;  %v15062_v27 = vcombine.low %v15055_v1, %v1825_v41  ;;  %v479_v40 = vsel %vm15008_vm2, 0, %v478_v24 }
  0x92   : > { %13683 = vmatprep.subr.bf16.mxu0 %v14109_v2  ;;  %13635 = vmatprep.subr.bf16.mxu1 %v14092_v55  ;;  %v2832_v30 = vor.u32 %v2831_v22, %v2828_v21  ;;  %v2141_v48 = vshll.u32 %v15065_v34, 16  ;;  %480 = vst [vmem:[#allocation2 + $0xf0] sm:$0x8] %v479_v40  ;;  %v12096_v49 = vcombine.low %v1861_v19, %v1861_v19  ;;  %v2344_v54 = vshrl.u32 %v12072_v39, 16 }
  0x93   : > { %v2042_v36 = vshrl.u32 %v15062_v27, 16  ;;  %v2045_v37 = vshll.u32 %v15062_v27, 16  ;;  %v2824_v56 = vsel %vm1032_vm3, %v2815_v28, %v2823_v46  ;;  %v2140_v57 = vrot.slane %v2138_v47, 4 }
  0x94   : > { %3219 = vmatmul.mubr.bf16.gmra.mxu0 %v2308_v26  ;;  %3314 = vmatprep.mubr.bf16.mxu1 %v2832_v30  ;;  %v2143_v58 = vrot.slane %v2141_v48, 5  ;;  %v2860_v59 = vshrl.u32 %v12096_v49, 16  ;;  %v15084_v62 = vrot.slane %v2344_v54, 3  ;;  %v2863_v0 = vshll.u32 %v12096_v49, 16  ;;  %v549_v30 = vld [vmem:[%s14994_s11 + $0x38] sm:$0xff]  }
  0x95   : > { %13684 = vmatpush3.bf16.msra.mxu0 %v14109_v2  ;;  %13636 = vmatpush3.bf16.msra.mxu1 %v14092_v55  ;;  %v2044_v52 = vrot.slane %v2042_v36, 4  ;;  %v2047_v53 = vrot.slane %v2045_v37, 5  ;;  %v2347_v55 = vshll.u32 %v12072_v39, 16  ;;  %v547_v2 = vld [vmem:[%s14994_s11 + $0x30] sm:$0xff]   ;;  %v15093_v42 = vcombine.low %v15073_v44, %v15075_v45  ;;  %v481_v39 = vld [vmem:[#allocation2 + $0x100] sm:$0x8] }
  0x96   : > { %13637 = vmatprep.subr.bf16.mxu1 %v14093_v18  ;;  %3315 = vmatmul.mubr.bf16.gmra.mxu1 %v2824_v56  ;;  %v2144_v3 = vor.u32 %v2143_v58, %v2140_v57  ;;  %v15089_v4 = vrot.slane %v2860_v59, 3  ;;  %v15097_v6 = vcombine.low %v15079_v50, %v15081_v51  ;;  %579 = vst [vmem:[#allocation2 + $0x74] sm:$0xff] %v547_v2   ;;  %v15101_v10 = vrot.slane %v2863_v0, 4  ;;  %v551_v0 = vld [vmem:[%s14994_s11 + $0x40] sm:$0xff]  }
  0x97   : > { %v2048_v61 = vor.u32 %v2047_v53, %v2044_v52  ;;  %v15086_v63 = vrot.slane %v2347_v55, 4  ;;  %13685 = vmatprep.subr.bf16.mxu0 %v14120_v60  ;;  %v1823_v15 = vld [vmem:[#allocation2 + $0x30] sm:$0x8]  ;;  %v2050_v16 = vshrl.u32 %v15093_v42, 16  ;;  %v2053_v17 = vshll.u32 %v15093_v42, 16  ;;  %581 = vst [vmem:[#allocation2 + $0x84] sm:$0xff] %v549_v30  }
  0x98   : > { %v2869_v12 = vshrl.u32 %v2144_v3, 16  ;;  %v2872_v14 = vshll.u32 %v2144_v3, 16  ;;  %v12071_v20 = vcombine.low %v1823_v15, %v15055_v1  ;;  %v2866_v22 = vor.u32 %v15101_v10, %v15089_v4  ;;  %v14129_v1 = vld [vmem:[#allocation7 + $0x98] sm:$0xff]   ;;  %v14106_v53 = vld [vmem:[#allocation7 + $0x140] sm:$0xff]   ;;  %583 = vst [vmem:[#allocation2 + $0x94] sm:$0xff] %v551_v0  }
  0x99   : > { %13638 = vmatpush3.bf16.msra.mxu1 %v14093_v18  ;;  %v2353_v41 = vshrl.u32 %v2048_v61, 16  ;;  %v2356_v7 = vshll.u32 %v2048_v61, 16  ;;  %v2350_v8 = vor.u32 %v15086_v63, %v15084_v62  ;;  %13686 = vmatpush3.bf16.msra.mxu0 %v14120_v60  ;;  %v1859_v21 = vld [vmem:[#allocation2 + $0xf0] sm:$0x8]  ;;  %v2052_v28 = vrot.slane %v2050_v16, 4 }
  0x9a   : > { %13639 = vmatprep.subr.bf16.mxu1 %v14098_v43  ;;  %v2871_v24 = vrot.slane %v2869_v12, 3  ;;  %v2874_v25 = vrot.slane %v2872_v14, 4  ;;  %v12095_v26 = vcombine.low %v1859_v21, %v15057_v13  ;;  %v2336_v35 = vshrl.u32 %v12071_v20, 16  ;;  %13687 = vmatprep.subr.bf16.mxu0 %v14129_v1  ;;  %v15126_v15 = vld [vmem:[#allocation2 + $0x54] sm:$0xf] }
  0x9b   : > { %v2355_v18 = vrot.slane %v2353_v41, 3  ;;  %v2358_v19 = vrot.slane %v2356_v7, 4  ;;  %v2339_v36 = vshll.u32 %v12071_v20, 16  ;;  %v2055_v37 = vrot.slane %v2053_v17, 5  ;;  %v553_v7 = vld [vmem:[%s14994_s11 + $0x48] sm:$0xff]  }
  0x9c   : > { %v2875_v40 = vor.u32 %v2874_v25, %v2871_v24  ;;  %v2852_v46 = vshrl.u32 %v12095_v26, 16  ;;  %v2855_v47 = vshll.u32 %v12095_v26, 16  ;;  %v2146_v48 = vshrl.u32 %v15097_v6, 16  ;;  %585 = vst [vmem:[#allocation2 + $0xa4] sm:$0xff] %v553_v7   ;;  %v487_v63 = vld [vmem:[#allocation2 + $0x1c] sm:$0x1] }
  0x9d   : > { %13640 = vmatpush3.bf16.msra.mxu1 %v14098_v43  ;;  %v2359_v33 = vor.u32 %v2358_v19, %v2355_v18  ;;  %v2338_v49 = vrot.slane %v2336_v35, 3  ;;  %v2341_v13 = vrot.slane %v2339_v36, 4  ;;  %v2056_v43 = vor.u32 %v2055_v37, %v2052_v28  ;;  %13688 = vmatpush3.bf16.msra.mxu0 %v14129_v1  ;;  %v448_v28 = vld [vmem:[#allocation2 + $0x50] sm:$0x8]  ;;  %v490_v37 = vld [vmem:[#allocation2 + $0x2c] sm:$0x1] }
  0x9e   : > { %13641 = vmatprep.subr.bf16.mxu1 %v14100_v11  ;;  %v2149_v52 = vshll.u32 %v15097_v6, 16  ;;  %3322 = vmatprep.mubr.bf16.mxu1 %v2875_v40  ;;  %v2854_v54 = vrot.slane %v2852_v46, 3  ;;  %v2857_v55 = vrot.slane %v2855_v47, 4  ;;  %v2148_v56 = vrot.slane %v2146_v48, 4  ;;  %v555_v48 = vld [vmem:[%s14994_s11 + $0x50] sm:$0xff]  }
  0x9f   : > { %3226 = vmatprep.mubr.bf16.mxu0 %v2359_v33  ;;  %v446_v57 = vsel %vm15008_vm2, 0, %v445_v23  ;;  %v2342_v58 = vor.u32 %v2341_v13, %v2338_v49  ;;  %v2396_v59 = vshrl.u32 %v2056_v43, 16  ;;  %v2399_v60 = vshll.u32 %v2056_v43, 16  ;;  %v14112_v23 = vld [vmem:[#allocation7 + $0x78] sm:$0xff]   ;;  %587 = vst [vmem:[#allocation2 + $0xb4] sm:$0xff] %v555_v48  }
  0xa0   : > { %v2151_v61 = vrot.slane %v2149_v52, 5  ;;  %447 = vst [vmem:[#allocation2 + $0x40] sm:$0x8] %v446_v57  ;;  %v2858_v2 = vor.u32 %v2857_v55, %v2854_v54  ;;  %v12074_v3 = vcombine.low %v15075_v45, %v15075_v45  ;;  %v482_v4 = vsel %vm15008_vm2, 0, %v481_v39  ;;  %v1831_v45 = vld [vmem:[#allocation2 + $0x58] sm:$0xf] }
  0xa1   : > { %13642 = vmatpush3.bf16.msra.mxu1 %v14100_v11  ;;  %v12098_v41 = vcombine.low %v15081_v51, %v15081_v51  ;;  %v2351_v10 = vsel %vm1032_vm3, %v2342_v58, %v2350_v8  ;;  %v2398_v11 = vrot.slane %v2396_v59, 3  ;;  %v2401_v12 = vrot.slane %v2399_v60, 4  ;;  %483 = vst [vmem:[#allocation2 + $0x100] sm:$0x8] %v482_v4  ;;  %v15171_v4 = vld [vmem:[#allocation2 + $0x64] sm:$0xf] }
  0xa2   : > { %13643 = vmatprep.subr.bf16.mxu1 %v14105_v29  ;;  %v2152_v14 = vor.u32 %v2151_v61, %v2148_v56  ;;  %3227 = vmatmul.mubr.bf16.gmra.mxu0 %v2351_v10  ;;  %v2867_v16 = vsel %vm1032_vm3, %v2858_v2, %v2866_v22  ;;  %v2387_v17 = vshrl.u32 %v12074_v3, 16  ;;  %v2390_v51 = vshll.u32 %v12074_v3, 16 }
  0xa3   : > { %v2903_v18 = vshrl.u32 %v12098_v41, 16  ;;  %v18770_v62 = vmov 0  ;;  %3323 = vmatmul.mubr.bf16.gmra.mxu1 %v2867_v16  ;;  %v2402_v8 = vor.u32 %v2401_v12, %v2398_v11  ;;  %v2906_v21 = vshll.u32 %v12098_v41, 16  ;;  %v1834_v12 = vld [vmem:[#allocation2 + $0x68] sm:$0xf] }
  0xa4   : > { %v18771_v62 = vsel %vm15131_vm6, 4294967295, %v18770_v62  ;;  %v2912_v19 = vshrl.u32 %v2152_v14, 16  ;;  %v2915_v20 = vshll.u32 %v2152_v14, 16  ;;  %v15135_v24 = vrot.slane %v2387_v17, 3 }
  0xa5   : > { %13644 = vmatpush3.bf16.msra.mxu1 %v14105_v29  ;;  %18772 = vst [vmem:[#allocation19_spill] sm:$0xff] %v18771_v62  ;;  %v15137_v22 = vrot.slane %v2390_v51, 4  ;;  %v15139_v25 = vrot.slane %v2903_v18, 3  ;;  %v15142_v26 = vcombine.low %v15126_v15, %v1831_v45  ;;  %v14140_v29 = vld [vmem:[#allocation7 + $0x90] sm:$0xff]   ;;  %3234 = vmatprep.mubr.bf16.mxu0 %v2402_v8  ;;  %v15144_v35 = vrot.slane %v2906_v21, 4  ;;  %v14149_v8 = vld [vmem:[#allocation7 + $0x88] sm:$0xff]  }
  0xa6   : > { %13645 = vmatprep.subr.bf16.mxu1 %v14106_v53  ;;  %v2914_v30 = vrot.slane %v2912_v19, 3  ;;  %v2917_v33 = vrot.slane %v2915_v20, 4  ;;  %v488_v36 = vsel %vm15131_vm6, 0, %v487_v63  ;;  %v15153_v47 = vrot.slane %v15025_v32, 5  ;;  %13689 = vmatprep.subr.bf16.mxu0 %v14140_v29 }
  0xa7   : > { %v1826_v39 = vld [vmem:[#allocation2 + $0x40] sm:$0x8]  ;;  %v2393_v1 = vor.u32 %v15137_v22, %v15135_v24  ;;  %v2058_v40 = vshrl.u32 %v15142_v26, 16  ;;  %v2061_v46 = vshll.u32 %v15142_v26, 16  ;;  %489 = vst [vmem:[#allocation2 + $0x1c] sm:$0x1] %v488_v36  ;;  %v2909_v43 = vor.u32 %v15144_v35, %v15139_v25  ;;  %13690 = vmatpush3.bf16.msra.mxu0 %v14140_v29 }
  0xa8   : > { %v2918_v49 = vor.u32 %v2917_v33, %v2914_v30  ;;  %v12073_v13 = vcombine.low %v1826_v39, %v15073_v44  ;;  %v449_v52 = vsel %vm15008_vm2, 0, %v448_v28  ;;  %v1862_v54 = vld [vmem:[#allocation2 + $0x100] sm:$0x8]  ;;  %v2276_v56 = vshrl.u32 %v15153_v47, 16  ;;  %13691 = vmatprep.subr.bf16.mxu0 %v14149_v8  ;;  %v493_v39 = vld [vmem:[#allocation2 + $0x3c] sm:$0x1] }
  0xa9   : > { %13646 = vmatpush3.bf16.msra.mxu1 %v14106_v53  ;;  %v557_v53 = vld [vmem:[%s14994_s11 + $0x58] sm:$0xff]   ;;  %v2060_v55 = vrot.slane %v2058_v40, 4  ;;  %v2063_v32 = vrot.slane %v2061_v46, 5  ;;  %v2279_v57 = vshll.u32 %v15153_v47, 16  ;;  %450 = vst [vmem:[#allocation2 + $0x50] sm:$0x8] %v449_v52  ;;  %v12097_v59 = vcombine.low %v1862_v54, %v15079_v50 }
  0xaa   : > { %12927 = vmatprep.subr.bf16.mxu1 %v14112_v23  ;;  %589 = vst [vmem:[#allocation2 + $0xc4] sm:$0xff] %v557_v53   ;;  %3330 = vmatprep.mubr.bf16.mxu1 %v2918_v49  ;;  %v2379_v44 = vshrl.u32 %v12073_v13, 16  ;;  %v2382_v58 = vshll.u32 %v12073_v13, 16  ;;  %v12076_v60 = vcombine.low %v1831_v45, %v1831_v45  ;;  %v15165_v0 = vrot.slane %v2276_v56, 3  ;;  %v451_v53 = vld [vmem:[#allocation2 + $0x60] sm:$0x8] }
  0xab   : > { %v2064_v61 = vor.u32 %v2063_v32, %v2060_v55  ;;  %v15167_v2 = vrot.slane %v2279_v57, 4  ;;  %v491_v3 = vsel %vm15131_vm6, 0, %v490_v37  ;;  %v2895_v10 = vshrl.u32 %v12097_v59, 16  ;;  %13692 = vmatpush3.bf16.msra.mxu0 %v14149_v8  ;;  %v15193_v8 = vld [vmem:[#allocation2 + $0x74] sm:$0xf] }
  0xac   : > { %v2381_v41 = vrot.slane %v2379_v44, 3  ;;  %v2384_v7 = vrot.slane %v2382_v58, 4  ;;  %v2898_v11 = vshll.u32 %v12097_v59, 16  ;;  %492 = vst [vmem:[#allocation2 + $0x2c] sm:$0x1] %v491_v3  ;;  %v2430_v45 = vshrl.u32 %v12076_v60, 16 }
  0xad   : > { %v2439_v14 = vshrl.u32 %v2064_v61, 16  ;;  %v2442_v16 = vshll.u32 %v2064_v61, 16  ;;  %v2282_v50 = vor.u32 %v15167_v2, %v15165_v0  ;;  %v2897_v51 = vrot.slane %v2895_v10, 3  ;;  %v499_v2 = vld [vmem:[#allocation2 + $0x5c] sm:$0x1] }
  0xae   : > { %v2385_v17 = vor.u32 %v2384_v7, %v2381_v41  ;;  %v2900_v18 = vrot.slane %v2898_v11, 4  ;;  %v2433_v63 = vshll.u32 %v12076_v60, 16  ;;  %v14108_v21 = vld [vmem:[#allocation2 + $0x1c] ss:$0 sps:$4 sm:$0x11]   ;;  %v2432_v23 = vrot.slane %v2430_v45, 3 }
  0xaf   : > { %v2441_v19 = vrot.slane %v2439_v14, 3  ;;  %v2444_v20 = vrot.slane %v2442_v16, 4  ;;  %v15176_v24 = vcombine.low %v15171_v4, %v1834_v12  ;;  %v2204_v30 = vrot.slane %v15039_v5, 5 }
  0xb0   : > { %v2394_v22 = vsel %vm1032_vm3, %v2385_v17, %v2393_v1  ;;  %v2901_v25 = vor.u32 %v2900_v18, %v2897_v51  ;;  %v1829_v28 = vld [vmem:[#allocation2 + $0x50] sm:$0x8]  ;;  %v2435_v29 = vrot.slane %v2433_v63, 4  ;;  %v2202_v35 = vrot.slane %v14108_v21, 5  ;;  %v496_v63 = vld [vmem:[#allocation2 + $0x4c] sm:$0x1] }
  0xb1   : > { %3235 = vmatmul.mubr.bf16.gmra.mxu0 %v2394_v22  ;;  %v2445_v33 = vor.u32 %v2444_v20, %v2441_v19  ;;  %v12075_v36 = vcombine.low %v1829_v28, %v15126_v15  ;;  %v2066_v37 = vshrl.u32 %v15176_v24, 16  ;;  %v2319_v48 = vshrl.u32 %v2204_v30, 16  ;;  %v14113_v28 = vld [vmem:[#allocation7 + $0x38] sm:$0xff]  }
  0xb2   : > { %v2910_v40 = vsel %vm1032_vm3, %v2901_v25, %v2909_v43  ;;  %v2436_v46 = vor.u32 %v2435_v29, %v2432_v23  ;;  %v2322_v49 = vshll.u32 %v2204_v30, 16  ;;  %v2203_v5 = vsel %vm983_vm7, %v15153_v47, %v2202_v35  ;;  %v1837_v23 = vld [vmem:[#allocation2 + $0x78] sm:$0xf] }
  0xb3   : > { %3331 = vmatmul.mubr.bf16.gmra.mxu1 %v2910_v40  ;;  %3242 = vmatprep.mubr.bf16.mxu0 %v2445_v33  ;;  %v2422_v1 = vshrl.u32 %v12075_v36, 16  ;;  %v2425_v13 = vshll.u32 %v12075_v36, 16  ;;  %v2068_v52 = vrot.slane %v2066_v37, 4  ;;  %v2284_v54 = vshrl.u32 %v2203_v5, 16 }
  0xb4   : > { %v2287_v15 = vshll.u32 %v2203_v5, 16  ;;  %v14111_v55 = vld [vmem:[#allocation2 + $0x2c] ss:$0 sps:$4 sm:$0x11]   ;;  %v2321_v32 = vrot.slane %v2319_v48, 3  ;;  %v12078_v56 = vcombine.low %v1834_v12, %v1834_v12  ;;  %v2324_v44 = vrot.slane %v2322_v49, 4 }
  0xb5   : > { %v2424_v57 = vrot.slane %v2422_v1, 3  ;;  %v2427_v43 = vrot.slane %v2425_v13, 4  ;;  %v2069_v58 = vshll.u32 %v15176_v24, 16  ;;  %v2286_v59 = vrot.slane %v2284_v54, 3 }
  0xb6   : > { %v2289_v60 = vrot.slane %v2287_v15, 4  ;;  %v2205_v61 = vrot.slane %v14111_v55, 5  ;;  %v494_v47 = vsel %vm15131_vm6, 0, %v493_v39  ;;  %v2325_v41 = vor.u32 %v2324_v44, %v2321_v32  ;;  %v15222_v15 = vld [vmem:[#allocation2 + $0x84] sm:$0xf] }
  0xb7   : > { %v2428_v3 = vor.u32 %v2427_v43, %v2424_v57  ;;  %v2071_v7 = vrot.slane %v2069_v58, 5  ;;  %495 = vst [vmem:[#allocation2 + $0x3c] sm:$0x1] %v494_v47  ;;  %v2207_v10 = vrot.slane %v15062_v27, 5  ;;  %v452_v14 = vsel %vm15008_vm2, 0, %v451_v53  ;;  %v14119_v43 = vld [vmem:[#allocation7 + $0x30] sm:$0xff]  }
  0xb8   : > { %v2290_v11 = vor.u32 %v2289_v60, %v2286_v59  ;;  %v2206_v12 = vsel %vm983_vm7, %v2204_v30, %v2205_v61  ;;  %v2473_v16 = vshrl.u32 %v12078_v56, 16  ;;  %453 = vst [vmem:[#allocation2 + $0x60] sm:$0x8] %v452_v14  ;;  %v2476_v36 = vshll.u32 %v12078_v56, 16  ;;  %v15224_v55 = vld [vmem:[#allocation2 + $0x88] sm:$0xf] }
  0xb9   : > { %v2437_v45 = vsel %vm1032_vm3, %v2428_v3, %v2436_v46  ;;  %v2327_v17 = vshrl.u32 %v2206_v12, 16  ;;  %v2330_v51 = vshll.u32 %v2206_v12, 16  ;;  %v2072_v18 = vor.u32 %v2071_v7, %v2068_v52  ;;  %v14118_v46 = vld [vmem:[#allocation7 + $0x70] sm:$0xff]   ;;  %v14159_v3 = vld [vmem:[#allocation7 + $0x80] sm:$0xff]   ;;  %v14125_v14 = vld [vmem:[#allocation7 + $0x68] sm:$0xff]  }
  0xba   : > { %v2291_v27 = vsel %vm1032_vm3, %v2282_v50, %v2290_v11  ;;  %3243 = vmatmul.mubr.bf16.gmra.mxu0 %v2437_v45  ;;  %v2362_v19 = vshrl.u32 %v2207_v10, 16  ;;  %v2365_v20 = vshll.u32 %v2207_v10, 16  ;;  %v15199_v21 = vrot.slane %v2473_v16, 3  ;;  %13693 = vmatprep.subr.bf16.mxu0 %v14159_v3 }
  0xbb   : > { %13647 = vmatprep.mubr.bf16.mxu1 %v2291_v27  ;;  %v2329_v22 = vrot.slane %v2327_v17, 3  ;;  %v2332_v25 = vrot.slane %v2330_v51, 4  ;;  %v2482_v29 = vshrl.u32 %v2072_v18, 16  ;;  %v2485_v30 = vshll.u32 %v2072_v18, 16  ;;  %v454_v51 = vld [vmem:[#allocation2 + $0x70] sm:$0x8]  ;;  %13694 = vmatpush3.bf16.msra.mxu0 %v14159_v3 }
  0xbc   : > { %v15201_v33 = vrot.slane %v2362_v19, 3  ;;  %v15203_v35 = vrot.slane %v2365_v20, 4  ;;  %v497_v0 = vsel %vm15131_vm6, 0, %v496_v63  ;;  %v15208_v40 = vrot.slane %v15093_v42, 5 }
  0xbd   : > { %v2333_v50 = vor.u32 %v2332_v25, %v2329_v22  ;;  %v2484_v37 = vrot.slane %v2482_v29, 3  ;;  %v2487_v39 = vrot.slane %v2485_v30, 4  ;;  %498 = vst [vmem:[#allocation2 + $0x4c] sm:$0x1] %v497_v0  ;;  %v15212_v5 = vrot.slane %v2476_v36, 4  ;;  %v14126_v22 = vld [vmem:[#allocation7 + $0x28] sm:$0xff]  }
  0xbe   : > { %v14115_v48 = vld [vmem:[#allocation2 + $0x3c] ss:$0 sps:$4 sm:$0x11]   ;;  %v2368_v49 = vor.u32 %v15203_v35, %v15201_v33  ;;  %v15215_v1 = vcombine.low %v15193_v8, %v1837_v23  ;;  %v15217_v13 = vcombine.low %v1837_v23, %v1837_v23  ;;  %v2405_v54 = vshrl.u32 %v15208_v40, 16 }
  0xbf   : > { %v2334_v52 = vsel %vm1032_vm3, %v2325_v41, %v2333_v50  ;;  %v2488_v53 = vor.u32 %v2487_v39, %v2484_v37  ;;  %v2408_v42 = vshll.u32 %v15208_v40, 16  ;;  %v2208_v32 = vrot.slane %v14115_v48, 5  ;;  %v1832_v56 = vld [vmem:[#allocation2 + $0x60] sm:$0x8] }
  0xc0   : > { %13648 = vmatmul.mubr.bf16.vlgmr.msra.gmra.mxu1 %v2334_v52  ;;  %v2479_v57 = vor.u32 %v15212_v5, %v15199_v21  ;;  %v2074_v44 = vshrl.u32 %v15215_v1, 16  ;;  %v2077_v58 = vshll.u32 %v15215_v1, 16  ;;  %v12077_v59 = vcombine.low %v1832_v56, %v15171_v4  ;;  %v14132_v37 = vld [vmem:[#allocation7 + $0x60] sm:$0xff]  }
  0xc1   : > { %12928 = vmatpush3.bf16.msra.mxu1 %v14113_v28  ;;  %3250 = vmatprep.mubr.bf16.mxu0 %v2488_v53  ;;  %v15231_v60 = vrot.slane %v2405_v54, 3  ;;  %v15233_v61 = vrot.slane %v2408_v42, 4  ;;  %v500_v47 = vsel %vm15131_vm6, 0, %v499_v2  ;;  %v2209_v41 = vsel %vm983_vm7, %v2207_v10, %v2208_v32  ;;  %v14133_v39 = vld [vmem:[#allocation7 + $0x20] sm:$0xff]   ;;  %v502_v53 = vld [vmem:[#allocation2 + $0x6c] sm:$0x1] }
  0xc2   : > { %12929 = vmatprep.subr.bf16.mxu1 %v14118_v46  ;;  %v2076_v7 = vrot.slane %v2074_v44, 4  ;;  %v2079_v11 = vrot.slane %v2077_v58, 5  ;;  %501 = vst [vmem:[#allocation2 + $0x5c] sm:$0x1] %v500_v47  ;;  %v15239_v12 = vrot.slane %v15142_v26, 5  ;;  %v2370_v16 = vshrl.u32 %v2209_v41, 16 }
  0xc3   : > { %v2373_v4 = vshll.u32 %v2209_v41, 16  ;;  %v2465_v45 = vshrl.u32 %v12077_v59, 16  ;;  %v2468_v17 = vshll.u32 %v12077_v59, 16  ;;  %v2411_v63 = vor.u32 %v15233_v61, %v15231_v60  ;;  %v14138_v54 = vld [vmem:[#allocation7 + $0x58] sm:$0xff]  }
  0xc4   : > { %v14117_v18 = vld [vmem:[#allocation2 + $0x4c] ss:$0 sps:$4 sm:$0x11]   ;;  %v2080_v27 = vor.u32 %v2079_v11, %v2076_v7  ;;  %v2448_v10 = vshrl.u32 %v15239_v12, 16  ;;  %v15246_v19 = vcombine.low %v15222_v15, %v15224_v55  ;;  %v2372_v26 = vrot.slane %v2370_v16, 3  ;;  %v14167_v42 = vld [vmem:[#allocation7 + $0x1f8] sm:$0xff]  }
  0xc5   : > { %v2375_v20 = vrot.slane %v2373_v4, 4  ;;  %v2467_v21 = vrot.slane %v2465_v45, 3  ;;  %v2470_v23 = vrot.slane %v2468_v17, 4  ;;  %12930 = vmatpush3.bf16.msra.mxu1 %v14119_v43  ;;  %v2211_v25 = vrot.slane %v14117_v18, 5  ;;  %v505_v58 = vld [vmem:[#allocation2 + $0x7c] sm:$0x1]  ;;  %13063 = vmatprep.subr.bf16.mxu0 %v14167_v42 }
  0xc6   : > { %v2525_v28 = vshrl.u32 %v2080_v27, 16  ;;  %v2528_v29 = vshll.u32 %v2080_v27, 16  ;;  %v15248_v30 = vrot.slane %v2448_v10, 3  ;;  %12931 = vmatprep.subr.bf16.mxu1 %v14125_v14  ;;  %v2451_v2 = vshll.u32 %v15239_v12, 16  ;;  %v457_v16 = vld [vmem:[#allocation2 + $0x80] sm:$0x8] }
  0xc7   : > { %v2376_v36 = vor.u32 %v2375_v20, %v2372_v26  ;;  %v2471_v0 = vor.u32 %v2470_v23, %v2467_v21  ;;  %v455_v50 = vsel %vm15008_vm2, 0, %v454_v51  ;;  %v2212_v46 = vsel %vm983_vm7, %v15208_v40, %v2211_v25  ;;  %v14139_v4 = vld [vmem:[#allocation7 + $0x18] sm:$0xff]   ;;  %v14146_v18 = vld [vmem:[#allocation7 + $0x50] sm:$0xff]  }
  0xc8   : > { %v2527_v48 = vrot.slane %v2525_v28, 3  ;;  %v2530_v5 = vrot.slane %v2528_v29, 4  ;;  %456 = vst [vmem:[#allocation2 + $0x70] sm:$0x8] %v455_v50  ;;  %v2516_v52 = vshrl.u32 %v15217_v13, 16  ;;  %v2413_v43 = vshrl.u32 %v2212_v46, 16 }
  0xc9   : > { %v2377_v32 = vsel %vm1032_vm3, %v2368_v49, %v2376_v36  ;;  %v2480_v56 = vsel %vm1032_vm3, %v2471_v0, %v2479_v57  ;;  %v2416_v44 = vshll.u32 %v2212_v46, 16  ;;  %12932 = vmatpush3.bf16.msra.mxu1 %v14126_v22  ;;  %v14122_v59 = vld [vmem:[#allocation2 + $0x5c] ss:$0 sps:$4 sm:$0x11]   ;;  %v15261_v47 = vrot.slane %v2451_v2, 4 }
  0xca   : > { %13651 = vmatprep.mubr.bf16.mxu1 %v2377_v32  ;;  %3251 = vmatmul.mubr.bf16.gmra.mxu0 %v2480_v56  ;;  %v2531_v40 = vor.u32 %v2530_v5, %v2527_v48  ;;  %v15263_v3 = vrot.slane %v2516_v52, 3  ;;  %v2519_v41 = vshll.u32 %v15217_v13, 16  ;;  %v2415_v7 = vrot.slane %v2413_v43, 3  ;;  %v15285_v21 = vld [vmem:[#allocation2 + $0x94] sm:$0xf] }
  0xcb   : > { %v2418_v33 = vrot.slane %v2416_v44, 4  ;;  %v503_v35 = vsel %vm15131_vm6, 0, %v502_v53  ;;  %v15269_v49 = vrot.slane %v15176_v24, 5  ;;  %12933 = vmatprep.subr.bf16.mxu1 %v14132_v37  ;;  %v2214_v57 = vrot.slane %v14122_v59, 5  ;;  %v1843_v23 = vld [vmem:[#allocation2 + $0x98] sm:$0xf] }
  0xcc   : > { %3258 = vmatprep.mubr.bf16.mxu0 %v2531_v40  ;;  %v2454_v11 = vor.u32 %v15261_v47, %v15248_v30  ;;  %v15273_v14 = vrot.slane %v2519_v41, 4  ;;  %504 = vst [vmem:[#allocation2 + $0x6c] sm:$0x1] %v503_v35  ;;  %v2082_v13 = vshrl.u32 %v15246_v19, 16  ;;  %v2085_v51 = vshll.u32 %v15246_v19, 16 }
  0xcd   : > { %v2419_v45 = vor.u32 %v2418_v33, %v2415_v7  ;;  %v2491_v17 = vshrl.u32 %v15269_v49, 16  ;;  %v2494_v24 = vshll.u32 %v15269_v49, 16  ;;  %12934 = vmatpush3.bf16.msra.mxu1 %v14133_v39  ;;  %v2215_v27 = vsel %vm983_vm7, %v15239_v12, %v2214_v57  ;;  %v508_v5 = vld [vmem:[#allocation2 + $0x8c] sm:$0x1]  ;;  %v14157_v57 = vld [vmem:[#allocation7 + $0x40] sm:$0xff]  }
  0xce   : > { %v2522_v10 = vor.u32 %v15273_v14, %v15263_v3  ;;  %v2084_v26 = vrot.slane %v2082_v13, 4  ;;  %v506_v20 = vsel %vm15131_vm6, 0, %v505_v58  ;;  %12935 = vmatprep.subr.bf16.mxu1 %v14138_v54  ;;  %v2456_v25 = vshrl.u32 %v2215_v27, 16  ;;  %v14153_v3 = vld [vmem:[#allocation7 + $0x8] sm:$0xff]  }
  0xcf   : > { %v2420_v22 = vsel %vm1032_vm3, %v2411_v63, %v2419_v45  ;;  %v2459_v28 = vshll.u32 %v2215_v27, 16  ;;  %v1835_v29 = vld [vmem:[#allocation2 + $0x70] sm:$0x8]  ;;  %v15291_v12 = vrot.slane %v2491_v17, 3  ;;  %507 = vst [vmem:[#allocation2 + $0x7c] sm:$0x1] %v506_v20  ;;  %v12082_v61 = vcombine.low %v15224_v55, %v15224_v55 }
  0xd0   : > { %13652 = vmatmul.mubr.bf16.gmra.mxu1 %v2420_v22  ;;  %v12079_v30 = vcombine.low %v1835_v29, %v15193_v8  ;;  %v15294_v36 = vrot.slane %v2494_v24, 4  ;;  %v2087_v0 = vrot.slane %v2085_v51, 5  ;;  %v15297_v2 = vrot.slane %v15215_v1, 5  ;;  %v14147_v63 = vld [vmem:[#allocation7 + $0x10] sm:$0xff]   ;;  %v14152_v1 = vld [vmem:[#allocation7 + $0x48] sm:$0xff]  }
  0xd1   : > { %v2458_v50 = vrot.slane %v2456_v25, 3  ;;  %v2461_v37 = vrot.slane %v2459_v28, 4  ;;  %v458_v60 = vsel %vm15008_vm2, 0, %v457_v16  ;;  %12936 = vmatpush3.bf16.msra.mxu1 %v14139_v4  ;;  %v15307_v42 = vcombine.low %v15285_v21, %v1843_v23  ;;  %v15326_v29 = vld [vmem:[#allocation2 + $0xa4] sm:$0xf] }
  0xd2   : > { %v2508_v39 = vshrl.u32 %v12079_v30, 16  ;;  %v2511_v46 = vshll.u32 %v12079_v30, 16  ;;  %v2497_v8 = vor.u32 %v15294_v36, %v15291_v12  ;;  %v2088_v48 = vor.u32 %v2087_v0, %v2084_v26  ;;  %459 = vst [vmem:[#allocation2 + $0x80] sm:$0x8] %v458_v60  ;;  %12937 = vmatprep.subr.bf16.mxu1 %v14146_v18  ;;  %v1846_v30 = vld [vmem:[#allocation2 + $0xa8] sm:$0xf] }
  0xd3   : > { %v2462_v52 = vor.u32 %v2461_v37, %v2458_v50  ;;  %v14124_v53 = vld [vmem:[#allocation2 + $0x6c] ss:$0 sps:$4 sm:$0x11]   ;;  %v2534_v54 = vshrl.u32 %v15297_v2, 16  ;;  %v15309_v55 = vcombine.low %v1843_v23, %v1843_v23  ;;  %v2537_v47 = vshll.u32 %v15297_v2, 16  ;;  %v14158_v23 = vld [vmem:[#allocation7] sm:$0xff]  }
  0xd4   : > { %v2510_v32 = vrot.slane %v2508_v39, 3  ;;  %v2513_v56 = vrot.slane %v2511_v46, 4  ;;  %v2568_v43 = vshrl.u32 %v2088_v48, 16  ;;  %v2571_v44 = vshll.u32 %v2088_v48, 16  ;;  %v15328_v0 = vld [vmem:[#allocation2 + $0xb4] sm:$0xf] }
  0xd5   : > { %v2463_v58 = vsel %vm1032_vm3, %v2454_v11, %v2462_v52  ;;  %v2217_v40 = vrot.slane %v14124_v53, 5  ;;  %v15312_v59 = vrot.slane %v2534_v54, 3  ;;  %12938 = vmatpush3.bf16.msra.mxu1 %v14147_v63  ;;  %v2559_v35 = vshrl.u32 %v12082_v61, 16  ;;  %v15330_v50 = vld [vmem:[#allocation7 + $0x238] sm:$0xff]  }
  0xd6   : > { %13655 = vmatprep.mubr.bf16.mxu1 %v2463_v58  ;;  %v2514_v41 = vor.u32 %v2513_v56, %v2510_v32  ;;  %v2570_v7 = vrot.slane %v2568_v43, 3  ;;  %v2573_v33 = vrot.slane %v2571_v44, 4  ;;  %12939 = vmatprep.subr.bf16.mxu1 %v14152_v1  ;;  %v14128_v13 = vld [vmem:[#allocation2 + $0x7c] ss:$0 sps:$4 sm:$0x11]   ;;  %v15317_v16 = vrot.slane %v2537_v47, 4 }
  0xd7   : > { %v2218_v14 = vsel %vm983_vm7, %v15269_v49, %v2217_v40  ;;  %v2562_v11 = vshll.u32 %v12082_v61, 16  ;;  %v509_v4 = vsel %vm15131_vm6, 0, %v508_v5  ;;  %v2220_v18 = vrot.slane %v14128_v13, 5  ;;  %v15336_v39 = vld [vmem:[#allocation2 + $0xb8] sm:$0xf] }
  0xd8   : > { %v2523_v45 = vsel %vm1032_vm3, %v2514_v41, %v2522_v10  ;;  %v2499_v17 = vshrl.u32 %v2218_v14, 16  ;;  %v2502_v24 = vshll.u32 %v2218_v14, 16  ;;  %v2574_v51 = vor.u32 %v2573_v33, %v2570_v7  ;;  %510 = vst [vmem:[#allocation2 + $0x8c] sm:$0x1] %v509_v4  ;;  %v511_v5 = vld [vmem:[#allocation2 + $0x9c] sm:$0x1] }
  0xd9   : > { %3259 = vmatmul.mubr.bf16.gmra.mxu0 %v2523_v45  ;;  %v2540_v27 = vor.u32 %v15317_v16, %v15312_v59  ;;  %v1838_v26 = vld [vmem:[#allocation2 + $0x80] sm:$0x8]  ;;  %v2561_v49 = vrot.slane %v2559_v35, 3  ;;  %v2564_v20 = vrot.slane %v2562_v11, 4  ;;  %12940 = vmatpush3.bf16.msra.mxu1 %v14153_v3  ;;  %v2222_v10 = vrot.slane %v15246_v19, 5 }
  0xda   : > { %v2501_v22 = vrot.slane %v2499_v17, 3  ;;  %v2504_v25 = vrot.slane %v2502_v24, 4  ;;  %3266 = vmatprep.mubr.bf16.mxu0 %v2574_v51  ;;  %v12081_v28 = vcombine.low %v1838_v26, %v15222_v15  ;;  %12941 = vmatprep.subr.bf16.mxu1 %v14157_v57  ;;  %v2221_v37 = vsel %vm983_vm7, %v15297_v2, %v2220_v18  ;;  %v460_v32 = vld [vmem:[#allocation2 + $0x90] sm:$0x8]  ;;  %v514_v4 = vld [vmem:[#allocation2 + $0xac] sm:$0x1] }
  0xdb   : > { %v2565_v60 = vor.u32 %v2564_v20, %v2561_v49  ;;  %v2090_v61 = vshrl.u32 %v15307_v42, 16  ;;  %v2093_v63 = vshll.u32 %v15307_v42, 16  ;;  %v2542_v19 = vshrl.u32 %v2221_v37, 16 }
  0xdc   : > { %v2505_v15 = vor.u32 %v2504_v25, %v2501_v22  ;;  %v2545_v46 = vshll.u32 %v2221_v37, 16  ;;  %v2551_v48 = vshrl.u32 %v12081_v28, 16  ;;  %v2554_v1 = vshll.u32 %v12081_v28, 16  ;;  %v15366_v25 = vld [vmem:[#allocation2 + $0xc4] sm:$0xf] }
  0xdd   : > { %v2577_v52 = vshrl.u32 %v2222_v10, 16  ;;  %v2580_v53 = vshll.u32 %v2222_v10, 16  ;;  %v2092_v54 = vrot.slane %v2090_v61, 4  ;;  %12942 = vmatpush3.bf16.msra.mxu1 %v14158_v23  ;;  %v2544_v56 = vrot.slane %v2542_v19, 3  ;;  %v1852_v61 = vld [vmem:[#allocation2 + $0xc8] sm:$0xf] }
  0xde   : > { %v2506_v2 = vsel %vm1032_vm3, %v2497_v8, %v2505_v15  ;;  %v2547_v43 = vrot.slane %v2545_v46, 4  ;;  %v2553_v44 = vrot.slane %v2551_v48, 3  ;;  %13727 = vmatprep.subr.bf16.mxu1 %v15330_v50  ;;  %v2556_v58 = vrot.slane %v2554_v1, 4  ;;  %v463_v48 = vld [vmem:[#allocation2 + $0xa0] sm:$0x8] }
  0xdf   : > { %13656 = vmatmul.mubr.bf16.gmra.mxu1 %v2506_v2  ;;  %v14131_v40 = vld [vmem:[#allocation2 + $0x8c] ss:$0 sps:$4 sm:$0x11]   ;;  %v15344_v59 = vcombine.low %v15326_v29, %v1846_v30  ;;  %v15348_v47 = vcombine.low %v15328_v0, %v15336_v39  ;;  %v15350_v3 = vcombine.low %v1846_v30, %v1846_v30  ;;  %v2579_v36 = vrot.slane %v2577_v52, 3 }
  0xe0   : > { %v2548_v12 = vor.u32 %v2547_v43, %v2544_v56  ;;  %v2582_v8 = vrot.slane %v2580_v53, 4  ;;  %v2095_v41 = vrot.slane %v2093_v63, 5  ;;  %v2557_v7 = vor.u32 %v2556_v58, %v2553_v44 }
  0xe1   : > { %v2223_v33 = vrot.slane %v14131_v40, 5  ;;  %v512_v35 = vsel %vm15131_vm6, 0, %v511_v5  ;;  %v2225_v57 = vrot.slane %v15307_v42, 5  ;;  %v461_v11 = vsel %vm15008_vm2, 0, %v460_v32 }
  0xe2   : > { %v2549_v14 = vsel %vm1032_vm3, %v2540_v27, %v2548_v12  ;;  %v2583_v13 = vor.u32 %v2582_v8, %v2579_v36  ;;  %v2096_v16 = vor.u32 %v2095_v41, %v2092_v54  ;;  %513 = vst [vmem:[#allocation2 + $0x9c] sm:$0x1] %v512_v35  ;;  %v2566_v45 = vsel %vm1032_vm3, %v2557_v7, %v2565_v60  ;;  %v517_v60 = vld [vmem:[#allocation2 + $0xbc] sm:$0x1] }
  0xe3   : > { %13659 = vmatprep.mubr.bf16.mxu1 %v2549_v14  ;;  %v2224_v17 = vsel %vm983_vm7, %v2222_v10, %v2223_v33  ;;  %v2620_v24 = vshrl.u32 %v2225_v57, 16  ;;  %v2623_v51 = vshll.u32 %v2225_v57, 16  ;;  %462 = vst [vmem:[#allocation2 + $0x90] sm:$0x8] %v461_v11  ;;  %3267 = vmatmul.mubr.bf16.gmra.mxu0 %v2566_v45  ;;  %v2602_v23 = vshrl.u32 %v15309_v55, 16 }
  0xe4   : > { %v2585_v18 = vshrl.u32 %v2224_v17, 16  ;;  %v2588_v42 = vshll.u32 %v2224_v17, 16  ;;  %v2611_v26 = vshrl.u32 %v2096_v16, 16  ;;  %v2614_v27 = vshll.u32 %v2096_v16, 16 }
  0xe5   : > { %v15360_v49 = vrot.slane %v2620_v24, 3  ;;  %v15362_v20 = vrot.slane %v2623_v51, 4  ;;  %v2605_v22 = vshll.u32 %v15309_v55, 16  ;;  %v2604_v15 = vrot.slane %v2602_v23, 3  ;;  %v15396_v24 = vld [vmem:[#allocation2 + $0x14] sm:$0xf] }
  0xe6   : > { %v2587_v28 = vrot.slane %v2585_v18, 3  ;;  %v2590_v10 = vrot.slane %v2588_v42, 4  ;;  %v2613_v30 = vrot.slane %v2611_v26, 3  ;;  %v2616_v37 = vrot.slane %v2614_v27, 4  ;;  %v15398_v51 = vld [vmem:[#allocation2 + $0x18] sm:$0xf] }
  0xe7   : > { %v2626_v63 = vor.u32 %v15362_v20, %v15360_v49  ;;  %v2607_v19 = vrot.slane %v2605_v22, 4  ;;  %v515_v46 = vsel %vm15131_vm6, 0, %v514_v4  ;;  %v2228_v55 = vrot.slane %v15344_v59, 5 }
  0xe8   : > { %v2591_v5 = vor.u32 %v2590_v10, %v2587_v28  ;;  %v2617_v1 = vor.u32 %v2616_v37, %v2613_v30  ;;  %516 = vst [vmem:[#allocation2 + $0xac] sm:$0x1] %v515_v46  ;;  %v2098_v52 = vshrl.u32 %v15344_v59, 16  ;;  %v2101_v32 = vshll.u32 %v15344_v59, 16 }
  0xe9   : > { %v14135_v53 = vld [vmem:[#allocation2 + $0x9c] ss:$0 sps:$4 sm:$0x11]   ;;  %v2608_v54 = vor.u32 %v2607_v19, %v2604_v15  ;;  %v15376_v2 = vcombine.low %v15366_v25, %v1852_v61  ;;  %v15380_v56 = vcombine.low %v15336_v39, %v15336_v39  ;;  %v2663_v58 = vshrl.u32 %v2228_v55, 16 }
  0xea   : > { %v2592_v43 = vsel %vm1032_vm3, %v2583_v13, %v2591_v5  ;;  %3274 = vmatprep.mubr.bf16.mxu0 %v2617_v1  ;;  %v1841_v44 = vld [vmem:[#allocation2 + $0x90] sm:$0x8]  ;;  %v2666_v40 = vshll.u32 %v2228_v55, 16  ;;  %v2100_v12 = vrot.slane %v2098_v52, 4  ;;  %v2226_v36 = vrot.slane %v14135_v53, 5 }
  0xeb   : > { %13660 = vmatmul.mubr.bf16.gmra.mxu1 %v2592_v43  ;;  %v12083_v8 = vcombine.low %v1841_v44, %v15285_v21  ;;  %v2103_v41 = vrot.slane %v2101_v32, 5  ;;  %v518_v59 = vsel %vm15131_vm6, 0, %v517_v60  ;;  %v15386_v7 = vrot.slane %v2663_v58, 3  ;;  %v520_v1 = vld [vmem:[#allocation2 + $0xcc] sm:$0x1] }
  0xec   : > { %v15388_v33 = vrot.slane %v2666_v40, 4  ;;  %519 = vst [vmem:[#allocation2 + $0xbc] sm:$0x1] %v518_v59  ;;  %v2231_v39 = vrot.slane %v15348_v47, 5  ;;  %v464_v35 = vsel %vm15008_vm2, 0, %v463_v48  ;;  %v2227_v14 = vsel %vm983_vm7, %v2225_v57, %v2226_v36 }
  0xed   : > { %v2594_v13 = vshrl.u32 %v12083_v8, 16  ;;  %v2597_v16 = vshll.u32 %v12083_v8, 16  ;;  %v2104_v11 = vor.u32 %v2103_v41, %v2100_v12  ;;  %465 = vst [vmem:[#allocation2 + $0xa0] sm:$0x8] %v464_v35  ;;  %v2628_v21 = vshrl.u32 %v2227_v14, 16 }
  0xee   : > { %v2631_v4 = vshll.u32 %v2227_v14, 16  ;;  %v2669_v45 = vor.u32 %v15388_v33, %v15386_v7  ;;  %v2706_v17 = vshrl.u32 %v2231_v39, 16  ;;  %v15402_v10 = vcombine.low %v1852_v61, %v1852_v61 }
  0xef   : > { %v2596_v18 = vrot.slane %v2594_v13, 3  ;;  %v2599_v42 = vrot.slane %v2597_v16, 4  ;;  %v2654_v26 = vshrl.u32 %v2104_v11, 16  ;;  %v2657_v27 = vshll.u32 %v2104_v11, 16  ;;  %v523_v16 = vld [vmem:[#allocation2 + $0xdc] sm:$0x1] }
  0xf0   : > { %v2630_v23 = vrot.slane %v2628_v21, 3  ;;  %v2633_v57 = vrot.slane %v2631_v4, 4  ;;  %v14137_v22 = vld [vmem:[#allocation2 + $0xac] ss:$0 sps:$4 sm:$0x11]   ;;  %v15400_v28 = vrot.slane %v2706_v17, 3  ;;  %v15409_v61 = vcombine.low %v15396_v24, %v15398_v51 }
  0xf1   : > { %v2600_v30 = vor.u32 %v2599_v42, %v2596_v18  ;;  %v2656_v37 = vrot.slane %v2654_v26, 3  ;;  %v2659_v60 = vrot.slane %v2657_v27, 4  ;;  %v2709_v15 = vshll.u32 %v2231_v39, 16  ;;  %v466_v18 = vld [vmem:[#allocation2 + $0xb0] sm:$0x8] }
  0xf2   : > { %v2634_v19 = vor.u32 %v2633_v57, %v2630_v23  ;;  %v2229_v46 = vrot.slane %v14137_v22, 5  ;;  %v2645_v48 = vshrl.u32 %v15350_v3, 16  ;;  %v2648_v5 = vshll.u32 %v15350_v3, 16  ;;  %v15423_v23 = vld [vmem:[#allocation2 + $0x24] sm:$0xf] }
  0xf3   : > { %v2609_v52 = vsel %vm1032_vm3, %v2600_v30, %v2608_v54  ;;  %v2660_v53 = vor.u32 %v2659_v60, %v2656_v37  ;;  %v14142_v32 = vld [vmem:[#allocation2 + $0xbc] ss:$0 sps:$4 sm:$0x11]   ;;  %v2711_v43 = vrot.slane %v2709_v15, 4  ;;  %v521_v49 = vsel %vm15131_vm6, 0, %v520_v1 }
  0xf4   : > { %v2635_v44 = vsel %vm1032_vm3, %v2626_v63, %v2634_v19  ;;  %3275 = vmatmul.mubr.bf16.gmra.mxu0 %v2609_v52  ;;  %v2230_v58 = vsel %vm983_vm7, %v2228_v55, %v2229_v46  ;;  %v1844_v40 = vld [vmem:[#allocation2 + $0xa0] sm:$0x8]  ;;  %v2647_v3 = vrot.slane %v2645_v48, 3  ;;  %v2650_v12 = vrot.slane %v2648_v5, 4  ;;  %522 = vst [vmem:[#allocation2 + $0xcc] sm:$0x1] %v521_v49 }
  0xf5   : > { %13663 = vmatprep.mubr.bf16.mxu1 %v2635_v44  ;;  %v2671_v54 = vshrl.u32 %v2230_v58, 16  ;;  %v2674_v36 = vshll.u32 %v2230_v58, 16  ;;  %3282 = vmatprep.mubr.bf16.mxu0 %v2660_v53  ;;  %v2232_v8 = vrot.slane %v14142_v32, 5  ;;  %v2712_v41 = vor.u32 %v2711_v43, %v15400_v28  ;;  %v15434_v19 = vld [vmem:[#allocation2 + $0x28] sm:$0xf] }
  0xf6   : > { %v12085_v59 = vcombine.low %v1844_v40, %v15326_v29  ;;  %v2651_v35 = vor.u32 %v2650_v12, %v2647_v3  ;;  %v2234_v20 = vrot.slane %v15376_v2, 5  ;;  %v2106_v13 = vshrl.u32 %v15348_v47, 16  ;;  %v526_v52 = vld [vmem:[#allocation2 + $0xec] sm:$0x1] }
  0xf7   : > { %v2673_v63 = vrot.slane %v2671_v54, 3  ;;  %v2676_v55 = vrot.slane %v2674_v36, 4  ;;  %v2233_v14 = vsel %vm983_vm7, %v2231_v39, %v2232_v8  ;;  %v2109_v15 = vshll.u32 %v15348_v47, 16  ;;  %v602_v54 = vld [vmem:[#allocation2 + $0x10] sm:$0x8] }
  0xf8   : > { %v2714_v11 = vshrl.u32 %v2233_v14, 16  ;;  %v2717_v21 = vshll.u32 %v2233_v14, 16  ;;  %v2637_v4 = vshrl.u32 %v12085_v59, 16  ;;  %v2640_v17 = vshll.u32 %v12085_v59, 16 }
  0xf9   : > { %v2677_v29 = vor.u32 %v2676_v55, %v2673_v63  ;;  %v2749_v42 = vshrl.u32 %v2234_v20, 16  ;;  %v2752_v26 = vshll.u32 %v2234_v20, 16  ;;  %v2108_v27 = vrot.slane %v2106_v13, 4 }
  0xfa   : > { %v2716_v57 = vrot.slane %v2714_v11, 3  ;;  %v2719_v22 = vrot.slane %v2717_v21, 4  ;;  %v2639_v28 = vrot.slane %v2637_v4, 3  ;;  %v2642_v30 = vrot.slane %v2640_v17, 4  ;;  %v529_v11 = vld [vmem:[#allocation2 + $0xfc] sm:$0x1] }
  0xfb   : > { %v2678_v39 = vsel %vm1032_vm3, %v2669_v45, %v2677_v29  ;;  %v15429_v37 = vrot.slane %v2749_v42, 3  ;;  %v15431_v60 = vrot.slane %v2752_v26, 4  ;;  %v524_v5 = vsel %vm15131_vm6, 0, %v523_v16  ;;  %v14145_v43 = vld [vmem:[#allocation2 + $0xcc] ss:$0 sps:$4 sm:$0x11]  }
  0xfc   : > { %13664 = vmatmul.mubr.bf16.gmra.mxu1 %v2678_v39  ;;  %v2720_v46 = vor.u32 %v2719_v22, %v2716_v57  ;;  %v2643_v48 = vor.u32 %v2642_v30, %v2639_v28  ;;  %v2237_v1 = vrot.slane %v15028_v38, 5  ;;  %v2111_v33 = vrot.slane %v2109_v15, 5  ;;  %525 = vst [vmem:[#allocation2 + $0xdc] sm:$0x1] %v524_v5 }
  0xfd   : > { %v2755_v7 = vor.u32 %v15431_v60, %v15429_v37  ;;  %v467_v45 = vsel %vm15008_vm2, 0, %v466_v18  ;;  %v2688_v47 = vshrl.u32 %v15380_v56, 16  ;;  %v15448_v38 = vcombine.low %v15423_v23, %v15434_v19 }
  0xfe   : > { %v2721_v53 = vsel %vm1032_vm3, %v2712_v41, %v2720_v46  ;;  %v2652_v32 = vsel %vm1032_vm3, %v2643_v48, %v2651_v35  ;;  %v2792_v44 = vshrl.u32 %v2237_v1, 16  ;;  %468 = vst [vmem:[#allocation2 + $0xb0] sm:$0x8] %v467_v45  ;;  %v2112_v58 = vor.u32 %v2111_v33, %v2108_v27 }
  0xff   : > { %13667 = vmatprep.mubr.bf16.mxu1 %v2721_v53  ;;  %3283 = vmatmul.mubr.bf16.gmra.mxu0 %v2652_v32  ;;  %v2795_v40 = vshll.u32 %v2237_v1, 16  ;;  %v15450_v3 = vrot.slane %v2688_v47, 3  ;;  %v2691_v12 = vshll.u32 %v15380_v56, 16  ;;  %v2235_v36 = vrot.slane %v14145_v43, 5 }
 0x100   : > { %v15453_v8 = vrot.slane %v2792_v44, 3  ;;  %v527_v41 = vsel %vm15131_vm6, 0, %v526_v52  ;;  %v2240_v59 = vrot.slane %v15045_v31, 5  ;;  %v2697_v35 = vshrl.u32 %v2112_v58, 16 }
 0x101   : > { %v2700_v49 = vshll.u32 %v2112_v58, 16  ;;  %v15458_v63 = vrot.slane %v2795_v40, 4  ;;  %v2693_v55 = vrot.slane %v2691_v12, 4  ;;  %528 = vst [vmem:[#allocation2 + $0xec] sm:$0x1] %v527_v41  ;;  %v2236_v14 = vsel %vm983_vm7, %v2234_v20, %v2235_v36 }
 0x102   : > { %v2835_v13 = vshrl.u32 %v2240_v59, 16  ;;  %v2838_v16 = vshll.u32 %v2240_v59, 16  ;;  %v2114_v56 = vshrl.u32 %v15376_v2, 16  ;;  %v2757_v21 = vshrl.u32 %v2236_v14, 16  ;;  %v469_v12 = vld [vmem:[#allocation2 + $0xc0] sm:$0x8] }
 0x103   : > { %v2760_v4 = vshll.u32 %v2236_v14, 16  ;;  %v2699_v17 = vrot.slane %v2697_v35, 3  ;;  %v2702_v18 = vrot.slane %v2700_v49, 4  ;;  %v14148_v29 = vld [vmem:[#allocation2 + $0xdc] ss:$0 sps:$4 sm:$0x11]   ;;  %v2798_v31 = vor.u32 %v15458_v63, %v15453_v8 }
 0x104   : > { %v2694_v42 = vor.u32 %v2693_v55, %v15450_v3  ;;  %v15465_v26 = vrot.slane %v2835_v13, 3  ;;  %v15468_v27 = vcombine.low %v602_v54, %v15396_v24  ;;  %v2759_v20 = vrot.slane %v2757_v21, 3  ;;  %v532_v13 = vld [vmem:[#allocation2 + $0x10c] sm:$0x1] }
 0x105   : > { %v2762_v57 = vrot.slane %v2760_v4, 4  ;;  %v2703_v22 = vor.u32 %v2702_v18, %v2699_v17  ;;  %v1847_v28 = vld [vmem:[#allocation2 + $0xb0] sm:$0x8]  ;;  %v15470_v30 = vrot.slane %v2838_v16, 4  ;;  %v2238_v39 = vrot.slane %v14148_v29, 5 }
 0x106   : > { %v12087_v37 = vcombine.low %v1847_v28, %v15328_v0  ;;  %v2116_v60 = vrot.slane %v2114_v56, 4  ;;  %v2117_v15 = vshll.u32 %v15376_v2, 16  ;;  %v530_v24 = vsel %vm15131_vm6, 0, %v529_v11  ;;  %v14163_v4 = vld [vmem:[#allocation2 + $0x1c] ss:$0 sps:$4 sm:$0x11]  }
 0x107   : > { %v2763_v46 = vor.u32 %v2762_v57, %v2759_v20  ;;  %3290 = vmatprep.mubr.bf16.mxu0 %v2703_v22  ;;  %v2841_v48 = vor.u32 %v15470_v30, %v15465_v26  ;;  %v2243_v5 = vrot.slane %v15065_v34, 5  ;;  %v2239_v52 = vsel %vm983_vm7, %v2237_v1, %v2238_v39  ;;  %531 = vst [vmem:[#allocation2 + $0xfc] sm:$0x1] %v530_v24 }
 0x108   : > { %v2680_v33 = vshrl.u32 %v12087_v37, 16  ;;  %v2683_v45 = vshll.u32 %v12087_v37, 16  ;;  %v2119_v47 = vrot.slane %v2117_v15, 5  ;;  %v2800_v53 = vshrl.u32 %v2239_v52, 16 }
 0x109   : > { %v2764_v0 = vsel %vm1032_vm3, %v2755_v7, %v2763_v46  ;;  %v2803_v2 = vshll.u32 %v2239_v52, 16  ;;  %v14151_v32 = vld [vmem:[#allocation2 + $0xec] ss:$0 sps:$4 sm:$0x11]   ;;  %v2878_v43 = vshrl.u32 %v2243_v5, 16  ;;  %v2881_v3 = vshll.u32 %v2243_v5, 16 }
 0x10a   : > { %13668 = vmatmul.mubr.bf16.gmra.mxu1 %v2764_v0  ;;  %v2682_v44 = vrot.slane %v2680_v33, 3  ;;  %v2685_v58 = vrot.slane %v2683_v45, 4  ;;  %v2120_v40 = vor.u32 %v2119_v47, %v2116_v60  ;;  %v2802_v54 = vrot.slane %v2800_v53, 3  ;;  %v15517_v53 = vld [vmem:[#allocation2 + $0x34] sm:$0xf] }
 0x10b   : > { %v2805_v34 = vrot.slane %v2803_v2, 4  ;;  %v2241_v36 = vrot.slane %v14151_v32, 5  ;;  %v15481_v1 = vrot.slane %v2878_v43, 3  ;;  %v15483_v49 = vrot.slane %v2881_v3, 4  ;;  %v15519_v2 = vld [vmem:[#allocation2 + $0x38] sm:$0xf] }
 0x10c   : > { %v2686_v8 = vor.u32 %v2685_v58, %v2682_v44  ;;  %v2740_v41 = vshrl.u32 %v2120_v40, 16  ;;  %v2743_v35 = vshll.u32 %v2120_v40, 16  ;;  %v470_v55 = vsel %vm15008_vm2, 0, %v469_v12  ;;  %v15521_v32 = vld [vmem:[#allocation2 + $0x44] sm:$0xf] }
 0x10d   : > { %v2806_v7 = vor.u32 %v2805_v34, %v2802_v54  ;;  %v2242_v63 = vsel %vm983_vm7, %v2240_v59, %v2241_v36  ;;  %v2731_v14 = vshrl.u32 %v15402_v10, 16  ;;  %471 = vst [vmem:[#allocation2 + $0xc0] sm:$0x8] %v470_v55  ;;  %v2884_v59 = vor.u32 %v15483_v49, %v15481_v1  ;;  %v15523_v43 = vld [vmem:[#allocation2 + $0x48] sm:$0xf] }
 0x10e   : > { %v2695_v16 = vsel %vm1032_vm3, %v2686_v8, %v2694_v42  ;;  %v2843_v56 = vshrl.u32 %v2242_v63, 16  ;;  %v2846_v11 = vshll.u32 %v2242_v63, 16  ;;  %v2742_v21 = vrot.slane %v2740_v41, 3  ;;  %v14154_v29 = vld [vmem:[#allocation2 + $0xfc] ss:$0 sps:$4 sm:$0x11]  }
 0x10f   : > { %v2807_v17 = vsel %vm1032_vm3, %v2798_v31, %v2806_v7  ;;  %3291 = vmatmul.mubr.bf16.gmra.mxu0 %v2695_v16  ;;  %v2745_v18 = vrot.slane %v2743_v35, 4  ;;  %v15495_v20 = vcombine.low %v15398_v51, %v15398_v51  ;;  %v15497_v22 = vrot.slane %v2731_v14, 3  ;;  %v605_v44 = vld [vmem:[#allocation2 + $0x20] sm:$0x8] }
 0x110   : > { %13671 = vmatprep.mubr.bf16.mxu1 %v2807_v17  ;;  %v2845_v57 = vrot.slane %v2843_v56, 3  ;;  %v2848_v42 = vrot.slane %v2846_v11, 4  ;;  %v2734_v28 = vshll.u32 %v15402_v10, 16  ;;  %v2244_v37 = vrot.slane %v14154_v29, 5 }
 0x111   : > { %v2746_v39 = vor.u32 %v2745_v18, %v2742_v21  ;;  %v533_v31 = vsel %vm15131_vm6, 0, %v532_v13  ;;  %v15503_v60 = vrot.slane %v15097_v6, 5  ;;  %v987_v51 = vrot.slane %v15409_v61, 5 }
 0x112   : > { %v2849_v15 = vor.u32 %v2848_v42, %v2845_v57  ;;  %v15505_v46 = vrot.slane %v2734_v28, 4  ;;  %534 = vst [vmem:[#allocation2 + $0x10c] sm:$0x1] %v533_v31  ;;  %v2245_v24 = vsel %vm983_vm7, %v2243_v5, %v2244_v37  ;;  %v14782_v33 = vmov 0  }
 0x113   : > { %3298 = vmatprep.mubr.bf16.mxu0 %v2746_v39  ;;  %v2921_v52 = vshrl.u32 %v15503_v60, 16  ;;  %v2924_v10 = vshll.u32 %v15503_v60, 16  ;;  %424 = vst [vmem:[#allocation2 + $0x4] sm:$0xf] %v14782_v33  ;;  %425 = vst [vmem:[#allocation2 + $0x8] sm:$0xf] %v14782_v33  ;;  %v15541_v56 = vcombine.low %v15517_v53, %v15519_v2  ;;  %v15548_v11 = vcombine.low %v605_v44, %v15423_v23 }
 0x114   : > { %423 = vst [vmem:[#allocation2] sm:$0xf] %v14782_v33  ;;  %426 = vst [vmem:[#allocation2 + $0xc] sm:$0xf] %v14782_v33  ;;  %v988_v6 = vrot.slane %v14163_v4, 5  ;;  %v2850_v5 = vsel %vm1032_vm3, %v2841_v48, %v2849_v15  ;;  %v2886_v45 = vshrl.u32 %v2245_v24, 16  ;;  %v2737_v0 = vor.u32 %v15505_v46, %v15497_v22 }
 0x115   : > { %428 = vst [vmem:[#allocation2 + $0x110] sm:$0xf] %v14782_v33  ;;  %429 = vst [vmem:[#allocation2 + $0x114] sm:$0xf] %v14782_v33  ;;  %v2889_v47 = vshll.u32 %v2245_v24, 16  ;;  %13672 = vmatmul.mubr.bf16.gmra.mxu1 %v2850_v5  ;;  %v15525_v40 = vrot.slane %v2921_v52, 3  ;;  %v15558_v23 = vcombine.low %v15434_v19, %v15434_v19 }
 0x116   : > { %430 = vst [vmem:[#allocation2 + $0x118] sm:$0xf] %v14782_v33  ;;  %431 = vst [vmem:[#allocation2 + $0x11c] sm:$0xf] %v14782_v33  ;;  %v1850_v58 = vld [vmem:[#allocation2 + $0xc0] sm:$0x8]  ;;  %v989_v30 = vsel %vm983_vm7, %v987_v51, %v988_v6 }
 0x117   : > { %5792 = vst [vmem:[#allocation3] sm:$0xf] %v14782_v33  ;;  %5793 = vst [vmem:[#allocation3 + $0x4] sm:$0xf] %v14782_v33  ;;  %v15527_v26 = vrot.slane %v2924_v10, 4  ;;  %v1103_v48 = vshrl.u32 %v987_v51, 16  ;;  %v12089_v54 = vcombine.low %v1850_v58, %v15366_v25  ;;  %v15545_v25 = vcombine.low %v15521_v32, %v15523_v43 }
 0x118   : > { %5794 = vst [vmem:[#allocation3 + $0x8] sm:$0xf] %v14782_v33  ;;  %5795 = vst [vmem:[#allocation3 + $0xc] sm:$0xf] %v14782_v33  ;;  %v2888_v3 = vrot.slane %v2886_v45, 3  ;;  %v2891_v12 = vrot.slane %v2889_v47, 4 }
 0x119   : > { %5797 = vst [vmem:[#allocation3 + $0x110] sm:$0xf] %v14782_v33  ;;  %5798 = vst [vmem:[#allocation3 + $0x114] sm:$0xf] %v14782_v33  ;;  %v1106_v34 = vshll.u32 %v987_v51, 16  ;;  %v2927_v36 = vor.u32 %v15527_v26, %v15525_v40  ;;  %v15533_v8 = vrot.slane %v1103_v48, 3 }
 0x11a   : > { %5799 = vst [vmem:[#allocation3 + $0x118] sm:$0xf] %v14782_v33  ;;  %5800 = vst [vmem:[#allocation3 + $0x11c] sm:$0xf] %v14782_v33  ;;  %v1111_v41 = vshrl.u32 %v989_v30, 16  ;;  %v1114_v35 = vshll.u32 %v989_v30, 16  ;;  %v2892_v7 = vor.u32 %v2891_v12, %v2888_v3 }
 0x11b   : > { %v2723_v63 = vshrl.u32 %v12089_v54, 16  ;;  %v2726_v55 = vshll.u32 %v12089_v54, 16  ;;  %v15535_v14 = vrot.slane %v1106_v34, 4  ;;  %v14156_v13 = vld [vmem:[#allocation2 + $0x10c] ss:$0 sps:$4 sm:$0x11]  }
 0x11c   : > { %v15537_v16 = vrot.slane %v1111_v41, 3  ;;  %v2893_v21 = vsel %vm1032_vm3, %v2884_v59, %v2892_v7  ;;  %v600_v18 = vld [vmem:[#allocation2 + $0x4] sm:$0xf]  ;;  %v601_v29 = vld [vmem:[#allocation2 + $0x8] sm:$0xf]  ;;  %v2247_v42 = vrot.slane %v14156_v13, 5 }
 0x11d   : > { %v2725_v4 = vrot.slane %v2723_v63, 3  ;;  %v2728_v17 = vrot.slane %v2726_v55, 4  ;;  %v1109_v57 = vor.u32 %v15535_v14, %v15533_v8  ;;  %13675 = vmatprep.mubr.bf16.mxu1 %v2893_v21  ;;  %v12035_v22 = vcombine.low %v600_v18, %v601_v29  ;;  %v14161_v28 = vld [vmem:[#allocation2 + $0xc] ss:$0 sps:$4 sm:$0x11]  }
 0x11e   : > { %v12004_v39 = vcombine.low %v601_v29, %v601_v29  ;;  %v599_v1 = vld [vmem:[#allocation2] sm:$0x8]  ;;  %v1116_v49 = vrot.slane %v1114_v35, 4  ;;  %v816_v59 = vshrl.u32 %v15409_v61, 16  ;;  %v819_v31 = vshll.u32 %v15409_v61, 16 }
 0x11f   : > { %v2729_v37 = vor.u32 %v2728_v17, %v2725_v4  ;;  %v2248_v15 = vsel %vm983_vm7, %v15503_v60, %v2247_v42  ;;  %v808_v46 = vshrl.u32 %v12035_v22, 16  ;;  %v811_v51 = vshll.u32 %v12035_v22, 16  ;;  %v14166_v34 = vld [vmem:[#allocation2 + $0x2c] ss:$0 sps:$4 sm:$0x11]  }
 0x120   : > { %v984_v24 = vrot.slane %v12035_v22, 5  ;;  %v2929_v10 = vshrl.u32 %v2248_v15, 16  ;;  %v2932_v33 = vshll.u32 %v2248_v15, 16  ;;  %v985_v6 = vrot.slane %v14161_v28, 5 }
 0x121   : > { %v2738_v52 = vsel %vm1032_vm3, %v2729_v37, %v2737_v0  ;;  %v810_v19 = vrot.slane %v808_v46, 4  ;;  %v813_v5 = vrot.slane %v811_v51, 5  ;;  %v12003_v40 = vcombine.low %v599_v1, %v600_v18  ;;  %v14172_v51 = vld [vmem:[#allocation7 + $0x1b8] sm:$0xff]  }
 0x122   : > { %3299 = vmatmul.mubr.bf16.gmra.mxu0 %v2738_v52  ;;  %v1060_v45 = vshrl.u32 %v984_v24, 16  ;;  %v1063_v47 = vshll.u32 %v984_v24, 16  ;;  %v2931_v44 = vrot.slane %v2929_v10, 3  ;;  %v2934_v58 = vrot.slane %v2932_v33, 4  ;;  %v14175_v33 = vld [vmem:[#allocation7 + $0x1f0] sm:$0xff]  }
 0x123   : > { %v986_v61 = vsel %vm983_vm7, %v984_v24, %v985_v6  ;;  %v814_v26 = vor.u32 %v813_v5, %v810_v19  ;;  %v1034_v0 = vshrl.u32 %v12003_v40, 16  ;;  %v1037_v54 = vshll.u32 %v12003_v40, 16  ;;  %v14171_v40 = vld [vmem:[#allocation2 + $0x3c] ss:$0 sps:$4 sm:$0x11]  }
 0x124   : > { %v1062_v60 = vrot.slane %v1060_v45, 3  ;;  %v1065_v30 = vrot.slane %v1063_v47, 4  ;;  %v1068_v48 = vshrl.u32 %v986_v61, 16  ;;  %v2935_v3 = vor.u32 %v2934_v58, %v2931_v44  ;;  %v14181_v45 = vld [vmem:[#allocation7 + $0x230] sm:$0xff]  }
 0x125   : > { %v1071_v12 = vshll.u32 %v986_v61, 16  ;;  %v1051_v8 = vshrl.u32 %v814_v26, 16  ;;  %v1054_v41 = vshll.u32 %v814_v26, 16  ;;  %v1036_v14 = vrot.slane %v1034_v0, 3 }
 0x126   : > { %v1066_v35 = vor.u32 %v1065_v30, %v1062_v60  ;;  %v1070_v7 = vrot.slane %v1068_v48, 3  ;;  %v2936_v63 = vsel %vm1032_vm3, %v2927_v36, %v2935_v3  ;;  %v1039_v13 = vrot.slane %v1037_v54, 4  ;;  %v14184_v48 = vld [vmem:[#allocation7 + $0x1e8] sm:$0xff]  }
 0x127   : > { %v1073_v55 = vrot.slane %v1071_v12, 4  ;;  %13676 = vmatmul.mubr.bf16.gmra.mxu1 %v2936_v63  ;;  %v1053_v21 = vrot.slane %v1051_v8, 3  ;;  %v1056_v4 = vrot.slane %v1054_v41, 4  ;;  %v1042_v17 = vshrl.u32 %v12004_v39, 16  ;;  %v14192_v63 = vld [vmem:[#allocation7 + $0x1e0] sm:$0xff]  }
 0x128   : > { %v1045_v18 = vshll.u32 %v12004_v39, 16  ;;  %v1040_v42 = vor.u32 %v1039_v13, %v1036_v14  ;;  %v1117_v22 = vor.u32 %v1116_v49, %v15537_v16  ;;  %v818_v28 = vrot.slane %v816_v59, 4 }
 0x129   : > { %v1074_v29 = vor.u32 %v1073_v55, %v1070_v7  ;;  %v1057_v37 = vor.u32 %v1056_v4, %v1053_v21  ;;  %v1044_v1 = vrot.slane %v1042_v17, 3  ;;  %v821_v46 = vrot.slane %v819_v31, 5  ;;  %v14189_v7 = vld [vmem:[#allocation7 + $0x1a8] sm:$0xff]  }
 0x12a   : > { %v1047_v15 = vrot.slane %v1045_v18, 4  ;;  %v1118_v24 = vsel %vm1032_vm3, %v1109_v57, %v1117_v22  ;;  %v990_v52 = vrot.slane %v15448_v38, 5  ;;  %v991_v10 = vrot.slane %v14166_v34, 5  ;;  %v14180_v57 = vld [vmem:[#allocation7 + $0x1b0] sm:$0xff]   ;;  %v14198_v55 = vld [vmem:[#allocation7 + $0x228] sm:$0xff]  }
 0x12b   : > { %v1075_v36 = vsel %vm1032_vm3, %v1066_v35, %v1074_v29  ;;  %3676 = vmatprep.mubr.bf16.mxu1 %v1057_v37  ;;  %v822_v6 = vor.u32 %v821_v46, %v818_v28  ;;  %v1077_v16 = vshrl.u32 %v15468_v27, 16  ;;  %v1080_v49 = vshll.u32 %v15468_v27, 16 }
 0x12c   : > { %13695 = vmatprep.mubr.bf16.mxu0 %v1075_v36  ;;  %v1048_v39 = vor.u32 %v1047_v15, %v1044_v1  ;;  %v992_v59 = vsel %vm983_vm7, %v990_v52, %v991_v10  ;;  %v1146_v31 = vshrl.u32 %v990_v52, 16  ;;  %v1149_v19 = vshll.u32 %v990_v52, 16  ;;  %v14197_v1 = vld [vmem:[#allocation7 + $0x1a0] sm:$0xff]  }
 0x12d   : > { %13696 = vmatmul.mubr.bf16.vlgmr.msra.gmra.mxu0 %v1118_v24  ;;  %v1085_v5 = vshrl.u32 %v15495_v20, 16  ;;  %v1094_v44 = vshrl.u32 %v822_v6, 16  ;;  %v1097_v58 = vshll.u32 %v822_v6, 16  ;;  %v1154_v61 = vshrl.u32 %v992_v59, 16  ;;  %v14215_v15 = vld [vmem:[#allocation7 + $0x220] sm:$0xff]  }
 0x12e   : > { %v1049_v47 = vsel %vm1032_vm3, %v1040_v42, %v1048_v39  ;;  %13064 = vmatpush3.bf16.msra.mxu0 %v14172_v51  ;;  %v1148_v26 = vrot.slane %v1146_v31, 3  ;;  %v1151_v60 = vrot.slane %v1149_v19, 4  ;;  %v1157_v30 = vshll.u32 %v992_v59, 16  ;;  %v14174_v42 = vld [vmem:[#allocation2 + $0x4c] ss:$0 sps:$4 sm:$0x11]  }
 0x12f   : > { %v1079_v27 = vrot.slane %v1077_v16, 3  ;;  %13065 = vmatprep.subr.bf16.mxu0 %v14175_v33  ;;  %3677 = vmatmul.mubr.bf16.vlgmr.msra.gmra.mxu1 %v1049_v47  ;;  %v1096_v3 = vrot.slane %v1094_v44, 3  ;;  %v1099_v12 = vrot.slane %v1097_v58, 4  ;;  %v1156_v0 = vrot.slane %v1154_v61, 3  ;;  %v14201_v59 = vld [vmem:[#allocation7 + $0x1d8] sm:$0xff]  }
 0x130   : > { %v1082_v54 = vrot.slane %v1080_v49, 4  ;;  %13728 = vmatpush3.bf16.msra.mxu1 %v15330_v50  ;;  %v1152_v34 = vor.u32 %v1151_v60, %v1148_v26  ;;  %v1159_v8 = vrot.slane %v1157_v30, 4  ;;  %v1087_v41 = vrot.slane %v1085_v5, 3  ;;  %v14206_v47 = vld [vmem:[#allocation7 + $0x198] sm:$0xff]   ;;  %v15590_v26 = vld [vmem:[#allocation2 + $0x54] sm:$0xf] }
 0x131   : > { %v1088_v35 = vshll.u32 %v15495_v20, 16  ;;  %v1100_v14 = vor.u32 %v1099_v12, %v1096_v3  ;;  %v993_v21 = vrot.slane %v15541_v56, 5  ;;  %v994_v4 = vrot.slane %v14171_v40, 5  ;;  %13729 = vmatprep.subr.bf16.mxu1 %v14181_v45  ;;  %v15592_v60 = vld [vmem:[#allocation2 + $0x58] sm:$0xf]  ;;  %v14209_v30 = vld [vmem:[#allocation7 + $0x1d0] sm:$0xff]  }
 0x132   : > { %v1083_v13 = vor.u32 %v1082_v54, %v1079_v27  ;;  %13066 = vmatpush3.bf16.msra.mxu0 %v14180_v57  ;;  %v1160_v17 = vor.u32 %v1159_v8, %v1156_v0  ;;  %v824_v29 = vshrl.u32 %v15448_v38, 16  ;;  %v827_v50 = vshll.u32 %v15448_v38, 16  ;;  %v14231_v27 = vld [vmem:[#allocation7 + $0x218] sm:$0xff]  }
 0x133   : > { %v1090_v18 = vrot.slane %v1088_v35, 4  ;;  %13067 = vmatprep.subr.bf16.mxu0 %v14184_v48  ;;  %3684 = vmatprep.mubr.bf16.mxu1 %v1100_v14  ;;  %v995_v20 = vsel %vm983_vm7, %v993_v21, %v994_v4  ;;  %v1189_v22 = vshrl.u32 %v993_v21, 16  ;;  %v1192_v28 = vshll.u32 %v993_v21, 16  ;;  %v15595_v35 = vld [vmem:[#allocation2 + $0x64] sm:$0xf] }
 0x134   : > { %v996_v37 = vrot.slane %v15545_v25, 5  ;;  %v1161_v46 = vsel %vm1032_vm3, %v1152_v34, %v1160_v17  ;;  %v1197_v36 = vshrl.u32 %v995_v20, 16  ;;  %v1200_v24 = vshll.u32 %v995_v20, 16  ;;  %13730 = vmatpush3.bf16.msra.mxu1 %v14181_v45  ;;  %v15585_v45 = vld [vmem:[#allocation2 + $0x5c] ss:$0 sps:$4 sm:$0x11]  }
 0x135   : > { %v1091_v51 = vor.u32 %v1090_v18, %v1087_v41  ;;  %13699 = vmatprep.mubr.bf16.mxu0 %v1161_v46  ;;  %v1191_v52 = vrot.slane %v1189_v22, 3  ;;  %v1194_v38 = vrot.slane %v1192_v28, 4  ;;  %v826_v10 = vrot.slane %v824_v29, 4  ;;  %13731 = vmatprep.subr.bf16.mxu1 %v14198_v55  ;;  %v608_v22 = vld [vmem:[#allocation2 + $0x30] sm:$0x8] }
 0x136   : > { %v829_v33 = vrot.slane %v827_v50, 5  ;;  %13068 = vmatpush3.bf16.msra.mxu0 %v14189_v7  ;;  %v1199_v6 = vrot.slane %v1197_v36, 3  ;;  %v1202_v16 = vrot.slane %v1200_v24, 4  ;;  %v997_v49 = vrot.slane %v14174_v42, 5  ;;  %v14214_v28 = vld [vmem:[#allocation7 + $0x190] sm:$0xff]  }
 0x137   : > { %v1092_v39 = vsel %vm1032_vm3, %v1083_v13, %v1091_v51  ;;  %13069 = vmatprep.subr.bf16.mxu0 %v14192_v63  ;;  %v1195_v31 = vor.u32 %v1194_v38, %v1191_v52  ;;  %v1232_v5 = vshrl.u32 %v996_v37, 16  ;;  %v1235_v57 = vshll.u32 %v996_v37, 16  ;;  %v14183_v7 = vld [vmem:[#allocation2 + $0x6c] ss:$0 sps:$4 sm:$0x11]  }
 0x138   : > { %3685 = vmatmul.mubr.bf16.gmra.mxu1 %v1092_v39  ;;  %v830_v19 = vor.u32 %v829_v33, %v826_v10  ;;  %v1203_v44 = vor.u32 %v1202_v16, %v1199_v6  ;;  %v998_v58 = vsel %vm983_vm7, %v996_v37, %v997_v49  ;;  %v1120_v61 = vshrl.u32 %v15548_v11, 16 }
 0x139   : > { %v1123_v40 = vshll.u32 %v15548_v11, 16  ;;  %13732 = vmatpush3.bf16.msra.mxu1 %v14198_v55  ;;  %v1234_v12 = vrot.slane %v1232_v5, 3  ;;  %v1237_v0 = vrot.slane %v1235_v57, 4  ;;  %v1240_v34 = vshrl.u32 %v998_v58, 16  ;;  %v15597_v11 = vld [vmem:[#allocation2 + $0x68] sm:$0xf] }
 0x13a   : > { %v1137_v48 = vshrl.u32 %v830_v19, 16  ;;  %v1140_v3 = vshll.u32 %v830_v19, 16  ;;  %13070 = vmatpush3.bf16.msra.mxu0 %v14197_v1  ;;  %13733 = vmatprep.subr.bf16.mxu1 %v14215_v15  ;;  %v1204_v54 = vsel %vm1032_vm3, %v1195_v31, %v1203_v44  ;;  %v1243_v8 = vshll.u32 %v998_v58, 16 }
 0x13b   : > { %v1122_v41 = vrot.slane %v1120_v61, 3  ;;  %13071 = vmatprep.subr.bf16.mxu0 %v14201_v59  ;;  %13700 = vmatmul.mubr.bf16.gmra.mxu0 %v1204_v54  ;;  %v1238_v14 = vor.u32 %v1237_v0, %v1234_v12  ;;  %v1125_v13 = vrot.slane %v1123_v40, 4  ;;  %v1242_v21 = vrot.slane %v1240_v34, 3 }
 0x13c   : > { %v1139_v63 = vrot.slane %v1137_v48, 3  ;;  %v1142_v55 = vrot.slane %v1140_v3, 4  ;;  %v1245_v4 = vrot.slane %v1243_v8, 4  ;;  %v1128_v17 = vshrl.u32 %v15558_v23, 16  ;;  %v14253_v3 = vld [vmem:[#allocation7 + $0x208] sm:$0xff]  }
 0x13d   : > { %v1131_v18 = vshll.u32 %v15558_v23, 16  ;;  %13734 = vmatpush3.bf16.msra.mxu1 %v14215_v15  ;;  %v1126_v50 = vor.u32 %v1125_v13, %v1122_v41  ;;  %v15603_v42 = vcombine.low %v15590_v26, %v15592_v60  ;;  %v1000_v20 = vrot.slane %v15585_v45, 5  ;;  %v14218_v23 = vld [vmem:[#allocation7 + $0x1c8] sm:$0xff]   ;;  %v14242_v15 = vld [vmem:[#allocation7 + $0x210] sm:$0xff]   ;;  %v15623_v41 = vld [vmem:[#allocation2 + $0x78] sm:$0xf] }
 0x13e   : > { %v1143_v29 = vor.u32 %v1142_v55, %v1139_v63  ;;  %13072 = vmatpush3.bf16.msra.mxu0 %v14206_v47  ;;  %13735 = vmatprep.subr.bf16.mxu1 %v14231_v27  ;;  %v1246_v37 = vor.u32 %v1245_v4, %v1242_v21  ;;  %v1130_v1 = vrot.slane %v1128_v17, 3  ;;  %v832_v51 = vshrl.u32 %v15541_v56, 16  ;;  %v14224_v47 = vld [vmem:[#allocation7 + $0x1c0] sm:$0xff]   ;;  %v15621_v8 = vld [vmem:[#allocation2 + $0x74] sm:$0xf] }
 0x13f   : > { %v1133_v46 = vrot.slane %v1131_v18, 4  ;;  %13073 = vmatprep.subr.bf16.mxu0 %v14209_v30  ;;  %v999_v36 = vrot.slane %v15603_v42, 5  ;;  %v835_v24 = vshll.u32 %v15541_v56, 16  ;;  %v15611_v52 = vcombine.low %v15595_v35, %v15597_v11  ;;  %v14223_v56 = vld [vmem:[#allocation7 + $0x188] sm:$0xff]   ;;  %v14225_v13 = vld [vmem:[#allocation7 + $0x180] sm:$0xff]  }
 0x140   : > { %3692 = vmatprep.mubr.bf16.mxu1 %v1143_v29  ;;  %v1003_v38 = vrot.slane %v14183_v7, 5  ;;  %v1247_v10 = vsel %vm1032_vm3, %v1238_v14, %v1246_v37  ;;  %v834_v39 = vrot.slane %v832_v51, 4  ;;  %v12009_v6 = vcombine.low %v608_v22, %v15517_v53  ;;  %v14188_v7 = vld [vmem:[#allocation2 + $0x7c] ss:$0 sps:$4 sm:$0x11]  }
 0x141   : > { %v1134_v33 = vor.u32 %v1133_v46, %v1130_v1  ;;  %13736 = vmatpush3.bf16.msra.mxu1 %v14231_v27  ;;  %13703 = vmatprep.mubr.bf16.mxu0 %v1247_v10  ;;  %v1001_v16 = vsel %vm983_vm7, %v999_v36, %v1000_v20  ;;  %v1275_v49 = vshrl.u32 %v999_v36, 16  ;;  %v1278_v59 = vshll.u32 %v999_v36, 16  ;;  %v14191_v29 = vld [vmem:[#allocation2 + $0x8c] ss:$0 sps:$4 sm:$0x11]  }
 0x142   : > { %v837_v31 = vrot.slane %v835_v24, 5  ;;  %13074 = vmatpush3.bf16.msra.mxu0 %v14214_v28  ;;  %v1283_v5 = vshrl.u32 %v1001_v16, 16  ;;  %v1286_v57 = vshll.u32 %v1001_v16, 16  ;;  %v1002_v45 = vrot.slane %v15611_v52, 5  ;;  %13737 = vmatprep.subr.bf16.mxu1 %v14242_v15  ;;  %v15626_v37 = vld [vmem:[#allocation2 + $0x84] sm:$0xf] }
 0x143   : > { %v1135_v19 = vsel %vm1032_vm3, %v1126_v50, %v1134_v33  ;;  %13075 = vmatprep.subr.bf16.mxu0 %v14218_v23  ;;  %v1277_v53 = vrot.slane %v1275_v49, 3  ;;  %v1280_v44 = vrot.slane %v1278_v59, 4  ;;  %v12010_v61 = vcombine.low %v15519_v2, %v15519_v2  ;;  %v15632_v10 = vld [vmem:[#allocation2 + $0x88] sm:$0xf] }
 0x144   : > { %3693 = vmatmul.mubr.bf16.gmra.mxu1 %v1135_v19  ;;  %v838_v58 = vor.u32 %v837_v31, %v834_v39  ;;  %v1285_v40 = vrot.slane %v1283_v5, 3  ;;  %v1288_v30 = vrot.slane %v1286_v57, 4  ;;  %v1004_v27 = vsel %vm983_vm7, %v1002_v45, %v1003_v38  ;;  %v611_v57 = vld [vmem:[#allocation2 + $0x40] sm:$0x8] }
 0x145   : > { %v1318_v48 = vshrl.u32 %v1002_v45, 16  ;;  %13738 = vmatpush3.bf16.msra.mxu1 %v14242_v15  ;;  %v1281_v12 = vor.u32 %v1280_v44, %v1277_v53  ;;  %v1321_v34 = vshll.u32 %v1002_v45, 16  ;;  %v1326_v2 = vshrl.u32 %v1004_v27, 16 }
 0x146   : > { %v1180_v0 = vshrl.u32 %v838_v58, 16  ;;  %v1183_v54 = vshll.u32 %v838_v58, 16  ;;  %13076 = vmatpush3.bf16.msra.mxu0 %v14223_v56  ;;  %v1289_v63 = vor.u32 %v1288_v30, %v1285_v40  ;;  %v1329_v14 = vshll.u32 %v1004_v27, 16  ;;  %13739 = vmatprep.subr.bf16.mxu1 %v14253_v3 }
 0x147   : > { %v1320_v55 = vrot.slane %v1318_v48, 3  ;;  %13077 = vmatprep.subr.bf16.mxu0 %v14224_v47  ;;  %v1323_v17 = vrot.slane %v1321_v34, 4  ;;  %v1163_v18 = vshrl.u32 %v12009_v6, 16  ;;  %v1328_v20 = vrot.slane %v1326_v2, 3 }
 0x148   : > { %v1182_v21 = vrot.slane %v1180_v0, 3  ;;  %v1185_v4 = vrot.slane %v1183_v54, 4  ;;  %v1290_v50 = vsel %vm1032_vm3, %v1281_v12, %v1289_v63  ;;  %v1331_v22 = vrot.slane %v1329_v14, 4 }
 0x149   : > { %v1166_v28 = vshll.u32 %v12009_v6, 16  ;;  %13740 = vmatpush3.bf16.msra.mxu1 %v14253_v3  ;;  %13704 = vmatmul.mubr.bf16.gmra.mxu0 %v1290_v50  ;;  %v1324_v46 = vor.u32 %v1323_v17, %v1320_v55  ;;  %v1165_v51 = vrot.slane %v1163_v18, 3  ;;  %v1171_v23 = vshrl.u32 %v12010_v61, 16 }
 0x14a   : > { %v1186_v1 = vor.u32 %v1185_v4, %v1182_v21  ;;  %v1332_v15 = vor.u32 %v1331_v22, %v1328_v20  ;;  %v1174_v24 = vshll.u32 %v12010_v61, 16  ;;  %v15630_v38 = vcombine.low %v15621_v8, %v15623_v41  ;;  %13078 = vmatpush3.bf16.msra.mxu0 %v14225_v13  ;;  %v15661_v22 = vld [vmem:[#allocation2 + $0x94] sm:$0xf] }
 0x14b   : > { %v1168_v36 = vrot.slane %v1166_v28, 4  ;;  %v1173_v39 = vrot.slane %v1171_v23, 3  ;;  %v1006_v6 = vrot.slane %v14188_v7, 5  ;;  %v840_v16 = vshrl.u32 %v15545_v25, 16  ;;  %v15663_v28 = vld [vmem:[#allocation2 + $0x98] sm:$0xf] }
 0x14c   : > { %v15634_v33 = vpop.f32.mrf.mxu0  ;;  %3700 = vmatprep.mubr.bf16.mxu1 %v1186_v1  ;;  %v843_v49 = vshll.u32 %v15545_v25, 16  ;;  %v15638_v59 = vpop.f32.mrf.mxu1  ;;  %v1333_v31 = vsel %vm1032_vm3, %v1324_v46, %v1332_v15  ;;  %v1176_v19 = vrot.slane %v1174_v24, 4  ;;  %v1005_v5 = vrot.slane %v15630_v38, 5  ;;  %v14196_v23 = vld [vmem:[#allocation2 + $0x9c] ss:$0 sps:$4 sm:$0x11]  }
 0x14d   : > { %v1169_v56 = vor.u32 %v1168_v36, %v1165_v51  ;;  %13707 = vmatprep.mubr.bf16.mxu0 %v1333_v31  ;;  %v842_v47 = vrot.slane %v840_v16, 4  ;;  %v15646_v44 = vcombine.low %v15626_v37, %v15632_v10  ;;  %v1009_v58 = vrot.slane %v14191_v29, 5 }
 0x14e   : > { %v15642_v45 = vpop.f32.mrf.mxu0  ;;  %v845_v53 = vrot.slane %v843_v49, 5  ;;  %v15648_v25 = vpop.f32.mrf.mxu1  ;;  %v1177_v61 = vor.u32 %v1176_v19, %v1173_v39  ;;  %v1007_v40 = vsel %vm983_vm7, %v1005_v5, %v1006_v6  ;;  %v1361_v30 = vshrl.u32 %v1005_v5, 16  ;;  %v15667_v6 = vld [vmem:[#allocation2 + $0xa4] sm:$0xf] }
 0x14f   : > { %v1364_v27 = vshll.u32 %v1005_v5, 16  ;;  %v1369_v3 = vshrl.u32 %v1007_v40, 16  ;;  %v1372_v12 = vshll.u32 %v1007_v40, 16  ;;  %v1008_v54 = vrot.slane %v15646_v44, 5  ;;  %v15672_v5 = vld [vmem:[#allocation2 + $0xa8] sm:$0xf] }
 0x150   : > { %v15651_v48 = vpop.f32.mrf.mxu0  ;;  %v846_v0 = vor.u32 %v845_v53, %v842_v47  ;;  %v1178_v34 = vsel %vm1032_vm3, %v1169_v56, %v1177_v61  ;;  %v1363_v7 = vrot.slane %v1361_v30, 3  ;;  %v12011_v55 = vcombine.low %v611_v57, %v15521_v32  ;;  %v15656_v2 = vpop.f32.mrf.mxu1  ;;  %v14200_v40 = vld [vmem:[#allocation2 + $0xac] ss:$0 sps:$4 sm:$0x11]  }
 0x151   : > { %v1366_v63 = vrot.slane %v1364_v27, 4  ;;  %3701 = vmatmul.mubr.bf16.gmra.mxu1 %v1178_v34  ;;  %v1371_v14 = vrot.slane %v1369_v3, 3  ;;  %v1374_v13 = vrot.slane %v1372_v12, 4  ;;  %v1010_v29 = vsel %vm983_vm7, %v1008_v54, %v1009_v58 }
 0x152   : > { %v1223_v21 = vshrl.u32 %v846_v0, 16  ;;  %v1226_v4 = vshll.u32 %v846_v0, 16  ;;  %v15658_v17 = vpop.f32.mrf.mxu0  ;;  %v1404_v50 = vshrl.u32 %v1008_v54, 16  ;;  %v1407_v20 = vshll.u32 %v1008_v54, 16  ;;  %v15669_v16 = vpop.f32.mrf.mxu1 }
 0x153   : > { %v1367_v18 = vor.u32 %v1366_v63, %v1363_v7  ;;  %v1375_v1 = vor.u32 %v1374_v13, %v1371_v14  ;;  %v1412_v51 = vshrl.u32 %v1010_v29, 16  ;;  %v1415_v24 = vshll.u32 %v1010_v29, 16 }
 0x154   : > { %v1225_v32 = vrot.slane %v1223_v21, 3  ;;  %v1228_v46 = vrot.slane %v1226_v4, 4  ;;  %v1406_v15 = vrot.slane %v1404_v50, 3  ;;  %v1409_v36 = vrot.slane %v1407_v20, 4  ;;  %v15674_v57 = vpop.f32.mrf.mxu0  ;;  %v614_v20 = vld [vmem:[#allocation2 + $0x50] sm:$0x8] }
 0x155   : > { %v12012_v39 = vcombine.low %v15523_v43, %v15523_v43  ;;  %v1376_v49 = vsel %vm1032_vm3, %v1367_v18, %v1375_v1  ;;  %v1414_v56 = vrot.slane %v1412_v51, 3  ;;  %v1206_v19 = vshrl.u32 %v12011_v55, 16 }
 0x156   : > { %v1229_v31 = vor.u32 %v1228_v46, %v1225_v32  ;;  %13708 = vmatmul.mubr.bf16.gmra.mxu0 %v1376_v49  ;;  %v1410_v47 = vor.u32 %v1409_v36, %v1406_v15  ;;  %v1417_v53 = vrot.slane %v1415_v24, 4  ;;  %v1209_v58 = vshll.u32 %v12011_v55, 16  ;;  %v15681_v7 = vpop.f32.mrf.mxu1  ;;  %v15689_v21 = vpop.f32.mrf.mxu0 }
 0x157   : > { %v1214_v61 = vshrl.u32 %v12012_v39, 16  ;;  %v1208_v43 = vrot.slane %v1206_v19, 3  ;;  %v1217_v30 = vshll.u32 %v12012_v39, 16  ;;  %v15678_v27 = vcombine.low %v15661_v22, %v15663_v28 }
 0x158   : > { %3708 = vmatprep.mubr.bf16.mxu1 %v1229_v31  ;;  %v1012_v3 = vrot.slane %v14196_v23, 5  ;;  %v1418_v12 = vor.u32 %v1417_v53, %v1414_v56  ;;  %v1211_v0 = vrot.slane %v1209_v58, 4  ;;  %v848_v34 = vshrl.u32 %v15603_v42, 16  ;;  %v15692_v1 = vpop.f32.mrf.mxu1  ;;  %v15698_v19 = vpop.f32.mrf.mxu0 }
 0x159   : > { %v1216_v54 = vrot.slane %v1214_v61, 3  ;;  %v1219_v63 = vrot.slane %v1217_v30, 4  ;;  %v1011_v55 = vrot.slane %v15678_v27, 5  ;;  %v851_v14 = vshll.u32 %v15603_v42, 16 }
 0x15a   : > { %v15687_v13 = vcombine.low %v15667_v6, %v15672_v5  ;;  %v1419_v4 = vsel %vm1032_vm3, %v1410_v47, %v1418_v12  ;;  %v1212_v18 = vor.u32 %v1211_v0, %v1208_v43  ;;  %v850_v29 = vrot.slane %v848_v34, 4  ;;  %v15703_v0 = vld [vmem:[#allocation2 + $0xb4] sm:$0xf] }
 0x15b   : > { %v1015_v50 = vrot.slane %v14200_v40, 5  ;;  %13711 = vmatprep.mubr.bf16.mxu0 %v1419_v4  ;;  %v1220_v32 = vor.u32 %v1219_v63, %v1216_v54  ;;  %v1013_v46 = vsel %vm983_vm7, %v1011_v55, %v1012_v3  ;;  %v1447_v51 = vshrl.u32 %v1011_v55, 16  ;;  %v15701_v40 = vpop.f32.mrf.mxu1  ;;  %v14264_v54 = vld [vmem:[#allocation7 + $0x200] sm:$0xff]  }
 0x15c   : > { %v1450_v42 = vshll.u32 %v1011_v55, 16  ;;  %v1455_v23 = vshrl.u32 %v1013_v46, 16  ;;  %v1458_v15 = vshll.u32 %v1013_v46, 16  ;;  %v853_v36 = vrot.slane %v851_v14, 5  ;;  %18773 = vst [vmem:[#allocation20_spill] sm:$0xff] %v15701_v40  ;;  %13741 = vmatprep.subr.bf16.mxu1 %v14264_v54 }
 0x15d   : > { %v1014_v24 = vrot.slane %v15687_v13, 5  ;;  %v1221_v39 = vsel %vm1032_vm3, %v1212_v18, %v1220_v32  ;;  %v1449_v49 = vrot.slane %v1447_v51, 3  ;;  %v12013_v56 = vcombine.low %v614_v20, %v15590_v26  ;;  %v15705_v14 = vld [vmem:[#allocation2 + $0xb8] sm:$0xf]  ;;  %v15709_v32 = vpop.f32.mrf.mxu0  ;;  %13742 = vmatpush3.bf16.msra.mxu1 %v14264_v54 }
 0x15e   : > { %v1452_v31 = vrot.slane %v1450_v42, 4  ;;  %3709 = vmatmul.mubr.bf16.gmra.mxu1 %v1221_v39  ;;  %v1457_v47 = vrot.slane %v1455_v23, 3  ;;  %v1460_v53 = vrot.slane %v1458_v15, 4  ;;  %v854_v58 = vor.u32 %v853_v36, %v850_v29  ;;  %v14205_v20 = vld [vmem:[#allocation2 + $0xbc] ss:$0 sps:$4 sm:$0x11]  }
 0x15f   : > { %v1016_v61 = vsel %vm983_vm7, %v1014_v24, %v1015_v50  ;;  %v1490_v30 = vshrl.u32 %v1014_v24, 16  ;;  %v1493_v3 = vshll.u32 %v1014_v24, 16  ;;  %v12014_v50 = vcombine.low %v15592_v60, %v15592_v60  ;;  %v15712_v15 = vld [vmem:[#allocation2 + $0xc4] sm:$0xf]  ;;  %v15714_v24 = vpop.f32.mrf.mxu1 }
 0x160   : > { %v1453_v43 = vor.u32 %v1452_v31, %v1449_v49  ;;  %v1498_v12 = vshrl.u32 %v1016_v61, 16  ;;  %v1461_v34 = vor.u32 %v1460_v53, %v1457_v47  ;;  %v1266_v63 = vshrl.u32 %v854_v58, 16  ;;  %v14208_v36 = vld [vmem:[#allocation2 + $0xcc] ss:$0 sps:$4 sm:$0x11]   ;;  %18774 = vst [vmem:[#allocation21_spill] sm:$0xff] %v15714_v24 }
 0x161   : > { %v1269_v26 = vshll.u32 %v854_v58, 16  ;;  %v1501_v55 = vshll.u32 %v1016_v61, 16  ;;  %v1492_v4 = vrot.slane %v1490_v30, 3  ;;  %v1495_v18 = vrot.slane %v1493_v3, 4 }
 0x162   : > { %v1500_v29 = vrot.slane %v1498_v12, 3  ;;  %v1462_v46 = vsel %vm1032_vm3, %v1453_v43, %v1461_v34  ;;  %v1268_v51 = vrot.slane %v1266_v63, 3  ;;  %v1249_v49 = vshrl.u32 %v12013_v56, 16  ;;  %v15720_v43 = vld [vmem:[#allocation2 + $0xc8] sm:$0xf]  ;;  %v15722_v63 = vpop.f32.mrf.mxu0 }
 0x163   : > { %v1271_v42 = vrot.slane %v1269_v26, 4  ;;  %v1503_v23 = vrot.slane %v1501_v55, 4  ;;  %13712 = vmatmul.mubr.bf16.gmra.mxu0 %v1462_v46  ;;  %v1496_v39 = vor.u32 %v1495_v18, %v1492_v4  ;;  %v1252_v31 = vshll.u32 %v12013_v56, 16  ;;  %18775 = vst [vmem:[#allocation22_spill] sm:$0xff] %v15722_v63  ;;  %v15727_v4 = vpop.f32.mrf.mxu1 }
 0x164   : > { %v1257_v60 = vshrl.u32 %v12014_v50, 16  ;;  %v1260_v58 = vshll.u32 %v12014_v50, 16  ;;  %v15718_v61 = vcombine.low %v15703_v0, %v15705_v14  ;;  %v1251_v30 = vrot.slane %v1249_v49, 3  ;;  %18776 = vst [vmem:[#allocation23_spill] sm:$0xff] %v15727_v4  ;;  %v15734_v46 = vpop.f32.mrf.mxu0  ;;  %v617_v49 = vld [vmem:[#allocation2 + $0x60] sm:$0x8] }
 0x165   : > { %v1272_v47 = vor.u32 %v1271_v42, %v1268_v51  ;;  %v1504_v53 = vor.u32 %v1503_v23, %v1500_v29  ;;  %v1254_v3 = vrot.slane %v1252_v31, 4  ;;  %v1018_v34 = vrot.slane %v14205_v20, 5  ;;  %18777 = vst [vmem:[#allocation24_spill] sm:$0xff] %v15734_v46  ;;  %v640_v46 = vld [vmem:[#allocation2 + $0xd8] sm:$0xf] }
 0x166   : > { %v1259_v12 = vrot.slane %v1257_v60, 3  ;;  %v1262_v56 = vrot.slane %v1260_v58, 4  ;;  %v1017_v26 = vrot.slane %v15718_v61, 5  ;;  %v856_v55 = vshrl.u32 %v15611_v52, 16  ;;  %v15737_v58 = vpop.f32.mrf.mxu1 }
 0x167   : > { %3716 = vmatprep.mubr.bf16.mxu1 %v1272_v47  ;;  %v1505_v54 = vsel %vm1032_vm3, %v1496_v39, %v1504_v53  ;;  %v1255_v18 = vor.u32 %v1254_v3, %v1251_v30  ;;  %v859_v29 = vshll.u32 %v15611_v52, 16  ;;  %v15732_v50 = vcombine.low %v15712_v15, %v15720_v43  ;;  %18778 = vst [vmem:[#allocation25_spill] sm:$0xff] %v15737_v58  ;;  %v639_v58 = vld [vmem:[#allocation2 + $0xd4] sm:$0xf] }
 0x168   : > { %13715 = vmatprep.mubr.bf16.mxu0 %v1505_v54  ;;  %v1021_v20 = vrot.slane %v14208_v36, 5  ;;  %v1263_v51 = vor.u32 %v1262_v56, %v1259_v12  ;;  %v1019_v42 = vsel %vm983_vm7, %v1017_v26, %v1018_v34  ;;  %v1533_v23 = vshrl.u32 %v1017_v26, 16 }
 0x169   : > { %v1536_v39 = vshll.u32 %v1017_v26, 16  ;;  %v1541_v31 = vshrl.u32 %v1019_v42, 16  ;;  %v1544_v60 = vshll.u32 %v1019_v42, 16  ;;  %v858_v47 = vrot.slane %v856_v55, 4  ;;  %v15742_v26 = vpop.f32.mrf.mxu0 }
 0x16a   : > { %v861_v53 = vrot.slane %v859_v29, 5  ;;  %v1264_v52 = vsel %vm1032_vm3, %v1255_v18, %v1263_v51  ;;  %v1535_v30 = vrot.slane %v1533_v23, 3  ;;  %v1020_v36 = vrot.slane %v15732_v50, 5  ;;  %18779 = vst [vmem:[#allocation26_spill] sm:$0xff] %v15742_v26 }
 0x16b   : > { %v1538_v3 = vrot.slane %v1536_v39, 4  ;;  %3717 = vmatmul.mubr.bf16.gmra.mxu1 %v1264_v52  ;;  %v1543_v54 = vrot.slane %v1541_v31, 3  ;;  %v1546_v12 = vrot.slane %v1544_v60, 4  ;;  %v12015_v34 = vcombine.low %v617_v49, %v15595_v35  ;;  %v14213_v18 = vld [vmem:[#allocation2 + $0xdc] ss:$0 sps:$4 sm:$0x11]   ;;  %v15745_v52 = vpop.f32.mrf.mxu1  ;;  %v15750_v26 = vpop.f32.mrf.mxu0 }
 0x16c   : > { %v862_v56 = vor.u32 %v861_v53, %v858_v47  ;;  %v1022_v55 = vsel %vm983_vm7, %v1020_v36, %v1021_v20  ;;  %v1576_v29 = vshrl.u32 %v1020_v36, 16  ;;  %v1579_v42 = vshll.u32 %v1020_v36, 16  ;;  %18780 = vst [vmem:[#allocation27_spill] sm:$0xff] %v15745_v52  ;;  %v643_v36 = vld [vmem:[#allocation2 + $0xe8] sm:$0xf]  ;;  %18781 = vst [vmem:[#allocation28_spill] sm:$0xff] %v15750_v26 }
 0x16d   : > { %v1539_v4 = vor.u32 %v1538_v3, %v1535_v30  ;;  %v1547_v51 = vor.u32 %v1546_v12, %v1543_v54  ;;  %v1584_v63 = vshrl.u32 %v1022_v55, 16  ;;  %v1587_v47 = vshll.u32 %v1022_v55, 16  ;;  %v642_v3 = vld [vmem:[#allocation2 + $0xe4] sm:$0xf] }
 0x16e   : > { %v1309_v23 = vshrl.u32 %v862_v56, 16  ;;  %v1312_v39 = vshll.u32 %v862_v56, 16  ;;  %v1578_v31 = vrot.slane %v1576_v29, 3  ;;  %v1581_v60 = vrot.slane %v1579_v42, 4 }
 0x16f   : > { %v12016_v35 = vcombine.low %v15597_v11, %v15597_v11  ;;  %v1548_v49 = vsel %vm1032_vm3, %v1539_v4, %v1547_v51  ;;  %v1586_v30 = vrot.slane %v1584_v63, 3  ;;  %v1589_v12 = vrot.slane %v1587_v47, 4  ;;  %v15754_v11 = vpop.f32.mrf.mxu1 }
 0x170   : > { %v1311_v20 = vrot.slane %v1309_v23, 3  ;;  %v1314_v53 = vrot.slane %v1312_v39, 4  ;;  %13716 = vmatmul.mubr.bf16.gmra.mxu0 %v1548_v49  ;;  %v1582_v54 = vor.u32 %v1581_v60, %v1578_v31  ;;  %v1292_v56 = vshrl.u32 %v12015_v34, 16  ;;  %v14217_v39 = vld [vmem:[#allocation2 + $0xec] ss:$0 sps:$4 sm:$0x11]  }
 0x171   : > { %v1295_v52 = vshll.u32 %v12015_v34, 16  ;;  %v1300_v42 = vshrl.u32 %v12016_v35, 16  ;;  %v1303_v55 = vshll.u32 %v12016_v35, 16  ;;  %v15752_v24 = vcombine.low %v639_v58, %v640_v46  ;;  %v15758_v34 = vpop.f32.mrf.mxu0  ;;  %v620_v49 = vld [vmem:[#allocation2 + $0x70] sm:$0x8] }
 0x172   : > { %v1315_v29 = vor.u32 %v1314_v53, %v1311_v20  ;;  %v1590_v4 = vor.u32 %v1589_v12, %v1586_v30  ;;  %v1294_v51 = vrot.slane %v1292_v56, 3  ;;  %v1024_v63 = vrot.slane %v14213_v18, 5  ;;  %18782 = vst [vmem:[#allocation29_spill] sm:$0xff] %v15758_v34 }
 0x173   : > { %v1297_v23 = vrot.slane %v1295_v52, 4  ;;  %v1302_v40 = vrot.slane %v1300_v42, 3  ;;  %v1305_v26 = vrot.slane %v1303_v55, 4  ;;  %v1023_v31 = vrot.slane %v15752_v24, 5  ;;  %v15765_v30 = vpop.f32.mrf.mxu1  ;;  %v15767_v12 = vpop.f32.mrf.mxu0 }
 0x174   : > { %3724 = vmatprep.mubr.bf16.mxu1 %v1315_v29  ;;  %v864_v60 = vshrl.u32 %v15630_v38, 16  ;;  %v1591_v47 = vsel %vm1032_vm3, %v1582_v54, %v1590_v4  ;;  %v867_v58 = vshll.u32 %v15630_v38, 16  ;;  %v15762_v35 = vcombine.low %v642_v3, %v643_v36  ;;  %18783 = vst [vmem:[#allocation30_spill] sm:$0xff] %v15765_v30  ;;  %18784 = vst [vmem:[#allocation31_spill] sm:$0xff] %v15767_v12  ;;  %v645_v30 = vld [vmem:[#allocation2 + $0xf4] sm:$0xf] }
 0x175   : > { %v1298_v46 = vor.u32 %v1297_v23, %v1294_v51  ;;  %13719 = vmatprep.mubr.bf16.mxu0 %v1591_v47  ;;  %v1306_v18 = vor.u32 %v1305_v26, %v1302_v40  ;;  %v1025_v52 = vsel %vm983_vm7, %v1023_v31, %v1024_v63  ;;  %v1619_v20 = vshrl.u32 %v1023_v31, 16  ;;  %v15771_v4 = vpop.f32.mrf.mxu1  ;;  %v15773_v40 = vpop.f32.mrf.mxu0  ;;  %v623_v12 = vld [vmem:[#allocation2 + $0x80] sm:$0x8] }
 0x176   : > { %v1622_v53 = vshll.u32 %v1023_v31, 16  ;;  %v1627_v56 = vshrl.u32 %v1025_v52, 16  ;;  %v1630_v29 = vshll.u32 %v1025_v52, 16  ;;  %v866_v42 = vrot.slane %v864_v60, 4  ;;  %18785 = vst [vmem:[#allocation32_spill] sm:$0xff] %v15771_v4  ;;  %18786 = vst [vmem:[#allocation33_spill] sm:$0xff] %v15773_v40 }
 0x177   : > { %v869_v54 = vrot.slane %v867_v58, 5  ;;  %v1307_v55 = vsel %vm1032_vm3, %v1298_v46, %v1306_v18  ;;  %v1621_v38 = vrot.slane %v1619_v20, 3  ;;  %v1026_v36 = vrot.slane %v15762_v35, 5  ;;  %v14222_v58 = vld [vmem:[#allocation2 + $0xfc] ss:$0 sps:$4 sm:$0x11]   ;;  %v15776_v46 = vpop.f32.mrf.mxu0 }
 0x178   : > { %v1624_v3 = vrot.slane %v1622_v53, 4  ;;  %3725 = vmatmul.mubr.bf16.gmra.mxu1 %v1307_v55  ;;  %v1629_v26 = vrot.slane %v1627_v56, 3  ;;  %v1632_v51 = vrot.slane %v1630_v29, 4  ;;  %v1027_v63 = vrot.slane %v14217_v39, 5  ;;  %18787 = vst [vmem:[#allocation34_spill] sm:$0xff] %v15776_v46  ;;  %v15779_v55 = vpop.f32.mrf.mxu1 }
 0x179   : > { %v870_v23 = vor.u32 %v869_v54, %v866_v42  ;;  %v1662_v47 = vshrl.u32 %v1026_v36, 16  ;;  %v1665_v52 = vshll.u32 %v1026_v36, 16  ;;  %v12017_v60 = vcombine.low %v620_v49, %v15621_v8  ;;  %v646_v40 = vld [vmem:[#allocation2 + $0xf8] sm:$0xf]  ;;  %18788 = vst [vmem:[#allocation35_spill] sm:$0xff] %v15779_v55 }
 0x17a   : > { %v1625_v31 = vor.u32 %v1624_v3, %v1621_v38  ;;  %v1633_v18 = vor.u32 %v1632_v51, %v1629_v26  ;;  %v1028_v4 = vsel %vm983_vm7, %v1026_v36, %v1027_v63  ;;  %v12018_v49 = vcombine.low %v15623_v41, %v15623_v41  ;;  %v15784_v3 = vld [vmem:[#allocation2 + $0x24] sm:$0xf]  ;;  %v15786_v26 = vld [vmem:[#allocation2 + $0x28] sm:$0xf]  ;;  %v15788_v36 = vpop.f32.mrf.mxu0 }
 0x17b   : > { %v1352_v20 = vshrl.u32 %v870_v23, 16  ;;  %v1355_v53 = vshll.u32 %v870_v23, 16  ;;  %v1664_v56 = vrot.slane %v1662_v47, 3  ;;  %v1667_v29 = vrot.slane %v1665_v52, 4  ;;  %18789 = vst [vmem:[#allocation36_spill] sm:$0xff] %v15788_v36 }
 0x17c   : > { %v1670_v39 = vshrl.u32 %v1028_v4, 16  ;;  %v1673_v42 = vshll.u32 %v1028_v4, 16  ;;  %v1634_v54 = vsel %vm1032_vm3, %v1625_v31, %v1633_v18  ;;  %v1335_v47 = vshrl.u32 %v12017_v60, 16  ;;  %v15790_v18 = vpop.f32.mrf.mxu1 }
 0x17d   : > { %v1354_v38 = vrot.slane %v1352_v20, 3  ;;  %v1357_v8 = vrot.slane %v1355_v53, 4  ;;  %13720 = vmatmul.mubr.bf16.gmra.mxu0 %v1634_v54  ;;  %v1668_v51 = vor.u32 %v1667_v29, %v1664_v56  ;;  %v1338_v4 = vshll.u32 %v12017_v60, 16  ;;  %v15795_v29 = vpop.f32.mrf.mxu0 }
 0x17e   : > { %v1672_v23 = vrot.slane %v1670_v39, 3  ;;  %v1675_v63 = vrot.slane %v1673_v42, 4  ;;  %v1343_v55 = vshrl.u32 %v12018_v49, 16  ;;  %v1346_v31 = vshll.u32 %v12018_v49, 16  ;;  %18790 = vst [vmem:[#allocation37_spill] sm:$0xff] %v15795_v29 }
 0x17f   : > { %v1358_v52 = vor.u32 %v1357_v8, %v1354_v38  ;;  %v1337_v53 = vrot.slane %v1335_v47, 3  ;;  %v15792_v41 = vcombine.low %v645_v30, %v646_v40  ;;  %v1030_v46 = vrot.slane %v14222_v58, 5 }
 0x180   : > { %v1676_v20 = vor.u32 %v1675_v63, %v1672_v23  ;;  %v1340_v34 = vrot.slane %v1338_v4, 4  ;;  %v1345_v36 = vrot.slane %v1343_v55, 3  ;;  %v1348_v54 = vrot.slane %v1346_v31, 4  ;;  %v15805_v8 = vpop.f32.mrf.mxu1  ;;  %v15810_v31 = vpop.f32.mrf.mxu0 }
 0x181   : > { %3732 = vmatprep.mubr.bf16.mxu1 %v1358_v52  ;;  %v872_v56 = vshrl.u32 %v15646_v44, 16  ;;  %v1029_v39 = vrot.slane %v15792_v41, 5  ;;  %v875_v42 = vshll.u32 %v15646_v44, 16  ;;  %v15802_v30 = vcombine.low %v15784_v3, %v15786_v26  ;;  %18791 = vst [vmem:[#allocation38_spill] sm:$0xff] %v15810_v31 }
 0x182   : > { %v1677_v60 = vsel %vm1032_vm3, %v1668_v51, %v1676_v20  ;;  %v1341_v40 = vor.u32 %v1340_v34, %v1337_v53  ;;  %v1349_v58 = vor.u32 %v1348_v54, %v1345_v36  ;;  %v12019_v55 = vcombine.low %v623_v12, %v15626_v37 }
 0x183   : > { %13723 = vmatprep.mubr.bf16.mxu0 %v1677_v60  ;;  %v874_v38 = vrot.slane %v872_v56, 4  ;;  %v1031_v49 = vsel %vm983_vm7, %v1029_v39, %v1030_v46  ;;  %v1705_v23 = vshrl.u32 %v1029_v39, 16  ;;  %v1708_v51 = vshll.u32 %v1029_v39, 16  ;;  %v15815_v56 = vpop.f32.mrf.mxu1 }
 0x184   : > { %v877_v63 = vrot.slane %v875_v42, 5  ;;  %v1350_v47 = vsel %vm1032_vm3, %v1341_v40, %v1349_v58  ;;  %v1713_v44 = vshrl.u32 %v1031_v49, 16  ;;  %v1716_v52 = vshll.u32 %v1031_v49, 16  ;;  %18792 = vst [vmem:[#allocation39_spill] sm:$0xff] %v15815_v56 }
 0x185   : > { %v4176_v4 = vshrl.u32 %v15802_v30, 16  ;;  %3733 = vmatmul.mubr.bf16.gmra.mxu1 %v1350_v47  ;;  %v1707_v34 = vrot.slane %v1705_v23, 3  ;;  %v1710_v36 = vrot.slane %v1708_v51, 4  ;;  %v4179_v37 = vshll.u32 %v15802_v30, 16  ;;  %v3967_v51 = vld [vmem:[#allocation2 + $0x20] sm:$0x8] }
 0x186   : > { %v878_v20 = vor.u32 %v877_v63, %v874_v38  ;;  %v1715_v12 = vrot.slane %v1713_v44, 3  ;;  %v1718_v53 = vrot.slane %v1716_v52, 4  ;;  %v12020_v54 = vcombine.low %v15632_v10, %v15632_v10  ;;  %v15817_v38 = vpop.f32.mrf.mxu0 }
 0x187   : > { %v4178_v46 = vrot.slane %v4176_v4, 4  ;;  %v1711_v60 = vor.u32 %v1710_v36, %v1707_v34  ;;  %v4181_v40 = vrot.slane %v4179_v37, 5  ;;  %v1378_v49 = vshrl.u32 %v12019_v55, 16  ;;  %18793 = vst [vmem:[#allocation40_spill] sm:$0xff] %v15817_v38  ;;  %v15820_v34 = vpop.f32.mrf.mxu1 }
 0x188   : > { %v1395_v39 = vshrl.u32 %v878_v20, 16  ;;  %v1398_v42 = vshll.u32 %v878_v20, 16  ;;  %v1719_v58 = vor.u32 %v1718_v53, %v1715_v12  ;;  %v1381_v47 = vshll.u32 %v12019_v55, 16 }
 0x189   : > { %v1386_v23 = vshrl.u32 %v12020_v54, 16  ;;  %v4182_v52 = vor.u32 %v4181_v40, %v4178_v46  ;;  %v1389_v4 = vshll.u32 %v12020_v54, 16  ;;  %v1380_v10 = vrot.slane %v1378_v49, 3  ;;  %v3971_v54 = vld [vmem:[#allocation2 + $0x34] sm:$0xf] }
 0x18a   : > { %v1397_v63 = vrot.slane %v1395_v39, 3  ;;  %v1400_v44 = vrot.slane %v1398_v42, 4  ;;  %v1720_v31 = vsel %vm1032_vm3, %v1711_v60, %v1719_v58  ;;  %v1383_v29 = vrot.slane %v1381_v47, 4  ;;  %v3972_v60 = vld [vmem:[#allocation2 + $0x38] sm:$0xf]  ;;  %v15826_v40 = vpop.f32.mrf.mxu0 }
 0x18b   : > { %v1388_v56 = vrot.slane %v1386_v23, 3  ;;  %13724 = vmatmul.mubr.bf16.gmra.mxu0 %v1720_v31  ;;  %v4417_v20 = vshrl.u32 %v4182_v52, 16  ;;  %v4420_v37 = vshll.u32 %v4182_v52, 16  ;;  %v1391_v55 = vrot.slane %v1389_v4, 4  ;;  %v626_v42 = vld [vmem:[#allocation2 + $0x90] sm:$0x8] }
 0x18c   : > { %v1401_v36 = vor.u32 %v1400_v44, %v1397_v63  ;;  %v1384_v12 = vor.u32 %v1383_v29, %v1380_v10  ;;  %v12179_v53 = vcombine.low %v3967_v51, %v15784_v3  ;;  %v12180_v39 = vcombine.low %v15786_v26, %v15786_v26  ;;  %v15829_v51 = vpop.f32.mrf.mxu1  ;;  %v3970_v10 = vld [vmem:[#allocation2 + $0x30] sm:$0x8]  ;;  %v15832_v38 = vpop.f32.mrf.mxu0 }
 0x18d   : > { %v880_v46 = vshrl.u32 %v15678_v27, 16  ;;  %v4419_v58 = vrot.slane %v4417_v20, 3  ;;  %v4422_v31 = vrot.slane %v4420_v37, 4  ;;  %v1392_v49 = vor.u32 %v1391_v55, %v1388_v56  ;;  %18794 = vst [vmem:[#allocation41_spill] sm:$0xff] %v15829_v51  ;;  %v3974_v51 = vld [vmem:[#allocation2 + $0x44] sm:$0xf] }
 0x18e   : > { %3740 = vmatprep.mubr.bf16.mxu1 %v1401_v36  ;;  %v883_v47 = vshll.u32 %v15678_v27, 16  ;;  %v4400_v23 = vshrl.u32 %v12179_v53, 16  ;;  %v4403_v29 = vshll.u32 %v12179_v53, 16  ;;  %v4408_v63 = vshrl.u32 %v12180_v39, 16 }
 0x18f   : > { %v4411_v3 = vshll.u32 %v12180_v39, 16  ;;  %v4423_v26 = vor.u32 %v4422_v31, %v4419_v58  ;;  %v1393_v44 = vsel %vm1032_vm3, %v1384_v12, %v1392_v49  ;;  %v882_v52 = vrot.slane %v880_v46, 4 }
 0x190   : > { %v885_v4 = vrot.slane %v883_v47, 5  ;;  %3741 = vmatmul.mubr.bf16.gmra.mxu1 %v1393_v44  ;;  %v4402_v36 = vrot.slane %v4400_v23, 3  ;;  %v4405_v20 = vrot.slane %v4403_v29, 4  ;;  %v4410_v56 = vrot.slane %v4408_v63, 3  ;;  %v15839_v49 = vpop.f32.mrf.mxu1 }
 0x191   : > { %v4413_v37 = vrot.slane %v4411_v3, 4  ;;  %5360 = vmatprep.mubr.bf16.mxu0 %v4423_v26  ;;  %v15834_v55 = vcombine.low %v3971_v54, %v3972_v60  ;;  %v12021_v53 = vcombine.low %v626_v42, %v15661_v22  ;;  %v12022_v39 = vcombine.low %v15663_v28, %v15663_v28  ;;  %18795 = vst [vmem:[#allocation42_spill] sm:$0xff] %v15839_v49  ;;  %v15843_v3 = vpop.f32.mrf.mxu0 }
 0x192   : > { %v886_v27 = vor.u32 %v885_v4, %v882_v52  ;;  %v4406_v12 = vor.u32 %v4405_v20, %v4402_v36  ;;  %v12181_v58 = vcombine.low %v3970_v10, %v3971_v54  ;;  %v12182_v31 = vcombine.low %v3972_v60, %v3972_v60  ;;  %18796 = vst [vmem:[#allocation43_spill] sm:$0xff] %v15843_v3  ;;  %v15846_v4 = vpop.f32.mrf.mxu1 }
 0x193   : > { %v4414_v46 = vor.u32 %v4413_v37, %v4410_v56  ;;  %v4184_v29 = vshrl.u32 %v15834_v55, 16  ;;  %v4187_v63 = vshll.u32 %v15834_v55, 16  ;;  %v1421_v22 = vshrl.u32 %v12021_v53, 16  ;;  %18797 = vst [vmem:[#allocation44_spill] sm:$0xff] %v15846_v4 }
 0x194   : > { %v1438_v47 = vshrl.u32 %v886_v27, 16  ;;  %v1441_v23 = vshll.u32 %v886_v27, 16  ;;  %v1424_v42 = vshll.u32 %v12021_v53, 16  ;;  %v1429_v44 = vshrl.u32 %v12022_v39, 16 }
 0x195   : > { %v4415_v26 = vsel %vm1032_vm3, %v4406_v12, %v4414_v46  ;;  %v4186_v54 = vrot.slane %v4184_v29, 4  ;;  %v4189_v60 = vrot.slane %v4187_v63, 5  ;;  %v1423_v10 = vrot.slane %v1421_v22, 3  ;;  %v3975_v12 = vld [vmem:[#allocation2 + $0x48] sm:$0xf]  ;;  %v15848_v46 = vpop.f32.mrf.mxu0 }
 0x196   : > { %5361 = vmatmul.mubr.bf16.vlgmr.msra.gmra.mxu0 %v4415_v26  ;;  %v1440_v28 = vrot.slane %v1438_v47, 3  ;;  %v1443_v52 = vrot.slane %v1441_v23, 4  ;;  %v1426_v36 = vrot.slane %v1424_v42, 4  ;;  %v1431_v20 = vrot.slane %v1429_v44, 3  ;;  %18798 = vst [vmem:[#allocation45_spill] sm:$0xff] %v15848_v46 }
 0x197   : > { %v1432_v56 = vshll.u32 %v12022_v39, 16  ;;  %v4190_v27 = vor.u32 %v4189_v60, %v4186_v54  ;;  %v4443_v49 = vshrl.u32 %v12181_v58, 16  ;;  %v4446_v3 = vshll.u32 %v12181_v58, 16  ;;  %v629_v29 = vld [vmem:[#allocation2 + $0xa0] sm:$0x8]  ;;  %v15850_v39 = vpop.f32.mrf.mxu1 }
 0x198   : > { %v1444_v37 = vor.u32 %v1443_v52, %v1440_v28  ;;  %v1427_v53 = vor.u32 %v1426_v36, %v1423_v10  ;;  %v4451_v47 = vshrl.u32 %v12182_v31, 16  ;;  %v4454_v23 = vshll.u32 %v12182_v31, 16  ;;  %v3973_v44 = vld [vmem:[#allocation2 + $0x40] sm:$0x8]  ;;  %18799 = vst [vmem:[#allocation46_spill] sm:$0xff] %v15850_v39 }
 0x199   : > { %v1434_v26 = vrot.slane %v1432_v56, 4  ;;  %v4460_v63 = vshrl.u32 %v4190_v27, 16  ;;  %v4463_v4 = vshll.u32 %v4190_v27, 16  ;;  %v4445_v22 = vrot.slane %v4443_v49, 3  ;;  %v15854_v31 = vpop.f32.mrf.mxu0 }
 0x19a   : > { %3748 = vmatprep.mubr.bf16.mxu1 %v1444_v37  ;;  %v4448_v42 = vrot.slane %v4446_v3, 4  ;;  %v4453_v52 = vrot.slane %v4451_v47, 3  ;;  %v4456_v58 = vrot.slane %v4454_v23, 4  ;;  %v888_v54 = vshrl.u32 %v15687_v13, 16  ;;  %18800 = vst [vmem:[#allocation47_spill] sm:$0xff] %v15854_v31 }
 0x19b   : > { %v1435_v28 = vor.u32 %v1434_v26, %v1431_v20  ;;  %v4462_v60 = vrot.slane %v4460_v63, 3  ;;  %v4465_v46 = vrot.slane %v4463_v4, 4  ;;  %v891_v36 = vshll.u32 %v15687_v13, 16  ;;  %v15862_v4 = vpop.f32.mrf.mxu1  ;;  %v15864_v23 = vpop.f32.mrf.mxu0 }
 0x19c   : > { %v4449_v10 = vor.u32 %v4448_v42, %v4445_v22  ;;  %v4457_v37 = vor.u32 %v4456_v58, %v4453_v52  ;;  %v890_v49 = vrot.slane %v888_v54, 4  ;;  %v15857_v3 = vcombine.low %v3974_v51, %v3975_v12  ;;  %18801 = vst [vmem:[#allocation48_spill] sm:$0xff] %v15862_v4  ;;  %18802 = vst [vmem:[#allocation49_spill] sm:$0xff] %v15864_v23 }
 0x19d   : > { %v1436_v56 = vsel %vm1032_vm3, %v1427_v53, %v1435_v28  ;;  %v4466_v27 = vor.u32 %v4465_v46, %v4462_v60  ;;  %v893_v20 = vrot.slane %v891_v36, 5  ;;  %v12023_v26 = vcombine.low %v629_v29, %v15667_v6  ;;  %v15869_v6 = vpop.f32.mrf.mxu0 }
 0x19e   : > { %3749 = vmatmul.mubr.bf16.gmra.mxu1 %v1436_v56  ;;  %v12024_v47 = vcombine.low %v15672_v5, %v15672_v5  ;;  %v4458_v13 = vsel %vm1032_vm3, %v4449_v10, %v4457_v37  ;;  %v4192_v53 = vshrl.u32 %v15857_v3, 16  ;;  %v4195_v63 = vshll.u32 %v15857_v3, 16  ;;  %18803 = vst [vmem:[#allocation50_spill] sm:$0xff] %v15869_v6 }
 0x19f   : > { %v12183_v22 = vcombine.low %v3973_v44, %v3974_v51  ;;  %5368 = vmatprep.mubr.bf16.mxu0 %v4466_v27  ;;  %v894_v46 = vor.u32 %v893_v20, %v890_v49  ;;  %v1464_v42 = vshrl.u32 %v12023_v26, 16  ;;  %v1467_v28 = vshll.u32 %v12023_v26, 16  ;;  %v15871_v37 = vpop.f32.mrf.mxu1  ;;  %v15873_v27 = vpop.f32.mrf.mxu0 }
 0x1a0   : > { %v1472_v52 = vshrl.u32 %v12024_v47, 16  ;;  %5369 = vmatmul.mubr.bf16.gmra.mxu0 %v4458_v13  ;;  %v4194_v5 = vrot.slane %v4192_v53, 4  ;;  %v4197_v29 = vrot.slane %v4195_v63, 5  ;;  %v1475_v58 = vshll.u32 %v12024_v47, 16  ;;  %18804 = vst [vmem:[#allocation51_spill] sm:$0xff] %v15871_v37  ;;  %18805 = vst [vmem:[#allocation52_spill] sm:$0xff] %v15873_v27 }
 0x1a1   : > { %v12184_v54 = vcombine.low %v3975_v12, %v3975_v12  ;;  %v1481_v60 = vshrl.u32 %v894_v46, 16  ;;  %v1484_v36 = vshll.u32 %v894_v46, 16  ;;  %v1466_v10 = vrot.slane %v1464_v42, 3  ;;  %v3977_v53 = vld [vmem:[#allocation2 + $0x54] sm:$0xf]  ;;  %v15875_v12 = vpop.f32.mrf.mxu1 }
 0x1a2   : > { %v1469_v56 = vrot.slane %v1467_v28, 4  ;;  %v4198_v4 = vor.u32 %v4197_v29, %v4194_v5  ;;  %v1474_v51 = vrot.slane %v1472_v52, 3  ;;  %v1477_v44 = vrot.slane %v1475_v58, 4  ;;  %v3978_v63 = vld [vmem:[#allocation2 + $0x58] sm:$0xf]  ;;  %18806 = vst [vmem:[#allocation53_spill] sm:$0xff] %v15875_v12 }
 0x1a3   : > { %v4486_v49 = vshrl.u32 %v12183_v22, 16  ;;  %v1483_v20 = vrot.slane %v1481_v60, 3  ;;  %v1486_v26 = vrot.slane %v1484_v36, 4  ;;  %v4489_v13 = vshll.u32 %v12183_v22, 16  ;;  %v632_v47 = vld [vmem:[#allocation2 + $0xb0] sm:$0x8]  ;;  %v15879_v36 = vpop.f32.mrf.mxu1 }
 0x1a4   : > { %v1470_v6 = vor.u32 %v1469_v56, %v1466_v10  ;;  %v4503_v46 = vshrl.u32 %v4198_v4, 16  ;;  %v4506_v42 = vshll.u32 %v4198_v4, 16  ;;  %v1478_v28 = vor.u32 %v1477_v44, %v1474_v51  ;;  %v3976_v58 = vld [vmem:[#allocation2 + $0x50] sm:$0x8]  ;;  %18807 = vst [vmem:[#allocation54_spill] sm:$0xff] %v15879_v36  ;;  %v15881_v10 = vpop.f32.mrf.mxu0 }
 0x1a5   : > { %v4488_v39 = vrot.slane %v4486_v49, 3  ;;  %v1487_v37 = vor.u32 %v1486_v26, %v1483_v20  ;;  %v4491_v5 = vrot.slane %v4489_v13, 4  ;;  %v4494_v52 = vshrl.u32 %v12184_v54, 16  ;;  %18808 = vst [vmem:[#allocation55_spill] sm:$0xff] %v15881_v10  ;;  %v3980_v36 = vld [vmem:[#allocation2 + $0x64] sm:$0xf] }
 0x1a6   : > { %v4497_v29 = vshll.u32 %v12184_v54, 16  ;;  %v4505_v23 = vrot.slane %v4503_v46, 3  ;;  %v4508_v27 = vrot.slane %v4506_v42, 4  ;;  %v1479_v60 = vsel %vm1032_vm3, %v1470_v6, %v1478_v28 }
 0x1a7   : > { %v896_v22 = vshrl.u32 %v15718_v61, 16  ;;  %3756 = vmatprep.mubr.bf16.mxu1 %v1487_v37  ;;  %v4492_v56 = vor.u32 %v4491_v5, %v4488_v39  ;;  %v4496_v4 = vrot.slane %v4494_v52, 3  ;;  %v899_v44 = vshll.u32 %v15718_v61, 16 }
 0x1a8   : > { %v4499_v51 = vrot.slane %v4497_v29, 4  ;;  %v4509_v49 = vor.u32 %v4508_v27, %v4505_v23  ;;  %3757 = vmatmul.mubr.bf16.gmra.mxu1 %v1479_v60  ;;  %v15884_v20 = vcombine.low %v3977_v53, %v3978_v63  ;;  %v12025_v26 = vcombine.low %v632_v47, %v15703_v0  ;;  %v15891_v23 = vpop.f32.mrf.mxu1  ;;  %v15893_v27 = vpop.f32.mrf.mxu0 }
 0x1a9   : > { %v898_v54 = vrot.slane %v896_v22, 4  ;;  %v901_v13 = vrot.slane %v899_v44, 5  ;;  %v12026_v46 = vcombine.low %v15705_v14, %v15705_v14  ;;  %v12185_v42 = vcombine.low %v3976_v58, %v3977_v53  ;;  %18809 = vst [vmem:[#allocation56_spill] sm:$0xff] %v15891_v23  ;;  %18810 = vst [vmem:[#allocation57_spill] sm:$0xff] %v15893_v27 }
 0x1aa   : > { %v4500_v6 = vor.u32 %v4499_v51, %v4496_v4  ;;  %5376 = vmatprep.mubr.bf16.mxu0 %v4509_v49  ;;  %v4200_v39 = vshrl.u32 %v15884_v20, 16  ;;  %v4203_v37 = vshll.u32 %v15884_v20, 16  ;;  %v1507_v28 = vshrl.u32 %v12025_v26, 16 }
 0x1ab   : > { %v1510_v61 = vshll.u32 %v12025_v26, 16  ;;  %v902_v0 = vor.u32 %v901_v13, %v898_v54  ;;  %v1515_v47 = vshrl.u32 %v12026_v46, 16  ;;  %v1518_v52 = vshll.u32 %v12026_v46, 16  ;;  %v15896_v12 = vpop.f32.mrf.mxu1 }
 0x1ac   : > { %v4501_v5 = vsel %vm1032_vm3, %v4492_v56, %v4500_v6  ;;  %v4202_v29 = vrot.slane %v4200_v39, 4  ;;  %v4205_v14 = vrot.slane %v4203_v37, 5  ;;  %v1509_v53 = vrot.slane %v1507_v28, 3  ;;  %18811 = vst [vmem:[#allocation58_spill] sm:$0xff] %v15896_v12  ;;  %v15898_v56 = vpop.f32.mrf.mxu0  ;;  %v3981_v39 = vld [vmem:[#allocation2 + $0x68] sm:$0xf] }
 0x1ad   : > { %5377 = vmatmul.mubr.bf16.gmra.mxu0 %v4501_v5  ;;  %v1512_v58 = vrot.slane %v1510_v61, 4  ;;  %v1524_v60 = vshrl.u32 %v902_v0, 16  ;;  %v1527_v22 = vshll.u32 %v902_v0, 16  ;;  %v1517_v4 = vrot.slane %v1515_v47, 3  ;;  %18812 = vst [vmem:[#allocation59_spill] sm:$0xff] %v15898_v56 }
 0x1ae   : > { %v1520_v51 = vrot.slane %v1518_v52, 4  ;;  %v4206_v44 = vor.u32 %v4205_v14, %v4202_v29  ;;  %v12186_v26 = vcombine.low %v3978_v63, %v3978_v63  ;;  %v4529_v23 = vshrl.u32 %v12185_v42, 16  ;;  %v635_v29 = vld [vmem:[#allocation2 + $0xc0] sm:$0x8] }
 0x1af   : > { %v1513_v49 = vor.u32 %v1512_v58, %v1509_v53  ;;  %v1526_v54 = vrot.slane %v1524_v60, 3  ;;  %v1529_v6 = vrot.slane %v1527_v22, 4  ;;  %v4532_v46 = vshll.u32 %v12185_v42, 16  ;;  %v15902_v60 = vpop.f32.mrf.mxu1  ;;  %v15904_v22 = vpop.f32.mrf.mxu0 }
 0x1b0   : > { %v1521_v13 = vor.u32 %v1520_v51, %v1517_v4  ;;  %v4546_v37 = vshrl.u32 %v4206_v44, 16  ;;  %v4549_v28 = vshll.u32 %v4206_v44, 16  ;;  %v4531_v61 = vrot.slane %v4529_v23, 3  ;;  %18813 = vst [vmem:[#allocation60_spill] sm:$0xff] %v15902_v60  ;;  %18814 = vst [vmem:[#allocation61_spill] sm:$0xff] %v15904_v22 }
 0x1b1   : > { %v4537_v5 = vshrl.u32 %v12186_v26, 16  ;;  %v1530_v0 = vor.u32 %v1529_v6, %v1526_v54  ;;  %v4534_v52 = vrot.slane %v4532_v46, 4  ;;  %v4540_v63 = vshll.u32 %v12186_v26, 16  ;;  %v3979_v6 = vld [vmem:[#allocation2 + $0x60] sm:$0x8] }
 0x1b2   : > { %v1522_v47 = vsel %vm1032_vm3, %v1513_v49, %v1521_v13  ;;  %v4548_v14 = vrot.slane %v4546_v37, 3  ;;  %v4551_v53 = vrot.slane %v4549_v28, 4  ;;  %v904_v12 = vshrl.u32 %v15732_v50, 16 }
 0x1b3   : > { %v4539_v58 = vrot.slane %v4537_v5, 3  ;;  %3764 = vmatprep.mubr.bf16.mxu1 %v1530_v0  ;;  %v4535_v42 = vor.u32 %v4534_v52, %v4531_v61  ;;  %v4542_v4 = vrot.slane %v4540_v63, 4  ;;  %v907_v23 = vshll.u32 %v15732_v50, 16  ;;  %v15914_v52 = vpop.f32.mrf.mxu1 }
 0x1b4   : > { %v15907_v51 = vcombine.low %v3980_v36, %v3981_v39  ;;  %v4552_v44 = vor.u32 %v4551_v53, %v4548_v14  ;;  %3765 = vmatmul.mubr.bf16.gmra.mxu1 %v1522_v47  ;;  %v906_v49 = vrot.slane %v904_v12, 4  ;;  %v12027_v26 = vcombine.low %v635_v29, %v15712_v15  ;;  %18815 = vst [vmem:[#allocation62_spill] sm:$0xff] %v15914_v52  ;;  %v15916_v12 = vpop.f32.mrf.mxu0 }
 0x1b5   : > { %v12028_v54 = vcombine.low %v15720_v43, %v15720_v43  ;;  %v4543_v13 = vor.u32 %v4542_v4, %v4539_v58  ;;  %v909_v46 = vrot.slane %v907_v23, 5  ;;  %18816 = vst [vmem:[#allocation63_spill] sm:$0xff] %v15916_v12  ;;  %v12188_v22 = vcombine.low %v3981_v39, %v3981_v39  ;;  %v15921_v12 = vpop.f32.mrf.mxu1  ;;  %v638_v39 = vld [vmem:[#allocation2 + $0xd0] sm:$0x8] }
 0x1b6   : > { %v4208_v37 = vshrl.u32 %v15907_v51, 16  ;;  %v4211_v28 = vshll.u32 %v15907_v51, 16  ;;  %5384 = vmatprep.mubr.bf16.mxu0 %v4552_v44  ;;  %v1550_v61 = vshrl.u32 %v12027_v26, 16  ;;  %v1553_v50 = vshll.u32 %v12027_v26, 16  ;;  %v15919_v4 = vpop.f32.mrf.mxu0  ;;  %18818 = vst [vmem:[#allocation65_spill] sm:$0xff] %v15921_v12 }
 0x1b7   : > { %v1558_v5 = vshrl.u32 %v12028_v54, 16  ;;  %v1561_v0 = vshll.u32 %v12028_v54, 16  ;;  %v4544_v15 = vsel %vm1032_vm3, %v4535_v42, %v4543_v13  ;;  %v910_v47 = vor.u32 %v909_v46, %v906_v49  ;;  %18817 = vst [vmem:[#allocation64_spill] sm:$0xff] %v15919_v4 }
 0x1b8   : > { %v4210_v43 = vrot.slane %v4208_v37, 4  ;;  %v4213_v63 = vrot.slane %v4211_v28, 5  ;;  %5385 = vmatmul.mubr.bf16.gmra.mxu0 %v4544_v15  ;;  %v1552_v29 = vrot.slane %v1550_v61, 3  ;;  %v1555_v14 = vrot.slane %v1553_v50, 4  ;;  %v15923_v42 = vpop.f32.mrf.mxu0  ;;  %v3983_v28 = vld [vmem:[#allocation2 + $0x74] sm:$0xf] }
 0x1b9   : > { %v1560_v53 = vrot.slane %v1558_v5, 3  ;;  %v1563_v58 = vrot.slane %v1561_v0, 4  ;;  %v1567_v23 = vshrl.u32 %v910_v47, 16  ;;  %v1570_v44 = vshll.u32 %v910_v47, 16  ;;  %18819 = vst [vmem:[#allocation66_spill] sm:$0xff] %v15923_v42 }
 0x1ba   : > { %v4214_v26 = vor.u32 %v4213_v63, %v4210_v43  ;;  %v12187_v54 = vcombine.low %v3979_v6, %v3980_v36  ;;  %v1556_v60 = vor.u32 %v1555_v14, %v1552_v29  ;;  %v3984_v61 = vld [vmem:[#allocation2 + $0x78] sm:$0xf]  ;;  %v4580_v15 = vshrl.u32 %v12188_v22, 16  ;;  %v15926_v63 = vpop.f32.mrf.mxu0 }
 0x1bb   : > { %v1564_v52 = vor.u32 %v1563_v58, %v1560_v53  ;;  %v1569_v49 = vrot.slane %v1567_v23, 3  ;;  %v1572_v13 = vrot.slane %v1570_v44, 4  ;;  %v4583_v43 = vshll.u32 %v12188_v22, 16  ;;  %18820 = vst [vmem:[#allocation67_spill] sm:$0xff] %v15926_v63  ;;  %v3982_v58 = vld [vmem:[#allocation2 + $0x70] sm:$0x8] }
 0x1bc   : > { %v4589_v46 = vshrl.u32 %v4214_v26, 16  ;;  %v4592_v37 = vshll.u32 %v4214_v26, 16  ;;  %v4572_v5 = vshrl.u32 %v12187_v54, 16  ;;  %v4575_v0 = vshll.u32 %v12187_v54, 16  ;;  %v15928_v23 = vpop.f32.mrf.mxu1 }
 0x1bd   : > { %v1565_v50 = vsel %vm1032_vm3, %v1556_v60, %v1564_v52  ;;  %v1573_v47 = vor.u32 %v1572_v13, %v1569_v49  ;;  %v4582_v53 = vrot.slane %v4580_v15, 3  ;;  %18821 = vst [vmem:[#allocation68_spill] sm:$0xff] %v15928_v23  ;;  %v4585_v26 = vrot.slane %v4583_v43, 4 }
 0x1be   : > { %v4591_v36 = vrot.slane %v4589_v46, 3  ;;  %v4594_v6 = vrot.slane %v4592_v37, 4  ;;  %v4574_v29 = vrot.slane %v4572_v5, 3  ;;  %v4577_v14 = vrot.slane %v4575_v0, 4  ;;  %v15934_v22 = vpop.f32.mrf.mxu1  ;;  %v14582_v46 = vld [vmem:[#allocation2 + $0xd4] sm:$0xf] }
 0x1bf   : > { %3772 = vmatprep.mubr.bf16.mxu1 %v1573_v47  ;;  %v912_v52 = vshrl.u32 %v15752_v24, 16  ;;  %v915_v54 = vshll.u32 %v15752_v24, 16  ;;  %v15932_v49 = vcombine.low %v3983_v28, %v3984_v61  ;;  %18822 = vst [vmem:[#allocation69_spill] sm:$0xff] %v15934_v22  ;;  %v4586_v13 = vor.u32 %v4585_v26, %v4582_v53  ;;  %v14583_v5 = vld [vmem:[#allocation2 + $0xd8] sm:$0xf]  ;;  %v15936_v47 = vpop.f32.mrf.mxu0 }
 0x1c0   : > { %v4595_v44 = vor.u32 %v4594_v6, %v4591_v36  ;;  %3773 = vmatmul.mubr.bf16.gmra.mxu1 %v1565_v50  ;;  %v4578_v60 = vor.u32 %v4577_v14, %v4574_v29  ;;  %v12029_v37 = vcombine.low %v638_v39, %v14582_v46  ;;  %v12030_v0 = vcombine.low %v14583_v5, %v14583_v5  ;;  %v15941_v46 = vpop.f32.mrf.mxu1  ;;  %v18971_v62 = vld [vmem:[#allocation66_spill] sm:$0xff] }
 0x1c1   : > { %v12189_v15 = vcombine.low %v3982_v58, %v3983_v28  ;;  %18823 = vst [vmem:[#allocation70_spill] sm:$0xff] %v15936_v47  ;;  %v914_v36 = vrot.slane %v912_v52, 4  ;;  %v917_v50 = vrot.slane %v915_v54, 5  ;;  %v4216_v6 = vshrl.u32 %v15932_v49, 16  ;;  %18824 = vst [vmem:[#allocation71_spill] sm:$0xff] %v15941_v46  ;;  %v15943_v5 = vpop.f32.mrf.mxu0 }
 0x1c2   : > { %5392 = vmatprep.mubr.bf16.mxu0 %v4595_v44  ;;  %v4219_v43 = vshll.u32 %v15932_v49, 16  ;;  %v4587_v24 = vsel %vm1032_vm3, %v4578_v60, %v4586_v13  ;;  %v1593_v29 = vshrl.u32 %v12029_v37, 16  ;;  %v1596_v14 = vshll.u32 %v12029_v37, 16  ;;  %18825 = vst [vmem:[#allocation72_spill] sm:$0xff] %v15943_v5  ;;  %v3987_v46 = vld [vmem:[#allocation2 + $0x88] sm:$0xf] }
 0x1c3   : > { %v1601_v23 = vshrl.u32 %v12030_v0, 16  ;;  %5393 = vmatmul.mubr.bf16.gmra.mxu0 %v4587_v24  ;;  %v918_v53 = vor.u32 %v917_v50, %v914_v36  ;;  %v4218_v44 = vrot.slane %v4216_v6, 4  ;;  %v1604_v26 = vshll.u32 %v12030_v0, 16 }
 0x1c4   : > { %v4221_v39 = vrot.slane %v4219_v43, 5  ;;  %v1595_v28 = vrot.slane %v1593_v29, 3  ;;  %v1598_v58 = vrot.slane %v1596_v14, 4  ;;  %v12190_v54 = vcombine.low %v3984_v61, %v3984_v61  ;;  %v3986_v43 = vld [vmem:[#allocation2 + $0x84] sm:$0xf]  ;;  %v15945_v14 = vpop.f32.mrf.mxu1 }
 0x1c5   : > { %v1603_v52 = vrot.slane %v1601_v23, 3  ;;  %v1610_v22 = vshrl.u32 %v918_v53, 16  ;;  %v1613_v12 = vshll.u32 %v918_v53, 16  ;;  %v1606_v60 = vrot.slane %v1604_v26, 4  ;;  %v641_v29 = vld [vmem:[#allocation2 + $0xe0] sm:$0x8] }
 0x1c6   : > { %v4222_v47 = vor.u32 %v4221_v39, %v4218_v44  ;;  %v1599_v13 = vor.u32 %v1598_v58, %v1595_v28  ;;  %v4615_v37 = vshrl.u32 %v12189_v15, 16  ;;  %v4618_v63 = vshll.u32 %v12189_v15, 16  ;;  %18826 = vst [vmem:[#allocation73_spill] sm:$0xff] %v15945_v14  ;;  %v3985_v53 = vld [vmem:[#allocation2 + $0x80] sm:$0x8]  ;;  %v15947_v44 = vpop.f32.mrf.mxu0 }
 0x1c7   : > { %v4623_v24 = vshrl.u32 %v12190_v54, 16  ;;  %v1612_v36 = vrot.slane %v1610_v22, 3  ;;  %v1615_v50 = vrot.slane %v1613_v12, 4  ;;  %v1607_v61 = vor.u32 %v1606_v60, %v1603_v52  ;;  %18827 = vst [vmem:[#allocation74_spill] sm:$0xff] %v15947_v44  ;;  %v3990_v44 = vld [vmem:[#allocation2 + $0x98] sm:$0xf] }
 0x1c8   : > { %v4632_v6 = vshrl.u32 %v4222_v47, 16  ;;  %v4635_v0 = vshll.u32 %v4222_v47, 16  ;;  %v4617_v23 = vrot.slane %v4615_v37, 3  ;;  %v4620_v5 = vrot.slane %v4618_v63, 4  ;;  %v14584_v37 = vld [vmem:[#allocation2 + $0xe4] sm:$0xf] }
 0x1c9   : > { %v4625_v42 = vrot.slane %v4623_v24, 3  ;;  %v1616_v39 = vor.u32 %v1615_v50, %v1612_v36  ;;  %v4626_v28 = vshll.u32 %v12190_v54, 16  ;;  %v1608_v12 = vsel %vm1032_vm3, %v1599_v13, %v1607_v61  ;;  %v15956_v36 = vpop.f32.mrf.mxu0  ;;  %v14585_v13 = vld [vmem:[#allocation2 + $0xe8] sm:$0xf] }
 0x1ca   : > { %v4634_v26 = vrot.slane %v4632_v6, 3  ;;  %v4637_v15 = vrot.slane %v4635_v0, 4  ;;  %v4621_v47 = vor.u32 %v4620_v5, %v4617_v23  ;;  %v15950_v4 = vpop.f32.mrf.mxu1  ;;  %v920_v52 = vshrl.u32 %v15762_v35, 16  ;;  %18829 = vst [vmem:[#allocation76_spill] sm:$0xff] %v15956_v36 }
 0x1cb   : > { %3780 = vmatprep.mubr.bf16.mxu1 %v1616_v39  ;;  %v4628_v58 = vrot.slane %v4626_v28, 4  ;;  %18828 = vst [vmem:[#allocation75_spill] sm:$0xff] %v15950_v4  ;;  %v923_v63 = vshll.u32 %v15762_v35, 16  ;;  %v15954_v60 = vcombine.low %v3986_v43, %v3987_v46  ;;  %v12031_v24 = vcombine.low %v641_v29, %v14584_v37 }
 0x1cc   : > { %v4638_v22 = vor.u32 %v4637_v15, %v4634_v26  ;;  %3781 = vmatmul.mubr.bf16.gmra.mxu1 %v1608_v12  ;;  %v12032_v50 = vcombine.low %v14585_v13, %v14585_v13  ;;  %v12191_v6 = vcombine.low %v3985_v53, %v3986_v43  ;;  %v12192_v5 = vcombine.low %v3987_v46, %v3987_v46  ;;  %v15958_v0 = vpop.f32.mrf.mxu1 }
 0x1cd   : > { %v4629_v54 = vor.u32 %v4628_v58, %v4625_v42  ;;  %v922_v61 = vrot.slane %v920_v52, 4  ;;  %v925_v23 = vrot.slane %v923_v63, 5  ;;  %v4224_v39 = vshrl.u32 %v15954_v60, 16 }
 0x1ce   : > { %5400 = vmatprep.mubr.bf16.mxu0 %v4638_v22  ;;  %v4227_v35 = vshll.u32 %v15954_v60, 16  ;;  %v1636_v15 = vshrl.u32 %v12031_v24, 16  ;;  %v1639_v29 = vshll.u32 %v12031_v24, 16  ;;  %v1644_v28 = vshrl.u32 %v12032_v50, 16  ;;  %v15963_v12 = vpop.f32.mrf.mxu1 }
 0x1cf   : > { %v4630_v26 = vsel %vm1032_vm3, %v4621_v47, %v4629_v54  ;;  %18830 = vst [vmem:[#allocation77_spill] sm:$0xff] %v15963_v12  ;;  %v926_v42 = vor.u32 %v925_v23, %v922_v61  ;;  %v4226_v22 = vrot.slane %v4224_v39, 4  ;;  %v1647_v46 = vshll.u32 %v12032_v50, 16  ;;  %v15965_v53 = vpop.f32.mrf.mxu0 }
 0x1d0   : > { %5401 = vmatmul.mubr.bf16.gmra.mxu0 %v4630_v26  ;;  %v4229_v43 = vrot.slane %v4227_v35, 5  ;;  %v1638_v58 = vrot.slane %v1636_v15, 3  ;;  %v1641_v52 = vrot.slane %v1639_v29, 4  ;;  %v1646_v63 = vrot.slane %v1644_v28, 3  ;;  %v15967_v54 = vpop.f32.mrf.mxu1  ;;  %v3989_v35 = vld [vmem:[#allocation2 + $0x94] sm:$0xf] }
 0x1d1   : > { %v4658_v37 = vshrl.u32 %v12191_v6, 16  ;;  %v1653_v13 = vshrl.u32 %v926_v42, 16  ;;  %v1656_v4 = vshll.u32 %v926_v42, 16  ;;  %v1649_v47 = vrot.slane %v1647_v46, 4  ;;  %18831 = vst [vmem:[#allocation78_spill] sm:$0xff] %v15967_v54  ;;  %v15969_v29 = vpop.f32.mrf.mxu0 }
 0x1d2   : > { %v4230_v14 = vor.u32 %v4229_v43, %v4226_v22  ;;  %v1642_v24 = vor.u32 %v1641_v52, %v1638_v58  ;;  %v4661_v12 = vshll.u32 %v12191_v6, 16  ;;  %v4666_v26 = vshrl.u32 %v12192_v5, 16  ;;  %v644_v15 = vld [vmem:[#allocation2 + $0xf0] sm:$0x8] }
 0x1d3   : > { %v4660_v36 = vrot.slane %v4658_v37, 3  ;;  %v1655_v61 = vrot.slane %v1653_v13, 3  ;;  %v1658_v23 = vrot.slane %v1656_v4, 4  ;;  %v1650_v28 = vor.u32 %v1649_v47, %v1646_v63  ;;  %v3988_v43 = vld [vmem:[#allocation2 + $0x90] sm:$0x8]  ;;  %v15975_v27 = vpop.f32.mrf.mxu0 }
 0x1d4   : > { %v4675_v39 = vshrl.u32 %v4230_v14, 16  ;;  %v4678_v50 = vshll.u32 %v4230_v14, 16  ;;  %v4663_v56 = vrot.slane %v4661_v12, 4  ;;  %v4668_v42 = vrot.slane %v4666_v26, 3  ;;  %18833 = vst [vmem:[#allocation80_spill] sm:$0xff] %v15975_v27 }
 0x1d5   : > { %v4669_v22 = vshll.u32 %v12192_v5, 16  ;;  %v1659_v46 = vor.u32 %v1658_v23, %v1655_v61  ;;  %v15971_v52 = vpop.f32.mrf.mxu1  ;;  %v1651_v6 = vsel %vm1032_vm3, %v1642_v24, %v1650_v28  ;;  %v928_v13 = vshrl.u32 %v15792_v41, 16  ;;  %v14586_v47 = vld [vmem:[#allocation2 + $0xf4] sm:$0xf]  ;;  %v14587_v23 = vld [vmem:[#allocation2 + $0xf8] sm:$0xf] }
 0x1d6   : > { %v4677_v54 = vrot.slane %v4675_v39, 3  ;;  %v4680_v58 = vrot.slane %v4678_v50, 4  ;;  %18832 = vst [vmem:[#allocation79_spill] sm:$0xff] %v15971_v52  ;;  %v4664_v4 = vor.u32 %v4663_v56, %v4660_v36  ;;  %v931_v5 = vshll.u32 %v15792_v41, 16  ;;  %v3992_v27 = vld [vmem:[#allocation2 + $0xa4] sm:$0xf] }
 0x1d7   : > { %v4671_v37 = vrot.slane %v4669_v22, 4  ;;  %3788 = vmatprep.mubr.bf16.mxu1 %v1659_v46  ;;  %v15978_v63 = vcombine.low %v3989_v35, %v3990_v44  ;;  %v12033_v26 = vcombine.low %v644_v15, %v14586_v47  ;;  %v930_v61 = vrot.slane %v928_v13, 4  ;;  %v15980_v39 = vpop.f32.mrf.mxu1 }
 0x1d8   : > { %v4681_v14 = vor.u32 %v4680_v58, %v4677_v54  ;;  %3789 = vmatmul.mubr.bf16.gmra.mxu1 %v1651_v6  ;;  %v12034_v24 = vcombine.low %v14587_v23, %v14587_v23  ;;  %v12193_v56 = vcombine.low %v3988_v43, %v3989_v35  ;;  %v12194_v36 = vcombine.low %v3990_v44, %v3990_v44  ;;  %v15985_v58 = vpop.f32.mrf.mxu0 }
 0x1d9   : > { %v4672_v12 = vor.u32 %v4671_v37, %v4668_v42  ;;  %18834 = vst [vmem:[#allocation81_spill] sm:$0xff] %v15980_v39  ;;  %v933_v50 = vrot.slane %v931_v5, 5  ;;  %v4232_v28 = vshrl.u32 %v15978_v63, 16  ;;  %v4235_v42 = vshll.u32 %v15978_v63, 16  ;;  %18835 = vst [vmem:[#allocation82_spill] sm:$0xff] %v15985_v58 }
 0x1da   : > { %5408 = vmatprep.mubr.bf16.mxu0 %v4681_v14  ;;  %v1679_v41 = vshrl.u32 %v12033_v26, 16  ;;  %v1682_v22 = vshll.u32 %v12033_v26, 16  ;;  %v1687_v46 = vshrl.u32 %v12034_v24, 16  ;;  %v1690_v15 = vshll.u32 %v12034_v24, 16  ;;  %v3993_v58 = vld [vmem:[#allocation2 + $0xa8] sm:$0xf] }
 0x1db   : > { %v4673_v54 = vsel %vm1032_vm3, %v4664_v4, %v4672_v12  ;;  %v934_v6 = vor.u32 %v933_v50, %v930_v61  ;;  %v4234_v37 = vrot.slane %v4232_v28, 4  ;;  %v4237_v35 = vrot.slane %v4235_v42, 5  ;;  %v15987_v12 = vpop.f32.mrf.mxu1  ;;  %v14271_v61 = vld [vmem:[#allocation2 + $0x2c] ss:$0 sps:$4 sm:$0x11]  }
 0x1dc   : > { %5409 = vmatmul.mubr.bf16.gmra.mxu0 %v4673_v54  ;;  %v4701_v44 = vshrl.u32 %v12193_v56, 16  ;;  %v1681_v43 = vrot.slane %v1679_v41, 3  ;;  %v1684_v14 = vrot.slane %v1682_v22, 4  ;;  %v1689_v13 = vrot.slane %v1687_v46, 3  ;;  %18836 = vst [vmem:[#allocation83_spill] sm:$0xff] %v15987_v12 }
 0x1dd   : > { %v1692_v4 = vrot.slane %v1690_v15, 4  ;;  %v1696_v5 = vshrl.u32 %v934_v6, 16  ;;  %v1699_v47 = vshll.u32 %v934_v6, 16  ;;  %v4238_v23 = vor.u32 %v4237_v35, %v4234_v37  ;;  %v3991_v46 = vld [vmem:[#allocation2 + $0xa0] sm:$0x8]  ;;  %v14310_v15 = vld [vmem:[#allocation9 + $0x178] sm:$0xff]   ;;  %v15991_v37 = vpop.f32.mrf.mxu1 }
 0x1de   : > { %v4703_v54 = vrot.slane %v4701_v44, 3  ;;  %v1685_v39 = vor.u32 %v1684_v14, %v1681_v43  ;;  %v4704_v52 = vshll.u32 %v12193_v56, 16  ;;  %v4709_v24 = vshrl.u32 %v12194_v36, 16  ;;  %18838 = vst [vmem:[#allocation85_spill] sm:$0xff] %v15991_v37  ;;  %13775 = vmatprep.subr.bf16.mxu0 %v14310_v15 }
 0x1df   : > { %v1693_v26 = vor.u32 %v1692_v4, %v1689_v13  ;;  %v1698_v28 = vrot.slane %v1696_v5, 3  ;;  %v1701_v42 = vrot.slane %v1699_v47, 4  ;;  %v4718_v41 = vshrl.u32 %v4238_v23, 16  ;;  %v14311_v13 = vld [vmem:[#allocation9 + $0x170] sm:$0xff]   ;;  %13776 = vmatpush3.bf16.msra.mxu0 %v14310_v15 }
 0x1e0   : > { %v4721_v22 = vshll.u32 %v4238_v23, 16  ;;  %v4706_v12 = vrot.slane %v4704_v52, 4  ;;  %v4711_v10 = vrot.slane %v4709_v24, 3  ;;  %v4712_v6 = vshll.u32 %v12194_v36, 16  ;;  %13777 = vmatprep.subr.bf16.mxu0 %v14311_v13 }
 0x1e1   : > { %v1702_v56 = vor.u32 %v1701_v42, %v1698_v28  ;;  %v4720_v44 = vrot.slane %v4718_v41, 3  ;;  %v1694_v14 = vsel %vm1032_vm3, %v1685_v39, %v1693_v26  ;;  %v15998_v23 = vcombine.low %v3992_v27, %v3993_v58 }
 0x1e2   : > { %v15989_v50 = vpop.f32.mrf.mxu0  ;;  %v4723_v43 = vrot.slane %v4721_v22, 4  ;;  %v4707_v4 = vor.u32 %v4706_v12, %v4703_v54  ;;  %v4714_v5 = vrot.slane %v4712_v6, 4  ;;  %v4351_v36 = vrot.slane %v15802_v30, 5 }
 0x1e3   : > { %18837 = vst [vmem:[#allocation84_spill] sm:$0xff] %v15989_v50  ;;  %3796 = vmatprep.mubr.bf16.mxu1 %v1702_v56  ;;  %v4352_v28 = vrot.slane %v14271_v61, 5  ;;  %v12195_v42 = vcombine.low %v3991_v46, %v3992_v27  ;;  %v4240_v39 = vshrl.u32 %v15998_v23, 16  ;;  %v4243_v12 = vshll.u32 %v15998_v23, 16  ;;  %13778 = vmatpush3.bf16.msra.mxu0 %v14311_v13 }
 0x1e4   : > { %v15993_v35 = vpop.f32.mrf.mxu0  ;;  %v4724_v52 = vor.u32 %v4723_v43, %v4720_v44  ;;  %3797 = vmatmul.mubr.bf16.gmra.mxu1 %v1694_v14  ;;  %v4715_v24 = vor.u32 %v4714_v5, %v4711_v10  ;;  %v4426_v54 = vshrl.u32 %v4351_v36, 16  ;;  %v4429_v26 = vshll.u32 %v4351_v36, 16  ;;  %v14274_v10 = vld [vmem:[#allocation2 + $0x3c] ss:$0 sps:$4 sm:$0x11]  }
 0x1e5   : > { %18839 = vst [vmem:[#allocation86_spill] sm:$0xff] %v15993_v35  ;;  %v4353_v30 = vsel %vm983_vm7, %v4351_v36, %v4352_v28  ;;  %v12196_v6 = vcombine.low %v3993_v58, %v3993_v58  ;;  %v4744_v56 = vshrl.u32 %v12195_v42, 16  ;;  %v4242_v27 = vrot.slane %v4240_v39, 4  ;;  %v14304_v35 = vld [vmem:[#allocation2 + $0xfc] ss:$0 sps:$4 sm:$0x11]  }
 0x1e6   : > { %v15996_v47 = vpop.f32.mrf.mxu0  ;;  %5416 = vmatprep.mubr.bf16.mxu0 %v4724_v52  ;;  %v4716_v15 = vsel %vm1032_vm3, %v4707_v4, %v4715_v24  ;;  %v4245_v46 = vrot.slane %v4243_v12, 5  ;;  %v4428_v44 = vrot.slane %v4426_v54, 3  ;;  %v4431_v43 = vrot.slane %v4429_v26, 4 }
 0x1e7   : > { %18840 = vst [vmem:[#allocation87_spill] sm:$0xff] %v15996_v47  ;;  %v16001_v41 = vpop.f32.mrf.mxu1  ;;  %5417 = vmatmul.mubr.bf16.gmra.mxu0 %v4716_v15  ;;  %v4434_v14 = vshrl.u32 %v4353_v30, 16  ;;  %v4437_v5 = vshll.u32 %v4353_v30, 16  ;;  %v4746_v52 = vrot.slane %v4744_v56, 3  ;;  %v4747_v47 = vshll.u32 %v12195_v42, 16 }
 0x1e8   : > { %18841 = vst [vmem:[#allocation88_spill] sm:$0xff] %v16001_v41  ;;  %v16005_v22 = vpop.f32.mrf.mxu0  ;;  %v4246_v4 = vor.u32 %v4245_v46, %v4242_v27  ;;  %v4432_v24 = vor.u32 %v4431_v43, %v4428_v44  ;;  %v4752_v36 = vshrl.u32 %v12196_v6, 16  ;;  %v4755_v58 = vshll.u32 %v12196_v6, 16  ;;  %v14312_v41 = vld [vmem:[#allocation9 + $0x168] sm:$0xff]   ;;  %v3995_v6 = vld [vmem:[#allocation2 + $0xb4] sm:$0xf] }
 0x1e9   : > { %18842 = vst [vmem:[#allocation89_spill] sm:$0xff] %v16005_v22  ;;  %v16009_v61 = vpop.f32.mrf.mxu1  ;;  %v4439_v13 = vrot.slane %v4437_v5, 4  ;;  %v4749_v15 = vrot.slane %v4747_v47, 4  ;;  %v4354_v39 = vrot.slane %v15834_v55, 5  ;;  %13779 = vmatprep.subr.bf16.mxu0 %v14312_v41  ;;  %v4355_v46 = vrot.slane %v14274_v10, 5 }
 0x1ea   : > { %18843 = vst [vmem:[#allocation90_spill] sm:$0xff] %v16009_v61  ;;  %v4436_v61 = vrot.slane %v4434_v14, 3  ;;  %v4761_v54 = vshrl.u32 %v4246_v4, 16  ;;  %v4764_v26 = vshll.u32 %v4246_v4, 16  ;;  %v4754_v30 = vrot.slane %v4752_v36, 3  ;;  %13780 = vmatpush3.bf16.msra.mxu0 %v14312_v41 }
 0x1eb   : > { %v16011_v22 = vpop.f32.mrf.mxu1  ;;  %v4757_v42 = vrot.slane %v4755_v58, 4  ;;  %v4750_v27 = vor.u32 %v4749_v15, %v4746_v52  ;;  %v4469_v44 = vshrl.u32 %v4354_v39, 16  ;;  %v3996_v43 = vld [vmem:[#allocation2 + $0xb8] sm:$0xf]  ;;  %v4356_v36 = vsel %vm983_vm7, %v4354_v39, %v4355_v46  ;;  %v3994_v52 = vld [vmem:[#allocation2 + $0xb0] sm:$0x8] }
 0x1ec   : > { %18844 = vst [vmem:[#allocation91_spill] sm:$0xff] %v16011_v22  ;;  %v4440_v56 = vor.u32 %v4439_v13, %v4436_v61  ;;  %v4763_v55 = vrot.slane %v4761_v54, 3  ;;  %v4766_v47 = vrot.slane %v4764_v26, 4  ;;  %v4477_v37 = vshrl.u32 %v4356_v36, 16 }
 0x1ed   : > { %v16013_v28 = vpop.f32.mrf.mxu0  ;;  %v16016_v12 = vpop.f32.mrf.mxu1  ;;  %v4758_v5 = vor.u32 %v4757_v42, %v4754_v30  ;;  %v4471_v61 = vrot.slane %v4469_v44, 3  ;;  %v4357_v42 = vrot.slane %v15857_v3, 5  ;;  %v12197_v44 = vcombine.low %v3994_v52, %v3995_v6 }
 0x1ee   : > { %18845 = vst [vmem:[#allocation92_spill] sm:$0xff] %v16013_v28  ;;  %18846 = vst [vmem:[#allocation93_spill] sm:$0xff] %v16016_v12  ;;  %v14276_v28 = vld [vmem:[#allocation2 + $0x4c] ss:$0 sps:$4 sm:$0x11]   ;;  %v4472_v12 = vshll.u32 %v4354_v39, 16  ;;  %v4441_v4 = vsel %vm1032_vm3, %v4432_v24, %v4440_v56  ;;  %v4767_v58 = vor.u32 %v4766_v47, %v4763_v55  ;;  %v16031_v24 = vcombine.low %v3995_v6, %v3996_v43 }
 0x1ef   : > { %v16018_v22 = vpop.f32.mrf.mxu1  ;;  %v16020_v14 = vpop.f32.mrf.mxu0  ;;  %13743 = vmatprep.mubr.bf16.mxu1 %v4441_v4  ;;  %v4759_v13 = vsel %vm1032_vm3, %v4750_v27, %v4758_v5  ;;  %v4479_v26 = vrot.slane %v4477_v37, 3  ;;  %v4358_v56 = vrot.slane %v14276_v28, 5  ;;  %v12198_v55 = vcombine.low %v3996_v43, %v3996_v43 }
 0x1f0   : > { %18847 = vst [vmem:[#allocation94_spill] sm:$0xff] %v16018_v22  ;;  %18848 = vst [vmem:[#allocation95_spill] sm:$0xff] %v16020_v14  ;;  %v4474_v15 = vrot.slane %v4472_v12, 4  ;;  %v4480_v14 = vshll.u32 %v4356_v36, 16  ;;  %5424 = vmatprep.mubr.bf16.mxu0 %v4767_v58  ;;  %v4248_v12 = vshrl.u32 %v16031_v24, 16  ;;  %v4251_v27 = vshll.u32 %v16031_v24, 16 }
 0x1f1   : > { %v16024_v10 = vpop.f32.mrf.mxu1  ;;  %v16029_v54 = vpop.f32.mrf.mxu0  ;;  %5425 = vmatmul.mubr.bf16.gmra.mxu0 %v4759_v13  ;;  %v4359_v5 = vsel %vm983_vm7, %v4357_v42, %v4358_v56  ;;  %v4512_v37 = vshrl.u32 %v4357_v42, 16  ;;  %v4515_v4 = vshll.u32 %v4357_v42, 16  ;;  %v14279_v36 = vld [vmem:[#allocation2 + $0x5c] ss:$0 sps:$4 sm:$0x11]   ;;  %v4787_v6 = vshrl.u32 %v12197_v44, 16 }
 0x1f2   : > { %18849 = vst [vmem:[#allocation96_spill] sm:$0xff] %v16024_v10  ;;  %18851 = vst [vmem:[#allocation98_spill] sm:$0xff] %v16029_v54  ;;  %v4475_v39 = vor.u32 %v4474_v15, %v4471_v61  ;;  %v4482_v30 = vrot.slane %v4480_v14, 4  ;;  %v4250_v3 = vrot.slane %v4248_v12, 4  ;;  %v4253_v28 = vrot.slane %v4251_v27, 5 }
 0x1f3   : > { %v16027_v41 = vpop.f32.mrf.mxu1  ;;  %v16039_v58 = vpop.f32.mrf.mxu0  ;;  %v4520_v61 = vshrl.u32 %v4359_v5, 16  ;;  %v4523_v13 = vshll.u32 %v4359_v5, 16  ;;  %v4514_v54 = vrot.slane %v4512_v37, 3  ;;  %v4790_v42 = vshll.u32 %v12197_v44, 16 }
 0x1f4   : > { %18850 = vst [vmem:[#allocation97_spill] sm:$0xff] %v16027_v41  ;;  %v4483_v47 = vor.u32 %v4482_v30, %v4479_v26  ;;  %18853 = vst [vmem:[#allocation100_spill] sm:$0xff] %v16039_v58  ;;  %v4254_v52 = vor.u32 %v4253_v28, %v4250_v3  ;;  %v4789_v58 = vrot.slane %v4787_v6, 3  ;;  %v4795_v41 = vshrl.u32 %v12198_v55, 16 }
 0x1f5   : > { %v16034_v46 = vpop.f32.mrf.mxu1  ;;  %v4522_v26 = vrot.slane %v4520_v61, 3  ;;  %v4525_v30 = vrot.slane %v4523_v13, 4  ;;  %v4792_v37 = vrot.slane %v4790_v42, 4  ;;  %v4361_v3 = vrot.slane %v14279_v36, 5  ;;  %v3998_v61 = vld [vmem:[#allocation2 + $0xc4] sm:$0xf] }
 0x1f6   : > { %18852 = vst [vmem:[#allocation99_spill] sm:$0xff] %v16034_v46  ;;  %v4484_v15 = vsel %vm1032_vm3, %v4475_v39, %v4483_v47  ;;  %v4517_v46 = vrot.slane %v4515_v4, 4  ;;  %v4804_v5 = vshrl.u32 %v4254_v52, 16  ;;  %v4807_v39 = vshll.u32 %v4254_v52, 16  ;;  %v3999_v13 = vld [vmem:[#allocation2 + $0xc8] sm:$0xf] }
 0x1f7   : > { %13744 = vmatmul.mubr.bf16.vlgmr.msra.gmra.mxu1 %v4484_v15  ;;  %v4526_v47 = vor.u32 %v4525_v30, %v4522_v26  ;;  %v4797_v4 = vrot.slane %v4795_v41, 3  ;;  %v4360_v15 = vrot.slane %v15884_v20, 5  ;;  %v14281_v6 = vld [vmem:[#allocation2 + $0x6c] ss:$0 sps:$4 sm:$0x11]  }
 0x1f8   : > { %v16041_v14 = vpop.f32.mrf.mxu1  ;;  %v4518_v56 = vor.u32 %v4517_v46, %v4514_v54  ;;  %v4806_v44 = vrot.slane %v4804_v5, 3  ;;  %v4809_v54 = vrot.slane %v4807_v39, 4 }
 0x1f9   : > { %18854 = vst [vmem:[#allocation101_spill] sm:$0xff] %v16041_v14  ;;  %v4798_v14 = vshll.u32 %v12198_v55, 16  ;;  %v4793_v55 = vor.u32 %v4792_v37, %v4789_v58  ;;  %v4362_v52 = vsel %vm983_vm7, %v4360_v15, %v4361_v3  ;;  %v4555_v26 = vshrl.u32 %v4360_v15, 16 }
 0x1fa   : > { %v16044_v43 = vpop.f32.mrf.mxu1  ;;  %v4527_v46 = vsel %vm1032_vm3, %v4518_v56, %v4526_v47  ;;  %v4558_v41 = vshll.u32 %v4360_v15, 16  ;;  %v4810_v20 = vor.u32 %v4809_v54, %v4806_v44  ;;  %v4563_v36 = vshrl.u32 %v4362_v52, 16 }
 0x1fb   : > { %18855 = vst [vmem:[#allocation102_spill] sm:$0xff] %v16044_v43  ;;  %v16046_v12 = vpop.f32.mrf.mxu0  ;;  %v4800_v10 = vrot.slane %v4798_v14, 4  ;;  %13747 = vmatprep.mubr.bf16.mxu1 %v4527_v46  ;;  %v3997_v14 = vld [vmem:[#allocation2 + $0xc0] sm:$0x8]  ;;  %v4566_v42 = vshll.u32 %v4362_v52, 16  ;;  %v4557_v39 = vrot.slane %v4555_v26, 3 }
 0x1fc   : > { %18856 = vst [vmem:[#allocation103_spill] sm:$0xff] %v16046_v12  ;;  %v16048_v27 = vpop.f32.mrf.mxu1  ;;  %v4560_v56 = vrot.slane %v4558_v41, 4  ;;  %5432 = vmatprep.mubr.bf16.mxu0 %v4810_v20  ;;  %v4565_v47 = vrot.slane %v4563_v36, 3  ;;  %v4363_v15 = vrot.slane %v15907_v51, 5  ;;  %v4364_v54 = vrot.slane %v14281_v6, 5  ;;  %v14313_v52 = vld [vmem:[#allocation9 + $0x160] sm:$0xff]  }
 0x1fd   : > { %18857 = vst [vmem:[#allocation104_spill] sm:$0xff] %v16048_v27  ;;  %v16051_v28 = vpop.f32.mrf.mxu0  ;;  %v4801_v12 = vor.u32 %v4800_v10, %v4797_v4  ;;  %v4568_v37 = vrot.slane %v4566_v42, 4  ;;  %v16060_v4 = vcombine.low %v3998_v61, %v3999_v13  ;;  %v12199_v46 = vcombine.low %v3997_v14, %v3998_v61  ;;  %13781 = vmatprep.subr.bf16.mxu0 %v14313_v52 }
 0x1fe   : > { %18858 = vst [vmem:[#allocation105_spill] sm:$0xff] %v16051_v28  ;;  %v16055_v30 = vpop.f32.mrf.mxu1  ;;  %v4561_v10 = vor.u32 %v4560_v56, %v4557_v39  ;;  %v4598_v26 = vshrl.u32 %v4363_v15, 16  ;;  %v4601_v41 = vshll.u32 %v4363_v15, 16  ;;  %v4365_v51 = vsel %vm983_vm7, %v4363_v15, %v4364_v54  ;;  %v14284_v56 = vld [vmem:[#allocation2 + $0x7c] ss:$0 sps:$4 sm:$0x11]   ;;  %13782 = vmatpush3.bf16.msra.mxu0 %v14313_v52 }
 0x1ff   : > { %18859 = vst [vmem:[#allocation106_spill] sm:$0xff] %v16055_v30  ;;  %v4802_v5 = vsel %vm1032_vm3, %v4793_v55, %v4801_v12  ;;  %v16058_v58 = vpop.f32.mrf.mxu0  ;;  %v4569_v44 = vor.u32 %v4568_v37, %v4565_v47  ;;  %v4256_v12 = vshrl.u32 %v16060_v4, 16  ;;  %v4259_v55 = vshll.u32 %v16060_v4, 16 }
 0x200   : > { %18860 = vst [vmem:[#allocation107_spill] sm:$0xff] %v16058_v58  ;;  %5433 = vmatmul.mubr.bf16.gmra.mxu0 %v4802_v5  ;;  %v12200_v5 = vcombine.low %v3999_v13, %v3999_v13  ;;  %v4830_v39 = vshrl.u32 %v12199_v46, 16  ;;  %v4600_v14 = vrot.slane %v4598_v26, 3  ;;  %v4603_v47 = vrot.slane %v4601_v41, 4 }
 0x201   : > { %v16067_v20 = vpop.f32.mrf.mxu0  ;;  %v4570_v42 = vsel %vm1032_vm3, %v4561_v10, %v4569_v44  ;;  %v4258_v61 = vrot.slane %v4256_v12, 4  ;;  %v4261_v6 = vrot.slane %v4259_v55, 5  ;;  %v4606_v37 = vshrl.u32 %v4365_v51, 16 }
 0x202   : > { %18862 = vst [vmem:[#allocation109_spill] sm:$0xff] %v16067_v20  ;;  %13748 = vmatmul.mubr.bf16.gmra.mxu1 %v4570_v42  ;;  %v4609_v58 = vshll.u32 %v4365_v51, 16  ;;  %v4832_v28 = vrot.slane %v4830_v39, 3  ;;  %v4833_v20 = vshll.u32 %v12199_v46, 16  ;;  %v4838_v30 = vshrl.u32 %v12200_v5, 16 }
 0x203   : > { %v4841_v10 = vshll.u32 %v12200_v5, 16  ;;  %v4608_v15 = vrot.slane %v4606_v37, 3  ;;  %v4366_v12 = vrot.slane %v15932_v49, 5  ;;  %v4001_v5 = vld [vmem:[#allocation2 + $0xd4] sm:$0xf] }
 0x204   : > { %v16063_v3 = vpop.f32.mrf.mxu1  ;;  %v4611_v54 = vrot.slane %v4609_v58, 4  ;;  %v4835_v42 = vrot.slane %v4833_v20, 4  ;;  %v4840_v52 = vrot.slane %v4838_v30, 3  ;;  %v4000_v20 = vld [vmem:[#allocation2 + $0xd0] sm:$0x8] }
 0x205   : > { %18861 = vst [vmem:[#allocation108_spill] sm:$0xff] %v16063_v3  ;;  %v4262_v3 = vor.u32 %v4261_v6, %v4258_v61  ;;  %v4843_v41 = vrot.slane %v4841_v10, 4  ;;  %v4367_v61 = vrot.slane %v14284_v56, 5  ;;  %v4641_v6 = vshrl.u32 %v4366_v12, 16 }
 0x206   : > { %v16069_v36 = vpop.f32.mrf.mxu1  ;;  %v4612_v46 = vor.u32 %v4611_v54, %v4608_v15  ;;  %v4836_v39 = vor.u32 %v4835_v42, %v4832_v28  ;;  %v4644_v58 = vshll.u32 %v4366_v12, 16 }
 0x207   : > { %18863 = vst [vmem:[#allocation110_spill] sm:$0xff] %v16069_v36  ;;  %v4604_v36 = vor.u32 %v4603_v47, %v4600_v14  ;;  %v4847_v55 = vshrl.u32 %v4262_v3, 16  ;;  %v4850_v26 = vshll.u32 %v4262_v3, 16  ;;  %v4002_v14 = vld [vmem:[#allocation2 + $0xd8] sm:$0xf]  ;;  %v4844_v37 = vor.u32 %v4843_v41, %v4840_v52 }
 0x208   : > { %v16075_v13 = vpop.f32.mrf.mxu1  ;;  %v14286_v47 = vld [vmem:[#allocation2 + $0x8c] ss:$0 sps:$4 sm:$0x11]   ;;  %v4368_v30 = vsel %vm983_vm7, %v4366_v12, %v4367_v61  ;;  %v4643_v3 = vrot.slane %v4641_v6, 3  ;;  %v4646_v15 = vrot.slane %v4644_v58, 4  ;;  %v16087_v52 = vcombine.low %v4001_v5, %v4002_v14 }
 0x209   : > { %v16073_v44 = vpop.f32.mrf.mxu0  ;;  %18865 = vst [vmem:[#allocation112_spill] sm:$0xff] %v16075_v13  ;;  %v4852_v13 = vrot.slane %v4850_v26, 4  ;;  %v4613_v49 = vsel %vm1032_vm3, %v4604_v36, %v4612_v46  ;;  %v4845_v56 = vsel %vm1032_vm3, %v4836_v39, %v4844_v37  ;;  %v4649_v54 = vshrl.u32 %v4368_v30, 16 }
 0x20a   : > { %18864 = vst [vmem:[#allocation111_spill] sm:$0xff] %v16073_v44  ;;  %v4849_v44 = vrot.slane %v4847_v55, 3  ;;  %v16080_v27 = vpop.f32.mrf.mxu1  ;;  %13751 = vmatprep.mubr.bf16.mxu1 %v4613_v49  ;;  %v4652_v42 = vshll.u32 %v4368_v30, 16  ;;  %v4647_v55 = vor.u32 %v4646_v15, %v4643_v3  ;;  %v4369_v12 = vrot.slane %v15954_v60, 5  ;;  %v14314_v60 = vld [vmem:[#allocation9 + $0x138] sm:$0xff]  }
 0x20b   : > { %v16078_v51 = vpop.f32.mrf.mxu0  ;;  %18867 = vst [vmem:[#allocation114_spill] sm:$0xff] %v16080_v27  ;;  %v4651_v26 = vrot.slane %v4649_v54, 3  ;;  %v4370_v46 = vrot.slane %v14286_v47, 5  ;;  %v12201_v61 = vcombine.low %v4000_v20, %v4001_v5  ;;  %v4267_v39 = vshll.u32 %v16087_v52, 16  ;;  %v14315_v47 = vld [vmem:[#allocation9 + $0xf8] sm:$0xff]   ;;  %13199 = vmatprep.subr.bf16.mxu1 %v14314_v60 }
 0x20c   : > { %18866 = vst [vmem:[#allocation113_spill] sm:$0xff] %v16078_v51  ;;  %v4853_v28 = vor.u32 %v4852_v13, %v4849_v44  ;;  %v4654_v36 = vrot.slane %v4652_v42, 4  ;;  %v4264_v13 = vshrl.u32 %v16087_v52, 16  ;;  %v12202_v6 = vcombine.low %v4002_v14, %v4002_v14  ;;  %13200 = vmatpush3.bf16.msra.mxu1 %v14315_v47 }
 0x20d   : > { %v16084_v10 = vpop.f32.mrf.mxu0  ;;  %v4372_v37 = vrot.slane %v15978_v63, 5  ;;  %v4371_v30 = vsel %vm983_vm7, %v4369_v12, %v4370_v46  ;;  %v4684_v3 = vshrl.u32 %v4369_v12, 16  ;;  %v4269_v20 = vrot.slane %v4267_v39, 5 }
 0x20e   : > { %18868 = vst [vmem:[#allocation115_spill] sm:$0xff] %v16084_v10  ;;  %5440 = vmatprep.mubr.bf16.mxu0 %v4853_v28  ;;  %v4655_v49 = vor.u32 %v4654_v36, %v4651_v26  ;;  %v4687_v28 = vshll.u32 %v4369_v12, 16  ;;  %v4266_v5 = vrot.slane %v4264_v13, 4  ;;  %v4692_v15 = vshrl.u32 %v4371_v30, 16 }
 0x20f   : > { %5441 = vmatmul.mubr.bf16.gmra.mxu0 %v4845_v56  ;;  %v16092_v44 = vpop.f32.mrf.mxu0  ;;  %v14289_v56 = vld [vmem:[#allocation2 + $0x9c] ss:$0 sps:$4 sm:$0x11]   ;;  %v4695_v54 = vshll.u32 %v4371_v30, 16  ;;  %v4873_v10 = vshrl.u32 %v12201_v61, 16  ;;  %v4876_v46 = vshll.u32 %v12201_v61, 16 }
 0x210   : > { %18870 = vst [vmem:[#allocation117_spill] sm:$0xff] %v16092_v44  ;;  %v4656_v42 = vsel %vm1032_vm3, %v4647_v55, %v4655_v49  ;;  %v4686_v44 = vrot.slane %v4684_v3, 3  ;;  %v4689_v14 = vrot.slane %v4687_v28, 4  ;;  %v4270_v26 = vor.u32 %v4269_v20, %v4266_v5 }
 0x211   : > { %v16089_v41 = vpop.f32.mrf.mxu1  ;;  %13752 = vmatmul.mubr.bf16.gmra.mxu1 %v4656_v42  ;;  %v4694_v36 = vrot.slane %v4692_v15, 3  ;;  %v4697_v12 = vrot.slane %v4695_v54, 4  ;;  %v4875_v13 = vrot.slane %v4873_v10, 3  ;;  %v4881_v39 = vshrl.u32 %v12202_v6, 16 }
 0x212   : > { %18869 = vst [vmem:[#allocation116_spill] sm:$0xff] %v16089_v41  ;;  %v4884_v41 = vshll.u32 %v12202_v6, 16  ;;  %v4890_v55 = vshrl.u32 %v4270_v26, 16  ;;  %v4893_v49 = vshll.u32 %v4270_v26, 16  ;;  %v4878_v28 = vrot.slane %v4876_v46, 4  ;;  %v14316_v46 = vld [vmem:[#allocation9 + $0x158] sm:$0xff]  }
 0x213   : > { %v16097_v58 = vpop.f32.mrf.mxu1  ;;  %v4698_v3 = vor.u32 %v4697_v12, %v4694_v36  ;;  %v4727_v60 = vshrl.u32 %v4372_v37, 16  ;;  %v4730_v54 = vshll.u32 %v4372_v37, 16  ;;  %v4005_v26 = vld [vmem:[#allocation2 + $0xe8] sm:$0xf]  ;;  %13783 = vmatprep.subr.bf16.mxu0 %v14316_v46 }
 0x214   : > { %18871 = vst [vmem:[#allocation118_spill] sm:$0xff] %v16097_v58  ;;  %v4690_v58 = vor.u32 %v4689_v14, %v4686_v44  ;;  %v4886_v27 = vrot.slane %v4884_v41, 4  ;;  %v4892_v5 = vrot.slane %v4890_v55, 3  ;;  %v4895_v20 = vrot.slane %v4893_v49, 4  ;;  %v4004_v14 = vld [vmem:[#allocation2 + $0xe4] sm:$0xf]  ;;  %13784 = vmatpush3.bf16.msra.mxu0 %v14316_v46 }
 0x215   : > { %v16103_v51 = vpop.f32.mrf.mxu1  ;;  %v4879_v10 = vor.u32 %v4878_v28, %v4875_v13  ;;  %v4729_v15 = vrot.slane %v4727_v60, 3  ;;  %v14291_v12 = vld [vmem:[#allocation2 + $0xac] ss:$0 sps:$4 sm:$0x11]   ;;  %v4732_v55 = vrot.slane %v4730_v54, 4  ;;  %v14317_v60 = vld [vmem:[#allocation9 + $0x130] sm:$0xff]  }
 0x216   : > { %v16101_v63 = vpop.f32.mrf.mxu0  ;;  %18873 = vst [vmem:[#allocation120_spill] sm:$0xff] %v16103_v51  ;;  %v4373_v51 = vrot.slane %v14289_v56, 5  ;;  %v4699_v61 = vsel %vm1032_vm3, %v4690_v58, %v4698_v3  ;;  %v4896_v41 = vor.u32 %v4895_v20, %v4892_v5  ;;  %v4003_v58 = vld [vmem:[#allocation2 + $0xe0] sm:$0x8]  ;;  %v4375_v3 = vrot.slane %v15998_v23, 5  ;;  %v14318_v5 = vld [vmem:[#allocation9 + $0xf0] sm:$0xff]   ;;  %13201 = vmatprep.subr.bf16.mxu1 %v14317_v60 }
 0x217   : > { %18872 = vst [vmem:[#allocation119_spill] sm:$0xff] %v16101_v63  ;;  %v4883_v63 = vrot.slane %v4881_v39, 3  ;;  %v16107_v42 = vpop.f32.mrf.mxu1  ;;  %13755 = vmatprep.mubr.bf16.mxu1 %v4699_v61  ;;  %v4376_v61 = vrot.slane %v14291_v12, 5  ;;  %13202 = vmatpush3.bf16.msra.mxu1 %v14318_v5  ;;  %v4378_v5 = vrot.slane %v16031_v24, 5 }
 0x218   : > { %v16105_v30 = vpop.f32.mrf.mxu0  ;;  %18875 = vst [vmem:[#allocation122_spill] sm:$0xff] %v16107_v42  ;;  %v4374_v47 = vsel %vm983_vm7, %v4372_v37, %v4373_v51  ;;  %5448 = vmatprep.mubr.bf16.mxu0 %v4896_v41  ;;  %v4733_v51 = vor.u32 %v4732_v55, %v4729_v15  ;;  %v16118_v37 = vcombine.low %v4004_v14, %v4005_v26  ;;  %v4770_v41 = vshrl.u32 %v4375_v3, 16  ;;  %v14294_v55 = vld [vmem:[#allocation2 + $0xbc] ss:$0 sps:$4 sm:$0x11]  }
 0x219   : > { %18874 = vst [vmem:[#allocation121_spill] sm:$0xff] %v16105_v30  ;;  %v4887_v6 = vor.u32 %v4886_v27, %v4883_v63  ;;  %v4735_v56 = vshrl.u32 %v4374_v47, 16  ;;  %v4738_v36 = vshll.u32 %v4374_v47, 16  ;;  %v4377_v23 = vsel %vm983_vm7, %v4375_v3, %v4376_v61 }
 0x21a   : > { %v16110_v44 = vpop.f32.mrf.mxu0  ;;  %v4272_v47 = vshrl.u32 %v16118_v37, 16  ;;  %v4275_v54 = vshll.u32 %v16118_v37, 16  ;;  %v4772_v46 = vrot.slane %v4770_v41, 3 }
 0x21b   : > { %18876 = vst [vmem:[#allocation123_spill] sm:$0xff] %v16110_v44  ;;  %v4888_v39 = vsel %vm1032_vm3, %v4879_v10, %v4887_v6  ;;  %v4737_v49 = vrot.slane %v4735_v56, 3  ;;  %v4740_v27 = vrot.slane %v4738_v36, 4  ;;  %v12203_v10 = vcombine.low %v4003_v58, %v4004_v14 }
 0x21c   : > { %v16116_v63 = vpop.f32.mrf.mxu0  ;;  %5449 = vmatmul.mubr.bf16.gmra.mxu0 %v4888_v39  ;;  %v12204_v6 = vcombine.low %v4005_v26, %v4005_v26  ;;  %v4773_v56 = vshll.u32 %v4375_v3, 16  ;;  %v4274_v14 = vrot.slane %v4272_v47, 4  ;;  %v4277_v26 = vrot.slane %v4275_v54, 5 }
 0x21d   : > { %18877 = vst [vmem:[#allocation124_spill] sm:$0xff] %v16116_v63  ;;  %v4741_v20 = vor.u32 %v4740_v27, %v4737_v49  ;;  %v4916_v36 = vshrl.u32 %v12203_v10, 16  ;;  %v4919_v39 = vshll.u32 %v12203_v10, 16  ;;  %v4778_v49 = vshrl.u32 %v4377_v23, 16 }
 0x21e   : > { %v16114_v13 = vpop.f32.mrf.mxu1  ;;  %v4775_v58 = vrot.slane %v4773_v56, 4  ;;  %v4781_v27 = vshll.u32 %v4377_v23, 16  ;;  %v4278_v3 = vor.u32 %v4277_v26, %v4274_v14  ;;  %v4924_v61 = vshrl.u32 %v12204_v6, 16  ;;  %v4007_v23 = vld [vmem:[#allocation2 + $0xf4] sm:$0xf] }
 0x21f   : > { %v4742_v15 = vsel %vm1032_vm3, %v4733_v51, %v4741_v20  ;;  %v4918_v60 = vrot.slane %v4916_v36, 3  ;;  %v4921_v44 = vrot.slane %v4919_v39, 4  ;;  %v4927_v10 = vshll.u32 %v12204_v6, 16 }
 0x220   : > { %v16121_v28 = vpop.f32.mrf.mxu1  ;;  %13756 = vmatmul.mubr.bf16.gmra.mxu1 %v4742_v15  ;;  %v4776_v20 = vor.u32 %v4775_v58, %v4772_v46  ;;  %v4780_v30 = vrot.slane %v4778_v49, 3  ;;  %v4933_v47 = vshrl.u32 %v4278_v3, 16  ;;  %v4936_v54 = vshll.u32 %v4278_v3, 16  ;;  %v4008_v46 = vld [vmem:[#allocation2 + $0xf8] sm:$0xf] }
 0x221   : > { %v4922_v42 = vor.u32 %v4921_v44, %v4918_v60  ;;  %v4926_v41 = vrot.slane %v4924_v61, 3  ;;  %v4929_v56 = vrot.slane %v4927_v10, 4  ;;  %v4813_v14 = vshrl.u32 %v4378_v5, 16  ;;  %v14296_v44 = vld [vmem:[#allocation2 + $0xcc] ss:$0 sps:$4 sm:$0x11]  }
 0x222   : > { %v16129_v12 = vpop.f32.mrf.mxu1  ;;  %v4816_v26 = vshll.u32 %v4378_v5, 16  ;;  %v4935_v6 = vrot.slane %v4933_v47, 3  ;;  %v4938_v58 = vrot.slane %v4936_v54, 4  ;;  %v16145_v54 = vcombine.low %v4007_v23, %v4008_v46 }
 0x223   : > { %v16127_v63 = vpop.f32.mrf.mxu0  ;;  %18879 = vst [vmem:[#allocation126_spill] sm:$0xff] %v16129_v12  ;;  %v4930_v49 = vor.u32 %v4929_v56, %v4926_v41  ;;  %v4815_v60 = vrot.slane %v4813_v14, 3  ;;  %v4382_v56 = vrot.slane %v14296_v44, 5  ;;  %v14320_v14 = vld [vmem:[#allocation9 + $0xe8] sm:$0xff]  }
 0x224   : > { %18878 = vst [vmem:[#allocation125_spill] sm:$0xff] %v16127_v63  ;;  %v4783_v63 = vrot.slane %v4781_v27, 4  ;;  %v16134_v15 = vpop.f32.mrf.mxu1  ;;  %v4818_v3 = vrot.slane %v4816_v26, 4  ;;  %v4939_v10 = vor.u32 %v4938_v58, %v4935_v6  ;;  %v4283_v26 = vshll.u32 %v16145_v54, 16 }
 0x225   : > { %v16131_v51 = vpop.f32.mrf.mxu0  ;;  %18881 = vst [vmem:[#allocation128_spill] sm:$0xff] %v16134_v15 }
 0x226   : > { %18880 = vst [vmem:[#allocation127_spill] sm:$0xff] %v16131_v51  ;;  %v4784_v39 = vor.u32 %v4783_v63, %v4780_v30  ;;  %v4379_v51 = vrot.slane %v14294_v55, 5  ;;  %v4931_v30 = vsel %vm1032_vm3, %v4922_v42, %v4930_v49  ;;  %v4819_v47 = vor.u32 %v4818_v3, %v4815_v60  ;;  %5456 = vmatprep.mubr.bf16.mxu0 %v4939_v10 }
 0x227   : > { %v16136_v36 = vpop.f32.mrf.mxu0  ;;  %5457 = vmatmul.mubr.bf16.gmra.mxu0 %v4931_v30  ;;  %v4280_v42 = vshrl.u32 %v16145_v54, 16  ;;  %v4285_v44 = vrot.slane %v4283_v26, 5 }
 0x228   : > { %18882 = vst [vmem:[#allocation129_spill] sm:$0xff] %v16136_v36  ;;  %v4785_v24 = vsel %vm1032_vm3, %v4776_v20, %v4784_v39  ;;  %v4380_v27 = vsel %vm983_vm7, %v4378_v5, %v4379_v51  ;;  %v4006_v36 = vld [vmem:[#allocation2 + $0xf0] sm:$0x8]  ;;  %v4381_v5 = vrot.slane %v16060_v4, 5  ;;  %v14319_v39 = vld [vmem:[#allocation9 + $0x128] sm:$0xff]  }
 0x229   : > { %13759 = vmatprep.mubr.bf16.mxu1 %v4785_v24  ;;  %v4821_v63 = vshrl.u32 %v4380_v27, 16  ;;  %v4824_v55 = vshll.u32 %v4380_v27, 16  ;;  %v16143_v15 = vpop.f32.mrf.mxu0  ;;  %v12205_v6 = vcombine.low %v4006_v36, %v4007_v23  ;;  %13203 = vmatprep.subr.bf16.mxu1 %v14319_v39  ;;  %v4282_v4 = vrot.slane %v4280_v42, 4 }
 0x22a   : > { %18883 = vst [vmem:[#allocation130_spill] sm:$0xff] %v16143_v15  ;;  %v4383_v49 = vsel %vm983_vm7, %v4381_v5, %v4382_v56  ;;  %v4856_v24 = vshrl.u32 %v4381_v5, 16  ;;  %v4859_v27 = vshll.u32 %v4381_v5, 16  ;;  %13204 = vmatpush3.bf16.msra.mxu1 %v14320_v14  ;;  %v12206_v23 = vcombine.low %v4008_v46, %v4008_v46 }
 0x22b   : > { %v16140_v61 = vpop.f32.mrf.mxu1  ;;  %v4823_v51 = vrot.slane %v4821_v63, 3  ;;  %v4826_v20 = vrot.slane %v4824_v55, 4  ;;  %v4864_v10 = vshrl.u32 %v4383_v49, 16  ;;  %v4867_v63 = vshll.u32 %v4383_v49, 16 }
 0x22c   : > { %v4858_v55 = vrot.slane %v4856_v24, 3  ;;  %v4861_v15 = vrot.slane %v4859_v27, 4  ;;  %v4959_v56 = vshrl.u32 %v12205_v6, 16  ;;  %v4962_v39 = vshll.u32 %v12205_v6, 16 }
 0x22d   : > { %v16147_v41 = vpop.f32.mrf.mxu1  ;;  %v4827_v58 = vor.u32 %v4826_v20, %v4823_v51  ;;  %v4286_v51 = vor.u32 %v4285_v44, %v4282_v4  ;;  %v4866_v20 = vrot.slane %v4864_v10, 3  ;;  %v4869_v5 = vrot.slane %v4867_v63, 4  ;;  %v4010_v44 = vld [vmem:[#allocation2 + $0x104] sm:$0xf] }
 0x22e   : > { %v4967_v42 = vshrl.u32 %v12206_v23, 16  ;;  %v4970_v26 = vshll.u32 %v12206_v23, 16  ;;  %v4964_v46 = vrot.slane %v4962_v39, 4  ;;  %v4384_v4 = vrot.slane %v16087_v52, 5 }
 0x22f   : > { %v16155_v3 = vpop.f32.mrf.mxu1  ;;  %v4828_v30 = vsel %vm1032_vm3, %v4819_v47, %v4827_v58  ;;  %v4976_v14 = vshrl.u32 %v4286_v51, 16  ;;  %v4979_v49 = vshll.u32 %v4286_v51, 16  ;;  %v4870_v47 = vor.u32 %v4869_v5, %v4866_v20  ;;  %v14301_v5 = vld [vmem:[#allocation2 + $0xec] ss:$0 sps:$4 sm:$0x11]  }
 0x230   : > { %v16153_v60 = vpop.f32.mrf.mxu0  ;;  %18885 = vst [vmem:[#allocation132_spill] sm:$0xff] %v16155_v3  ;;  %13760 = vmatmul.mubr.bf16.gmra.mxu1 %v4828_v30  ;;  %v4862_v3 = vor.u32 %v4861_v15, %v4858_v55  ;;  %v4961_v58 = vrot.slane %v4959_v56, 3  ;;  %v4969_v27 = vrot.slane %v4967_v42, 3  ;;  %v4972_v30 = vrot.slane %v4970_v26, 4  ;;  %v4011_v55 = vld [vmem:[#allocation2 + $0x108] sm:$0xf] }
 0x231   : > { %18884 = vst [vmem:[#allocation131_spill] sm:$0xff] %v16153_v60  ;;  %v14299_v60 = vld [vmem:[#allocation2 + $0xdc] ss:$0 sps:$4 sm:$0x11]   ;;  %v16160_v12 = vpop.f32.mrf.mxu1  ;;  %v4978_v10 = vrot.slane %v4976_v14, 3  ;;  %v4981_v63 = vrot.slane %v4979_v49, 4 }
 0x232   : > { %v16158_v36 = vpop.f32.mrf.mxu0  ;;  %18886 = vst [vmem:[#allocation133_spill] sm:$0xff] %v16160_v12  ;;  %v4871_v15 = vsel %vm1032_vm3, %v4862_v3, %v4870_v47  ;;  %v4385_v6 = vrot.slane %v14299_v60, 5  ;;  %v4965_v23 = vor.u32 %v4964_v46, %v4961_v58  ;;  %v4973_v12 = vor.u32 %v4972_v30, %v4969_v27  ;;  %v4009_v46 = vld [vmem:[#allocation2 + $0x100] sm:$0x8] }
 0x233   : > { %13763 = vmatprep.mubr.bf16.mxu1 %v4871_v15  ;;  %v4899_v51 = vshrl.u32 %v4384_v4, 16  ;;  %v4902_v20 = vshll.u32 %v4384_v4, 16  ;;  %v4982_v39 = vor.u32 %v4981_v63, %v4978_v10  ;;  %v16174_v58 = vcombine.low %v4010_v44, %v4011_v55 }
 0x234   : > { %v16162_v24 = vpop.f32.mrf.mxu0  ;;  %v4386_v42 = vsel %vm983_vm7, %v4384_v4, %v4385_v6  ;;  %v4974_v52 = vsel %vm1032_vm3, %v4965_v23, %v4973_v12  ;;  %v4387_v30 = vrot.slane %v16118_v37, 5  ;;  %v4388_v10 = vrot.slane %v14301_v5, 5 }
 0x235   : > { %18887 = vst [vmem:[#allocation134_spill] sm:$0xff] %v16162_v24  ;;  %v4901_v14 = vrot.slane %v4899_v51, 3  ;;  %v4904_v49 = vrot.slane %v4902_v20, 4  ;;  %v4907_v3 = vshrl.u32 %v4386_v42, 16  ;;  %5464 = vmatprep.mubr.bf16.mxu0 %v4982_v39  ;;  %v4910_v47 = vshll.u32 %v4386_v42, 16 }
 0x236   : > { %v16169_v26 = vpop.f32.mrf.mxu0  ;;  %5465 = vmatmul.mubr.bf16.gmra.mxu0 %v4974_v52  ;;  %v4288_v15 = vshrl.u32 %v16174_v58, 16  ;;  %v4291_v12 = vshll.u32 %v16174_v58, 16  ;;  %v4389_v51 = vsel %vm983_vm7, %v4387_v30, %v4388_v10  ;;  %v4942_v20 = vshrl.u32 %v4387_v30, 16 }
 0x237   : > { %18888 = vst [vmem:[#allocation135_spill] sm:$0xff] %v16169_v26  ;;  %v4909_v27 = vrot.slane %v4907_v3, 3  ;;  %v4905_v4 = vor.u32 %v4904_v49, %v4901_v14  ;;  %v4912_v63 = vrot.slane %v4910_v47, 4  ;;  %v4945_v39 = vshll.u32 %v4387_v30, 16 }
 0x238   : > { %v16166_v56 = vpop.f32.mrf.mxu1  ;;  %v12207_v42 = vcombine.low %v4009_v46, %v4010_v44  ;;  %v4290_v3 = vrot.slane %v4288_v15, 4  ;;  %v4293_v24 = vrot.slane %v4291_v12, 5  ;;  %v4950_v37 = vshrl.u32 %v4389_v51, 16 }
 0x239   : > { %v4913_v52 = vor.u32 %v4912_v63, %v4909_v27  ;;  %v4944_v14 = vrot.slane %v4942_v20, 3  ;;  %v4947_v49 = vrot.slane %v4945_v39, 4  ;;  %v4953_v47 = vshll.u32 %v4389_v51, 16 }
 0x23a   : > { %v16172_v60 = vpop.f32.mrf.mxu1  ;;  %v12208_v26 = vcombine.low %v4011_v55, %v4011_v55  ;;  %v4952_v22 = vrot.slane %v4950_v37, 3  ;;  %v5005_v27 = vshll.u32 %v12207_v42, 16 }
 0x23b   : > { %v4914_v43 = vsel %vm1032_vm3, %v4905_v4, %v4913_v52  ;;  %v4948_v44 = vor.u32 %v4947_v49, %v4944_v14  ;;  %v4955_v46 = vrot.slane %v4953_v47, 4  ;;  %v4013_v47 = vld [vmem:[#allocation2 + $0x114] sm:$0xf] }
 0x23c   : > { %v16181_v23 = vpop.f32.mrf.mxu1  ;;  %13764 = vmatmul.mubr.bf16.gmra.mxu1 %v4914_v43  ;;  %v5010_v30 = vshrl.u32 %v12208_v26, 16  ;;  %v5013_v20 = vshll.u32 %v12208_v26, 16  ;;  %v5007_v51 = vrot.slane %v5005_v27, 4 }
 0x23d   : > { %v16179_v6 = vpop.f32.mrf.mxu0  ;;  %18890 = vst [vmem:[#allocation137_spill] sm:$0xff] %v16181_v23  ;;  %v5002_v23 = vshrl.u32 %v12207_v42, 16  ;;  %v4956_v55 = vor.u32 %v4955_v46, %v4952_v22  ;;  %v14306_v46 = vld [vmem:[#allocation2 + $0x10c] ss:$0 sps:$4 sm:$0x11]  }
 0x23e   : > { %18889 = vst [vmem:[#allocation136_spill] sm:$0xff] %v16179_v6  ;;  %v4294_v6 = vor.u32 %v4293_v24, %v4290_v3  ;;  %v16187_v10 = vpop.f32.mrf.mxu1  ;;  %v5012_v4 = vrot.slane %v5010_v30, 3  ;;  %v4390_v24 = vrot.slane %v16145_v54, 5  ;;  %v5015_v37 = vrot.slane %v5013_v20, 4  ;;  %v14321_v30 = vld [vmem:[#allocation9 + $0x150] sm:$0xff]  }
 0x23f   : > { %v16184_v5 = vpop.f32.mrf.mxu0  ;;  %18892 = vst [vmem:[#allocation139_spill] sm:$0xff] %v16187_v10  ;;  %v5004_v12 = vrot.slane %v5002_v23, 3  ;;  %v4957_v42 = vsel %vm1032_vm3, %v4948_v44, %v4956_v55  ;;  %v4014_v44 = vld [vmem:[#allocation2 + $0x118] sm:$0xf]  ;;  %v4012_v55 = vld [vmem:[#allocation2 + $0x110] sm:$0x8]  ;;  %13785 = vmatprep.subr.bf16.mxu0 %v14321_v30 }
 0x240   : > { %18891 = vst [vmem:[#allocation138_spill] sm:$0xff] %v16184_v5  ;;  %v5019_v63 = vshrl.u32 %v4294_v6, 16  ;;  %v5022_v15 = vshll.u32 %v4294_v6, 16  ;;  %v4391_v5 = vrot.slane %v14304_v35, 5  ;;  %v4985_v49 = vshrl.u32 %v4390_v24, 16  ;;  %13767 = vmatprep.mubr.bf16.mxu1 %v4957_v42  ;;  %13786 = vmatpush3.bf16.msra.mxu0 %v14321_v30 }
 0x241   : > { %v16189_v39 = vpop.f32.mrf.mxu0  ;;  %v5008_v14 = vor.u32 %v5007_v51, %v5004_v12  ;;  %v4988_v6 = vshll.u32 %v4390_v24, 16  ;;  %v5016_v26 = vor.u32 %v5015_v37, %v5012_v4  ;;  %v14322_v4 = vld [vmem:[#allocation9 + $0x120] sm:$0xff]   ;;  %v12226_v37 = vcombine.low %v4013_v47, %v4014_v44 }
 0x242   : > { %18893 = vst [vmem:[#allocation140_spill] sm:$0xff] %v16189_v39  ;;  %v5021_v52 = vrot.slane %v5019_v63, 3  ;;  %v5024_v3 = vrot.slane %v5022_v15, 4  ;;  %v4392_v22 = vsel %vm983_vm7, %v4390_v24, %v4391_v5  ;;  %v4987_v35 = vrot.slane %v4985_v49, 3  ;;  %v14323_v5 = vld [vmem:[#allocation9 + $0xe0] sm:$0xff]   ;;  %13205 = vmatprep.subr.bf16.mxu1 %v14322_v4 }
 0x243   : > { %v16196_v27 = vpop.f32.mrf.mxu0  ;;  %v4990_v63 = vrot.slane %v4988_v6, 4  ;;  %v4993_v15 = vshrl.u32 %v4392_v22, 16  ;;  %v4996_v20 = vshll.u32 %v4392_v22, 16  ;;  %v5017_v12 = vsel %vm1032_vm3, %v5008_v14, %v5016_v26  ;;  %13206 = vmatpush3.bf16.msra.mxu1 %v14323_v5 }
 0x244   : > { %v5025_v23 = vor.u32 %v5024_v3, %v5021_v52  ;;  %18894 = vst [vmem:[#allocation141_spill] sm:$0xff] %v16196_v27  ;;  %v4393_v42 = vrot.slane %v16174_v58, 5  ;;  %v4394_v49 = vrot.slane %v14306_v46, 5  ;;  %v12209_v14 = vcombine.low %v4012_v55, %v4013_v47  ;;  %v14309_v55 = vld [vmem:[#allocation2 + $0x11c] ss:$0 sps:$4 sm:$0x11]  }
 0x245   : > { %v16192_v43 = vpop.f32.mrf.mxu1  ;;  %v4991_v24 = vor.u32 %v4990_v63, %v4987_v35  ;;  %v4995_v52 = vrot.slane %v4993_v15, 3  ;;  %v4998_v3 = vrot.slane %v4996_v20, 4  ;;  %v4296_v22 = vshrl.u32 %v12226_v37, 16 }
 0x246   : > { %5472 = vmatprep.mubr.bf16.mxu0 %v5025_v23  ;;  %v4299_v39 = vshll.u32 %v12226_v37, 16  ;;  %v4395_v35 = vsel %vm983_vm7, %v4393_v42, %v4394_v49  ;;  %v5028_v63 = vshrl.u32 %v4393_v42, 16  ;;  %v5031_v58 = vshll.u32 %v4393_v42, 16 }
 0x247   : > { %v16198_v54 = vpop.f32.mrf.mxu1  ;;  %5473 = vmatmul.mubr.bf16.gmra.mxu0 %v5017_v12  ;;  %v4999_v23 = vor.u32 %v4998_v3, %v4995_v52  ;;  %v5036_v46 = vshrl.u32 %v4395_v35, 16  ;;  %v5039_v12 = vshll.u32 %v4395_v35, 16  ;;  %v4298_v30 = vrot.slane %v4296_v22, 4 }
 0x248   : > { %v4301_v4 = vrot.slane %v4299_v39, 5  ;;  %v5030_v52 = vrot.slane %v5028_v63, 3  ;;  %v12210_v47 = vcombine.low %v4014_v44, %v4014_v44  ;;  %v5033_v5 = vrot.slane %v5031_v58, 4 }
 0x249   : > { %v16201_v51 = vpop.f32.mrf.mxu1  ;;  %v5000_v20 = vsel %vm1032_vm3, %v4991_v24, %v4999_v23  ;;  %v5041_v27 = vrot.slane %v5039_v12, 4  ;;  %v5045_v49 = vshrl.u32 %v12209_v14, 16  ;;  %v4396_v39 = vrot.slane %v12226_v37, 5 }
 0x24a   : > { %18895 = vst [vmem:[#allocation142_spill] sm:$0xff] %v16201_v51  ;;  %13768 = vmatmul.mubr.bf16.gmra.mxu1 %v5000_v20  ;;  %v4302_v51 = vor.u32 %v4301_v4, %v4298_v30  ;;  %v5053_v10 = vshrl.u32 %v12210_v47, 16  ;;  %v5056_v24 = vshll.u32 %v12210_v47, 16  ;;  %v5034_v23 = vor.u32 %v5033_v5, %v5030_v52 }
 0x24b   : > { %v16204_v6 = vpop.f32.mrf.mxu0  ;;  %v16206_v26 = vpop.f32.mrf.mxu1  ;;  %v5047_v22 = vrot.slane %v5045_v49, 3  ;;  %v4397_v12 = vrot.slane %v14309_v55, 5  ;;  %v5071_v31 = vshrl.u32 %v4396_v39, 16  ;;  %v5074_v47 = vshll.u32 %v4396_v39, 16 }
 0x24c   : > { %18896 = vst [vmem:[#allocation143_spill] sm:$0xff] %v16204_v6  ;;  %18897 = vst [vmem:[#allocation144_spill] sm:$0xff] %v16206_v26  ;;  %v5038_v6 = vrot.slane %v5036_v46, 3  ;;  %v5062_v44 = vshrl.u32 %v4302_v51, 16  ;;  %v5065_v20 = vshll.u32 %v4302_v51, 16  ;;  %v5058_v46 = vrot.slane %v5056_v24, 4 }
 0x24d   : > { %v16209_v15 = vpop.f32.mrf.mxu0  ;;  %v5073_v51 = vrot.slane %v5071_v31, 3  ;;  %v5076_v5 = vrot.slane %v5074_v47, 4  ;;  %v16248_v47 = vadd.f32 %v16198_v54, %v16192_v43  ;;  %v12869_v43 = vadd.f32 %v15969_v29, %v15965_v53 }
 0x24e   : > { %18898 = vst [vmem:[#allocation145_spill] sm:$0xff] %v16209_v15  ;;  %v5048_v15 = vshll.u32 %v12209_v14, 16  ;;  %v5042_v35 = vor.u32 %v5041_v27, %v5038_v6  ;;  %v5064_v30 = vrot.slane %v5062_v44, 3  ;;  %v5067_v14 = vrot.slane %v5065_v20, 4 }
 0x24f   : > { %v16212_v3 = vpop.f32.mrf.mxu0  ;;  %v4398_v6 = vsel %vm983_vm7, %v4396_v39, %v4397_v12  ;;  %v16238_v12 = vadd.f32 %v16147_v41, %v16140_v61 }
 0x250   : > { %18899 = vst [vmem:[#allocation146_spill] sm:$0xff] %v16212_v3  ;;  %v12991_v26 = vpop.f32.mrf.mxu1  ;;  %v5050_v50 = vrot.slane %v5048_v15, 4  ;;  %v5055_v3 = vrot.slane %v5053_v10, 3  ;;  %v5043_v58 = vsel %vm1032_vm3, %v5034_v23, %v5042_v35  ;;  %v14324_v15 = vld [vmem:[#allocation9 + $0x118] sm:$0xff]   ;;  %v5068_v52 = vor.u32 %v5067_v14, %v5064_v30 }
 0x251   : > { %v16214_v42 = vpop.f32.mrf.mxu0  ;;  %13771 = vmatprep.mubr.bf16.mxu1 %v5043_v58  ;;  %v14325_v10 = vld [vmem:[#allocation9 + $0xd8] sm:$0xff]   ;;  %v5079_v49 = vshrl.u32 %v4398_v6, 16  ;;  %v5082_v55 = vshll.u32 %v4398_v6, 16  ;;  %13207 = vmatprep.subr.bf16.mxu1 %v14324_v15  ;;  %v16242_v14 = vadd.f32 %v16172_v60, %v16166_v56  ;;  %v14326_v56 = vld [vmem:[#allocation9 + $0x148] sm:$0xff]   ;;  %v14327_v60 = vld [vmem:[#allocation9 + $0x110] sm:$0xff]  }
 0x252   : > { %18900 = vst [vmem:[#allocation147_spill] sm:$0xff] %v16214_v42  ;;  %v12992_v63 = vpop.f32.mrf.mxu1  ;;  %v5051_v4 = vor.u32 %v5050_v50, %v5047_v22  ;;  %v5059_v37 = vor.u32 %v5058_v46, %v5055_v3  ;;  %5480 = vmatprep.mubr.bf16.mxu0 %v5068_v52  ;;  %v5077_v50 = vor.u32 %v5076_v5, %v5073_v51  ;;  %v14328_v51 = vld [vmem:[#allocation9 + $0xd0] sm:$0xff]  }
 0x253   : > { %v5081_v35 = vrot.slane %v5079_v49, 3  ;;  %v5084_v22 = vrot.slane %v5082_v55, 4  ;;  %13208 = vmatpush3.bf16.msra.mxu1 %v14325_v10  ;;  %v16234_v46 = vadd.f32 %v16121_v28, %v16114_v13  ;;  %v16254_v13 = vadd.f32 %v12992_v63, %v12991_v26  ;;  %13787 = vmatprep.subr.bf16.mxu0 %v14326_v56 }
 0x254   : > { %v16219_v27 = vpop.f32.mrf.mxu1  ;;  %v5060_v23 = vsel %vm1032_vm3, %v5051_v4, %v5059_v37  ;;  %13788 = vmatpush3.bf16.msra.mxu0 %v14326_v56  ;;  %13209 = vmatprep.subr.bf16.mxu1 %v14327_v60  ;;  %v3454_v63 = vadd.f32 %v12869_v43, %v15958_v0  ;;  %v14329_v0 = vld [vmem:[#allocation9 + $0x108] sm:$0xff]  }
 0x255   : > { %5481 = vmatmul.mubr.bf16.gmra.mxu0 %v5060_v23  ;;  %v5085_v31 = vor.u32 %v5084_v22, %v5081_v35  ;;  %v14330_v22 = vld [vmem:[#allocation9 + $0xc8] sm:$0xff]  }
 0x256   : > { %v16217_v42 = vpop.f32.mrf.mxu0  ;;  %v16227_v3 = vpop.f32.mrf.mxu1  ;;  %v5853_v56 = vld [vmem:[#allocation3 + $0x2c] sm:$0x1] }
 0x257   : > { %v5086_v20 = vsel %vm1032_vm3, %v5077_v50, %v5085_v31  ;;  %13210 = vmatpush3.bf16.msra.mxu1 %v14328_v51  ;;  %v5805_v50 = vld [vmem:[#allocation3 + $0x20] sm:$0x8]  ;;  %v5802_v31 = vld [vmem:[#allocation3 + $0x10] sm:$0x8]  ;;  %v5854_v51 = vsel %vm15131_vm6, 0, %v5853_v56 }
 0x258   : > { %v16222_v24 = vpop.f32.mrf.mxu0  ;;  %13772 = vmatmul.mubr.bf16.gmra.mxu1 %v5086_v20  ;;  %v5806_v35 = vsel %vm15008_vm2, 0, %v5805_v50  ;;  %13211 = vmatprep.subr.bf16.mxu1 %v14329_v0  ;;  %5855 = vst [vmem:[#allocation3 + $0x2c] sm:$0x1] %v5854_v51  ;;  %v5856_v56 = vld [vmem:[#allocation3 + $0x3c] sm:$0x1] }
 0x259   : > { %5807 = vst [vmem:[#allocation3 + $0x20] sm:$0x8] %v5806_v35 }
 0x25a   : > { %v16225_v44 = vpop.f32.mrf.mxu0 }
 0x25b   : > { %13212 = vmatpush3.bf16.msra.mxu1 %v14330_v22  ;;  %v5859_v22 = vld [vmem:[#allocation3 + $0x4c] sm:$0x1] }
 0x25c   : > { %v16229_v39 = vpop.f32.mrf.mxu0 }
 0x25e   : > { %v12997_v58 = vpop.f32.mrf.mxu1 }
 0x260   : > { %v12998_v30 = vpop.f32.mrf.mxu1  ;;  %v16244_v4 = vpop.f32.mrf.mxu0 }
 0x261   : > { %v16256_v28 = vadd.f32 %v12998_v30, %v12997_v58  ;;  %v5803_v30 = vsel %vm15008_vm2, 0, %v5802_v31  ;;  %v5860_v31 = vsel %vm15131_vm6, 0, %v5859_v22  ;;  %v5811_v22 = vld [vmem:[#allocation3 + $0x40] sm:$0x8] }
 0x262   : > { %v16250_v37 = vpop.f32.mrf.mxu1  ;;  %v16252_v6 = vpop.f32.mrf.mxu0  ;;  %5804 = vst [vmem:[#allocation3 + $0x10] sm:$0x8] %v5803_v30  ;;  %5861 = vst [vmem:[#allocation3 + $0x4c] sm:$0x1] %v5860_v31  ;;  %v5865_v31 = vld [vmem:[#allocation3 + $0x6c] sm:$0x1] }
 0x264   : > { %v16258_v61 = vpop.f32.mrf.mxu0  ;;  %v16260_v41 = vpop.f32.mrf.mxu1 }
 0x265   : > { %18901 = vst [vmem:[#allocation148_spill] sm:$0xff] %v16258_v61 }
 0x266   : > { %v16264_v54 = vpop.f32.mrf.mxu0 }
 0x267   : > { %18902 = vst [vmem:[#allocation149_spill] sm:$0xff] %v16264_v54 }
 0x268   : > { %v13003_v15 = vpop.f32.mrf.mxu1 }
 0x26a   : > { %v13004_v26 = vpop.f32.mrf.mxu1 }
 0x26b   : > { %v13005_v10 = vadd.f32 %v13004_v26, %v13003_v15  ;;  %v5850_v26 = vld [vmem:[#allocation3 + $0x1c] sm:$0x1] }
 0x26c   : > { %v16269_v5 = vpop.f32.mrf.mxu1 }
 0x26d   : > { %v16267_v52 = vpop.f32.mrf.mxu0  ;;  %v3759_v49 = vadd.f32 %v13005_v10, %v3454_v63  ;;  %v5851_v63 = vsel %vm15131_vm6, 0, %v5850_v26  ;;  %v14332_v26 = vld [vmem:[#allocation9 + $0x100] sm:$0xff]  }
 0x26e   : > { %18903 = vst [vmem:[#allocation150_spill] sm:$0xff] %v16267_v52  ;;  %v16278_v29 = vpop.f32.mrf.mxu1  ;;  %5852 = vst [vmem:[#allocation3 + $0x1c] sm:$0x1] %v5851_v63  ;;  %v14333_v63 = vld [vmem:[#allocation9 + $0xc0] sm:$0xff]   ;;  %13213 = vmatprep.subr.bf16.mxu1 %v14332_v26 }
 0x26f   : > { %v16271_v55 = vpop.f32.mrf.mxu0  ;;  %v16274_v23 = vadd.f32 %v16158_v36, %v3759_v49  ;;  %18907 = vst [vmem:[#allocation154_spill] sm:$0xff] %v16278_v29  ;;  %v5808_v49 = vld [vmem:[#allocation3 + $0x30] sm:$0x8]  ;;  %13214 = vmatpush3.bf16.msra.mxu1 %v14333_v63  ;;  %v18998_v29 = vld [vmem:[#allocation71_spill] sm:$0xff] }
 0x270   : > { %18904 = vst [vmem:[#allocation151_spill] sm:$0xff] %v16271_v55  ;;  %v5809_v0 = vsel %vm15008_vm2, 0, %v5808_v49  ;;  %v18948_v55 = vld [vmem:[#allocation37_spill] sm:$0xff] }
 0x271   : > { %18905 = vst [vmem:[#allocation152_spill] sm:$0xff] %v16274_v23  ;;  %v16276_v53 = vpop.f32.mrf.mxu0  ;;  %5810 = vst [vmem:[#allocation3 + $0x30] sm:$0x8] %v5809_v0  ;;  %v5857_v23 = vsel %vm15131_vm6, 0, %v5856_v56  ;;  %v5866_v56 = vsel %vm15131_vm6, 0, %v5865_v31  ;;  %v16334_v31 = vld [vmem:[#allocation9 + $0xb8] sm:$0xff]  }
 0x272   : > { %18906 = vst [vmem:[#allocation153_spill] sm:$0xff] %v16276_v53  ;;  %5858 = vst [vmem:[#allocation3 + $0x3c] sm:$0x1] %v5857_v23  ;;  %13823 = vmatprep.subr.bf16.mxu1 %v16334_v31 }
 0x273   : > { %v16282_v20 = vpop.f32.mrf.mxu0  ;;  %5867 = vst [vmem:[#allocation3 + $0x6c] sm:$0x1] %v5866_v56  ;;  %18925 = vst [vmem:[#allocation172_spill] sm:$0xff] %v16334_v31  ;;  %v12815_v31 = vadd.f32 %v15689_v21, %v15674_v57  ;;  %v18937_v21 = vld [vmem:[#allocation26_spill] sm:$0xff] }
 0x274   : > { %18908 = vst [vmem:[#allocation155_spill] sm:$0xff] %v16282_v20  ;;  %v13009_v58 = vpop.f32.mrf.mxu1  ;;  %v18945_v20 = vld [vmem:[#allocation34_spill] sm:$0xff] }
 0x276   : > { %v13010_v36 = vpop.f32.mrf.mxu1 }
 0x277   : > { %v16286_v60 = vadd.f32 %v13010_v36, %v13009_v58  ;;  %v14331_v36 = vld [vmem:[#allocation9 + $0x140] sm:$0xff]  }
 0x278   : > { %v16290_v43 = vpop.f32.mrf.mxu0  ;;  %v16292_v15 = vpop.f32.mrf.mxu1  ;;  %13789 = vmatprep.subr.bf16.mxu0 %v14331_v36 }
 0x279   : > { %18909 = vst [vmem:[#allocation156_spill] sm:$0xff] %v16286_v60  ;;  %18910 = vst [vmem:[#allocation157_spill] sm:$0xff] %v16290_v43  ;;  %13790 = vmatpush3.bf16.msra.mxu0 %v14331_v36  ;;  %v18975_v60 = vld [vmem:[#allocation51_spill] sm:$0xff] }
 0x27a   : > { %18911 = vst [vmem:[#allocation158_spill] sm:$0xff] %v16292_v15  ;;  %v16296_v10 = vpop.f32.mrf.mxu0  ;;  %v16300_v35 = vpop.f32.mrf.mxu1 }
 0x27b   : > { %18912 = vst [vmem:[#allocation159_spill] sm:$0xff] %v16296_v10  ;;  %18914 = vst [vmem:[#allocation161_spill] sm:$0xff] %v16300_v35  ;;  %v5812_v10 = vsel %vm15008_vm2, 0, %v5811_v22  ;;  %v18988_v35 = vld [vmem:[#allocation58_spill] sm:$0xff] }
 0x27c   : > { %v16298_v50 = vpop.f32.mrf.mxu0  ;;  %5813 = vst [vmem:[#allocation3 + $0x40] sm:$0x8] %v5812_v10 }
 0x27d   : > { %18913 = vst [vmem:[#allocation160_spill] sm:$0xff] %v16298_v50 }
 0x27e   : > { %v16306_v58 = vpop.f32.mrf.mxu0 }
 0x27f   : > { %18915 = vst [vmem:[#allocation162_spill] sm:$0xff] %v16306_v58 }
 0x280   : > { %v13015_v30 = vpop.f32.mrf.mxu1 }
 0x282   : > { %v13016_v51 = vpop.f32.mrf.mxu1 }
 0x283   : > { %v16310_v50 = vadd.f32 %v13016_v51, %v13015_v30  ;;  %v16312_v49 = vpop.f32.mrf.mxu0  ;;  %v5862_v30 = vld [vmem:[#allocation3 + $0x5c] sm:$0x1] }
 0x284   : > { %18917 = vst [vmem:[#allocation164_spill] sm:$0xff] %v16312_v49  ;;  %v16314_v0 = vpop.f32.mrf.mxu1  ;;  %v5863_v51 = vsel %vm15131_vm6, 0, %v5862_v30 }
 0x285   : > { %18916 = vst [vmem:[#allocation163_spill] sm:$0xff] %v16310_v50  ;;  %18918 = vst [vmem:[#allocation165_spill] sm:$0xff] %v16314_v0  ;;  %v16316_v58 = vpop.f32.mrf.mxu0  ;;  %v18944_v50 = vld [vmem:[#allocation33_spill] sm:$0xff] }
 0x286   : > { %18919 = vst [vmem:[#allocation166_spill] sm:$0xff] %v16316_v58  ;;  %v16324_v36 = vpop.f32.mrf.mxu1  ;;  %5864 = vst [vmem:[#allocation3 + $0x5c] sm:$0x1] %v5863_v51  ;;  %v12809_v51 = vadd.f32 %v15642_v45, %v15634_v33  ;;  %v12818_v33 = vadd.f32 %v15709_v32, %v15698_v19  ;;  %v18932_v45 = vld [vmem:[#allocation21_spill] sm:$0xff] }
 0x287   : > { %v16322_v23 = vpop.f32.mrf.mxu0  ;;  %18921 = vst [vmem:[#allocation168_spill] sm:$0xff] %v16324_v36  ;;  %v18940_v32 = vld [vmem:[#allocation29_spill] sm:$0xff] }
 0x288   : > { %18920 = vst [vmem:[#allocation167_spill] sm:$0xff] %v16322_v23 }
 0x289   : > { %v16328_v26 = vpop.f32.mrf.mxu0 }
 0x28a   : > { %18922 = vst [vmem:[#allocation169_spill] sm:$0xff] %v16328_v26 }
 0x28c   : > { %v13021_v63 = vpop.f32.mrf.mxu1 }
 0x28e   : > { %v13022_v58 = vpop.f32.mrf.mxu1 }
 0x28f   : > { %v16330_v49 = vadd.f32 %v13022_v58, %v13021_v63  ;;  %v16349_v58 = vadd.f32 %v15648_v25, %v15638_v59  ;;  %v12812_v63 = vadd.f32 %v15658_v17, %v15651_v48  ;;  %v18931_v59 = vld [vmem:[#allocation20_spill] sm:$0xff]  ;;  %v18933_v48 = vld [vmem:[#allocation22_spill] sm:$0xff] }
 0x290   : > { %v16332_v22 = vpop.f32.mrf.mxu0  ;;  %v16336_v10 = vpop.f32.mrf.mxu1  ;;  %v16367_v25 = vadd.f32 %v18932_v45, %v18931_v59  ;;  %v18934_v17 = vld [vmem:[#allocation24_spill] sm:$0xff]  ;;  %v18941_v59 = vld [vmem:[#allocation31_spill] sm:$0xff] }
 0x291   : > { %18923 = vst [vmem:[#allocation170_spill] sm:$0xff] %v16330_v49  ;;  %18924 = vst [vmem:[#allocation171_spill] sm:$0xff] %v16332_v22  ;;  %v16355_v22 = vadd.f32 %v15669_v16, %v15656_v2  ;;  %v12821_v26 = vadd.f32 %v18934_v17, %v18933_v48  ;;  %v5871_v16 = vld [vmem:[#allocation3 + $0x8c] sm:$0x1]  ;;  %v12827_v45 = vadd.f32 %v18941_v59, %v18940_v32  ;;  %v18942_v48 = vld [vmem:[#allocation30_spill] sm:$0xff] }
 0x292   : > { %18926 = vst [vmem:[#allocation173_spill] sm:$0xff] %v16336_v10  ;;  %v16338_v56 = vpop.f32.mrf.mxu0  ;;  %v16343_v30 = vpop.f32.mrf.mxu1  ;;  %v18936_v10 = vld [vmem:[#allocation25_spill] sm:$0xff]  ;;  %v5872_v19 = vsel %vm15131_vm6, 0, %v5871_v16  ;;  %v18943_v17 = vld [vmem:[#allocation32_spill] sm:$0xff] }
 0x293   : > { %18927 = vst [vmem:[#allocation174_spill] sm:$0xff] %v16338_v56  ;;  %18929 = vst [vmem:[#allocation176_spill] sm:$0xff] %v16343_v30  ;;  %v12887_v56 = vadd.f32 %v15692_v1, %v15681_v7  ;;  %v18935_v30 = vld [vmem:[#allocation23_spill] sm:$0xff]  ;;  %v12899_v43 = vadd.f32 %v18943_v17, %v18942_v48  ;;  %v18947_v16 = vld [vmem:[#allocation36_spill] sm:$0xff]  ;;  %v16406_v17 = vadd.f32 %v15820_v34, %v12818_v33 }
 0x294   : > { %v16341_v23 = vpop.f32.mrf.mxu0  ;;  %v16373_v57 = vadd.f32 %v18936_v10, %v18935_v30  ;;  %v18939_v7 = vld [vmem:[#allocation27_spill] sm:$0xff]  ;;  %v12830_v10 = vadd.f32 %v18945_v20, %v18944_v50  ;;  %5873 = vst [vmem:[#allocation3 + $0x8c] sm:$0x1] %v5872_v19  ;;  %v12833_v32 = vadd.f32 %v18948_v55, %v18947_v16  ;;  %v18953_v19 = vld [vmem:[#allocation40_spill] sm:$0xff]  ;;  %v18954_v55 = vld [vmem:[#allocation41_spill] sm:$0xff] }
 0x295   : > { %18928 = vst [vmem:[#allocation175_spill] sm:$0xff] %v16341_v23  ;;  %v16379_v1 = vadd.f32 %v15754_v11, %v18939_v7  ;;  %v18946_v30 = vld [vmem:[#allocation35_spill] sm:$0xff]  ;;  %v5868_v11 = vld [vmem:[#allocation3 + $0x7c] sm:$0x1]  ;;  %v16394_v7 = vadd.f32 %v15805_v8, %v12815_v31  ;;  %v12839_v8 = vadd.f32 %v15832_v38, %v15826_v40  ;;  %v3377_v31 = vadd.f32 %v12812_v63, %v18954_v55  ;;  %v18956_v16 = vld [vmem:[#allocation44_spill] sm:$0xff] }
 0x296   : > { %v16359_v23 = vpop.f32.mrf.mxu0  ;;  %v16391_v53 = vadd.f32 %v15790_v18, %v18946_v30  ;;  %v5869_v20 = vsel %vm15131_vm6, 0, %v5868_v11  ;;  %v18951_v50 = vld [vmem:[#allocation39_spill] sm:$0xff]  ;;  %v18952_v30 = vld [vmem:[#allocation38_spill] sm:$0xff]  ;;  %v16417_v11 = vadd.f32 %v12821_v26, %v18956_v16  ;;  %v18963_v40 = vld [vmem:[#allocation45_spill] sm:$0xff] }
 0x297   : > { %18930 = vst [vmem:[#allocation177_spill] sm:$0xff] %v16359_v23  ;;  %v18938_v23 = vld [vmem:[#allocation28_spill] sm:$0xff]  ;;  %v3374_v18 = vadd.f32 %v12809_v51, %v18951_v50  ;;  %v12836_v52 = vadd.f32 %v18953_v19, %v18952_v30  ;;  %5870 = vst [vmem:[#allocation3 + $0x7c] sm:$0x1] %v5869_v20  ;;  %v18957_v51 = vld [vmem:[#allocation47_spill] sm:$0xff] }
 0x298   : > { %v13027_v2 = vpop.f32.mrf.mxu1  ;;  %v12824_v49 = vadd.f32 %v18938_v23, %v18937_v21  ;;  %v14344_v21 = vld [vmem:[#allocation9 + $0x78] sm:$0xff]   ;;  %v18961_v30 = vld [vmem:[#allocation46_spill] sm:$0xff]  ;;  %v18962_v38 = vld [vmem:[#allocation43_spill] sm:$0xff] }
 0x299   : > { %13335 = vmatprep.subr.bf16.mxu0 %v14344_v21  ;;  %v18958_v50 = vld [vmem:[#allocation49_spill] sm:$0xff]  ;;  %v16426_v19 = vadd.f32 %v18961_v30, %v12830_v10  ;;  %v12842_v21 = vadd.f32 %v18963_v40, %v18962_v38  ;;  %v18964_v63 = vld [vmem:[#allocation55_spill] sm:$0xff]  ;;  %v18968_v16 = vld [vmem:[#allocation48_spill] sm:$0xff]  ;;  %v16444_v38 = vadd.f32 %v18975_v60, %v12839_v8 }
 0x29a   : > { %v13028_v23 = vpop.f32.mrf.mxu1  ;;  %v12845_v34 = vadd.f32 %v18958_v50, %v18957_v51  ;;  %v18965_v20 = vld [vmem:[#allocation57_spill] sm:$0xff]  ;;  %v18966_v55 = vld [vmem:[#allocation59_spill] sm:$0xff]  ;;  %v18970_v50 = vld [vmem:[#allocation64_spill] sm:$0xff] }
 0x29b   : > { %v16400_v48 = vadd.f32 %v13028_v23, %v13027_v2  ;;  %v18955_v2 = vld [vmem:[#allocation42_spill] sm:$0xff]  ;;  %v18969_v51 = vld [vmem:[#allocation63_spill] sm:$0xff]  ;;  %v18974_v30 = vld [vmem:[#allocation72_spill] sm:$0xff] }
 0x29c   : > { %v16398_v59 = vpop.f32.mrf.mxu0  ;;  %v16414_v23 = vadd.f32 %v18955_v2, %v12827_v45  ;;  %v12851_v45 = vadd.f32 %v18965_v20, %v18964_v63  ;;  %v18967_v2 = vld [vmem:[#allocation61_spill] sm:$0xff]  ;;  %v18973_v10 = vld [vmem:[#allocation70_spill] sm:$0xff]  ;;  %v18985_v60 = vld [vmem:[#allocation80_spill] sm:$0xff] }
 0x29d   : > { %18949 = vst [vmem:[#allocation20_spill] sm:$0xff] %v16398_v59  ;;  %18950 = vst [vmem:[#allocation21_spill] sm:$0xff] %v16400_v48  ;;  %v16423_v59 = vpop.f32.mrf.mxu1  ;;  %v12854_v26 = vadd.f32 %v18967_v2, %v18966_v55  ;;  %v16435_v48 = vadd.f32 %v12824_v49, %v18968_v16  ;;  %v12863_v0 = vadd.f32 %v18974_v30, %v18973_v10  ;;  %v18976_v40 = vld [vmem:[#allocation53_spill] sm:$0xff]  ;;  %v18977_v20 = vld [vmem:[#allocation50_spill] sm:$0xff] }
 0x29e   : > { %v16421_v33 = vpop.f32.mrf.mxu0  ;;  %18960 = vst [vmem:[#allocation24_spill] sm:$0xff] %v16423_v59  ;;  %v18972_v59 = vld [vmem:[#allocation67_spill] sm:$0xff]  ;;  %v16447_v63 = vadd.f32 %v12833_v32, %v18976_v40  ;;  %v18978_v55 = vld [vmem:[#allocation52_spill] sm:$0xff]  ;;  %v18979_v49 = vld [vmem:[#allocation74_spill] sm:$0xff] }
 0x29f   : > { %18959 = vst [vmem:[#allocation22_spill] sm:$0xff] %v16421_v33  ;;  %v12857_v33 = vadd.f32 %v18970_v50, %v18969_v51  ;;  %v12860_v36 = vadd.f32 %v18972_v59, %v18971_v62  ;;  %v12848_v2 = vadd.f32 %v18978_v55, %v18977_v20  ;;  %v18980_v16 = vld [vmem:[#allocation76_spill] sm:$0xff]  ;;  %v18982_v51 = vld [vmem:[#allocation54_spill] sm:$0xff]  ;;  %v16464_v40 = vpop.f32.mrf.mxu1  ;;  %v16467_v20 = vadd.f32 %v18988_v35, %v12851_v45  ;;  %v16807_v9 = vld [vmem:[#allocation3 + $0x7c] ss:$0 sps:$4 sm:$0x11]  }
 0x2a0   : > { %v12866_v54 = vadd.f32 %v18980_v16, %v18979_v49  ;;  %v16453_v61 = vpop.f32.mrf.mxu0  ;;  %v16456_v50 = vadd.f32 %v18982_v51, %v12842_v21  ;;  %v18983_v62 = vld [vmem:[#allocation56_spill] sm:$0xff]  ;;  %v18986_v8 = vld [vmem:[#allocation82_spill] sm:$0xff]  ;;  %18987 = vst [vmem:[#allocation25_spill] sm:$0xff] %v16464_v40  ;;  %v18990_v16 = vld [vmem:[#allocation65_spill] sm:$0xff] }
 0x2a1   : > { %18981 = vst [vmem:[#allocation23_spill] sm:$0xff] %v16453_v61  ;;  %v3409_v59 = vadd.f32 %v12836_v52, %v18983_v62  ;;  %v18984_v10 = vld [vmem:[#allocation60_spill] sm:$0xff]  ;;  %v12872_v32 = vadd.f32 %v18986_v8, %v18985_v60  ;;  %v18989_v55 = vld [vmem:[#allocation62_spill] sm:$0xff]  ;;  %v3425_v61 = vadd.f32 %v12848_v2, %v18990_v16  ;;  %v18993_v52 = vld [vmem:[#allocation69_spill] sm:$0xff] }
 0x2a2   : > { %v16460_v30 = vadd.f32 %v12845_v34, %v18984_v10  ;;  %v16470_v49 = vadd.f32 %v18989_v55, %v12854_v26  ;;  %v18991_v21 = vld [vmem:[#allocation84_spill] sm:$0xff]  ;;  %v18992_v51 = vld [vmem:[#allocation86_spill] sm:$0xff]  ;;  %v16476_v62 = vadd.f32 %v12857_v33, %v18993_v52  ;;  %v18994_v34 = vld [vmem:[#allocation73_spill] sm:$0xff]  ;;  %v16487_v26 = vadd.f32 %v18998_v29, %v12866_v54  ;;  %v16498_v52 = vpop.f32.mrf.mxu0 }
 0x2a3   : > { %v12875_v15 = vadd.f32 %v18992_v51, %v18991_v21  ;;  %v16479_v10 = vadd.f32 %v12860_v36, %v18994_v34  ;;  %v18995_v60 = vld [vmem:[#allocation68_spill] sm:$0xff]  ;;  %v18996_v40 = vld [vmem:[#allocation94_spill] sm:$0xff]  ;;  %v19000_v55 = vld [vmem:[#allocation79_spill] sm:$0xff]  ;;  %19006 = vst [vmem:[#allocation29_spill] sm:$0xff] %v16498_v52 }
 0x2a4   : > { %v16482_v8 = vadd.f32 %v18995_v60, %v12863_v0  ;;  %v18997_v35 = vld [vmem:[#allocation96_spill] sm:$0xff]  ;;  %18999 = vst [vmem:[#allocation26_spill] sm:$0xff] %v16487_v26  ;;  %v16490_v2 = vadd.f32 %v19000_v55, %v12887_v56  ;;  %v19002_v16 = vld [vmem:[#allocation81_spill] sm:$0xff]  ;;  %v19005_v51 = vld [vmem:[#allocation99_spill] sm:$0xff] }
 0x2a5   : > { %v12945_v45 = vadd.f32 %v18997_v35, %v18996_v40  ;;  %v16494_v21 = vadd.f32 %v16349_v58, %v19002_v16  ;;  %v19004_v33 = vld [vmem:[#allocation97_spill] sm:$0xff]  ;;  %v5814_v0 = vld [vmem:[#allocation3 + $0x50] sm:$0x8]  ;;  %v19007_v34 = vld [vmem:[#allocation83_spill] sm:$0xff]  ;;  %v13033_v35 = vpop.f32.mrf.mxu1 }
 0x2a6   : > { %19001 = vst [vmem:[#allocation28_spill] sm:$0xff] %v16490_v2  ;;  %v12948_v36 = vadd.f32 %v19005_v51, %v19004_v33  ;;  %v16502_v60 = vadd.f32 %v19007_v34, %v16367_v25  ;;  %v19009_v40 = vld [vmem:[#allocation78_spill] sm:$0xff]  ;;  %v19011_v29 = vld [vmem:[#allocation85_spill] sm:$0xff]  ;;  %v5815_v58 = vsel %vm15008_vm2, 0, %v5814_v0  ;;  %v19013_v55 = vld [vmem:[#allocation88_spill] sm:$0xff] }
 0x2a7   : > { %19003 = vst [vmem:[#allocation27_spill] sm:$0xff] %v16494_v21  ;;  %v16505_v54 = vadd.f32 %v12872_v32, %v19009_v40  ;;  %v16509_v56 = vadd.f32 %v16355_v22, %v19011_v29  ;;  %v16514_v16 = vadd.f32 %v19013_v55, %v12899_v43  ;;  %v19015_v33 = vld [vmem:[#allocation75_spill] sm:$0xff]  ;;  %v19018_v25 = vld [vmem:[#allocation89_spill] sm:$0xff]  ;;  %v19020_v32 = vld [vmem:[#allocation102_spill] sm:$0xff]  ;;  %v3679_v29 = vadd.f32 %v12945_v45, %v3374_v18  ;;  %v16533_v26 = vpop.f32.mrf.mxu0 }
 0x2a8   : > { %19008 = vst [vmem:[#allocation31_spill] sm:$0xff] %v16502_v60  ;;  %v16517_v51 = vadd.f32 %v19015_v33, %v12875_v15  ;;  %v19017_v52 = vld [vmem:[#allocation87_spill] sm:$0xff]  ;;  %v19019_v60 = vld [vmem:[#allocation101_spill] sm:$0xff]  ;;  %5816 = vst [vmem:[#allocation3 + $0x50] sm:$0x8] %v5815_v58  ;;  %v13034_v15 = vpop.f32.mrf.mxu1 }
 0x2a9   : > { %19010 = vst [vmem:[#allocation30_spill] sm:$0xff] %v16505_v54  ;;  %19012 = vst [vmem:[#allocation32_spill] sm:$0xff] %v16509_v56  ;;  %v12878_v34 = vadd.f32 %v19018_v25, %v19017_v52  ;;  %v12951_v40 = vadd.f32 %v19020_v32, %v19019_v60  ;;  %v19021_v2 = vld [vmem:[#allocation90_spill] sm:$0xff]  ;;  %v19022_v56 = vld [vmem:[#allocation104_spill] sm:$0xff]  ;;  %v16535_v60 = vadd.f32 %v13034_v15, %v13033_v35 }
 0x2aa   : > { %19014 = vst [vmem:[#allocation33_spill] sm:$0xff] %v16514_v16  ;;  %19016 = vst [vmem:[#allocation34_spill] sm:$0xff] %v16517_v51  ;;  %v16525_v22 = vadd.f32 %v16373_v57, %v19021_v2  ;;  %v19023_v0 = vld [vmem:[#allocation106_spill] sm:$0xff]  ;;  %v19024_v43 = vld [vmem:[#allocation108_spill] sm:$0xff]  ;;  %v3682_v51 = vadd.f32 %v12948_v36, %v3377_v31 }
 0x2ab   : > { %v12954_v21 = vadd.f32 %v19023_v0, %v19022_v56  ;;  %v19025_v55 = vld [vmem:[#allocation110_spill] sm:$0xff]  ;;  %v19026_v54 = vld [vmem:[#allocation112_spill] sm:$0xff]  ;;  %19028 = vst [vmem:[#allocation35_spill] sm:$0xff] %v16533_v26  ;;  %v19029_v18 = vld [vmem:[#allocation91_spill] sm:$0xff] }
 0x2ac   : > { %v12957_v16 = vadd.f32 %v19025_v55, %v19024_v43  ;;  %v5817_v33 = vld [vmem:[#allocation3 + $0x60] sm:$0x8]  ;;  %v16541_v45 = vadd.f32 %v19029_v18, %v16391_v53  ;;  %v19031_v2 = vld [vmem:[#allocation116_spill] sm:$0xff]  ;;  %v19037_v55 = vld [vmem:[#allocation77_spill] sm:$0xff] }
 0x2ad   : > { %v19027_v52 = vld [vmem:[#allocation114_spill] sm:$0xff]  ;;  %v5818_v57 = vsel %vm15008_vm2, 0, %v5817_v33  ;;  %v19033_v32 = vld [vmem:[#allocation120_spill] sm:$0xff]  ;;  %v3465_v35 = vadd.f32 %v19037_v55, %v12878_v34  ;;  %v19038_v15 = vld [vmem:[#allocation93_spill] sm:$0xff]  ;;  %v3687_v33 = vadd.f32 %v12951_v40, %v16394_v7 }
 0x2ae   : > { %v12960_v25 = vadd.f32 %v19027_v52, %v19026_v54  ;;  %19030 = vst [vmem:[#allocation36_spill] sm:$0xff] %v16541_v45  ;;  %v19032_v56 = vld [vmem:[#allocation118_spill] sm:$0xff]  ;;  %v19036_v43 = vld [vmem:[#allocation128_spill] sm:$0xff]  ;;  %5819 = vst [vmem:[#allocation3 + $0x60] sm:$0x8] %v5818_v57  ;;  %v16552_v52 = vadd.f32 %v16379_v1, %v19038_v15  ;;  %v16557_v45 = vpop.f32.mrf.mxu0 }
 0x2af   : > { %v12963_v58 = vadd.f32 %v19032_v56, %v19031_v2  ;;  %v19034_v0 = vld [vmem:[#allocation122_spill] sm:$0xff]  ;;  %v19039_v53 = vld [vmem:[#allocation132_spill] sm:$0xff]  ;;  %v19040_v18 = vld [vmem:[#allocation133_spill] sm:$0xff]  ;;  %v3690_v2 = vadd.f32 %v12954_v21, %v16406_v17  ;;  %v3695_v56 = vadd.f32 %v12957_v16, %v16417_v11  ;;  %v3711_v16 = vadd.f32 %v16234_v46, %v16447_v63 }
 0x2b0   : > { %v12966_v31 = vadd.f32 %v19034_v0, %v19033_v32  ;;  %v19035_v36 = vld [vmem:[#allocation126_spill] sm:$0xff]  ;;  %v12978_v26 = vadd.f32 %v19040_v18, %v19039_v53  ;;  %v19041_v32 = vld [vmem:[#allocation137_spill] sm:$0xff]  ;;  %v19042_v0 = vld [vmem:[#allocation139_spill] sm:$0xff]  ;;  %v3698_v40 = vadd.f32 %v12960_v25, %v16435_v48  ;;  %v12996_v53 = vadd.f32 %v16227_v3, %v16219_v27  ;;  %v16574_v17 = vpop.f32.mrf.mxu0 }
 0x2b1   : > { %v12972_v54 = vadd.f32 %v19036_v43, %v19035_v36  ;;  %v12984_v57 = vadd.f32 %v19042_v0, %v19041_v32  ;;  %v19043_v36 = vld [vmem:[#allocation142_spill] sm:$0xff]  ;;  %v19044_v34 = vld [vmem:[#allocation144_spill] sm:$0xff]  ;;  %v19045_v55 = vld [vmem:[#allocation95_spill] sm:$0xff]  ;;  %v3703_v11 = vadd.f32 %v12963_v58, %v16414_v23  ;;  %v3727_v48 = vadd.f32 %v16242_v14, %v16460_v30 }
 0x2b2   : > { %v12990_v43 = vadd.f32 %v19044_v34, %v19043_v36  ;;  %v16566_v1 = vadd.f32 %v19045_v55, %v3679_v29  ;;  %v19046_v15 = vld [vmem:[#allocation100_spill] sm:$0xff]  ;;  %v3706_v21 = vadd.f32 %v12966_v31, %v16426_v19  ;;  %v3719_v29 = vadd.f32 %v16238_v12, %v16444_v38  ;;  %v16594_v63 = vpop.f32.mrf.mxu0  ;;  %v19050_v30 = vld [vmem:[#allocation26_spill] sm:$0xff]  ;;  %v19057_v25 = vld [vmem:[#allocation107_spill] sm:$0xff] }
 0x2b3   : > { %v16569_v7 = vadd.f32 %v19046_v15, %v3682_v51  ;;  %v3714_v18 = vadd.f32 %v12972_v54, %v3409_v59  ;;  %v3722_v51 = vadd.f32 %v12978_v26, %v16456_v50  ;;  %v13002_v27 = vadd.f32 %v16260_v41, %v16250_v37  ;;  %v19048_v38 = vld [vmem:[#allocation92_spill] sm:$0xff]  ;;  %v19058_v31 = vld [vmem:[#allocation109_spill] sm:$0xff]  ;;  %v19063_v55 = vld [vmem:[#allocation119_spill] sm:$0xff] }
 0x2b4   : > { %v3730_v3 = vadd.f32 %v12984_v57, %v3425_v61  ;;  %v3735_v23 = vadd.f32 %v16248_v47, %v16467_v20  ;;  %v3738_v19 = vadd.f32 %v12990_v43, %v16470_v49  ;;  %v16592_v46 = vadd.f32 %v16222_v24, %v16217_v42  ;;  %v16605_v61 = vpop.f32.mrf.mxu1  ;;  %v19047_v24 = vld [vmem:[#allocation154_spill] sm:$0xff]  ;;  %v19060_v0 = vld [vmem:[#allocation113_spill] sm:$0xff] }
 0x2b5   : > { %v3743_v12 = vadd.f32 %v16254_v13, %v16476_v62  ;;  %v3746_v14 = vadd.f32 %v12996_v53, %v16479_v10  ;;  %v16601_v37 = vadd.f32 %v16229_v39, %v16225_v44  ;;  %v13087_v47 = vadd.f32 %v16252_v6, %v16244_v4  ;;  %v19049_v13 = vld [vmem:[#allocation98_spill] sm:$0xff]  ;;  %v19052_v39 = vld [vmem:[#allocation161_spill] sm:$0xff]  ;;  %v19053_v62 = vld [vmem:[#allocation103_spill] sm:$0xff] }
 0x2b6   : > { %v3751_v42 = vadd.f32 %v16256_v28, %v16482_v8  ;;  %v13008_v41 = vadd.f32 %v19047_v24, %v16269_v5  ;;  %v3848_v50 = vadd.f32 %v19048_v38, %v3687_v33  ;;  %v16613_v59 = vadd.f32 %v19049_v13, %v3690_v2  ;;  %v19051_v44 = vld [vmem:[#allocation158_spill] sm:$0xff]  ;;  %v19054_v6 = vld [vmem:[#allocation105_spill] sm:$0xff]  ;;  %v19055_v28 = vld [vmem:[#allocation148_spill] sm:$0xff]  ;;  %v16626_v5 = vpop.f32.mrf.mxu0  ;;  %v16637_v32 = vpop.f32.mrf.mxu1 }
 0x2b7   : > { %v3754_v20 = vadd.f32 %v13002_v27, %v19050_v30  ;;  %v13014_v49 = vadd.f32 %v19052_v39, %v19051_v44  ;;  %v16619_v4 = vadd.f32 %v19053_v62, %v3703_v11  ;;  %v16622_v10 = vadd.f32 %v19054_v6, %v3695_v56  ;;  %v19056_v8 = vld [vmem:[#allocation149_spill] sm:$0xff]  ;;  %v19059_v33 = vld [vmem:[#allocation111_spill] sm:$0xff]  ;;  %v19064_v53 = vld [vmem:[#allocation30_spill] sm:$0xff] }
 0x2b8   : > { %v13090_v26 = vadd.f32 %v19056_v8, %v19055_v28  ;;  %v16629_v58 = vadd.f32 %v19057_v25, %v3706_v21  ;;  %v16632_v54 = vadd.f32 %v19058_v31, %v3698_v40  ;;  %v16635_v2 = vadd.f32 %v19059_v33, %v3719_v29  ;;  %v19061_v56 = vld [vmem:[#allocation115_spill] sm:$0xff]  ;;  %v19062_v34 = vld [vmem:[#allocation117_spill] sm:$0xff]  ;;  %v16652_v11 = vpop.f32.mrf.mxu0  ;;  %v19069_v13 = vld [vmem:[#allocation156_spill] sm:$0xff] }
 0x2b9   : > { %v16640_v57 = vadd.f32 %v19060_v0, %v3711_v16  ;;  %v16643_v36 = vadd.f32 %v19061_v56, %v3722_v51  ;;  %v16646_v43 = vadd.f32 %v19062_v34, %v3714_v18  ;;  %v16649_v15 = vadd.f32 %v19063_v55, %v3735_v23  ;;  %v19065_v21 = vld [vmem:[#allocation121_spill] sm:$0xff]  ;;  %v19066_v27 = vld [vmem:[#allocation123_spill] sm:$0xff]  ;;  %v19067_v16 = vld [vmem:[#allocation124_spill] sm:$0xff] }
 0x2ba   : > { %v3762_v40 = vadd.f32 %v13008_v41, %v19064_v53  ;;  %v16655_v29 = vadd.f32 %v19065_v21, %v3727_v48  ;;  %v16658_v24 = vadd.f32 %v19066_v27, %v3738_v19  ;;  %v16661_v38 = vadd.f32 %v19067_v16, %v3730_v3  ;;  %v16663_v51 = vld [vmem:[#allocation3 + $0x2c] ss:$0 sps:$4 sm:$0x11]   ;;  %v19068_v18 = vld [vmem:[#allocation34_spill] sm:$0xff]  ;;  %v19070_v44 = vld [vmem:[#allocation165_spill] sm:$0xff]  ;;  %v13745_v27 = vpop.f32.mrf.mxu1 }
 0x2bb   : > { %v3767_v30 = vadd.f32 %v19069_v13, %v19068_v18  ;;  %v3770_v23 = vadd.f32 %v13014_v49, %v3465_v35  ;;  %v19071_v39 = vld [vmem:[#allocation168_spill] sm:$0xff]  ;;  %v19072_v62 = vld [vmem:[#allocation125_spill] sm:$0xff]  ;;  %v5877_v28 = vld [vmem:[#allocation3 + $0xac] sm:$0x1] }
 0x2bc   : > { %v13020_v41 = vadd.f32 %v19071_v39, %v19070_v44  ;;  %v16670_v6 = vadd.f32 %v19072_v62, %v3751_v42  ;;  %v5874_v48 = vld [vmem:[#allocation3 + $0x9c] sm:$0x1]  ;;  %v19074_v8 = vld [vmem:[#allocation127_spill] sm:$0xff]  ;;  %v5878_v35 = vsel %vm15131_vm6, 0, %v5877_v28  ;;  %v19079_v49 = vld [vmem:[#allocation150_spill] sm:$0xff] }
 0x2bd   : > { %v16673_v19 = vadd.f32 %v19074_v8, %v3743_v12  ;;  %v19076_v25 = vld [vmem:[#allocation129_spill] sm:$0xff]  ;;  %v5875_v0 = vsel %vm15131_vm6, 0, %v5874_v48  ;;  %v19080_v56 = vld [vmem:[#allocation151_spill] sm:$0xff]  ;;  %v19085_v16 = vld [vmem:[#allocation130_spill] sm:$0xff]  ;;  %5879 = vst [vmem:[#allocation3 + $0xac] sm:$0x1] %v5878_v35  ;;  %v5532_v48 = vadd.f32 %v13745_v27, %v13087_v47  ;;  %v16708_v8 = vpop.f32.mrf.mxu0 }
 0x2be   : > { %19073 = vst [vmem:[#allocation37_spill] sm:$0xff] %v16670_v6  ;;  %v16676_v3 = vadd.f32 %v19076_v25, %v3754_v20  ;;  %v16678_v31 = vld [vmem:[#allocation3 + $0x1c] ss:$0 sps:$4 sm:$0x11]   ;;  %v16686_v42 = vadd.f32 %v19080_v56, %v19079_v49  ;;  %v19082_v55 = vld [vmem:[#allocation155_spill] sm:$0xff]  ;;  %v16695_v18 = vadd.f32 %v19085_v16, %v3746_v14  ;;  %v19092_v35 = vld [vmem:[#allocation162_spill] sm:$0xff] }
 0x2bf   : > { %19075 = vst [vmem:[#allocation39_spill] sm:$0xff] %v16673_v19  ;;  %v19081_v34 = vld [vmem:[#allocation153_spill] sm:$0xff]  ;;  %v19083_v12 = vld [vmem:[#allocation27_spill] sm:$0xff]  ;;  %5876 = vst [vmem:[#allocation3 + $0x9c] sm:$0x1] %v5875_v0 }
 0x2c0   : > { %19077 = vst [vmem:[#allocation38_spill] sm:$0xff] %v16676_v3  ;;  %v16690_v53 = vadd.f32 %v19082_v55, %v19081_v34  ;;  %v19084_v21 = vld [vmem:[#allocation163_spill] sm:$0xff]  ;;  %19086 = vst [vmem:[#allocation40_spill] sm:$0xff] %v16695_v18  ;;  %v19087_v44 = vld [vmem:[#allocation157_spill] sm:$0xff]  ;;  %v5652_v18 = vadd.f32 %v5532_v48, %v3848_v50 }
 0x2c1   : > { %v3775_v20 = vadd.f32 %v19084_v21, %v19083_v12  ;;  %v16697_v13 = vld [vmem:[#allocation3 + $0x4c] ss:$0 sps:$4 sm:$0x11]   ;;  %v16706_v28 = vld [vmem:[%s18722_s2] ss:$0 sm:$0xff]  ;;  %v19091_v0 = vld [vmem:[#allocation160_spill] sm:$0xff]  ;;  %v5523_v12 = vpop.f32.mrf.mxu1 }
 0x2c2   : > { %v19088_v39 = vld [vmem:[#allocation159_spill] sm:$0xff]  ;;  %v16714_v56 = vld [vmem:[#allocation3 + $0x3c] ss:$0 sps:$4 sm:$0x11]   ;;  %v16718_v34 = vadd.f32 %v19092_v35, %v19091_v0  ;;  %v19093_v55 = vld [vmem:[#allocation32_spill] sm:$0xff]  ;;  %v5524_v0 = vadd.f32 %v16592_v46, %v5523_v12 }
 0x2c3   : > { %v16701_v62 = vadd.f32 %v19088_v39, %v19087_v44  ;;  %v19089_v14 = vld [vmem:[#allocation135_spill] sm:$0xff]  ;;  %v3778_v47 = vadd.f32 %v13020_v41, %v19093_v55  ;;  %v19096_v16 = vld [vmem:[#allocation134_spill] sm:$0xff]  ;;  %v16727_v39 = vld [vmem:[#allocation3 + $0x5c] ss:$0 sps:$4 sm:$0x11]  }
 0x2c4   : > { %v16712_v49 = vadd.f32 %v19089_v14, %v3762_v40  ;;  %v19094_v21 = vld [vmem:[#allocation131_spill] sm:$0xff]  ;;  %v16725_v44 = vadd.f32 %v19096_v16, %v3770_v23  ;;  %v19098_v40 = vld [vmem:[#allocation164_spill] sm:$0xff]  ;;  %v19099_v14 = vld [vmem:[#allocation166_spill] sm:$0xff] }
 0x2c5   : > { %v16722_v27 = vadd.f32 %v19094_v21, %v3767_v30  ;;  %v16729_v25 = vld [vmem:[#allocation3 + $0x6c] ss:$0 sps:$4 sm:$0x11]   ;;  %v19100_v35 = vld [vmem:[#allocation28_spill] sm:$0xff]  ;;  %v19101_v55 = vld [vmem:[#allocation170_spill] sm:$0xff] }
 0x2c6   : > { %19090 = vst [vmem:[#allocation41_spill] sm:$0xff] %v16712_v49  ;;  %19097 = vst [vmem:[#allocation44_spill] sm:$0xff] %v16725_v44  ;;  %v16733_v49 = vadd.f32 %v19099_v14, %v19098_v40  ;;  %v3783_v30 = vadd.f32 %v19101_v55, %v19100_v35  ;;  %v19102_v21 = vld [vmem:[#allocation173_spill] sm:$0xff]  ;;  %v16744_v16 = vld [vmem:[%s18723_s3] ss:$0 sm:$0xff]  ;;  %v13746_v44 = vpop.f32.mrf.mxu1  ;;  %v5691_v35 = vmul.f32 %v16706_v28, %v5652_v18 }
 0x2c7   : > { %19095 = vst [vmem:[#allocation42_spill] sm:$0xff] %v16722_v27  ;;  %v19103_v27 = vld [vmem:[#allocation176_spill] sm:$0xff]  ;;  %v19104_v14 = vld [vmem:[#allocation138_spill] sm:$0xff]  ;;  %v19106_v46 = vld [vmem:[#allocation167_spill] sm:$0xff]  ;;  %v5650_v55 = vadd.f32 %v5524_v0, %v16566_v1 }
 0x2c8   : > { %v13026_v23 = vadd.f32 %v19103_v27, %v19102_v21  ;;  %v16748_v50 = vadd.f32 %v19104_v14, %v3775_v20  ;;  %v19107_v48 = vld [vmem:[#allocation169_spill] sm:$0xff]  ;;  %v5535_v27 = vadd.f32 %v13746_v44, %v13090_v26  ;;  %v16756_v21 = vpop.f32.mrf.mxu0  ;;  %v5526_v41 = vpop.f32.mrf.mxu1  ;;  %v19110_v26 = vld [vmem:[#allocation171_spill] sm:$0xff]  ;;  %v19111_v44 = vld [vmem:[#allocation174_spill] sm:$0xff] }
 0x2c9   : > { %v16752_v12 = vadd.f32 %v19107_v48, %v19106_v46  ;;  %v19108_v19 = vld [vmem:[#allocation141_spill] sm:$0xff]  ;;  %v5730_v46 = vadd.f32 %v16744_v16, %v5691_v35  ;;  %v5689_v48 = vmul.f32 %v16706_v28, %v5650_v55  ;;  %v5527_v1 = vadd.f32 %v16601_v37, %v5526_v41  ;;  %v19112_v40 = vld [vmem:[#allocation31_spill] sm:$0xff]  ;;  %v19115_v20 = vld [vmem:[#allocation136_spill] sm:$0xff] }
 0x2ca   : > { %19105 = vst [vmem:[#allocation47_spill] sm:$0xff] %v16748_v50  ;;  %v16760_v6 = vadd.f32 %v19108_v19, %v3778_v47  ;;  %v5653_v18 = vadd.f32 %v5535_v27, %v16613_v59  ;;  %v16770_v0 = vadd.f32 %v19111_v44, %v19110_v26  ;;  %v3786_v3 = vadd.f32 %v13026_v23, %v19112_v40  ;;  %v19113_v19 = vld [vmem:[#allocation24_spill] sm:$0xff]  ;;  %v19114_v47 = vld [vmem:[#allocation25_spill] sm:$0xff]  ;;  %v16781_v37 = vpop.f32.mrf.mxu0  ;;  %v5823_v27 = vld [vmem:[#allocation3 + $0x80] sm:$0x8] }
 0x2cb   : > { %v16776_v50 = vadd.f32 %v19115_v20, %v3783_v30  ;;  %v5762_v14 = vmax.f32 %v5730_v46, 0.0  ;;  %v5728_v35 = vadd.f32 %v16744_v16, %v5689_v48  ;;  %v5651_v59 = vadd.f32 %v5527_v1, %v16569_v7  ;;  %v5820_v41 = vld [vmem:[#allocation3 + $0x70] sm:$0x8]  ;;  %v19117_v26 = vld [vmem:[#allocation21_spill] sm:$0xff] }
 0x2cc   : > { %19109 = vst [vmem:[#allocation49_spill] sm:$0xff] %v16760_v6  ;;  %v13032_v6 = vadd.f32 %v19114_v47, %v19113_v19  ;;  %v5692_v55 = vmul.f32 %v16706_v28, %v5653_v18  ;;  %v3791_v23 = vadd.f32 %v19117_v26, %v16525_v22  ;;  %v13038_v40 = vadd.f32 %v16637_v32, %v16605_v61  ;;  %v16787_v44 = vld [vmem:[#allocation3 + $0x8c] ss:$0 sps:$4 sm:$0x11]   ;;  %v13134_v1 = vpop.f32.mrf.mxu0  ;;  %v5880_v19 = vld [vmem:[#allocation3 + $0xbc] sm:$0x1] }
 0x2cd   : > { %19116 = vst [vmem:[#allocation46_spill] sm:$0xff] %v16776_v50  ;;  %v5821_v30 = vsel %vm15008_vm2, 0, %v5820_v41  ;;  %v5824_v20 = vsel %vm15008_vm2, 0, %v5823_v27  ;;  %v12633_v46 = vpack.c.bf16 %v5762_v14, %v5762_v14  ;;  %v5760_v7 = vmax.f32 %v5728_v35, 0.0  ;;  %v5883_v22 = vld [vmem:[#allocation3 + $0xcc] sm:$0x1] }
 0x2ce   : > { %v5731_v48 = vadd.f32 %v16744_v16, %v5692_v55  ;;  %v5690_v18 = vmul.f32 %v16706_v28, %v5651_v59  ;;  %5822 = vst [vmem:[#allocation3 + $0x70] sm:$0x8] %v5821_v30  ;;  %5825 = vst [vmem:[#allocation3 + $0x80] sm:$0x8] %v5824_v20  ;;  %v19118_v61 = vld [vmem:[#allocation175_spill] sm:$0xff]  ;;  %v19119_v32 = vld [vmem:[#allocation177_spill] sm:$0xff]  ;;  %v3794_v41 = vadd.f32 %v13032_v6, %v16552_v52  ;;  %v13749_v20 = vpop.f32.mrf.mxu1 }
 0x2cf   : > { %v16797_v47 = vadd.f32 %v19119_v32, %v19118_v61  ;;  %v5881_v27 = vsel %vm15131_vm6, 0, %v5880_v19  ;;  %v5884_v14 = vsel %vm15131_vm6, 0, %v5883_v22  ;;  %v19120_v35 = vld [vmem:[#allocation33_spill] sm:$0xff]  ;;  %6028 = vst [vmem:[#allocation3 + $0x24] sm:$0xf] %v12633_v46  ;;  %v12631_v59 = vpack.c.bf16 %v5760_v7, %v5760_v7  ;;  %v19121_v52 = vld [vmem:[#allocation20_spill] sm:$0xff]  ;;  %v13136_v22 = vpop.f32.mrf.mxu0 }
 0x2d0   : > { %v3799_v55 = vadd.f32 %v16535_v60, %v19120_v35  ;;  %v5763_v26 = vmax.f32 %v5731_v48, 0.0  ;;  %v5729_v30 = vadd.f32 %v16744_v16, %v5690_v18  ;;  %5882 = vst [vmem:[#allocation3 + $0xbc] sm:$0x1] %v5881_v27  ;;  %5885 = vst [vmem:[#allocation3 + $0xcc] sm:$0x1] %v5884_v14  ;;  %v19122_v6 = vld [vmem:[#allocation22_spill] sm:$0xff]  ;;  %v5548_v19 = vadd.f32 %v13749_v20, %v16701_v62 }
 0x2d1   : > { %v16811_v61 = vadd.f32 %v19122_v6, %v19121_v52  ;;  %v19123_v32 = vld [vmem:[#allocation140_spill] sm:$0xff]  ;;  %v19124_v60 = vld [vmem:[#allocation145_spill] sm:$0xff]  ;;  %v19126_v7 = vld [vmem:[#allocation23_spill] sm:$0xff]  ;;  %6026 = vst [vmem:[#allocation3 + $0x14] sm:$0xf] %v12631_v59  ;;  %v5539_v52 = vpop.f32.mrf.mxu1 }
 0x2d2   : > { %v16815_v33 = vadd.f32 %v19123_v32, %v3786_v3  ;;  %v16818_v46 = vadd.f32 %v19124_v60, %v3791_v23  ;;  %v19127_v48 = vld [vmem:[#allocation29_spill] sm:$0xff]  ;;  %v19128_v35 = vld [vmem:[#allocation36_spill] sm:$0xff]  ;;  %v12634_v14 = vpack.c.bf16 %v5763_v26, %v5763_v26  ;;  %v5761_v50 = vmax.f32 %v5729_v30, 0.0  ;;  %v19130_v20 = vld [vmem:[#allocation147_spill] sm:$0xff] }
 0x2d3   : > { %v16822_v18 = vadd.f32 %v19127_v48, %v19126_v7  ;;  %v3802_v27 = vadd.f32 %v13038_v40, %v19128_v35  ;;  %v16825_v6 = vld [vmem:[#allocation3 + $0x9c] ss:$0 sps:$4 sm:$0x11]   ;;  %v5656_v62 = vadd.f32 %v5548_v19, %v16619_v4  ;;  %v5540_v3 = vadd.f32 %v16686_v42, %v5539_v52  ;;  %v19132_v60 = vld [vmem:[#allocation143_spill] sm:$0xff]  ;;  %v13750_v26 = vpop.f32.mrf.mxu1  ;;  %v13137_v35 = vpop.f32.mrf.mxu0  ;;  %v19135_v52 = vld [vmem:[#allocation146_spill] sm:$0xff] }
 0x2d4   : > { %19125 = vst [vmem:[#allocation43_spill] sm:$0xff] %v16818_v46  ;;  %19129 = vst [vmem:[#allocation45_spill] sm:$0xff] %v16825_v6  ;;  %v16830_v32 = vadd.f32 %v19130_v20, %v3794_v41  ;;  %v16834_v7 = vadd.f32 %v19132_v60, %v3799_v55  ;;  %v19133_v48 = vld [vmem:[#allocation35_spill] sm:$0xff]  ;;  %v12632_v59 = vpack.c.bf16 %v5761_v50, %v5761_v50 }
 0x2d5   : > { %v16838_v40 = vadd.f32 %v16557_v45, %v19133_v48  ;;  %6029 = vst [vmem:[#allocation3 + $0x28] sm:$0xf] %v12634_v14  ;;  %v16841_v4 = vld [vmem:[#allocation3 + $0xac] ss:$0 sps:$4 sm:$0x11]   ;;  %v16845_v42 = vadd.f32 %v16594_v63, %v16574_v17  ;;  %v5695_v41 = vmul.f32 %v16706_v28, %v5656_v62  ;;  %v5654_v55 = vadd.f32 %v5540_v3, %v16622_v10  ;;  %v5542_v17 = vpop.f32.mrf.mxu1 }
 0x2d6   : > { %19131 = vst [vmem:[#allocation55_spill] sm:$0xff] %v16830_v32  ;;  %19134 = vst [vmem:[#allocation57_spill] sm:$0xff] %v16841_v4  ;;  %v5551_v19 = vadd.f32 %v13750_v26, %v16718_v34  ;;  %v7277_v45 = vld [vmem:[#allocation3 + $0x20] sm:$0x8]  ;;  %v16851_v14 = vadd.f32 %v19135_v52, %v3802_v27  ;;  %v16855_v50 = vadd.f32 %v16652_v11, %v16626_v5  ;;  %v7274_v63 = vld [vmem:[#allocation3 + $0x10] sm:$0x8] }
 0x2d7   : > { %v16859_v20 = vadd.f32 %v16756_v21, %v16708_v8  ;;  %6027 = vst [vmem:[#allocation3 + $0x18] sm:$0xf] %v12632_v59  ;;  %v5734_v34 = vadd.f32 %v16744_v16, %v5695_v41  ;;  %v5693_v62 = vmul.f32 %v16706_v28, %v5654_v55  ;;  %v5543_v3 = vadd.f32 %v16690_v53, %v5542_v17  ;;  %v7278_v60 = vld [vmem:[#allocation3 + $0x24] sm:$0xf]  ;;  %v13139_v17 = vpop.f32.mrf.mxu0 }
 0x2d8   : > { %19136 = vst [vmem:[#allocation59_spill] sm:$0xff] %v16851_v14  ;;  %v5657_v27 = vadd.f32 %v5551_v19, %v16629_v58  ;;  %v16867_v5 = vadd.f32 %v13134_v1, %v16781_v37  ;;  %v16869_v11 = vadd.f32 %v13137_v35, %v13136_v22  ;;  %v16871_v8 = vcombine.low %v7277_v45, %v7278_v60  ;;  %v16874_v48 = vld [vmem:[#allocation3 + $0xbc] ss:$0 sps:$4 sm:$0x11]   ;;  %v7275_v53 = vld [vmem:[#allocation3 + $0x14] sm:$0xf] }
 0x2d9   : > { %19137 = vst [vmem:[#allocation61_spill] sm:$0xff] %v16874_v48  ;;  %v5766_v59 = vmax.f32 %v5734_v34, 0.0  ;;  %v5732_v26 = vadd.f32 %v16744_v16, %v5693_v62  ;;  %v5655_v58 = vadd.f32 %v5543_v3, %v16632_v54  ;;  %v12365_v55 = vcombine.low %v7274_v63, %v7275_v53  ;;  %v13140_v22 = vpop.f32.mrf.mxu0 }
 0x2da   : > { %v5696_v41 = vmul.f32 %v16706_v28, %v5657_v27  ;;  %v7750_v37 = vshrl.u32 %v16871_v8, 16 }
 0x2db   : > { %v12637_v19 = vpack.c.bf16 %v5766_v59, %v5766_v59  ;;  %v5764_v35 = vmax.f32 %v5732_v26, 0.0  ;;  %v5694_v52 = vmul.f32 %v16706_v28, %v5655_v58  ;;  %v7707_v27 = vshrl.u32 %v12365_v55, 16  ;;  %v13142_v30 = vpop.f32.mrf.mxu0 }
 0x2dc   : > { %v5735_v45 = vadd.f32 %v16744_v16, %v5696_v41  ;;  %v7279_v34 = vld [vmem:[#allocation3 + $0x28] sm:$0xf]  ;;  %v7710_v54 = vshll.u32 %v12365_v55, 16  ;;  %v16889_v26 = vrot.slane %v7750_v37, 3  ;;  %v16891_v41 = vadd.f32 %v13140_v22, %v13139_v17 }
 0x2dd   : > { %v16884_v62 = vcombine.low %v7278_v60, %v7279_v34  ;;  %v16886_v3 = vcombine.low %v7279_v34, %v7279_v34  ;;  %6032 = vst [vmem:[#allocation3 + $0x44] sm:$0xf] %v12637_v19  ;;  %v12635_v63 = vpack.c.bf16 %v5764_v35, %v5764_v35  ;;  %v5733_v10 = vadd.f32 %v16744_v16, %v5694_v52 }
 0x2de   : > { %v5767_v21 = vmax.f32 %v5735_v45, 0.0  ;;  %v7276_v59 = vld [vmem:[#allocation3 + $0x18] sm:$0xf]  ;;  %v16896_v19 = vrot.slane %v7707_v27, 3  ;;  %v16898_v35 = vrot.slane %v7710_v54, 4  ;;  %v13753_v45 = vpop.f32.mrf.mxu1  ;;  %v19138_v37 = vrot.slane %v16663_v51, 5 }
 0x2df   : > { %v12397_v58 = vcombine.low %v7275_v53, %v7276_v59  ;;  %v7661_v23 = vrot.slane %v16884_v62, 5  ;;  %v16894_v60 = vcombine.low %v7276_v59, %v7276_v59  ;;  %6030 = vst [vmem:[#allocation3 + $0x34] sm:$0xf] %v12635_v63  ;;  %v5765_v34 = vmax.f32 %v5733_v10, 0.0  ;;  %v13143_v63 = vpop.f32.mrf.mxu0 }
 0x2e0   : > { %v12638_v55 = vpack.c.bf16 %v5767_v21, %v5767_v21  ;;  %v5564_v59 = vadd.f32 %v13753_v45, %v16770_v0  ;;  %v5555_v48 = vpop.f32.mrf.mxu1  ;;  %v16904_v27 = vadd.f32 %v13143_v63, %v13142_v30  ;;  %v19139_v54 = vrot.slane %v16678_v31, 5 }
 0x2e1   : > { %v7658_v52 = vrot.slane %v12397_v58, 5  ;;  %v7663_v22 = vsel %vm983_vm7, %v7661_v23, %v19138_v37  ;;  %v7776_v17 = vshrl.u32 %v7661_v23, 16  ;;  %v7779_v53 = vshll.u32 %v7661_v23, 16 }
 0x2e2   : > { %6033 = vst [vmem:[#allocation3 + $0x48] sm:$0xf] %v12638_v55  ;;  %v12636_v1 = vpack.c.bf16 %v5765_v34, %v5765_v34  ;;  %v7784_v21 = vshrl.u32 %v7663_v22, 16  ;;  %v7787_v10 = vshll.u32 %v7663_v22, 16  ;;  %v5660_v37 = vadd.f32 %v5564_v59, %v16635_v2  ;;  %v13754_v0 = vpop.f32.mrf.mxu1 }
 0x2e3   : > { %v7660_v4 = vsel %vm983_vm7, %v7658_v52, %v19139_v54  ;;  %v7733_v6 = vshrl.u32 %v7658_v52, 16  ;;  %v7736_v51 = vshll.u32 %v7658_v52, 16  ;;  %v5556_v23 = vadd.f32 %v16733_v49, %v5555_v48 }
 0x2e4   : > { %6031 = vst [vmem:[#allocation3 + $0x38] sm:$0xf] %v12636_v1  ;;  %v7741_v55 = vshrl.u32 %v7660_v4, 16  ;;  %v7744_v34 = vshll.u32 %v7660_v4, 16  ;;  %v7778_v22 = vrot.slane %v7776_v17, 3  ;;  %v7781_v14 = vrot.slane %v7779_v53, 4  ;;  %v5558_v52 = vpop.f32.mrf.mxu1 }
 0x2e5   : > { %v7735_v45 = vrot.slane %v7733_v6, 3  ;;  %v7738_v32 = vrot.slane %v7736_v51, 4  ;;  %v5699_v30 = vmul.f32 %v16706_v28, %v5660_v37  ;;  %v5658_v31 = vadd.f32 %v5556_v23, %v16640_v57 }
 0x2e6   : > { %v5567_v63 = vadd.f32 %v13754_v0, %v16797_v47  ;;  %v7743_v54 = vrot.slane %v7741_v55, 3  ;;  %v7746_v46 = vrot.slane %v7744_v34, 4  ;;  %v7782_v2 = vor.u32 %v7781_v14, %v7778_v22  ;;  %v14351_v22 = vld [vmem:[#allocation9 + $0x70] sm:$0xff]  }
 0x2e7   : > { %v7739_v1 = vor.u32 %v7738_v32, %v7735_v45  ;;  %v7786_v59 = vrot.slane %v7784_v21, 3  ;;  %v5738_v49 = vadd.f32 %v16744_v16, %v5699_v30  ;;  %v5697_v4 = vmul.f32 %v16706_v28, %v5658_v31  ;;  %v13145_v21 = vpop.f32.mrf.mxu0 }
 0x2e8   : > { %v5661_v6 = vadd.f32 %v5567_v63, %v16643_v36  ;;  %v5559_v48 = vadd.f32 %v16752_v12, %v5558_v52  ;;  %v7747_v17 = vor.u32 %v7746_v46, %v7743_v54  ;;  %v7789_v53 = vrot.slane %v7787_v10, 4  ;;  %v14345_v36 = vld [vmem:[#allocation9 + $0x38] sm:$0xff]  }
 0x2e9   : > { %v7483_v51 = vshrl.u32 %v12397_v58, 16  ;;  %v7486_v57 = vshll.u32 %v12397_v58, 16  ;;  %v5770_v37 = vmax.f32 %v5738_v49, 0.0  ;;  %v5736_v47 = vadd.f32 %v16744_v16, %v5697_v4  ;;  %v13146_v10 = vpop.f32.mrf.mxu0 }
 0x2ea   : > { %v5700_v32 = vmul.f32 %v16706_v28, %v5661_v6  ;;  %v5659_v14 = vadd.f32 %v5559_v48, %v16646_v43  ;;  %v7748_v23 = vsel %vm1032_vm3, %v7739_v1, %v7747_v17  ;;  %v7790_v55 = vor.u32 %v7789_v53, %v7786_v59  ;;  %v13757_v59 = vpop.f32.mrf.mxu1  ;;  %v14352_v53 = vld [vmem:[#allocation9 + $0x30] sm:$0xff]  }
 0x2eb   : > { %v7485_v34 = vrot.slane %v7483_v51, 4  ;;  %v7488_v0 = vrot.slane %v7486_v57, 5  ;;  %v12641_v45 = vpack.c.bf16 %v5770_v37, %v5770_v37  ;;  %v5768_v12 = vmax.f32 %v5736_v47, 0.0  ;;  %13791 = vmatprep.mubr.bf16.mxu0 %v7748_v23  ;;  %v13148_v49 = vpop.f32.mrf.mxu0 }
 0x2ec   : > { %v5739_v46 = vadd.f32 %v16744_v16, %v5700_v32  ;;  %v5698_v58 = vmul.f32 %v16706_v28, %v5659_v14  ;;  %v16924_v30 = vadd.f32 %v13146_v10, %v13145_v21  ;;  %v7791_v43 = vsel %vm1032_vm3, %v7782_v2, %v7790_v55  ;;  %v5571_v51 = vpop.f32.mrf.mxu1  ;;  %v14359_v32 = vld [vmem:[#allocation9 + $0x68] sm:$0xff]   ;;  %v16946_v10 = vld [vmem:[#allocation3 + $0x34] sm:$0xf] }
 0x2ed   : > { %v7489_v31 = vor.u32 %v7488_v0, %v7485_v34  ;;  %v7713_v63 = vor.u32 %v16898_v35, %v16896_v19  ;;  %6036 = vst [vmem:[#allocation3 + $0x64] sm:$0xf] %v12641_v45  ;;  %v12639_v54 = vpack.c.bf16 %v5768_v12, %v5768_v12  ;;  %13792 = vmatmul.mubr.bf16.vlgmr.msra.gmra.mxu0 %v7791_v43  ;;  %v7715_v4 = vshrl.u32 %v16894_v60, 16  ;;  %v13149_v57 = vpop.f32.mrf.mxu0  ;;  %v16940_v55 = vld [vmem:[#allocation3 + $0x48] sm:$0xf] }
 0x2ee   : > { %v5771_v52 = vmax.f32 %v5739_v46, 0.0  ;;  %v5737_v1 = vadd.f32 %v16744_v16, %v5698_v58  ;;  %v5580_v6 = vadd.f32 %v13757_v59, %v16838_v40  ;;  %v7718_v2 = vshll.u32 %v16894_v60, 16  ;;  %13336 = vmatpush3.bf16.msra.mxu0 %v14345_v36  ;;  %v16938_v60 = vld [vmem:[#allocation3 + $0x38] sm:$0xf]  ;;  %v13758_v0 = vpop.f32.mrf.mxu1  ;;  %v14360_v43 = vld [vmem:[#allocation9 + $0x28] sm:$0xff]  }
 0x2ef   : > { %v7724_v48 = vshrl.u32 %v7489_v31, 16  ;;  %v7727_v17 = vshll.u32 %v7489_v31, 16  ;;  %6034 = vst [vmem:[#allocation3 + $0x54] sm:$0xf] %v12639_v54  ;;  %v7717_v37 = vrot.slane %v7715_v4, 3  ;;  %v7491_v47 = vshrl.u32 %v16884_v62, 16  ;;  %13337 = vmatprep.subr.bf16.mxu0 %v14351_v22 }
 0x2f0   : > { %v12642_v19 = vpack.c.bf16 %v5771_v52, %v5771_v52  ;;  %v5769_v35 = vmax.f32 %v5737_v1, 0.0  ;;  %v5664_v14 = vadd.f32 %v5580_v6, %v16649_v15  ;;  %v5572_v40 = vadd.f32 %v16811_v61, %v5571_v51  ;;  %v16948_v22 = vld [vmem:[#allocation3 + $0x44] sm:$0xf]  ;;  %v5574_v31 = vpop.f32.mrf.mxu1  ;;  %v14354_v6 = vld [vmem:[#allocation9 + $0xb0] sm:$0xff]  }
 0x2f1   : > { %v16936_v21 = vadd.f32 %v13149_v57, %v13148_v49  ;;  %v7726_v23 = vrot.slane %v7724_v48, 3  ;;  %v7729_v36 = vrot.slane %v7727_v17, 4  ;;  %v7720_v45 = vrot.slane %v7718_v2, 4 }
 0x2f2   : > { %6037 = vst [vmem:[#allocation3 + $0x68] sm:$0xf] %v12642_v19  ;;  %v12640_v34 = vpack.c.bf16 %v5769_v35, %v5769_v35  ;;  %v7493_v12 = vrot.slane %v7491_v47, 4  ;;  %v5703_v46 = vmul.f32 %v16706_v28, %v5664_v14  ;;  %v5662_v58 = vadd.f32 %v5572_v40, %v16655_v29  ;;  %13338 = vmatpush3.bf16.msra.mxu0 %v14352_v53  ;;  %v14374_v40 = vld [vmem:[#allocation9 + $0x58] sm:$0xff]  }
 0x2f3   : > { %v5583_v15 = vadd.f32 %v13758_v0, %v16845_v42  ;;  %v7494_v61 = vshll.u32 %v16884_v62, 16  ;;  %v7730_v54 = vor.u32 %v7729_v36, %v7726_v23  ;;  %v7721_v52 = vor.u32 %v7720_v45, %v7717_v37  ;;  %13339 = vmatprep.subr.bf16.mxu0 %v14359_v32  ;;  %v14366_v42 = vld [vmem:[#allocation9 + $0x60] sm:$0xff]   ;;  %v19140_v37 = vld [vmem:[#allocation172_spill] sm:$0xff]  ;;  %v13151_v36 = vpop.f32.mrf.mxu0  ;;  %v14369_v45 = vld [vmem:[#allocation9 + $0xa8] sm:$0xff]  }
 0x2f4   : > { %6035 = vst [vmem:[#allocation3 + $0x58] sm:$0xf] %v12640_v34  ;;  %v16952_v1 = vcombine.low %v16946_v10, %v16938_v60  ;;  %v16956_v29 = vcombine.low %v16948_v22, %v16940_v55  ;;  %v5742_v62 = vadd.f32 %v16744_v16, %v5703_v46  ;;  %v5701_v59 = vmul.f32 %v16706_v28, %v5662_v58 }
 0x2f5   : > { %v5665_v49 = vadd.f32 %v5583_v15, %v16658_v24  ;;  %v5575_v4 = vadd.f32 %v16822_v18, %v5574_v31  ;;  %8667 = vmatprep.mubr.bf16.mxu1 %v7730_v54  ;;  %v7722_v48 = vsel %vm1032_vm3, %v7713_v63, %v7721_v52  ;;  %v7496_v17 = vrot.slane %v7494_v61, 5  ;;  %v14367_v24 = vld [vmem:[#allocation9 + $0x20] sm:$0xff]   ;;  %v13152_v31 = vpop.f32.mrf.mxu0  ;;  %v14375_v52 = vld [vmem:[#allocation9 + $0x18] sm:$0xff]  }
 0x2f6   : > { %v7664_v2 = vrot.slane %v16952_v1, 5  ;;  %v16965_v53 = vrot.slane %v16956_v29, 5  ;;  %v5774_v19 = vmax.f32 %v5742_v62, 0.0  ;;  %v5740_v35 = vadd.f32 %v16744_v16, %v5701_v59  ;;  %8668 = vmatmul.mubr.bf16.vlgmr.msra.gmra.mxu1 %v7722_v48  ;;  %13340 = vmatpush3.bf16.msra.mxu0 %v14360_v43 }
 0x2f7   : > { %v5704_v51 = vmul.f32 %v16706_v28, %v5665_v49  ;;  %v5663_v57 = vadd.f32 %v5575_v4, %v16661_v38  ;;  %v7497_v18 = vor.u32 %v7496_v17, %v7493_v12  ;;  %13824 = vmatpush3.bf16.msra.mxu1 %v19140_v37  ;;  %v19141_v63 = vrot.slane %v16714_v56, 5  ;;  %13341 = vmatprep.subr.bf16.mxu0 %v14366_v42  ;;  %v13761_v17 = vpop.f32.mrf.mxu1 }
 0x2f8   : > { %v7819_v32 = vshrl.u32 %v7664_v2, 16  ;;  %v7822_v14 = vshll.u32 %v7664_v2, 16  ;;  %v12645_v23 = vpack.c.bf16 %v5774_v19, %v5774_v19  ;;  %v5772_v34 = vmax.f32 %v5740_v35, 0.0  ;;  %13825 = vmatprep.subr.bf16.mxu1 %v14354_v6 }
 0x2f9   : > { %v7666_v47 = vsel %vm983_vm7, %v7664_v2, %v19141_v63  ;;  %v5743_v0 = vadd.f32 %v16744_v16, %v5704_v51  ;;  %v5702_v38 = vmul.f32 %v16706_v28, %v5663_v57  ;;  %v7767_v12 = vshrl.u32 %v7497_v18, 16  ;;  %v13154_v2 = vpop.f32.mrf.mxu0  ;;  %v14381_v51 = vld [vmem:[#allocation9 + $0x50] sm:$0xff]   ;;  %v14384_v57 = vld [vmem:[#allocation9 + $0xa0] sm:$0xff]  }
 0x2fa   : > { %v7770_v46 = vshll.u32 %v7497_v18, 16  ;;  %v7821_v58 = vrot.slane %v7819_v32, 3  ;;  %v7824_v15 = vrot.slane %v7822_v14, 4  ;;  %6040 = vst [vmem:[#allocation3 + $0x84] sm:$0xf] %v12645_v23  ;;  %v12643_v56 = vpack.c.bf16 %v5772_v34, %v5772_v34  ;;  %13342 = vmatpush3.bf16.msra.mxu0 %v14367_v24  ;;  %v5587_v14 = vpop.f32.mrf.mxu1 }
 0x2fb   : > { %v5775_v61 = vmax.f32 %v5743_v0, 0.0  ;;  %v5741_v43 = vadd.f32 %v16744_v16, %v5702_v38  ;;  %v7827_v54 = vshrl.u32 %v7666_v47, 16  ;;  %v16977_v42 = vadd.f32 %v13152_v31, %v13151_v36  ;;  %13826 = vmatpush3.bf16.msra.mxu1 %v14354_v6  ;;  %13343 = vmatprep.subr.bf16.mxu0 %v14374_v40  ;;  %v13155_v40 = vpop.f32.mrf.mxu0  ;;  %v14382_v0 = vld [vmem:[#allocation9 + $0x10] sm:$0xff]   ;;  %v19143_v38 = vld [vmem:[#allocation37_spill] sm:$0xff]  ;;  %v19144_v31 = vld [vmem:[#allocation39_spill] sm:$0xff] }
 0x2fc   : > { %v7769_v62 = vrot.slane %v7767_v12, 3  ;;  %v7772_v59 = vrot.slane %v7770_v46, 4  ;;  %v7825_v49 = vor.u32 %v7824_v15, %v7821_v58  ;;  %6038 = vst [vmem:[#allocation3 + $0x74] sm:$0xf] %v12643_v56  ;;  %v7830_v35 = vshll.u32 %v7666_v47, 16  ;;  %13827 = vmatprep.subr.bf16.mxu1 %v14369_v45  ;;  %v13762_v46 = vpop.f32.mrf.mxu1 }
 0x2fd   : > { %v12646_v4 = vpack.c.bf16 %v5775_v61, %v5775_v61  ;;  %v5773_v48 = vmax.f32 %v5741_v43, 0.0  ;;  %v7829_v19 = vrot.slane %v7827_v54, 3  ;;  %v5596_v24 = vadd.f32 %v13761_v17, %v16867_v5 }
 0x2fe   : > { %v7773_v18 = vor.u32 %v7772_v59, %v7769_v62  ;;  %v19142_v37 = vrot.slane %v16697_v13, 5  ;;  %v7862_v6 = vshrl.u32 %v16965_v53, 16  ;;  %v7832_v23 = vrot.slane %v7830_v35, 4  ;;  %13344 = vmatpush3.bf16.msra.mxu0 %v14375_v52  ;;  %v5590_v59 = vpop.f32.mrf.mxu1 }
 0x2ff   : > { %6041 = vst [vmem:[#allocation3 + $0x88] sm:$0xf] %v12646_v4  ;;  %v12644_v32 = vpack.c.bf16 %v5773_v48, %v5773_v48  ;;  %v7865_v47 = vshll.u32 %v16965_v53, 16  ;;  %v5668_v5 = vadd.f32 %v5596_v24, %v19143_v38  ;;  %v5588_v36 = vadd.f32 %v16855_v50, %v5587_v14  ;;  %13828 = vmatpush3.bf16.msra.mxu1 %v14369_v45 }
 0x300   : > { %v7669_v63 = vsel %vm983_vm7, %v16965_v53, %v19142_v37  ;;  %v16988_v13 = vadd.f32 %v13155_v40, %v13154_v2  ;;  %8675 = vmatprep.mubr.bf16.mxu1 %v7773_v18  ;;  %v7864_v12 = vrot.slane %v7862_v6, 3  ;;  %v7833_v58 = vor.u32 %v7832_v23, %v7829_v19  ;;  %13345 = vmatprep.subr.bf16.mxu0 %v14381_v51  ;;  %v14387_v53 = vld [vmem:[#allocation9 + $0x48] sm:$0xff]   ;;  %v19146_v51 = vld [vmem:[#allocation38_spill] sm:$0xff]  ;;  %v14399_v18 = vld [vmem:[#allocation9 + $0x98] sm:$0xff]  }
 0x301   : > { %v7870_v34 = vshrl.u32 %v7669_v63, 16  ;;  %6039 = vst [vmem:[#allocation3 + $0x78] sm:$0xf] %v12644_v32  ;;  %v7867_v15 = vrot.slane %v7865_v47, 4  ;;  %v7873_v61 = vshll.u32 %v7669_v63, 16  ;;  %13829 = vmatprep.subr.bf16.mxu1 %v14384_v57  ;;  %v5707_v43 = vmul.f32 %v16706_v28, %v5668_v5  ;;  %v14390_v2 = vld [vmem:[#allocation9 + $0x8] sm:$0xff]  }
 0x302   : > { %v5666_v54 = vadd.f32 %v5588_v36, %v19144_v31  ;;  %v5599_v50 = vadd.f32 %v13762_v46, %v16869_v11  ;;  %v19145_v52 = vshll.u32 %v16871_v8, 16  ;;  %v7834_v45 = vsel %vm1032_vm3, %v7825_v49, %v7833_v58  ;;  %13346 = vmatpush3.bf16.msra.mxu0 %v14382_v0  ;;  %v14392_v8 = vld [vmem:[#allocation9 + $0x40] sm:$0xff]   ;;  %v19147_v23 = vld [vmem:[#allocation40_spill] sm:$0xff]  ;;  %v17009_v5 = vld [vmem:[#allocation3 + $0x58] sm:$0xf] }
 0x303   : > { %v7872_v56 = vrot.slane %v7870_v34, 3  ;;  %v7868_v4 = vor.u32 %v7867_v15, %v7864_v12  ;;  %v7875_v48 = vrot.slane %v7873_v61, 4  ;;  %v7758_v17 = vshrl.u32 %v16886_v3, 16  ;;  %13795 = vmatprep.mubr.bf16.mxu0 %v7834_v45  ;;  %13830 = vmatpush3.bf16.msra.mxu1 %v14384_v57  ;;  %v13157_v34 = vpop.f32.mrf.mxu0  ;;  %v17013_v15 = vld [vmem:[#allocation3 + $0x68] sm:$0xf]  ;;  %v14400_v61 = vld [vmem:[#allocation9 + $0x238] sm:$0xff]  }
 0x304   : > { %v7755_v62 = vrot.slane %v19145_v52, 4  ;;  %v5746_v19 = vadd.f32 %v16744_v16, %v5707_v43  ;;  %v5705_v35 = vmul.f32 %v16706_v28, %v5666_v54  ;;  %v5669_v24 = vadd.f32 %v5599_v50, %v19146_v51  ;;  %13347 = vmatprep.subr.bf16.mxu0 %v14387_v53  ;;  %13831 = vmatprep.subr.bf16.mxu1 %v14399_v18  ;;  %v17017_v54 = vld [vmem:[#allocation3 + $0x54] sm:$0xf] }
 0x305   : > { %v5591_v11 = vadd.f32 %v16859_v20, %v5590_v59  ;;  %v7876_v37 = vor.u32 %v7875_v48, %v7872_v56  ;;  %v7760_v63 = vrot.slane %v7758_v17, 3  ;;  %v7761_v6 = vshll.u32 %v16886_v3, 16  ;;  %v14393_v3 = vld [vmem:[#allocation9] sm:$0xff]   ;;  %v13158_v58 = vpop.f32.mrf.mxu0  ;;  %v7280_v56 = vld [vmem:[#allocation3 + $0x30] sm:$0x8] }
 0x306   : > { %v7756_v49 = vor.u32 %v7755_v62, %v16889_v26  ;;  %v5778_v32 = vmax.f32 %v5746_v19, 0.0  ;;  %v5744_v14 = vadd.f32 %v16744_v16, %v5705_v35  ;;  %v5708_v40 = vmul.f32 %v16706_v28, %v5669_v24  ;;  %13348 = vmatpush3.bf16.msra.mxu0 %v14390_v2  ;;  %v13765_v24 = vpop.f32.mrf.mxu1 }
 0x307   : > { %v5667_v47 = vadd.f32 %v5591_v11, %v19147_v23  ;;  %v7877_v20 = vsel %vm1032_vm3, %v7868_v4, %v7876_v37  ;;  %v7763_v0 = vrot.slane %v7761_v6, 4  ;;  %v7499_v38 = vshrl.u32 %v16952_v1, 16  ;;  %13349 = vmatprep.subr.bf16.mxu0 %v14392_v8  ;;  %13832 = vmatpush3.bf16.msra.mxu1 %v14399_v18  ;;  %v13160_v59 = vpop.f32.mrf.mxu0  ;;  %v17024_v4 = vld [vmem:[#allocation3 + $0x64] sm:$0xf] }
 0x308   : > { %v7502_v26 = vshll.u32 %v16952_v1, 16  ;;  %v12649_v57 = vpack.c.bf16 %v5778_v32, %v5778_v32  ;;  %v5776_v36 = vmax.f32 %v5744_v14, 0.0  ;;  %v5747_v12 = vadd.f32 %v16744_v16, %v5708_v40  ;;  %13796 = vmatmul.mubr.bf16.gmra.mxu0 %v7877_v20  ;;  %v5603_v32 = vpop.f32.mrf.mxu1 }
 0x309   : > { %v5706_v46 = vmul.f32 %v16706_v28, %v5667_v47  ;;  %v17015_v53 = vadd.f32 %v13158_v58, %v13157_v34  ;;  %v7764_v1 = vor.u32 %v7763_v0, %v7760_v63  ;;  %v7501_v43 = vrot.slane %v7499_v38, 4  ;;  %v13161_v11 = vpop.f32.mrf.mxu0  ;;  %v19149_v34 = vld [vmem:[#allocation42_spill] sm:$0xff] }
 0x30a   : > { %v7504_v31 = vrot.slane %v7502_v26, 5  ;;  %6044 = vst [vmem:[#allocation3 + $0xa4] sm:$0xf] %v12649_v57  ;;  %v12647_v50 = vpack.c.bf16 %v5776_v36, %v5776_v36  ;;  %v5779_v52 = vmax.f32 %v5747_v12, 0.0  ;;  %v17022_v45 = vcombine.low %v17017_v54, %v17009_v5  ;;  %13350 = vmatpush3.bf16.msra.mxu0 %v14393_v3 }
 0x30b   : > { %v5745_v62 = vadd.f32 %v16744_v16, %v5706_v46  ;;  %v7765_v48 = vsel %vm1032_vm3, %v7756_v49, %v7764_v1  ;;  %v17029_v2 = vcombine.low %v17024_v4, %v17013_v15  ;;  %v17032_v19 = vcombine.low %v7280_v56, %v16946_v10  ;;  %13871 = vmatprep.subr.bf16.mxu0 %v14400_v61  ;;  %v19150_v46 = vld [vmem:[#allocation152_spill] sm:$0xff] }
 0x30c   : > { %v7505_v17 = vor.u32 %v7504_v31, %v7501_v43  ;;  %6042 = vst [vmem:[#allocation3 + $0x94] sm:$0xf] %v12647_v50  ;;  %v12650_v35 = vpack.c.bf16 %v5779_v52, %v5779_v52  ;;  %8676 = vmatmul.mubr.bf16.gmra.mxu1 %v7765_v48  ;;  %v7670_v8 = vrot.slane %v17022_v45, 5  ;;  %v17037_v18 = vcombine.low %v16938_v60, %v16938_v60 }
 0x30d   : > { %v5777_v51 = vmax.f32 %v5745_v62, 0.0  ;;  %v5612_v37 = vadd.f32 %v13765_v24, %v16924_v30  ;;  %v17040_v49 = vadd.f32 %v13161_v11, %v13160_v59  ;;  %v19148_v14 = vrot.slane %v16727_v39, 5  ;;  %v13766_v30 = vpop.f32.mrf.mxu1  ;;  %v19151_v62 = vld [vmem:[#allocation44_spill] sm:$0xff] }
 0x30e   : > { %v7810_v10 = vshrl.u32 %v7505_v17, 16  ;;  %v7813_v63 = vshll.u32 %v7505_v17, 16  ;;  %6045 = vst [vmem:[#allocation3 + $0xa8] sm:$0xf] %v12650_v35  ;;  %v7905_v23 = vshrl.u32 %v7670_v8, 16  ;;  %v7908_v47 = vshll.u32 %v7670_v8, 16  ;;  %v13163_v17 = vpop.f32.mrf.mxu0 }
 0x30f   : > { %v12648_v6 = vpack.c.bf16 %v5777_v51, %v5777_v51  ;;  %v7672_v40 = vsel %vm983_vm7, %v7670_v8, %v19148_v14  ;;  %v5672_v20 = vadd.f32 %v5612_v37, %v19149_v34  ;;  %v5604_v60 = vadd.f32 %v16891_v41, %v5603_v32  ;;  %v5606_v61 = vpop.f32.mrf.mxu1 }
 0x310   : > { %v7812_v0 = vrot.slane %v7810_v10, 3  ;;  %v7815_v38 = vrot.slane %v7813_v63, 4  ;;  %v7907_v26 = vrot.slane %v7905_v23, 3  ;;  %v7910_v3 = vrot.slane %v7908_v47, 4  ;;  %v19153_v63 = vld [vmem:[#allocation41_spill] sm:$0xff]  ;;  %v13164_v32 = vpop.f32.mrf.mxu0 }
 0x311   : > { %6043 = vst [vmem:[#allocation3 + $0x98] sm:$0xf] %v12648_v6  ;;  %v7913_v57 = vshrl.u32 %v7672_v40, 16  ;;  %v7916_v36 = vshll.u32 %v7672_v40, 16  ;;  %v5711_v12 = vmul.f32 %v16706_v28, %v5672_v20  ;;  %v5670_v39 = vadd.f32 %v5604_v60, %v19150_v46 }
 0x312   : > { %v5615_v58 = vadd.f32 %v13766_v30, %v16936_v21  ;;  %v7816_v56 = vor.u32 %v7815_v38, %v7812_v0  ;;  %v7911_v1 = vor.u32 %v7910_v3, %v7907_v26  ;;  %v7673_v41 = vrot.slane %v17029_v2, 5  ;;  %v13166_v0 = vpop.f32.mrf.mxu0 }
 0x313   : > { %v7915_v43 = vrot.slane %v7913_v57, 3  ;;  %v7918_v31 = vrot.slane %v7916_v36, 4  ;;  %v5750_v50 = vadd.f32 %v16744_v16, %v5711_v12  ;;  %v5709_v52 = vmul.f32 %v16706_v28, %v5670_v39  ;;  %v13769_v12 = vpop.f32.mrf.mxu1 }
 0x314   : > { %v5673_v59 = vadd.f32 %v5615_v58, %v19151_v62  ;;  %v5607_v48 = vadd.f32 %v16904_v27, %v5606_v61  ;;  %8683 = vmatprep.mubr.bf16.mxu1 %v7816_v56  ;;  %v19152_v21 = vrot.slane %v16729_v25, 5  ;;  %v7948_v24 = vshrl.u32 %v7673_v41, 16  ;;  %v13167_v58 = vpop.f32.mrf.mxu0 }
 0x315   : > { %v7919_v35 = vor.u32 %v7918_v31, %v7915_v43  ;;  %v7951_v11 = vshll.u32 %v7673_v41, 16  ;;  %v5782_v8 = vmax.f32 %v5750_v50, 0.0  ;;  %v5748_v37 = vadd.f32 %v16744_v16, %v5709_v52  ;;  %v5619_v31 = vpop.f32.mrf.mxu1  ;;  %v14409_v52 = vld [vmem:[#allocation9 + $0x90] sm:$0xff]  }
 0x316   : > { %v7675_v51 = vsel %vm983_vm7, %v7673_v41, %v19152_v21  ;;  %v5712_v10 = vmul.f32 %v16706_v28, %v5673_v59  ;;  %v5671_v6 = vadd.f32 %v5607_v48, %v19153_v63  ;;  %v7950_v27 = vrot.slane %v7948_v24, 3  ;;  %13833 = vmatprep.subr.bf16.mxu1 %v14409_v52  ;;  %v17080_v24 = vld [vmem:[%s18722_s2] ss:$0 sm:$0xff]  ;;  %v17086_v63 = vld [vmem:[#allocation3 + $0x78] sm:$0xf] }
 0x317   : > { %v7920_v14 = vsel %vm1032_vm3, %v7911_v1, %v7919_v35  ;;  %v7953_v40 = vrot.slane %v7951_v11, 4  ;;  %v7956_v23 = vshrl.u32 %v7675_v51, 16  ;;  %v12653_v47 = vpack.c.bf16 %v5782_v8, %v5782_v8  ;;  %v13770_v35 = vpop.f32.mrf.mxu1  ;;  %v19155_v8 = vld [vmem:[#allocation47_spill] sm:$0xff]  ;;  %13834 = vmatpush3.bf16.msra.mxu1 %v14409_v52 }
 0x318   : > { %v5780_v34 = vmax.f32 %v5748_v37, 0.0  ;;  %v5751_v25 = vadd.f32 %v16744_v16, %v5712_v10  ;;  %v5710_v20 = vmul.f32 %v16706_v28, %v5671_v6  ;;  %13799 = vmatprep.mubr.bf16.mxu0 %v7920_v14  ;;  %v17064_v60 = vadd.f32 %v13164_v32, %v13163_v17  ;;  %v17088_v6 = vld [vmem:[#allocation3 + $0x88] sm:$0xf] }
 0x319   : > { %v7954_v38 = vor.u32 %v7953_v40, %v7950_v27  ;;  %v7958_v30 = vrot.slane %v7956_v23, 3  ;;  %v7959_v26 = vshll.u32 %v7675_v51, 16  ;;  %6048 = vst [vmem:[#allocation3 + $0xc4] sm:$0xf] %v12653_v47  ;;  %v7793_v46 = vshrl.u32 %v17032_v19, 16 }
 0x31a   : > { %v12651_v3 = vpack.c.bf16 %v5780_v34, %v5780_v34  ;;  %v5783_v57 = vmax.f32 %v5751_v25, 0.0  ;;  %v5749_v36 = vadd.f32 %v16744_v16, %v5710_v20  ;;  %v5628_v39 = vadd.f32 %v13769_v12, %v17015_v53  ;;  %v19154_v16 = vld [vmem:[#allocation46_spill] sm:$0xff]  ;;  %v17100_v20 = vld [vmem:[#allocation3 + $0x74] sm:$0xf] }
 0x31b   : > { %v7961_v56 = vrot.slane %v7959_v26, 4  ;;  %v7796_v28 = vshll.u32 %v17032_v19, 16  ;;  %v7801_v61 = vshrl.u32 %v17037_v18, 16  ;;  %v17071_v41 = vadd.f32 %v13167_v58, %v13166_v0  ;;  %v17094_v23 = vld [vmem:[%s18723_s3] ss:$0 sm:$0xff] }
 0x31c   : > { %6046 = vst [vmem:[#allocation3 + $0xb4] sm:$0xf] %v12651_v3  ;;  %v12654_v1 = vpack.c.bf16 %v5783_v57, %v5783_v57  ;;  %v5781_v43 = vmax.f32 %v5749_v36, 0.0  ;;  %v7795_v50 = vrot.slane %v7793_v46, 3  ;;  %v5676_v62 = vadd.f32 %v5628_v39, %v19154_v16  ;;  %v17102_v0 = vld [vmem:[#allocation3 + $0x84] sm:$0xf] }
 0x31d   : > { %v5620_v59 = vadd.f32 %v16977_v42, %v5619_v31  ;;  %v7962_v48 = vor.u32 %v7961_v56, %v7958_v30  ;;  %v7798_v53 = vrot.slane %v7796_v28, 4  ;;  %v7803_v19 = vrot.slane %v7801_v61, 3 }
 0x31e   : > { %6049 = vst [vmem:[#allocation3 + $0xc8] sm:$0xf] %v12654_v1  ;;  %v12652_v17 = vpack.c.bf16 %v5781_v43, %v5781_v43  ;;  %v7804_v21 = vshll.u32 %v17037_v18, 16  ;;  %v7507_v51 = vshrl.u32 %v16956_v29, 16  ;;  %v5715_v11 = vmul.f32 %v17080_v24, %v5676_v62  ;;  %v5622_v18 = vpop.f32.mrf.mxu1  ;;  %v13169_v43 = vpop.f32.mrf.mxu0 }
 0x31f   : > { %v5674_v42 = vadd.f32 %v5620_v59, %v19155_v8  ;;  %v5631_v37 = vadd.f32 %v13770_v35, %v17040_v49  ;;  %v7963_v10 = vsel %vm1032_vm3, %v7954_v38, %v7962_v48  ;;  %v7799_v32 = vor.u32 %v7798_v53, %v7795_v50 }
 0x320   : > { %6047 = vst [vmem:[#allocation3 + $0xb8] sm:$0xf] %v12652_v17  ;;  %13800 = vmatmul.mubr.bf16.gmra.mxu0 %v7963_v10  ;;  %v7806_v14 = vrot.slane %v7804_v21, 4  ;;  %v7509_v27 = vrot.slane %v7507_v51, 4  ;;  %v7510_v40 = vshll.u32 %v16956_v29, 16  ;;  %v5754_v49 = vadd.f32 %v17094_v23, %v5715_v11  ;;  %v13170_v17 = vpop.f32.mrf.mxu0 }
 0x321   : > { %v5713_v47 = vmul.f32 %v17080_v24, %v5674_v42  ;;  %v5677_v34 = vadd.f32 %v5631_v37, %v16815_v33  ;;  %v5623_v25 = vadd.f32 %v16988_v13, %v5622_v18  ;;  %v17106_v29 = vcombine.low %v17100_v20, %v17086_v63  ;;  %v19156_v13 = vld [vmem:[#allocation49_spill] sm:$0xff]  ;;  %v13773_v37 = vpop.f32.mrf.mxu1 }
 0x322   : > { %v7807_v38 = vor.u32 %v7806_v14, %v7803_v19  ;;  %v7512_v30 = vrot.slane %v7510_v40, 5  ;;  %v17110_v26 = vcombine.low %v17102_v0, %v17088_v6  ;;  %v5786_v3 = vmax.f32 %v5754_v49, 0.0  ;;  %v13172_v10 = vpop.f32.mrf.mxu0 }
 0x323   : > { %v5752_v57 = vadd.f32 %v17094_v23, %v5713_v47  ;;  %v5716_v33 = vmul.f32 %v17080_v24, %v5677_v34  ;;  %v5675_v36 = vadd.f32 %v5623_v25, %v19156_v13  ;;  %v7676_v39 = vrot.slane %v17106_v29, 5  ;;  %v5635_v34 = vpop.f32.mrf.mxu1 }
 0x324   : > { %v7808_v12 = vsel %vm1032_vm3, %v7799_v32, %v7807_v38  ;;  %v7513_v46 = vor.u32 %v7512_v30, %v7509_v27  ;;  %v7679_v58 = vrot.slane %v17110_v26, 5  ;;  %v12657_v56 = vpack.c.bf16 %v5786_v3, %v5786_v3  ;;  %v13173_v25 = vpop.f32.mrf.mxu0 }
 0x325   : > { %v5784_v28 = vmax.f32 %v5752_v57, 0.0  ;;  %v5755_v61 = vadd.f32 %v17094_v23, %v5716_v33  ;;  %v5714_v1 = vmul.f32 %v17080_v24, %v5675_v36  ;;  %8684 = vmatmul.mubr.bf16.gmra.mxu1 %v7808_v12  ;;  %v19157_v52 = vrot.slane %v16807_v9, 5  ;;  %v7283_v12 = vld [vmem:[#allocation3 + $0x40] sm:$0x8] }
 0x326   : > { %v7853_v31 = vshrl.u32 %v7513_v46, 16  ;;  %v7856_v50 = vshll.u32 %v7513_v46, 16  ;;  %v7991_v62 = vshrl.u32 %v7676_v39, 16  ;;  %6052 = vst [vmem:[#allocation3 + $0xe4] sm:$0xf] %v12657_v56  ;;  %v7994_v35 = vshll.u32 %v7676_v39, 16  ;;  %v13774_v46 = vpop.f32.mrf.mxu1 }
 0x327   : > { %v7678_v16 = vsel %vm983_vm7, %v7676_v39, %v19157_v52  ;;  %v12655_v59 = vpack.c.bf16 %v5784_v28, %v5784_v28  ;;  %v5787_v48 = vmax.f32 %v5755_v61, 0.0  ;;  %v5753_v53 = vadd.f32 %v17094_v23, %v5714_v1  ;;  %v19159_v1 = vld [vmem:[#allocation43_spill] sm:$0xff] }
 0x328   : > { %v13171_v19 = vadd.f32 %v13170_v17, %v13169_v43  ;;  %v7855_v21 = vrot.slane %v7853_v31, 3  ;;  %v7858_v51 = vrot.slane %v7856_v50, 4  ;;  %v7993_v11 = vrot.slane %v7991_v62, 3  ;;  %v5638_v52 = vpop.f32.mrf.mxu1 }
 0x329   : > { %6050 = vst [vmem:[#allocation3 + $0xd4] sm:$0xf] %v12655_v59  ;;  %v12658_v8 = vpack.c.bf16 %v5787_v48, %v5787_v48  ;;  %v5785_v42 = vmax.f32 %v5753_v53, 0.0  ;;  %v7996_v9 = vrot.slane %v7994_v35, 4  ;;  %v7999_v18 = vshrl.u32 %v7678_v16, 16  ;;  %v19160_v53 = vld [vmem:[#allocation59_spill] sm:$0xff] }
 0x32a   : > { %v5644_v32 = vadd.f32 %v13773_v37, %v13171_v19  ;;  %v7859_v14 = vor.u32 %v7858_v51, %v7855_v21  ;;  %v8002_v27 = vshll.u32 %v7678_v16, 16  ;;  %v19158_v40 = vrot.slane %v16787_v44, 5 }
 0x32b   : > { %6053 = vst [vmem:[#allocation3 + $0xe8] sm:$0xf] %v12658_v8  ;;  %v12656_v47 = vpack.c.bf16 %v5785_v42, %v5785_v42  ;;  %v7997_v38 = vor.u32 %v7996_v9, %v7993_v11  ;;  %v8001_v30 = vrot.slane %v7999_v18, 3  ;;  %v8034_v3 = vshrl.u32 %v7679_v58, 16  ;;  %v19161_v42 = vld [vmem:[#allocation55_spill] sm:$0xff] }
 0x32c   : > { %v7681_v49 = vsel %vm983_vm7, %v7679_v58, %v19158_v40  ;;  %v5680_v57 = vadd.f32 %v5644_v32, %v16834_v7  ;;  %v5636_v33 = vadd.f32 %v17064_v60, %v5635_v34  ;;  %8691 = vmatprep.mubr.bf16.mxu1 %v7859_v14  ;;  %v13174_v13 = vadd.f32 %v13173_v25, %v13172_v10 }
 0x32d   : > { %v8004_v36 = vrot.slane %v8002_v27, 4  ;;  %6051 = vst [vmem:[#allocation3 + $0xd8] sm:$0xf] %v12656_v47  ;;  %v8036_v44 = vrot.slane %v8034_v3, 3  ;;  %v8037_v39 = vshll.u32 %v7679_v58, 16  ;;  %v8042_v56 = vshrl.u32 %v7681_v49, 16 }
 0x32e   : > { %v8045_v28 = vshll.u32 %v7681_v49, 16  ;;  %v5719_v61 = vmul.f32 %v17080_v24, %v5680_v57  ;;  %v5678_v43 = vadd.f32 %v5636_v33, %v19159_v1  ;;  %v5647_v31 = vadd.f32 %v13774_v46, %v13174_v13  ;;  %v17151_v13 = vld [vmem:[#allocation3 + $0x94] sm:$0xf] }
 0x32f   : > { %v8005_v50 = vor.u32 %v8004_v36, %v8001_v30  ;;  %v8039_v7 = vrot.slane %v8037_v39, 4  ;;  %v8044_v16 = vrot.slane %v8042_v56, 3  ;;  %v12371_v62 = vcombine.low %v7283_v12, %v16948_v22  ;;  %v7286_v36 = vld [vmem:[#allocation3 + $0x50] sm:$0x8]  ;;  %v17158_v39 = vld [vmem:[#allocation3 + $0xa4] sm:$0xf] }
 0x330   : > { %v8047_v60 = vrot.slane %v8045_v28, 4  ;;  %v5758_v59 = vadd.f32 %v17094_v23, %v5719_v61  ;;  %v5717_v48 = vmul.f32 %v17080_v24, %v5678_v43  ;;  %v5681_v58 = vadd.f32 %v5647_v31, %v19160_v53  ;;  %v14419_v56 = vld [vmem:[#allocation9 + $0x88] sm:$0xff]  }
 0x331   : > { %v5639_v17 = vadd.f32 %v17071_v41, %v5638_v52  ;;  %v8006_v35 = vsel %vm1032_vm3, %v7997_v38, %v8005_v50  ;;  %v8040_v19 = vor.u32 %v8039_v7, %v8036_v44  ;;  %v12372_v51 = vcombine.low %v16940_v55, %v16940_v55  ;;  %v17145_v55 = vld [vmem:[#allocation3 + $0x98] sm:$0xf]  ;;  %v17147_v38 = vld [vmem:[#allocation3 + $0xa8] sm:$0xf]  ;;  %13835 = vmatprep.subr.bf16.mxu1 %v14419_v56 }
 0x332   : > { %v8048_v21 = vor.u32 %v8047_v60, %v8044_v16  ;;  %v5790_v11 = vmax.f32 %v5758_v59, 0.0  ;;  %v5756_v8 = vadd.f32 %v17094_v23, %v5717_v48  ;;  %v5720_v22 = vmul.f32 %v17080_v24, %v5681_v58  ;;  %13803 = vmatprep.mubr.bf16.mxu0 %v8006_v35  ;;  %13836 = vmatpush3.bf16.msra.mxu1 %v14419_v56  ;;  %v19162_v48 = vld [vmem:[#allocation45_spill] sm:$0xff] }
 0x333   : > { %v5679_v37 = vadd.f32 %v5639_v17, %v19161_v42  ;;  %v7836_v9 = vshrl.u32 %v12371_v62, 16  ;;  %v7839_v18 = vshll.u32 %v12371_v62, 16  ;;  %v7844_v41 = vshrl.u32 %v12372_v51, 16 }
 0x334   : > { %v8049_v10 = vsel %vm1032_vm3, %v8040_v19, %v8048_v21  ;;  %v12661_v32 = vpack.c.bf16 %v5790_v11, %v5790_v11  ;;  %v5788_v14 = vmax.f32 %v5756_v8, 0.0  ;;  %v5759_v27 = vadd.f32 %v17094_v23, %v5720_v22  ;;  %v19164_v21 = vld [vmem:[#allocation57_spill] sm:$0xff] }
 0x335   : > { %v5718_v40 = vmul.f32 %v17080_v24, %v5679_v37  ;;  %13804 = vmatmul.mubr.bf16.gmra.mxu0 %v8049_v10  ;;  %v7838_v49 = vrot.slane %v7836_v9, 3  ;;  %v7841_v47 = vrot.slane %v7839_v18, 4  ;;  %v7846_v34 = vrot.slane %v7844_v41, 3 }
 0x336   : > { %v7847_v25 = vshll.u32 %v12372_v51, 16  ;;  %6056 = vst [vmem:[#allocation3 + $0x104] sm:$0xf] %v12661_v32  ;;  %v12659_v30 = vpack.c.bf16 %v5788_v14, %v5788_v14  ;;  %v5791_v3 = vmax.f32 %v5759_v27, 0.0  ;;  %v7515_v33 = vshrl.u32 %v17022_v45, 16 }
 0x337   : > { %v5757_v57 = vadd.f32 %v17094_v23, %v5718_v40  ;;  %v7842_v24 = vor.u32 %v7841_v47, %v7838_v49  ;;  %v7518_v46 = vshll.u32 %v17022_v45, 16  ;;  %v17156_v44 = vcombine.low %v17151_v13, %v17145_v55 }
 0x338   : > { %v7849_v12 = vrot.slane %v7847_v25, 4  ;;  %6054 = vst [vmem:[#allocation3 + $0xf4] sm:$0xf] %v12659_v30  ;;  %v12662_v28 = vpack.c.bf16 %v5791_v3, %v5791_v3  ;;  %v7517_v23 = vrot.slane %v7515_v33, 4  ;;  %v17162_v1 = vcombine.low %v17158_v39, %v17147_v38 }
 0x339   : > { %v5789_v61 = vmax.f32 %v5757_v57, 0.0  ;;  %v7520_v31 = vrot.slane %v7518_v46, 5  ;;  %v7682_v50 = vrot.slane %v17156_v44, 5  ;;  %v12373_v45 = vcombine.low %v7286_v36, %v17017_v54  ;;  %v14373_v25 = vld [vmem:[#allocation3 + $0xcc] ss:$0 sps:$4 sm:$0x11]  }
 0x33a   : > { %v7850_v43 = vor.u32 %v7849_v12, %v7846_v34  ;;  %6057 = vst [vmem:[#allocation3 + $0x108] sm:$0xf] %v12662_v28  ;;  %v7685_v7 = vrot.slane %v17162_v1, 5  ;;  %v12374_v16 = vcombine.low %v17009_v5, %v17009_v5  ;;  %v7523_v60 = vshrl.u32 %v17029_v2, 16  ;;  %v17177_v36 = vld [vmem:[#allocation3 + $0xb8] sm:$0xf] }
 0x33b   : > { %v12660_v52 = vpack.c.bf16 %v5789_v61, %v5789_v61  ;;  %v7521_v59 = vor.u32 %v7520_v31, %v7517_v23  ;;  %v19163_v53 = vrot.slane %v19162_v48, 5  ;;  %v8077_v17 = vshrl.u32 %v7682_v50, 16  ;;  %v17180_v28 = vld [vmem:[#allocation3 + $0xc8] sm:$0xf]  ;;  %v7289_v61 = vld [vmem:[#allocation3 + $0x60] sm:$0x8] }
 0x33c   : > { %v7851_v62 = vsel %vm1032_vm3, %v7842_v24, %v7850_v43  ;;  %v8080_v54 = vshll.u32 %v7682_v50, 16  ;;  %v19165_v51 = vrot.slane %v19164_v21, 5  ;;  %v8120_v42 = vshrl.u32 %v7685_v7, 16  ;;  %v17189_v48 = vld [vmem:[#allocation3 + $0xc4] sm:$0xf] }
 0x33d   : > { %v7684_v58 = vsel %vm983_vm7, %v7682_v50, %v19163_v53  ;;  %6055 = vst [vmem:[#allocation3 + $0xf8] sm:$0xf] %v12660_v52  ;;  %8692 = vmatmul.mubr.bf16.gmra.mxu1 %v7851_v62  ;;  %v7896_v11 = vshrl.u32 %v7521_v59, 16  ;;  %v7899_v8 = vshll.u32 %v7521_v59, 16  ;;  %v8079_v22 = vrot.slane %v8077_v17, 3 }
 0x33e   : > { %v8085_v35 = vshrl.u32 %v7684_v58, 16  ;;  %v8088_v19 = vshll.u32 %v7684_v58, 16  ;;  %v7687_v5 = vsel %vm983_vm7, %v7685_v7, %v19165_v51  ;;  %v8082_v37 = vrot.slane %v8080_v54, 4  ;;  %v17182_v52 = vld [vmem:[#allocation3 + $0xb4] sm:$0xf] }
 0x33f   : > { %v8123_v18 = vshll.u32 %v7685_v7, 16  ;;  %v7898_v41 = vrot.slane %v7896_v11, 3  ;;  %v7901_v32 = vrot.slane %v7899_v8, 4  ;;  %v8122_v14 = vrot.slane %v8120_v42, 3  ;;  %v19166_v8 = vld [vmem:[#allocation61_spill] sm:$0xff] }
 0x340   : > { %v8087_v10 = vrot.slane %v8085_v35, 3  ;;  %v8090_v9 = vrot.slane %v8088_v19, 4  ;;  %v8128_v27 = vshrl.u32 %v7687_v5, 16  ;;  %v8083_v40 = vor.u32 %v8082_v37, %v8079_v22 }
 0x341   : > { %v8125_v47 = vrot.slane %v8123_v18, 4  ;;  %v8131_v34 = vshll.u32 %v7687_v5, 16  ;;  %v7902_v30 = vor.u32 %v7901_v32, %v7898_v41  ;;  %v7879_v57 = vshrl.u32 %v12373_v45, 16 }
 0x342   : > { %v8091_v49 = vor.u32 %v8090_v9, %v8087_v10  ;;  %v8130_v3 = vrot.slane %v8128_v27, 3  ;;  %v7882_v33 = vshll.u32 %v12373_v45, 16  ;;  %v7887_v56 = vshrl.u32 %v12374_v16, 16 }
 0x343   : > { %v8126_v12 = vor.u32 %v8125_v47, %v8122_v14  ;;  %v8133_v46 = vrot.slane %v8131_v34, 4  ;;  %8699 = vmatprep.mubr.bf16.mxu1 %v7902_v30  ;;  %v7881_v23 = vrot.slane %v7879_v57, 3  ;;  %v7890_v31 = vshll.u32 %v12374_v16, 16 }
 0x344   : > { %v8092_v24 = vsel %vm1032_vm3, %v8083_v40, %v8091_v49  ;;  %v7884_v43 = vrot.slane %v7882_v33, 4  ;;  %v7525_v50 = vrot.slane %v7523_v60, 4  ;;  %v7889_v45 = vrot.slane %v7887_v56, 3  ;;  %v5886_v56 = vld [vmem:[#allocation3 + $0xdc] sm:$0x1] }
 0x345   : > { %13807 = vmatprep.mubr.bf16.mxu0 %v8092_v24  ;;  %v8134_v7 = vor.u32 %v8133_v46, %v8130_v3  ;;  %v7526_v62 = vshll.u32 %v17029_v2, 16  ;;  %v17187_v59 = vcombine.low %v17182_v52, %v17177_v36  ;;  %v7892_v58 = vrot.slane %v7890_v31, 4 }
 0x346   : > { %v7885_v53 = vor.u32 %v7884_v43, %v7881_v23  ;;  %v17193_v17 = vcombine.low %v17189_v48, %v17180_v28  ;;  %v7692_v16 = vrot.slane %v14373_v25, 5  ;;  %v12375_v2 = vcombine.low %v7289_v61, %v17024_v4 }
 0x347   : > { %v8135_v60 = vsel %vm1032_vm3, %v8126_v12, %v8134_v7  ;;  %v7528_v54 = vrot.slane %v7526_v62, 5  ;;  %v7688_v35 = vrot.slane %v17187_v59, 5  ;;  %v7893_v19 = vor.u32 %v7892_v58, %v7889_v45  ;;  %v7292_v7 = vld [vmem:[#allocation3 + $0x70] sm:$0x8] }
 0x348   : > { %13808 = vmatmul.mubr.bf16.gmra.mxu0 %v8135_v60  ;;  %v7691_v21 = vrot.slane %v17193_v17, 5  ;;  %v12376_v51 = vcombine.low %v17013_v15, %v17013_v15  ;;  %v7531_v5 = vshrl.u32 %v17106_v29, 16  ;;  %v19167_v22 = vrot.slane %v19166_v8, 5  ;;  %v14429_v60 = vld [vmem:[#allocation9 + $0x80] sm:$0xff]  }
 0x349   : > { %v7529_v11 = vor.u32 %v7528_v54, %v7525_v50  ;;  %v8163_v37 = vshrl.u32 %v7688_v35, 16  ;;  %v8166_v10 = vshll.u32 %v7688_v35, 16  ;;  %v7894_v9 = vsel %vm1032_vm3, %v7885_v53, %v7893_v19  ;;  %v5889_v50 = vld [vmem:[#allocation3 + $0xec] sm:$0x1]  ;;  %13837 = vmatprep.subr.bf16.mxu1 %v14429_v60 }
 0x34a   : > { %v7690_v42 = vsel %vm983_vm7, %v7688_v35, %v19167_v22  ;;  %v7693_v41 = vsel %vm983_vm7, %v7691_v21, %v7692_v16  ;;  %8700 = vmatmul.mubr.bf16.gmra.mxu1 %v7894_v9  ;;  %v8206_v47 = vshrl.u32 %v7691_v21, 16  ;;  %v8209_v34 = vshll.u32 %v7691_v21, 16  ;;  %v17208_v16 = vld [vmem:[#allocation3 + $0xd8] sm:$0xf] }
 0x34b   : > { %v8171_v18 = vshrl.u32 %v7690_v42, 16  ;;  %v8174_v4 = vshll.u32 %v7690_v42, 16  ;;  %v7939_v32 = vshrl.u32 %v7529_v11, 16  ;;  %v7942_v14 = vshll.u32 %v7529_v11, 16  ;;  %v17210_v11 = vld [vmem:[#allocation3 + $0xe8] sm:$0xf]  ;;  %13838 = vmatpush3.bf16.msra.mxu1 %v14429_v60 }
 0x34c   : > { %v8165_v27 = vrot.slane %v8163_v37, 3  ;;  %v8168_v15 = vrot.slane %v8166_v10, 4  ;;  %v8214_v57 = vshrl.u32 %v7693_v41, 16  ;;  %v8208_v24 = vrot.slane %v8206_v47, 3  ;;  %v17215_v10 = vld [vmem:[#allocation3 + $0xd4] sm:$0xf] }
 0x34d   : > { %v8173_v40 = vrot.slane %v8171_v18, 3  ;;  %v8176_v49 = vrot.slane %v8174_v4, 4  ;;  %v7941_v25 = vrot.slane %v7939_v32, 3  ;;  %v7944_v30 = vrot.slane %v7942_v14, 4 }
 0x34e   : > { %v8169_v3 = vor.u32 %v8168_v15, %v8165_v27  ;;  %v8211_v12 = vrot.slane %v8209_v34, 4  ;;  %v8217_v46 = vshll.u32 %v7693_v41, 16  ;;  %v8216_v23 = vrot.slane %v8214_v57, 3 }
 0x34f   : > { %v8177_v33 = vor.u32 %v8176_v49, %v8173_v40  ;;  %v7945_v61 = vor.u32 %v7944_v30, %v7941_v25  ;;  %v7922_v43 = vshrl.u32 %v12375_v2, 16  ;;  %v7925_v31 = vshll.u32 %v12375_v2, 16 }
 0x350   : > { %v8212_v62 = vor.u32 %v8211_v12, %v8208_v24  ;;  %v8219_v53 = vrot.slane %v8217_v46, 4  ;;  %v7930_v58 = vshrl.u32 %v12376_v51, 16  ;;  %v7933_v19 = vshll.u32 %v12376_v51, 16 }
 0x351   : > { %v8178_v45 = vsel %vm1032_vm3, %v8169_v3, %v8177_v33  ;;  %8707 = vmatprep.mubr.bf16.mxu1 %v7945_v61  ;;  %v7924_v54 = vrot.slane %v7922_v43, 3  ;;  %v7927_v35 = vrot.slane %v7925_v31, 4  ;;  %v7533_v21 = vrot.slane %v7531_v5, 4  ;;  %v17223_v5 = vld [vmem:[#allocation3 + $0xe4] sm:$0xf] }
 0x352   : > { %13811 = vmatprep.mubr.bf16.mxu0 %v8178_v45  ;;  %v8220_v8 = vor.u32 %v8219_v53, %v8216_v23  ;;  %v7932_v2 = vrot.slane %v7930_v58, 3  ;;  %v7534_v22 = vshll.u32 %v17106_v29, 16  ;;  %v5887_v37 = vsel %vm15131_vm6, 0, %v5886_v56  ;;  %v5892_v61 = vld [vmem:[#allocation3 + $0xfc] sm:$0x1] }
 0x353   : > { %v7928_v9 = vor.u32 %v7927_v35, %v7924_v54  ;;  %v7935_v18 = vrot.slane %v7933_v19, 4  ;;  %5888 = vst [vmem:[#allocation3 + $0xdc] sm:$0x1] %v5887_v37  ;;  %v17219_v4 = vcombine.low %v17215_v10, %v17208_v16  ;;  %v5890_v51 = vsel %vm15131_vm6, 0, %v5889_v50  ;;  %v7317_v23 = vld [vmem:[#allocation3 + $0xf4] sm:$0xf] }
 0x354   : > { %v8221_v29 = vsel %vm1032_vm3, %v8212_v62, %v8220_v8  ;;  %v7536_v41 = vrot.slane %v7534_v22, 5  ;;  %5891 = vst [vmem:[#allocation3 + $0xec] sm:$0x1] %v5890_v51  ;;  %v17228_v32 = vcombine.low %v17223_v5, %v17210_v11  ;;  %v12377_v14 = vcombine.low %v7292_v7, %v17100_v20  ;;  %v5895_v45 = vld [vmem:[#allocation3 + $0x10c] sm:$0x1] }
 0x355   : > { %13812 = vmatmul.mubr.bf16.gmra.mxu0 %v8221_v29  ;;  %v7936_v27 = vor.u32 %v7935_v18, %v7932_v2  ;;  %v7694_v15 = vrot.slane %v17219_v4, 5  ;;  %v12378_v40 = vcombine.low %v17086_v63, %v17086_v63  ;;  %v7539_v49 = vshrl.u32 %v17110_v26, 16  ;;  %v7318_v63 = vld [vmem:[#allocation3 + $0xf8] sm:$0xf]  ;;  %v7321_v62 = vld [vmem:[#allocation3 + $0x108] sm:$0xf] }
 0x356   : > { %v7537_v47 = vor.u32 %v7536_v41, %v7533_v21  ;;  %v7697_v34 = vrot.slane %v17228_v32, 5  ;;  %v7965_v25 = vshrl.u32 %v12377_v14, 16  ;;  %v7968_v30 = vshll.u32 %v12377_v14, 16  ;;  %v7320_v22 = vld [vmem:[#allocation3 + $0x104] sm:$0xf] }
 0x357   : > { %v7937_v3 = vsel %vm1032_vm3, %v7928_v9, %v7936_v27  ;;  %v8249_v57 = vshrl.u32 %v7694_v15, 16  ;;  %v8252_v33 = vshll.u32 %v7694_v15, 16  ;;  %v7973_v24 = vshrl.u32 %v12378_v40, 16 }
 0x358   : > { %8708 = vmatmul.mubr.bf16.gmra.mxu1 %v7937_v3  ;;  %v7982_v20 = vshrl.u32 %v7537_v47, 16  ;;  %v7985_v12 = vshll.u32 %v7537_v47, 16  ;;  %v8292_v46 = vshrl.u32 %v7697_v34, 16  ;;  %v8295_v56 = vshll.u32 %v7697_v34, 16 }
 0x359   : > { %v17237_v43 = vrot.slane %v8249_v57, 3  ;;  %v17239_v31 = vrot.slane %v8252_v33, 4  ;;  %v7967_v50 = vrot.slane %v7965_v25, 3  ;;  %v7970_v7 = vrot.slane %v7968_v30, 4 }
 0x35a   : > { %v7984_v53 = vrot.slane %v7982_v20, 3  ;;  %v7987_v58 = vrot.slane %v7985_v12, 4  ;;  %v17241_v60 = vrot.slane %v8292_v46, 3  ;;  %v17243_v54 = vrot.slane %v8295_v56, 4 }
 0x35b   : > { %v14378_v35 = vld [vmem:[#allocation3 + $0xdc] ss:$0 sps:$4 sm:$0x11]   ;;  %v8255_v19 = vor.u32 %v17239_v31, %v17237_v43  ;;  %v7971_v21 = vor.u32 %v7970_v7, %v7967_v50  ;;  %v7975_v8 = vrot.slane %v7973_v24, 3  ;;  %v17247_v2 = vcombine.low %v7317_v23, %v7318_v63  ;;  %v7295_v24 = vld [vmem:[#allocation3 + $0x80] sm:$0x8] }
 0x35c   : > { %v7988_v37 = vor.u32 %v7987_v58, %v7984_v53  ;;  %v14380_v9 = vld [vmem:[#allocation3 + $0xec] ss:$0 sps:$4 sm:$0x11]   ;;  %v8298_v18 = vor.u32 %v17243_v54, %v17241_v60  ;;  %v7976_v51 = vshll.u32 %v12378_v40, 16  ;;  %v7541_v29 = vrot.slane %v7539_v49, 4 }
 0x35d   : > { %v7695_v41 = vrot.slane %v14378_v35, 5  ;;  %v7542_v14 = vshll.u32 %v17110_v26, 16  ;;  %v5893_v27 = vsel %vm15131_vm6, 0, %v5892_v61  ;;  %v17255_v47 = vrot.slane %v17247_v2, 5  ;;  %v6059_v43 = vld [vmem:[#allocation3 + $0x4] sm:$0xf] }
 0x35e   : > { %8715 = vmatprep.mubr.bf16.mxu1 %v7988_v37  ;;  %v7698_v25 = vrot.slane %v14380_v9, 5  ;;  %v7978_v30 = vrot.slane %v7976_v51, 4  ;;  %5894 = vst [vmem:[#allocation3 + $0xfc] sm:$0x1] %v5893_v27  ;;  %v5896_v3 = vsel %vm15131_vm6, 0, %v5895_v45  ;;  %v17259_v57 = vcombine.low %v7320_v22, %v7321_v62  ;;  %v14440_v37 = vld [vmem:[#allocation9 + $0x1f8] sm:$0xff]  }
 0x35f   : > { %v7696_v40 = vsel %vm983_vm7, %v7694_v15, %v7695_v41  ;;  %v7544_v49 = vrot.slane %v7542_v14, 5  ;;  %v8335_v26 = vshrl.u32 %v17255_v47, 16  ;;  %v8338_v33 = vshll.u32 %v17255_v47, 16  ;;  %5897 = vst [vmem:[#allocation3 + $0x10c] sm:$0x1] %v5896_v3  ;;  %13471 = vmatprep.subr.bf16.mxu1 %v14440_v37 }
 0x360   : > { %v8257_v20 = vshrl.u32 %v7696_v40, 16  ;;  %v8260_v12 = vshll.u32 %v7696_v40, 16  ;;  %v7699_v46 = vsel %vm983_vm7, %v7697_v34, %v7698_v25  ;;  %v7979_v56 = vor.u32 %v7978_v30, %v7975_v8  ;;  %v6060_v45 = vld [vmem:[#allocation3 + $0x8] sm:$0xf]  ;;  %v6058_v34 = vld [vmem:[#allocation3] sm:$0x8] }
 0x361   : > { %v8300_v61 = vshrl.u32 %v7699_v46, 16  ;;  %v8303_v23 = vshll.u32 %v7699_v46, 16  ;;  %v7545_v42 = vor.u32 %v7544_v49, %v7541_v29  ;;  %v17265_v63 = vrot.slane %v8335_v26, 3 }
 0x362   : > { %v8259_v31 = vrot.slane %v8257_v20, 3  ;;  %v8262_v15 = vrot.slane %v8260_v12, 4  ;;  %v7980_v50 = vsel %vm1032_vm3, %v7971_v21, %v7979_v56  ;;  %v17268_v7 = vrot.slane %v8338_v33, 4 }
 0x363   : > { %v8302_v62 = vrot.slane %v8300_v61, 3  ;;  %v8305_v53 = vrot.slane %v8303_v23, 4  ;;  %8716 = vmatmul.mubr.bf16.gmra.mxu1 %v7980_v50  ;;  %v8025_v58 = vshrl.u32 %v7545_v42, 16  ;;  %v8028_v60 = vshll.u32 %v7545_v42, 16 }
 0x364   : > { %v8263_v54 = vor.u32 %v8262_v15, %v8259_v31  ;;  %v8341_v35 = vor.u32 %v17268_v7, %v17265_v63  ;;  %v7703_v8 = vrot.slane %v17259_v57, 5  ;;  %v12379_v22 = vcombine.low %v7295_v24, %v17102_v0 }
 0x365   : > { %v8306_v9 = vor.u32 %v8305_v53, %v8302_v62  ;;  %v8027_v21 = vrot.slane %v8025_v58, 3  ;;  %v8030_v51 = vrot.slane %v8028_v60, 4  ;;  %v12380_v29 = vcombine.low %v17088_v6, %v17088_v6  ;;  %v14386_v14 = vld [vmem:[#allocation3 + $0xfc] ss:$0 sps:$4 sm:$0x11]  }
 0x366   : > { %v8264_v41 = vsel %vm1032_vm3, %v8255_v19, %v8263_v54  ;;  %v8378_v27 = vshrl.u32 %v7703_v8, 16  ;;  %v17277_v25 = vcombine.low %v6059_v43, %v6060_v45  ;;  %v12301_v30 = vcombine.low %v6058_v34, %v6059_v43  ;;  %v14389_v0 = vld [vmem:[#allocation3 + $0x10c] ss:$0 sps:$4 sm:$0x11]  }
 0x367   : > { %13815 = vmatprep.mubr.bf16.mxu0 %v8264_v41  ;;  %v8307_v3 = vsel %vm1032_vm3, %v8298_v18, %v8306_v9  ;;  %v8031_v40 = vor.u32 %v8030_v51, %v8027_v21  ;;  %v8381_v49 = vshll.u32 %v7703_v8, 16  ;;  %v8008_v26 = vshrl.u32 %v12379_v22, 16 }
 0x368   : > { %13816 = vmatmul.mubr.bf16.gmra.mxu0 %v8307_v3  ;;  %v7701_v33 = vrot.slane %v14386_v14, 5  ;;  %v8380_v24 = vrot.slane %v8378_v27, 3  ;;  %v8011_v20 = vshll.u32 %v12379_v22, 16  ;;  %v8016_v6 = vshrl.u32 %v12380_v29, 16 }
 0x369   : > { %8723 = vmatprep.mubr.bf16.mxu1 %v8031_v40  ;;  %v7704_v19 = vrot.slane %v14389_v0, 5  ;;  %v8383_v12 = vrot.slane %v8381_v49, 4  ;;  %v8010_v46 = vrot.slane %v8008_v26, 3  ;;  %v8019_v56 = vshll.u32 %v12380_v29, 16  ;;  %v5826_v26 = vld [vmem:[#allocation3 + $0x90] sm:$0x8] }
 0x36a   : > { %v7702_v61 = vsel %vm983_vm7, %v17255_v47, %v7701_v33  ;;  %v8013_v23 = vrot.slane %v8011_v20, 4  ;;  %v8018_v42 = vrot.slane %v8016_v6, 3  ;;  %v7547_v18 = vshrl.u32 %v17156_v44, 16 }
 0x36b   : > { %v8343_v63 = vshrl.u32 %v7702_v61, 16  ;;  %v8346_v43 = vshll.u32 %v7702_v61, 16  ;;  %v7705_v31 = vsel %vm983_vm7, %v7703_v8, %v7704_v19  ;;  %v8384_v15 = vor.u32 %v8383_v12, %v8380_v24 }
 0x36c   : > { %v8386_v50 = vshrl.u32 %v7705_v31, 16  ;;  %v8389_v7 = vshll.u32 %v7705_v31, 16  ;;  %v8014_v62 = vor.u32 %v8013_v23, %v8010_v46  ;;  %v8021_v53 = vrot.slane %v8019_v56, 4 }
 0x36d   : > { %v8345_v58 = vrot.slane %v8343_v63, 3  ;;  %v8348_v60 = vrot.slane %v8346_v43, 4  ;;  %v7549_v34 = vrot.slane %v7547_v18, 4  ;;  %v7550_v54 = vshll.u32 %v17156_v44, 16 }
 0x36e   : > { %v8388_v22 = vrot.slane %v8386_v50, 3  ;;  %v8391_v47 = vrot.slane %v8389_v7, 4  ;;  %v8022_v37 = vor.u32 %v8021_v53, %v8018_v42  ;;  %v6267_v9 = vshrl.u32 %v17277_v25, 16  ;;  %v6063_v42 = vld [vmem:[#allocation3 + $0x18] sm:$0xf] }
 0x36f   : > { %v8349_v21 = vor.u32 %v8348_v60, %v8345_v58  ;;  %v7552_v51 = vrot.slane %v7550_v54, 5  ;;  %v6270_v29 = vshll.u32 %v17277_v25, 16  ;;  %v12302_v8 = vcombine.low %v6060_v45, %v6060_v45  ;;  %v6062_v53 = vld [vmem:[#allocation3 + $0x14] sm:$0xf] }
 0x370   : > { %v8392_v41 = vor.u32 %v8391_v47, %v8388_v22  ;;  %v8023_v14 = vsel %vm1032_vm3, %v8014_v62, %v8022_v37  ;;  %v6269_v27 = vrot.slane %v6267_v9, 4  ;;  %v6491_v3 = vshrl.u32 %v12301_v30, 16  ;;  %v6061_v22 = vld [vmem:[#allocation3 + $0x10] sm:$0x8] }
 0x371   : > { %v8350_v40 = vsel %vm1032_vm3, %v8341_v35, %v8349_v21  ;;  %8724 = vmatmul.mubr.bf16.gmra.mxu1 %v8023_v14  ;;  %v7553_v0 = vor.u32 %v7552_v51, %v7549_v34  ;;  %v6272_v44 = vrot.slane %v6270_v29, 5  ;;  %v6494_v49 = vshll.u32 %v12301_v30, 16  ;;  %v5829_v21 = vld [vmem:[#allocation3 + $0xa0] sm:$0x8] }
 0x372   : > { %13819 = vmatprep.mubr.bf16.mxu0 %v8350_v40  ;;  %v8393_v33 = vsel %vm1032_vm3, %v8384_v15, %v8392_v41  ;;  %v6493_v24 = vrot.slane %v6491_v3, 3  ;;  %v6499_v20 = vshrl.u32 %v12302_v8, 16  ;;  %v6502_v6 = vshll.u32 %v12302_v8, 16 }
 0x373   : > { %13820 = vmatmul.mubr.bf16.gmra.mxu0 %v8393_v33  ;;  %v8068_v45 = vshrl.u32 %v7553_v0, 16  ;;  %v8071_v19 = vshll.u32 %v7553_v0, 16  ;;  %v6273_v12 = vor.u32 %v6272_v44, %v6269_v27  ;;  %v6496_v46 = vrot.slane %v6494_v49, 4  ;;  %v14410_v0 = vld [vmem:[#allocation9 + $0x230] sm:$0xff]  }
 0x374   : > { %v6501_v56 = vrot.slane %v6499_v20, 3  ;;  %v6504_v61 = vrot.slane %v6502_v6, 4  ;;  %v5827_v35 = vsel %vm15008_vm2, 0, %v5826_v26  ;;  %v12382_v30 = vcombine.low %v17145_v55, %v17145_v55 }
 0x375   : > { %v8070_v18 = vrot.slane %v8068_v45, 3  ;;  %v8073_v63 = vrot.slane %v8071_v19, 4  ;;  %v6508_v43 = vshrl.u32 %v6273_v12, 16  ;;  %v6511_v31 = vshll.u32 %v6273_v12, 16  ;;  %5828 = vst [vmem:[#allocation3 + $0x90] sm:$0x8] %v5827_v35 }
 0x376   : > { %v6497_v15 = vor.u32 %v6496_v46, %v6493_v24  ;;  %v6505_v50 = vor.u32 %v6504_v61, %v6501_v56  ;;  %v8059_v7 = vshrl.u32 %v12382_v30, 16  ;;  %v8062_v62 = vshll.u32 %v12382_v30, 16  ;;  %v14590_v56 = vld [vmem:[#allocation9 + $0x238] sm:$0xff]  }
 0x377   : > { %v8074_v58 = vor.u32 %v8073_v63, %v8070_v18  ;;  %v6510_v60 = vrot.slane %v6508_v43, 3  ;;  %v6513_v34 = vrot.slane %v6511_v31, 4  ;;  %v17294_v54 = vcombine.low %v6062_v53, %v6063_v42  ;;  %v14420_v63 = vld [vmem:[#allocation9 + $0x228] sm:$0xff]  }
 0x378   : > { %v6506_v47 = vsel %vm1032_vm3, %v6497_v15, %v6505_v50  ;;  %v17297_v55 = vrot.slane %v8059_v7, 3  ;;  %v17299_v37 = vrot.slane %v8062_v62, 4  ;;  %v7555_v9 = vshrl.u32 %v17162_v1, 16 }
 0x379   : > { %8731 = vmatprep.mubr.bf16.mxu1 %v8074_v58  ;;  %v6514_v51 = vor.u32 %v6513_v34, %v6510_v60  ;;  %v6275_v29 = vshrl.u32 %v17294_v54, 16  ;;  %v6278_v8 = vshll.u32 %v17294_v54, 16  ;;  %v7558_v41 = vshll.u32 %v17162_v1, 16  ;;  %v6066_v58 = vld [vmem:[#allocation3 + $0x28] sm:$0xf] }
 0x37a   : > { %v8065_v14 = vor.u32 %v17299_v37, %v17297_v55  ;;  %v7557_v27 = vrot.slane %v7555_v9, 4  ;;  %v12303_v3 = vcombine.low %v6061_v22, %v6062_v53  ;;  %v12304_v40 = vcombine.low %v6063_v42, %v6063_v42 }
 0x37b   : > { %9133 = vmatprep.mubr.bf16.mxu0 %v6514_v51  ;;  %v6277_v44 = vrot.slane %v6275_v29, 4  ;;  %v6280_v49 = vrot.slane %v6278_v8, 5  ;;  %v7560_v26 = vrot.slane %v7558_v41, 5  ;;  %v5830_v33 = vsel %vm15008_vm2, 0, %v5829_v21  ;;  %v6065_v21 = vld [vmem:[#allocation3 + $0x24] sm:$0xf] }
 0x37c   : > { %9134 = vmatmul.mubr.bf16.vlgmr.msra.gmra.mxu0 %v6506_v47  ;;  %v7298_v24 = vld [vmem:[#allocation3 + $0x90] sm:$0x8]  ;;  %v6534_v20 = vshrl.u32 %v12303_v3, 16  ;;  %v6537_v6 = vshll.u32 %v12303_v3, 16  ;;  %v6542_v45 = vshrl.u32 %v12304_v40, 16  ;;  %v6545_v1 = vshll.u32 %v12304_v40, 16 }
 0x37d   : > { %5831 = vst [vmem:[#allocation3 + $0xa0] sm:$0x8] %v5830_v33  ;;  %v12381_v19 = vcombine.low %v7298_v24, %v17151_v13  ;;  %v6281_v12 = vor.u32 %v6280_v49, %v6277_v44  ;;  %v7561_v46 = vor.u32 %v7560_v26, %v7557_v27  ;;  %13872 = vmatpush3.bf16.msra.mxu0 %v14590_v56  ;;  %v14430_v3 = vld [vmem:[#allocation9 + $0x220] sm:$0xff]  }
 0x37e   : > { %v12384_v61 = vcombine.low %v17147_v38, %v17147_v38  ;;  %v6536_v35 = vrot.slane %v6534_v20, 3  ;;  %v6539_v30 = vrot.slane %v6537_v6, 4  ;;  %v6544_v42 = vrot.slane %v6542_v45, 3  ;;  %13873 = vmatprep.subr.bf16.mxu0 %v14410_v0  ;;  %v6064_v26 = vld [vmem:[#allocation3 + $0x20] sm:$0x8] }
 0x37f   : > { %v6547_v18 = vrot.slane %v6545_v1, 4  ;;  %v8051_v43 = vshrl.u32 %v12381_v19, 16  ;;  %v8054_v31 = vshll.u32 %v12381_v19, 16  ;;  %v6551_v15 = vshrl.u32 %v6281_v12, 16  ;;  %v5832_v45 = vld [vmem:[#allocation3 + $0xb0] sm:$0x8] }
 0x380   : > { %v6554_v50 = vshll.u32 %v6281_v12, 16  ;;  %v8111_v7 = vshrl.u32 %v7561_v46, 16  ;;  %v8114_v62 = vshll.u32 %v7561_v46, 16  ;;  %v6540_v13 = vor.u32 %v6539_v30, %v6536_v35  ;;  %v14443_v46 = vld [vmem:[#allocation9 + $0x218] sm:$0xff]  }
 0x381   : > { %v6548_v53 = vor.u32 %v6547_v18, %v6544_v42  ;;  %v8053_v60 = vrot.slane %v8051_v43, 3  ;;  %v8056_v34 = vrot.slane %v8054_v31, 4  ;;  %v6553_v22 = vrot.slane %v6551_v15, 3  ;;  %13874 = vmatpush3.bf16.msra.mxu0 %v14410_v0 }
 0x382   : > { %v6556_v47 = vrot.slane %v6554_v50, 4  ;;  %v8113_v38 = vrot.slane %v8111_v7, 3  ;;  %v8116_v55 = vrot.slane %v8114_v62, 4  ;;  %v8102_v9 = vshrl.u32 %v12384_v61, 16  ;;  %13875 = vmatprep.subr.bf16.mxu0 %v14420_v63 }
 0x383   : > { %v6549_v37 = vsel %vm1032_vm3, %v6540_v13, %v6548_v53  ;;  %v8057_v51 = vor.u32 %v8056_v34, %v8053_v60  ;;  %v8105_v41 = vshll.u32 %v12384_v61, 16  ;;  %v17313_v27 = vcombine.low %v6065_v21, %v6066_v58  ;;  %v14458_v53 = vld [vmem:[#allocation9 + $0x210] sm:$0xff]  }
 0x384   : > { %v6557_v29 = vor.u32 %v6556_v47, %v6553_v22  ;;  %v7301_v8 = vld [vmem:[#allocation3 + $0xa0] sm:$0x8]  ;;  %v8117_v40 = vor.u32 %v8116_v55, %v8113_v38  ;;  %v8104_v49 = vrot.slane %v8102_v9, 3  ;;  %v7563_v0 = vshrl.u32 %v17187_v59, 16  ;;  %v6069_v38 = vld [vmem:[#allocation3 + $0x38] sm:$0xf] }
 0x385   : > { %v12383_v44 = vcombine.low %v7301_v8, %v17158_v39  ;;  %v8066_v33 = vsel %vm1032_vm3, %v8057_v51, %v8065_v14  ;;  %v8107_v24 = vrot.slane %v8105_v41, 4  ;;  %v6283_v20 = vshrl.u32 %v17313_v27, 16  ;;  %13876 = vmatpush3.bf16.msra.mxu0 %v14420_v63  ;;  %v6068_v41 = vld [vmem:[#allocation3 + $0x34] sm:$0xf] }
 0x386   : > { %9141 = vmatprep.mubr.bf16.mxu0 %v6557_v29  ;;  %v6286_v6 = vshll.u32 %v17313_v27, 16  ;;  %8732 = vmatmul.mubr.bf16.gmra.mxu1 %v8066_v33  ;;  %v7565_v12 = vrot.slane %v7563_v0, 4  ;;  %v7566_v39 = vshll.u32 %v17187_v59, 16  ;;  %v12305_v35 = vcombine.low %v6064_v26, %v6065_v21 }
 0x387   : > { %9142 = vmatmul.mubr.bf16.gmra.mxu0 %v6549_v37  ;;  %v8094_v1 = vshrl.u32 %v12383_v44, 16  ;;  %v8097_v19 = vshll.u32 %v12383_v44, 16  ;;  %8739 = vmatprep.mubr.bf16.mxu1 %v8117_v40  ;;  %v8108_v56 = vor.u32 %v8107_v24, %v8104_v49  ;;  %v6285_v61 = vrot.slane %v6283_v20, 4  ;;  %v6067_v20 = vld [vmem:[#allocation3 + $0x30] sm:$0x8] }
 0x388   : > { %v6288_v14 = vrot.slane %v6286_v6, 5  ;;  %13877 = vmatprep.subr.bf16.mxu0 %v14430_v3  ;;  %v7568_v18 = vrot.slane %v7566_v39, 5  ;;  %v12306_v43 = vcombine.low %v6066_v58, %v6066_v58  ;;  %v6577_v63 = vshrl.u32 %v12305_v35, 16 }
 0x389   : > { %v8096_v30 = vrot.slane %v8094_v1, 3  ;;  %v8099_v42 = vrot.slane %v8097_v19, 4  ;;  %v6580_v15 = vshll.u32 %v12305_v35, 16  ;;  %v5833_v50 = vsel %vm15008_vm2, 0, %v5832_v45  ;;  %13878 = vmatpush3.bf16.msra.mxu0 %v14430_v3 }
 0x38a   : > { %v6289_v31 = vor.u32 %v6288_v14, %v6285_v61  ;;  %v7569_v59 = vor.u32 %v7568_v18, %v7565_v12  ;;  %v6585_v62 = vshrl.u32 %v12306_v43, 16  ;;  %v6588_v13 = vshll.u32 %v12306_v43, 16  ;;  %5834 = vst [vmem:[#allocation3 + $0xb0] sm:$0x8] %v5833_v50  ;;  %13879 = vmatprep.subr.bf16.mxu0 %v14443_v46  ;;  %v5835_v12 = vld [vmem:[#allocation3 + $0xc0] sm:$0x8] }
 0x38b   : > { %v8100_v7 = vor.u32 %v8099_v42, %v8096_v30  ;;  %v6579_v22 = vrot.slane %v6577_v63, 3  ;;  %v6582_v47 = vrot.slane %v6580_v15, 4  ;;  %v12386_v44 = vcombine.low %v17177_v36, %v17177_v36 }
 0x38c   : > { %v6594_v60 = vshrl.u32 %v6289_v31, 16  ;;  %v6597_v34 = vshll.u32 %v6289_v31, 16  ;;  %v8154_v55 = vshrl.u32 %v7569_v59, 16  ;;  %v8157_v37 = vshll.u32 %v7569_v59, 16 }
 0x38d   : > { %v8109_v58 = vsel %vm1032_vm3, %v8100_v7, %v8108_v56  ;;  %v6587_v9 = vrot.slane %v6585_v62, 3  ;;  %v6583_v29 = vor.u32 %v6582_v47, %v6579_v22  ;;  %v6590_v8 = vrot.slane %v6588_v13, 4  ;;  %13880 = vmatpush3.bf16.msra.mxu0 %v14443_v46 }
 0x38e   : > { %v6596_v21 = vrot.slane %v6594_v60, 3  ;;  %v6599_v51 = vrot.slane %v6597_v34, 4  ;;  %8740 = vmatmul.mubr.bf16.gmra.mxu1 %v8109_v58  ;;  %v8156_v3 = vrot.slane %v8154_v55, 3  ;;  %v8159_v40 = vrot.slane %v8157_v37, 4  ;;  %13881 = vmatprep.subr.bf16.mxu0 %v14458_v53 }
 0x38f   : > { %v17326_v49 = vcombine.low %v6068_v41, %v6069_v38  ;;  %v6591_v26 = vor.u32 %v6590_v8, %v6587_v9  ;;  %v7571_v33 = vshrl.u32 %v17193_v17, 16  ;;  %v7574_v24 = vshll.u32 %v17193_v17, 16 }
 0x390   : > { %v6600_v0 = vor.u32 %v6599_v51, %v6596_v21  ;;  %v8160_v6 = vor.u32 %v8159_v40, %v8156_v3  ;;  %v8145_v45 = vshrl.u32 %v12386_v44, 16  ;;  %v8148_v1 = vshll.u32 %v12386_v44, 16  ;;  %v6071_v44 = vld [vmem:[#allocation3 + $0x44] sm:$0xf] }
 0x391   : > { %v6291_v19 = vshrl.u32 %v17326_v49, 16  ;;  %v6592_v39 = vsel %vm1032_vm3, %v6583_v29, %v6591_v26  ;;  %v7304_v36 = vld [vmem:[#allocation3 + $0xb0] sm:$0x8]  ;;  %v6294_v46 = vshll.u32 %v17326_v49, 16  ;;  %v7573_v56 = vrot.slane %v7571_v33, 4  ;;  %13882 = vmatpush3.bf16.msra.mxu0 %v14458_v53 }
 0x392   : > { %9149 = vmatprep.mubr.bf16.mxu0 %v6600_v0  ;;  %v7576_v61 = vrot.slane %v7574_v24, 5  ;;  %8747 = vmatprep.mubr.bf16.mxu1 %v8160_v6  ;;  %v12385_v17 = vcombine.low %v7304_v36, %v17182_v52  ;;  %v8147_v14 = vrot.slane %v8145_v45, 3  ;;  %v8150_v35 = vrot.slane %v8148_v1, 4 }
 0x393   : > { %9150 = vmatmul.mubr.bf16.gmra.mxu0 %v6592_v39  ;;  %v6293_v30 = vrot.slane %v6291_v19, 4  ;;  %v6296_v42 = vrot.slane %v6294_v46, 5  ;;  %v12307_v43 = vcombine.low %v6067_v20, %v6068_v41  ;;  %v12308_v31 = vcombine.low %v6069_v38, %v6069_v38  ;;  %v6072_v38 = vld [vmem:[#allocation3 + $0x48] sm:$0xf] }
 0x394   : > { %v7577_v18 = vor.u32 %v7576_v61, %v7573_v56  ;;  %v8137_v63 = vshrl.u32 %v12385_v17, 16  ;;  %v8140_v15 = vshll.u32 %v12385_v17, 16  ;;  %v8151_v50 = vor.u32 %v8150_v35, %v8147_v14  ;;  %v14473_v19 = vld [vmem:[#allocation9 + $0x208] sm:$0xff]   ;;  %v6070_v35 = vld [vmem:[#allocation3 + $0x40] sm:$0x8] }
 0x395   : > { %v5836_v7 = vsel %vm15008_vm2, 0, %v5835_v12  ;;  %v6297_v59 = vor.u32 %v6296_v42, %v6293_v30  ;;  %v6620_v53 = vshrl.u32 %v12307_v43, 16  ;;  %v6623_v34 = vshll.u32 %v12307_v43, 16  ;;  %13883 = vmatprep.subr.bf16.mxu0 %v14473_v19 }
 0x396   : > { %v8197_v62 = vshrl.u32 %v7577_v18, 16  ;;  %v8200_v13 = vshll.u32 %v7577_v18, 16  ;;  %5837 = vst [vmem:[#allocation3 + $0xc0] sm:$0x8] %v5836_v7  ;;  %v8139_v60 = vrot.slane %v8137_v63, 3  ;;  %v8142_v52 = vrot.slane %v8140_v15, 4  ;;  %13884 = vmatpush3.bf16.msra.mxu0 %v14473_v19 }
 0x397   : > { %v6628_v22 = vshrl.u32 %v12308_v31, 16  ;;  %v6637_v47 = vshrl.u32 %v6297_v59, 16  ;;  %v6640_v58 = vshll.u32 %v6297_v59, 16  ;;  %v6622_v21 = vrot.slane %v6620_v53, 3 }
 0x398   : > { %v8199_v55 = vrot.slane %v8197_v62, 3  ;;  %v8202_v37 = vrot.slane %v8200_v13, 4  ;;  %v8143_v9 = vor.u32 %v8142_v52, %v8139_v60  ;;  %v6625_v51 = vrot.slane %v6623_v34, 4 }
 0x399   : > { %v6630_v29 = vrot.slane %v6628_v22, 3  ;;  %v6639_v8 = vrot.slane %v6637_v47, 3  ;;  %v6642_v41 = vrot.slane %v6640_v58, 4  ;;  %v6631_v40 = vshll.u32 %v12308_v31, 16 }
 0x39a   : > { %v8203_v3 = vor.u32 %v8202_v37, %v8199_v55  ;;  %v8152_v0 = vsel %vm1032_vm3, %v8143_v9, %v8151_v50  ;;  %v6626_v26 = vor.u32 %v6625_v51, %v6622_v21  ;;  %v12388_v33 = vcombine.low %v17180_v28, %v17180_v28  ;;  %v5838_v21 = vld [vmem:[#allocation3 + $0xd0] sm:$0x8] }
 0x39b   : > { %v17339_v24 = vcombine.low %v6071_v44, %v6072_v38  ;;  %8748 = vmatmul.mubr.bf16.gmra.mxu1 %v8152_v0  ;;  %v6643_v20 = vor.u32 %v6642_v41, %v6639_v8  ;;  %v6633_v6 = vrot.slane %v6631_v40, 4  ;;  %v7579_v45 = vshrl.u32 %v17219_v4, 16 }
 0x39c   : > { %v7582_v1 = vshll.u32 %v17219_v4, 16  ;;  %8755 = vmatprep.mubr.bf16.mxu1 %v8203_v3  ;;  %v8188_v39 = vshrl.u32 %v12388_v33, 16  ;;  %v8191_v36 = vshll.u32 %v12388_v33, 16  ;;  %v12309_v59 = vcombine.low %v6070_v35, %v6071_v44  ;;  %v6075_v3 = vld [vmem:[#allocation3 + $0x58] sm:$0xf] }
 0x39d   : > { %v7307_v12 = vld [vmem:[#allocation3 + $0xc0] sm:$0x8]  ;;  %v6299_v46 = vshrl.u32 %v17339_v24, 16  ;;  %v6302_v56 = vshll.u32 %v17339_v24, 16  ;;  %9157 = vmatprep.mubr.bf16.mxu0 %v6643_v20  ;;  %v6634_v28 = vor.u32 %v6633_v6, %v6630_v29  ;;  %v7581_v17 = vrot.slane %v7579_v45, 4 }
 0x39e   : > { %v12387_v61 = vcombine.low %v7307_v12, %v17189_v48  ;;  %v7584_v14 = vrot.slane %v7582_v1, 5  ;;  %v8190_v30 = vrot.slane %v8188_v39, 3  ;;  %v8193_v42 = vrot.slane %v8191_v36, 4  ;;  %v6073_v33 = vld [vmem:[#allocation3 + $0x50] sm:$0x8] }
 0x39f   : > { %v6301_v4 = vrot.slane %v6299_v46, 4  ;;  %v6304_v18 = vrot.slane %v6302_v56, 5  ;;  %v6635_v43 = vsel %vm1032_vm3, %v6626_v26, %v6634_v28  ;;  %v12310_v62 = vcombine.low %v6072_v38, %v6072_v38  ;;  %v6074_v26 = vld [vmem:[#allocation3 + $0x54] sm:$0xf] }
 0x3a0   : > { %v8180_v31 = vshrl.u32 %v12387_v61, 16  ;;  %v8183_v63 = vshll.u32 %v12387_v61, 16  ;;  %v7585_v15 = vor.u32 %v7584_v14, %v7581_v17  ;;  %9158 = vmatmul.mubr.bf16.gmra.mxu0 %v6635_v43  ;;  %v8194_v50 = vor.u32 %v8193_v42, %v8190_v30  ;;  %v5841_v43 = vld [vmem:[#allocation3 + $0xe0] sm:$0x8] }
 0x3a1   : > { %v6305_v7 = vor.u32 %v6304_v18, %v6301_v4  ;;  %v6663_v22 = vshrl.u32 %v12309_v59, 16  ;;  %v6666_v47 = vshll.u32 %v12309_v59, 16  ;;  %v6671_v9 = vshrl.u32 %v12310_v62, 16 }
 0x3a2   : > { %v8182_v48 = vrot.slane %v8180_v31, 3  ;;  %v8185_v13 = vrot.slane %v8183_v63, 4  ;;  %v8240_v53 = vshrl.u32 %v7585_v15, 16  ;;  %v8243_v60 = vshll.u32 %v7585_v15, 16 }
 0x3a3   : > { %v6680_v52 = vshrl.u32 %v6305_v7, 16  ;;  %v6683_v34 = vshll.u32 %v6305_v7, 16  ;;  %v6665_v8 = vrot.slane %v6663_v22, 3  ;;  %v6668_v41 = vrot.slane %v6666_v47, 4 }
 0x3a4   : > { %v8186_v58 = vor.u32 %v8185_v13, %v8182_v48  ;;  %v8242_v55 = vrot.slane %v8240_v53, 3  ;;  %v8245_v37 = vrot.slane %v8243_v60, 4  ;;  %v6673_v44 = vrot.slane %v6671_v9, 3 }
 0x3a5   : > { %v6682_v51 = vrot.slane %v6680_v52, 3  ;;  %v6685_v29 = vrot.slane %v6683_v34, 4  ;;  %v6674_v0 = vshll.u32 %v12310_v62, 16  ;;  %v6669_v6 = vor.u32 %v6668_v41, %v6665_v8 }
 0x3a6   : > { %v8195_v38 = vsel %vm1032_vm3, %v8186_v58, %v8194_v50  ;;  %v8246_v40 = vor.u32 %v8245_v37, %v8242_v55  ;;  %v5839_v45 = vsel %vm15008_vm2, 0, %v5838_v21  ;;  %v12390_v1 = vcombine.low %v17208_v16, %v17208_v16 }
 0x3a7   : > { %8756 = vmatmul.mubr.bf16.gmra.mxu1 %v8195_v38  ;;  %v6686_v20 = vor.u32 %v6685_v29, %v6682_v51  ;;  %v6676_v19 = vrot.slane %v6674_v0, 4  ;;  %5840 = vst [vmem:[#allocation3 + $0xd0] sm:$0x8] %v5839_v45  ;;  %v17352_v12 = vcombine.low %v6074_v26, %v6075_v3  ;;  %v7587_v39 = vshrl.u32 %v17228_v32, 16  ;;  %v6077_v45 = vld [vmem:[#allocation3 + $0x64] sm:$0xf] }
 0x3a8   : > { %8763 = vmatprep.mubr.bf16.mxu1 %v8246_v40  ;;  %v7590_v36 = vshll.u32 %v17228_v32, 16  ;;  %v8231_v46 = vshrl.u32 %v12390_v1, 16  ;;  %v8234_v56 = vshll.u32 %v12390_v1, 16  ;;  %v12311_v28 = vcombine.low %v6073_v33, %v6074_v26 }
 0x3a9   : > { %9165 = vmatprep.mubr.bf16.mxu0 %v6686_v20  ;;  %v12312_v61 = vcombine.low %v6075_v3, %v6075_v3  ;;  %v6677_v17 = vor.u32 %v6676_v19, %v6673_v44  ;;  %v6307_v14 = vshrl.u32 %v17352_v12, 16  ;;  %v6310_v35 = vshll.u32 %v17352_v12, 16  ;;  %v6078_v3 = vld [vmem:[#allocation3 + $0x68] sm:$0xf] }
 0x3aa   : > { %v7589_v16 = vrot.slane %v7587_v39, 4  ;;  %v17358_v30 = vrot.slane %v8231_v46, 3  ;;  %v17360_v42 = vrot.slane %v8234_v56, 4  ;;  %v7592_v4 = vrot.slane %v7590_v36, 5 }
 0x3ab   : > { %v6706_v18 = vshrl.u32 %v12311_v28, 16  ;;  %v6678_v32 = vsel %vm1032_vm3, %v6669_v6, %v6677_v17  ;;  %v6309_v31 = vrot.slane %v6307_v14, 4  ;;  %v6312_v63 = vrot.slane %v6310_v35, 5 }
 0x3ac   : > { %v6709_v15 = vshll.u32 %v12311_v28, 16  ;;  %9166 = vmatmul.mubr.bf16.gmra.mxu0 %v6678_v32  ;;  %v8237_v50 = vor.u32 %v17360_v42, %v17358_v30  ;;  %v7593_v7 = vor.u32 %v7592_v4, %v7589_v16  ;;  %v6714_v62 = vshrl.u32 %v12312_v61, 16 }
 0x3ad   : > { %v6708_v59 = vrot.slane %v6706_v18, 3  ;;  %v6313_v48 = vor.u32 %v6312_v63, %v6309_v31  ;;  %v6717_v53 = vshll.u32 %v12312_v61, 16  ;;  %v5842_v60 = vsel %vm15008_vm2, 0, %v5841_v43  ;;  %v14488_v43 = vld [vmem:[#allocation9 + $0x200] sm:$0xff]  }
 0x3ae   : > { %v6711_v13 = vrot.slane %v6709_v15, 4  ;;  %v7310_v52 = vld [vmem:[#allocation3 + $0xd0] sm:$0x8]  ;;  %v8283_v34 = vshrl.u32 %v7593_v7, 16  ;;  %v8286_v22 = vshll.u32 %v7593_v7, 16  ;;  %v6716_v47 = vrot.slane %v6714_v62, 3  ;;  %13885 = vmatprep.subr.bf16.mxu0 %v14488_v43 }
 0x3af   : > { %5843 = vst [vmem:[#allocation3 + $0xe0] sm:$0x8] %v5842_v60  ;;  %v12392_v58 = vcombine.low %v17210_v11, %v17210_v11  ;;  %v12389_v55 = vcombine.low %v7310_v52, %v17215_v10  ;;  %v6723_v37 = vshrl.u32 %v6313_v48, 16  ;;  %v6726_v9 = vshll.u32 %v6313_v48, 16  ;;  %v6076_v11 = vld [vmem:[#allocation3 + $0x60] sm:$0x8]  ;;  %13886 = vmatpush3.bf16.msra.mxu0 %v14488_v43 }
 0x3b0   : > { %v6712_v21 = vor.u32 %v6711_v13, %v6708_v59  ;;  %v8285_v51 = vrot.slane %v8283_v34, 3  ;;  %v8288_v29 = vrot.slane %v8286_v22, 4  ;;  %v6719_v8 = vrot.slane %v6717_v53, 4 }
 0x3b1   : > { %v8274_v41 = vshrl.u32 %v12392_v58, 16  ;;  %v8223_v38 = vshrl.u32 %v12389_v55, 16  ;;  %v8226_v40 = vshll.u32 %v12389_v55, 16  ;;  %v6725_v44 = vrot.slane %v6723_v37, 3  ;;  %v5844_v37 = vld [vmem:[#allocation3 + $0xf0] sm:$0x8] }
 0x3b2   : > { %v6728_v0 = vrot.slane %v6726_v9, 4  ;;  %v8289_v26 = vor.u32 %v8288_v29, %v8285_v51  ;;  %v6720_v33 = vor.u32 %v6719_v8, %v6716_v47  ;;  %v8277_v6 = vshll.u32 %v12392_v58, 16  ;;  %v6080_v9 = vld [vmem:[#allocation3 + $0x74] sm:$0xf] }
 0x3b3   : > { %v8276_v20 = vrot.slane %v8274_v41, 3  ;;  %v8225_v1 = vrot.slane %v8223_v38, 3  ;;  %v8228_v10 = vrot.slane %v8226_v40, 4  ;;  %v17370_v39 = vcombine.low %v6077_v45, %v6078_v3  ;;  %v6081_v41 = vld [vmem:[#allocation3 + $0x78] sm:$0xf] }
 0x3b4   : > { %v6729_v19 = vor.u32 %v6728_v0, %v6725_v44  ;;  %v6721_v36 = vsel %vm1032_vm3, %v6712_v21, %v6720_v33  ;;  %v8279_v46 = vrot.slane %v8277_v6, 4  ;;  %v7595_v56 = vshrl.u32 %v17247_v2, 16  ;;  %v6079_v0 = vld [vmem:[#allocation3 + $0x70] sm:$0x8]  ;;  %v14591_v6 = vld [vmem:[#allocation3 + $0xf8] sm:$0xf] }
 0x3b5   : > { %v7598_v28 = vshll.u32 %v17247_v2, 16  ;;  %v8229_v61 = vor.u32 %v8228_v10, %v8225_v1  ;;  %v6315_v14 = vshrl.u32 %v17370_v39, 16  ;;  %v6318_v35 = vshll.u32 %v17370_v39, 16 }
 0x3b6   : > { %9173 = vmatprep.mubr.bf16.mxu0 %v6729_v19  ;;  %v7313_v17 = vld [vmem:[#allocation3 + $0xe0] sm:$0x8]  ;;  %v12313_v16 = vcombine.low %v6076_v11, %v6077_v45  ;;  %v8280_v42 = vor.u32 %v8279_v46, %v8276_v20  ;;  %v7597_v4 = vrot.slane %v7595_v56, 4  ;;  %v12314_v2 = vcombine.low %v6078_v3, %v6078_v3 }
 0x3b7   : > { %9174 = vmatmul.mubr.bf16.gmra.mxu0 %v6721_v36  ;;  %v12391_v30 = vcombine.low %v7313_v17, %v17223_v5  ;;  %v7600_v18 = vrot.slane %v7598_v28, 5  ;;  %v8238_v32 = vsel %vm1032_vm3, %v8229_v61, %v8237_v50  ;;  %v6317_v31 = vrot.slane %v6315_v14, 4 }
 0x3b8   : > { %v6320_v63 = vrot.slane %v6318_v35, 5  ;;  %8764 = vmatmul.mubr.bf16.gmra.mxu1 %v8238_v32  ;;  %v6749_v62 = vshrl.u32 %v12313_v16, 16  ;;  %v6752_v13 = vshll.u32 %v12313_v16, 16  ;;  %v6757_v53 = vshrl.u32 %v12314_v2, 16 }
 0x3b9   : > { %v8266_v15 = vshrl.u32 %v12391_v30, 16  ;;  %v8269_v7 = vshll.u32 %v12391_v30, 16  ;;  %v7601_v59 = vor.u32 %v7600_v18, %v7597_v4  ;;  %8771 = vmatprep.mubr.bf16.mxu1 %v8289_v26  ;;  %v6760_v5 = vshll.u32 %v12314_v2, 16  ;;  %v5847_v18 = vld [vmem:[#allocation3 + $0x100] sm:$0x8] }
 0x3ba   : > { %v6321_v48 = vor.u32 %v6320_v63, %v6317_v31  ;;  %v6751_v58 = vrot.slane %v6749_v62, 3  ;;  %v6754_v55 = vrot.slane %v6752_v13, 4  ;;  %v6759_v8 = vrot.slane %v6757_v53, 3 }
 0x3bb   : > { %v8268_v60 = vrot.slane %v8266_v15, 3  ;;  %v8271_v52 = vrot.slane %v8269_v7, 4  ;;  %v8326_v34 = vshrl.u32 %v7601_v59, 16  ;;  %v8329_v22 = vshll.u32 %v7601_v59, 16 }
 0x3bc   : > { %v6766_v50 = vshrl.u32 %v6321_v48, 16  ;;  %v6769_v47 = vshll.u32 %v6321_v48, 16  ;;  %v6755_v40 = vor.u32 %v6754_v55, %v6751_v58  ;;  %v6762_v44 = vrot.slane %v6760_v5, 4 }
 0x3bd   : > { %v8272_v21 = vor.u32 %v8271_v52, %v8268_v60  ;;  %v8328_v51 = vrot.slane %v8326_v34, 3  ;;  %v8331_v29 = vrot.slane %v8329_v22, 4  ;;  %v5845_v20 = vsel %vm15008_vm2, 0, %v5844_v37  ;;  %v14592_v22 = vld [vmem:[#allocation3 + $0xf4] sm:$0xf] }
 0x3be   : > { %v6768_v3 = vrot.slane %v6766_v50, 3  ;;  %v6771_v38 = vrot.slane %v6769_v47, 4  ;;  %v12394_v45 = vcombine.low %v14591_v6, %v14591_v6  ;;  %v6763_v1 = vor.u32 %v6762_v44, %v6759_v8  ;;  %5846 = vst [vmem:[#allocation3 + $0xf0] sm:$0x8] %v5845_v20  ;;  %v6083_v8 = vld [vmem:[#allocation3 + $0x84] sm:$0xf] }
 0x3bf   : > { %v8281_v26 = vsel %vm1032_vm3, %v8272_v21, %v8280_v42  ;;  %v8332_v33 = vor.u32 %v8331_v29, %v8328_v51  ;;  %v17382_v10 = vcombine.low %v6080_v9, %v6081_v41  ;;  %v7603_v19 = vshrl.u32 %v17259_v57, 16  ;;  %v14593_v51 = vld [vmem:[#allocation3 + $0x108] sm:$0xf]  ;;  %v6082_v44 = vld [vmem:[#allocation3 + $0x80] sm:$0x8] }
 0x3c0   : > { %v6772_v11 = vor.u32 %v6771_v38, %v6768_v3  ;;  %8772 = vmatmul.mubr.bf16.gmra.mxu1 %v8281_v26  ;;  %v8317_v36 = vshrl.u32 %v12394_v45, 16  ;;  %v8320_v46 = vshll.u32 %v12394_v45, 16  ;;  %v7606_v56 = vshll.u32 %v17259_v57, 16 }
 0x3c1   : > { %v12315_v28 = vcombine.low %v6079_v0, %v6080_v9  ;;  %8779 = vmatprep.mubr.bf16.mxu1 %v8332_v33  ;;  %v6764_v61 = vsel %vm1032_vm3, %v6755_v40, %v6763_v1  ;;  %v6323_v17 = vshrl.u32 %v17382_v10, 16  ;;  %v6326_v14 = vshll.u32 %v17382_v10, 16  ;;  %v17397_v0 = vpop.f32.mrf.mxu0 }
 0x3c2   : > { %9181 = vmatprep.mubr.bf16.mxu0 %v6772_v11  ;;  %v7605_v35 = vrot.slane %v7603_v19, 4  ;;  %v17389_v16 = vrot.slane %v8317_v36, 3  ;;  %v17391_v30 = vrot.slane %v8320_v46, 4  ;;  %v7608_v42 = vrot.slane %v7606_v56, 5  ;;  %19170 = vst [vmem:[#allocation48_spill] sm:$0xff] %v17397_v0 }
 0x3c3   : > { %9182 = vmatmul.mubr.bf16.gmra.mxu0 %v6764_v61  ;;  %v12316_v4 = vcombine.low %v6081_v41, %v6081_v41  ;;  %v6325_v43 = vrot.slane %v6323_v17, 4  ;;  %v6328_v57 = vrot.slane %v6326_v14, 5  ;;  %v6792_v32 = vshrl.u32 %v12315_v28, 16  ;;  %v6084_v41 = vld [vmem:[#allocation3 + $0x88] sm:$0xf] }
 0x3c4   : > { %v6795_v31 = vshll.u32 %v12315_v28, 16  ;;  %v8323_v63 = vor.u32 %v17391_v30, %v17389_v16  ;;  %v7609_v2 = vor.u32 %v7608_v42, %v7605_v35  ;;  %v5848_v13 = vsel %vm15008_vm2, 0, %v5847_v18  ;;  %v14437_v61 = vld [vmem:[#allocation3 + $0xc] ss:$0 sps:$4 sm:$0x11]   ;;  %v17405_v42 = vpop.f32.mrf.mxu1 }
 0x3c5   : > { %v6800_v15 = vshrl.u32 %v12316_v4, 16  ;;  %v6803_v7 = vshll.u32 %v12316_v4, 16  ;;  %v6329_v59 = vor.u32 %v6328_v57, %v6325_v43  ;;  %v6794_v62 = vrot.slane %v6792_v32, 3  ;;  %v7316_v53 = vld [vmem:[#allocation3 + $0xf0] sm:$0x8]  ;;  %19171 = vst [vmem:[#allocation63_spill] sm:$0xff] %v17405_v42  ;;  %v17407_v4 = vpop.f32.mrf.mxu0 }
 0x3c6   : > { %v6797_v48 = vrot.slane %v6795_v31, 4  ;;  %v8369_v5 = vshrl.u32 %v7609_v2, 16  ;;  %v8372_v60 = vshll.u32 %v7609_v2, 16  ;;  %5849 = vst [vmem:[#allocation3 + $0x100] sm:$0x8] %v5848_v13  ;;  %v12393_v50 = vcombine.low %v7316_v53, %v14592_v22  ;;  %19172 = vst [vmem:[#allocation64_spill] sm:$0xff] %v17407_v4 }
 0x3c7   : > { %v6802_v52 = vrot.slane %v6800_v15, 3  ;;  %v6805_v34 = vrot.slane %v6803_v7, 4  ;;  %v6809_v47 = vshrl.u32 %v6329_v59, 16  ;;  %v6812_v58 = vshll.u32 %v6329_v59, 16  ;;  %v14594_v18 = vld [vmem:[#allocation3 + $0x104] sm:$0xf]  ;;  %v17412_v22 = vpop.f32.mrf.mxu0 }
 0x3c8   : > { %v6798_v55 = vor.u32 %v6797_v48, %v6794_v62  ;;  %v8371_v37 = vrot.slane %v8369_v5, 3  ;;  %v8374_v9 = vrot.slane %v8372_v60, 4  ;;  %v12396_v29 = vcombine.low %v14593_v51, %v14593_v51  ;;  %19174 = vst [vmem:[#allocation67_spill] sm:$0xff] %v17412_v22  ;;  %v6100_v22 = vld [vmem:[#allocation3 + $0xe0] sm:$0x8] }
 0x3c9   : > { %v6806_v21 = vor.u32 %v6805_v34, %v6802_v52  ;;  %v8309_v23 = vshrl.u32 %v12393_v50, 16  ;;  %v8312_v3 = vshll.u32 %v12393_v50, 16  ;;  %v6811_v38 = vrot.slane %v6809_v47, 3  ;;  %v17410_v34 = vpop.f32.mrf.mxu1  ;;  %v14502_v50 = vld [vmem:[#allocation10 + $0x38] sm:$0xff]  }
 0x3ca   : > { %v6814_v40 = vrot.slane %v6812_v58, 4  ;;  %v8375_v26 = vor.u32 %v8374_v9, %v8371_v37  ;;  %v8360_v20 = vshrl.u32 %v12396_v29, 16  ;;  %v8363_v6 = vshll.u32 %v12396_v29, 16  ;;  %19173 = vst [vmem:[#allocation66_spill] sm:$0xff] %v17410_v34  ;;  %v17415_v29 = vld [vmem:[#allocation3 + $0x98] sm:$0xf]  ;;  %13919 = vmatprep.subr.bf16.mxu0 %v14502_v50 }
 0x3cb   : > { %v6807_v33 = vsel %vm1032_vm3, %v6798_v55, %v6806_v21  ;;  %v8311_v45 = vrot.slane %v8309_v23, 3  ;;  %v8314_v11 = vrot.slane %v8312_v3, 4  ;;  %v17400_v19 = vcombine.low %v6083_v8, %v6084_v41 }
 0x3cc   : > { %v6815_v1 = vor.u32 %v6814_v40, %v6811_v38  ;;  %v8362_v36 = vrot.slane %v8360_v20, 3  ;;  %v8365_v46 = vrot.slane %v8363_v6, 4  ;;  %v12317_v56 = vcombine.low %v6082_v44, %v6083_v8  ;;  %v14439_v38 = vld [vmem:[#allocation3 + $0x1c] ss:$0 sps:$4 sm:$0x11]   ;;  %v17417_v40 = vpop.f32.mrf.mxu0 }
 0x3cd   : > { %v12318_v28 = vcombine.low %v6084_v41, %v6084_v41  ;;  %v8315_v17 = vor.u32 %v8314_v11, %v8311_v45  ;;  %v7319_v14 = vld [vmem:[#allocation3 + $0x100] sm:$0x8]  ;;  %v6331_v35 = vshrl.u32 %v17400_v19, 16  ;;  %v6334_v16 = vshll.u32 %v17400_v19, 16  ;;  %19175 = vst [vmem:[#allocation70_spill] sm:$0xff] %v17417_v40  ;;  %v17419_v45 = vpop.f32.mrf.mxu1 }
 0x3ce   : > { %9189 = vmatprep.mubr.bf16.mxu0 %v6815_v1  ;;  %v6442_v30 = vrot.slane %v17277_v25, 5  ;;  %v12395_v43 = vcombine.low %v7319_v14, %v14594_v18  ;;  %v8366_v57 = vor.u32 %v8365_v46, %v8362_v36  ;;  %v6835_v32 = vshrl.u32 %v12317_v56, 16  ;;  %v6086_v6 = vld [vmem:[#allocation3 + $0x94] sm:$0xf]  ;;  %19176 = vst [vmem:[#allocation72_spill] sm:$0xff] %v17419_v45 }
 0x3cf   : > { %9190 = vmatmul.mubr.bf16.gmra.mxu0 %v6807_v33  ;;  %v6838_v31 = vshll.u32 %v12317_v56, 16  ;;  %v8324_v2 = vsel %vm1032_vm3, %v8315_v17, %v8323_v63  ;;  %v6333_v15 = vrot.slane %v6331_v35, 4  ;;  %v6336_v7 = vrot.slane %v6334_v16, 5  ;;  %v14441_v56 = vld [vmem:[#allocation3 + $0x2c] ss:$0 sps:$4 sm:$0x11]  }
 0x3d0   : > { %v6843_v59 = vshrl.u32 %v12318_v28, 16  ;;  %8780 = vmatmul.mubr.bf16.gmra.mxu1 %v8324_v2  ;;  %v8352_v62 = vshrl.u32 %v12395_v43, 16  ;;  %v8355_v48 = vshll.u32 %v12395_v43, 16  ;;  %v6837_v13 = vrot.slane %v6835_v32, 3  ;;  %v17429_v43 = vpop.f32.mrf.mxu0 }
 0x3d1   : > { %v6840_v25 = vrot.slane %v6838_v31, 4  ;;  %8787 = vmatprep.mubr.bf16.mxu1 %v8375_v26  ;;  %v6337_v53 = vor.u32 %v6336_v7, %v6333_v15  ;;  %v6846_v60 = vshll.u32 %v12318_v28, 16  ;;  %v6443_v52 = vrot.slane %v14437_v61, 5  ;;  %19177 = vst [vmem:[#allocation51_spill] sm:$0xff] %v17429_v43  ;;  %v17432_v15 = vpop.f32.mrf.mxu1 }
 0x3d2   : > { %v6845_v5 = vrot.slane %v6843_v59, 3  ;;  %v8354_v47 = vrot.slane %v8352_v62, 3  ;;  %v8357_v63 = vrot.slane %v8355_v48, 4  ;;  %v6517_v55 = vshrl.u32 %v6442_v30, 16  ;;  %19178 = vst [vmem:[#allocation53_spill] sm:$0xff] %v17432_v15 }
 0x3d3   : > { %v6841_v58 = vor.u32 %v6840_v25, %v6837_v13  ;;  %v6852_v37 = vshrl.u32 %v6337_v53, 16  ;;  %v6855_v9 = vshll.u32 %v6337_v53, 16  ;;  %v6848_v21 = vrot.slane %v6846_v60, 4 }
 0x3d4   : > { %v6444_v51 = vsel %vm983_vm7, %v6442_v30, %v6443_v52  ;;  %v8358_v8 = vor.u32 %v8357_v63, %v8354_v47  ;;  %v6519_v41 = vrot.slane %v6517_v55, 3  ;;  %v6520_v23 = vshll.u32 %v6442_v30, 16  ;;  %v17437_v47 = vpop.f32.mrf.mxu0 }
 0x3d5   : > { %v6525_v3 = vshrl.u32 %v6444_v51, 16  ;;  %v6854_v44 = vrot.slane %v6852_v37, 3  ;;  %v6857_v26 = vrot.slane %v6855_v9, 4  ;;  %v6849_v33 = vor.u32 %v6848_v21, %v6845_v5  ;;  %19179 = vst [vmem:[#allocation50_spill] sm:$0xff] %v17437_v47  ;;  %v17439_v9 = vpop.f32.mrf.mxu1 }
 0x3d6   : > { %v6528_v20 = vshll.u32 %v6444_v51, 16  ;;  %v8367_v11 = vsel %vm1032_vm3, %v8358_v8, %v8366_v57  ;;  %v6522_v1 = vrot.slane %v6520_v23, 4  ;;  %v17423_v46 = vcombine.low %v6086_v6, %v17415_v29  ;;  %19180 = vst [vmem:[#allocation52_spill] sm:$0xff] %v17439_v9 }
 0x3d7   : > { %v6527_v36 = vrot.slane %v6525_v3, 3  ;;  %v6858_v28 = vor.u32 %v6857_v26, %v6854_v44  ;;  %v6850_v61 = vsel %vm1032_vm3, %v6841_v58, %v6849_v33  ;;  %v6445_v14 = vrot.slane %v17294_v54, 5  ;;  %v14447_v26 = vld [vmem:[#allocation3 + $0x3c] ss:$0 sps:$4 sm:$0x11]  }
 0x3d8   : > { %v6530_v17 = vrot.slane %v6528_v20, 4  ;;  %8788 = vmatmul.mubr.bf16.gmra.mxu1 %v8367_v11  ;;  %v6523_v35 = vor.u32 %v6522_v1, %v6519_v41  ;;  %v6339_v16 = vshrl.u32 %v17423_v46, 16  ;;  %v6342_v30 = vshll.u32 %v17423_v46, 16  ;;  %v14442_v1 = vld [vmem:[#allocation9 + $0x1b8] sm:$0xff]  }
 0x3d9   : > { %v6446_v18 = vrot.slane %v14439_v38, 5  ;;  %9197 = vmatprep.mubr.bf16.mxu0 %v6858_v28  ;;  %v6560_v32 = vshrl.u32 %v6445_v14, 16  ;;  %v6563_v31 = vshll.u32 %v6445_v14, 16  ;;  %v6448_v2 = vrot.slane %v17313_v27, 5  ;;  %v6085_v27 = vld [vmem:[#allocation3 + $0x90] sm:$0x8]  ;;  %v17445_v28 = vpop.f32.mrf.mxu0 }
 0x3da   : > { %v6531_v57 = vor.u32 %v6530_v17, %v6527_v36  ;;  %9198 = vmatmul.mubr.bf16.gmra.mxu0 %v6850_v61  ;;  %v6341_v7 = vrot.slane %v6339_v16, 4  ;;  %v6344_v54 = vrot.slane %v6342_v30, 5  ;;  %v6449_v62 = vrot.slane %v14441_v56, 5  ;;  %v17443_v56 = vld [vmem:[#allocation3 + $0xa8] sm:$0xf]  ;;  %19181 = vst [vmem:[#allocation74_spill] sm:$0xff] %v17445_v28  ;;  %v17447_v30 = vpop.f32.mrf.mxu1 }
 0x3db   : > { %v6447_v59 = vsel %vm983_vm7, %v6445_v14, %v6446_v18  ;;  %v6562_v13 = vrot.slane %v6560_v32, 3  ;;  %v6565_v25 = vrot.slane %v6563_v31, 4  ;;  %v6603_v50 = vshrl.u32 %v6448_v2, 16  ;;  %v14448_v16 = vld [vmem:[#allocation9 + $0x1f0] sm:$0xff]   ;;  %19182 = vst [vmem:[#allocation76_spill] sm:$0xff] %v17447_v30 }
 0x3dc   : > { %v6532_v48 = vsel %vm1032_vm3, %v6523_v35, %v6531_v57  ;;  %v6568_v53 = vshrl.u32 %v6447_v59, 16  ;;  %v6345_v5 = vor.u32 %v6344_v54, %v6341_v7  ;;  %v6571_v60 = vshll.u32 %v6447_v59, 16  ;;  %v6089_v31 = vld [vmem:[#allocation3 + $0xa4] sm:$0xf] }
 0x3dd   : > { %13839 = vmatprep.mubr.bf16.mxu1 %v6532_v48  ;;  %v6450_v52 = vsel %vm983_vm7, %v6448_v2, %v6449_v62  ;;  %v6566_v63 = vor.u32 %v6565_v25, %v6562_v13  ;;  %v6606_v55 = vshll.u32 %v6448_v2, 16  ;;  %v6605_v41 = vrot.slane %v6603_v50, 3  ;;  %v14450_v25 = vld [vmem:[#allocation9 + $0x1b0] sm:$0xff]  }
 0x3de   : > { %v6570_v58 = vrot.slane %v6568_v53, 3  ;;  %v6611_v37 = vshrl.u32 %v6450_v52, 16  ;;  %v6895_v21 = vshrl.u32 %v6345_v5, 16  ;;  %v6898_v51 = vshll.u32 %v6345_v5, 16  ;;  %v17454_v53 = vpop.f32.mrf.mxu0 }
 0x3df   : > { %v6573_v8 = vrot.slane %v6571_v60, 4  ;;  %v6608_v23 = vrot.slane %v6606_v55, 4  ;;  %v6614_v38 = vshll.u32 %v6450_v52, 16  ;;  %v12319_v44 = vcombine.low %v6085_v27, %v6086_v6  ;;  %19183 = vst [vmem:[#allocation54_spill] sm:$0xff] %v17454_v53 }
 0x3e0   : > { %v6613_v3 = vrot.slane %v6611_v37, 3  ;;  %v6897_v33 = vrot.slane %v6895_v21, 3  ;;  %v6900_v20 = vrot.slane %v6898_v51, 4  ;;  %v12320_v36 = vcombine.low %v17415_v29, %v17415_v29  ;;  %v14449_v27 = vld [vmem:[#allocation3 + $0x4c] ss:$0 sps:$4 sm:$0x11]  }
 0x3e1   : > { %v6574_v11 = vor.u32 %v6573_v8, %v6570_v58  ;;  %v6609_v61 = vor.u32 %v6608_v23, %v6605_v41  ;;  %v6616_v17 = vrot.slane %v6614_v38, 4  ;;  %v6878_v14 = vshrl.u32 %v12319_v44, 16  ;;  %v17459_v58 = vpop.f32.mrf.mxu1 }
 0x3e2   : > { %v6881_v35 = vshll.u32 %v12319_v44, 16  ;;  %v6901_v6 = vor.u32 %v6900_v20, %v6897_v33  ;;  %v6886_v57 = vshrl.u32 %v12320_v36, 16  ;;  %v6889_v32 = vshll.u32 %v12320_v36, 16  ;;  %19184 = vst [vmem:[#allocation56_spill] sm:$0xff] %v17459_v58  ;;  %v14457_v20 = vld [vmem:[#allocation9 + $0x1a8] sm:$0xff]  }
 0x3e3   : > { %v6575_v18 = vsel %vm1032_vm3, %v6566_v63, %v6574_v11  ;;  %v6617_v2 = vor.u32 %v6616_v17, %v6613_v3  ;;  %v6880_v29 = vrot.slane %v6878_v14, 3  ;;  %v17451_v54 = vcombine.low %v6089_v31, %v17443_v56  ;;  %v14455_v63 = vld [vmem:[#allocation9 + $0x1e8] sm:$0xff]   ;;  %v6088_v3 = vld [vmem:[#allocation3 + $0xa0] sm:$0x8]  ;;  %v17464_v11 = vpop.f32.mrf.mxu0 }
 0x3e4   : > { %13840 = vmatmul.mubr.bf16.vlgmr.msra.gmra.mxu1 %v6575_v18  ;;  %v6883_v7 = vrot.slane %v6881_v35, 4  ;;  %9205 = vmatprep.mubr.bf16.mxu0 %v6901_v6  ;;  %v6888_v59 = vrot.slane %v6886_v57, 3  ;;  %v6891_v62 = vrot.slane %v6889_v32, 4  ;;  %v6451_v48 = vrot.slane %v17326_v49, 5  ;;  %19185 = vst [vmem:[#allocation60_spill] sm:$0xff] %v17464_v11  ;;  %v14463_v14 = vld [vmem:[#allocation9 + $0x1e0] sm:$0xff]   ;;  %v17466_v35 = vpop.f32.mrf.mxu1 }
 0x3e5   : > { %13472 = vmatpush3.bf16.msra.mxu1 %v14442_v1  ;;  %v6452_v13 = vrot.slane %v14447_v26, 5  ;;  %v6618_v5 = vsel %vm1032_vm3, %v6609_v61, %v6617_v2  ;;  %v6347_v52 = vshrl.u32 %v17451_v54, 16  ;;  %v6350_v50 = vshll.u32 %v17451_v54, 16  ;;  %19186 = vst [vmem:[#allocation80_spill] sm:$0xff] %v17466_v35 }
 0x3e6   : > { %v6884_v60 = vor.u32 %v6883_v7, %v6880_v29  ;;  %13473 = vmatprep.subr.bf16.mxu1 %v14448_v16  ;;  %13843 = vmatprep.mubr.bf16.mxu1 %v6618_v5  ;;  %v6892_v55 = vor.u32 %v6891_v62, %v6888_v59  ;;  %v6646_v37 = vshrl.u32 %v6451_v48, 16  ;;  %v6649_v21 = vshll.u32 %v6451_v48, 16  ;;  %v14454_v7 = vld [vmem:[#allocation3 + $0x5c] ss:$0 sps:$4 sm:$0x11]   ;;  %v17469_v5 = vpop.f32.mrf.mxu0 }
 0x3e7   : > { %v6453_v49 = vsel %vm983_vm7, %v6451_v48, %v6452_v13  ;;  %v6349_v51 = vrot.slane %v6347_v52, 4  ;;  %v6352_v8 = vrot.slane %v6350_v50, 5  ;;  %v6454_v33 = vrot.slane %v17339_v24, 5  ;;  %19187 = vst [vmem:[#allocation82_spill] sm:$0xff] %v17469_v5 }
 0x3e8   : > { %v6654_v41 = vshrl.u32 %v6453_v49, 16  ;;  %v6657_v23 = vshll.u32 %v6453_v49, 16  ;;  %v6893_v38 = vsel %vm1032_vm3, %v6884_v60, %v6892_v55  ;;  %v6648_v44 = vrot.slane %v6646_v37, 3  ;;  %v17476_v55 = vpop.f32.mrf.mxu1 }
 0x3e9   : > { %v6651_v26 = vrot.slane %v6649_v21, 4  ;;  %13474 = vmatpush3.bf16.msra.mxu1 %v14450_v25  ;;  %9206 = vmatmul.mubr.bf16.gmra.mxu0 %v6893_v38  ;;  %v6353_v1 = vor.u32 %v6352_v8, %v6349_v51  ;;  %v6455_v17 = vrot.slane %v14449_v27, 5  ;;  %v6689_v6 = vshrl.u32 %v6454_v33, 16  ;;  %v14465_v25 = vld [vmem:[#allocation9 + $0x1a0] sm:$0xff]   ;;  %v17474_v27 = vld [vmem:[#allocation3 + $0xb8] sm:$0xf] }
 0x3ea   : > { %v6656_v36 = vrot.slane %v6654_v41, 3  ;;  %v6659_v61 = vrot.slane %v6657_v23, 4  ;;  %13475 = vmatprep.subr.bf16.mxu1 %v14455_v63  ;;  %v6692_v18 = vshll.u32 %v6454_v33, 16  ;;  %v12321_v57 = vcombine.low %v6088_v3, %v6089_v31  ;;  %v14470_v63 = vld [vmem:[#allocation9 + $0x1d8] sm:$0xff]   ;;  %19188 = vst [vmem:[#allocation58_spill] sm:$0xff] %v17476_v55 }
 0x3eb   : > { %v6652_v16 = vor.u32 %v6651_v26, %v6648_v44  ;;  %v6938_v32 = vshrl.u32 %v6353_v1, 16  ;;  %v6941_v2 = vshll.u32 %v6353_v1, 16  ;;  %v6456_v29 = vsel %vm983_vm7, %v6454_v33, %v6455_v17  ;;  %v6092_v38 = vld [vmem:[#allocation3 + $0xb4] sm:$0xf]  ;;  %v17482_v1 = vpop.f32.mrf.mxu0 }
 0x3ec   : > { %v6660_v24 = vor.u32 %v6659_v61, %v6656_v36  ;;  %v6691_v59 = vrot.slane %v6689_v6, 3  ;;  %v6694_v62 = vrot.slane %v6692_v18, 4  ;;  %v6697_v48 = vshrl.u32 %v6456_v29, 16  ;;  %19189 = vst [vmem:[#allocation62_spill] sm:$0xff] %v17482_v1  ;;  %v17484_v6 = vpop.f32.mrf.mxu1 }
 0x3ed   : > { %v6700_v13 = vshll.u32 %v6456_v29, 16  ;;  %13476 = vmatpush3.bf16.msra.mxu1 %v14457_v20  ;;  %v6940_v60 = vrot.slane %v6938_v32, 3  ;;  %v6943_v52 = vrot.slane %v6941_v2, 4  ;;  %v12322_v31 = vcombine.low %v17443_v56, %v17443_v56  ;;  %v14472_v20 = vld [vmem:[#allocation9 + $0x198] sm:$0xff]   ;;  %19190 = vst [vmem:[#allocation65_spill] sm:$0xff] %v17484_v6 }
 0x3ee   : > { %v6661_v50 = vsel %vm1032_vm3, %v6652_v16, %v6660_v24  ;;  %13477 = vmatprep.subr.bf16.mxu1 %v14463_v14  ;;  %v6695_v49 = vor.u32 %v6694_v62, %v6691_v59  ;;  %v6699_v37 = vrot.slane %v6697_v48, 3  ;;  %v6921_v51 = vshrl.u32 %v12321_v57, 16  ;;  %v14478_v16 = vld [vmem:[#allocation9 + $0x1d0] sm:$0xff]   ;;  %v14456_v2 = vld [vmem:[#allocation3 + $0x6c] ss:$0 sps:$4 sm:$0x11]  }
 0x3ef   : > { %13844 = vmatmul.mubr.bf16.gmra.mxu1 %v6661_v50  ;;  %v6702_v21 = vrot.slane %v6700_v13, 4  ;;  %v6944_v8 = vor.u32 %v6943_v52, %v6940_v60  ;;  %v6924_v41 = vshll.u32 %v12321_v57, 16  ;;  %v6929_v23 = vshrl.u32 %v12322_v31, 16  ;;  %v6091_v48 = vld [vmem:[#allocation3 + $0xb0] sm:$0x8]  ;;  %v17490_v50 = vpop.f32.mrf.mxu0 }
 0x3f0   : > { %v6932_v3 = vshll.u32 %v12322_v31, 16  ;;  %v6923_v26 = vrot.slane %v6921_v51, 3  ;;  %v17479_v56 = vcombine.low %v6092_v38, %v17474_v27  ;;  %v6457_v33 = vrot.slane %v17352_v12, 5  ;;  %v14480_v52 = vld [vmem:[#allocation9 + $0x190] sm:$0xff]   ;;  %19191 = vst [vmem:[#allocation84_spill] sm:$0xff] %v17490_v50  ;;  %v17494_v51 = vpop.f32.mrf.mxu1 }
 0x3f1   : > { %v6703_v44 = vor.u32 %v6702_v21, %v6699_v37  ;;  %13478 = vmatpush3.bf16.msra.mxu1 %v14465_v25  ;;  %9213 = vmatprep.mubr.bf16.mxu0 %v6944_v8  ;;  %v6926_v36 = vrot.slane %v6924_v41, 4  ;;  %v6931_v61 = vrot.slane %v6929_v23, 3  ;;  %v6458_v14 = vrot.slane %v14454_v7, 5  ;;  %v14485_v21 = vld [vmem:[#allocation9 + $0x1c8] sm:$0xff]   ;;  %19192 = vst [vmem:[#allocation86_spill] sm:$0xff] %v17494_v51 }
 0x3f2   : > { %v6934_v17 = vrot.slane %v6932_v3, 4  ;;  %13479 = vmatprep.subr.bf16.mxu1 %v14470_v63  ;;  %v6355_v57 = vshrl.u32 %v17479_v56, 16  ;;  %v6358_v32 = vshll.u32 %v17479_v56, 16  ;;  %v6732_v12 = vshrl.u32 %v6457_v33, 16 }
 0x3f3   : > { %v6704_v18 = vsel %vm1032_vm3, %v6695_v49, %v6703_v44  ;;  %v6927_v24 = vor.u32 %v6926_v36, %v6923_v26  ;;  %v6459_v59 = vsel %vm983_vm7, %v6457_v33, %v6458_v14  ;;  %v6735_v62 = vshll.u32 %v6457_v33, 16  ;;  %v14462_v14 = vld [vmem:[#allocation3 + $0x7c] ss:$0 sps:$4 sm:$0x11]  }
 0x3f4   : > { %13847 = vmatprep.mubr.bf16.mxu1 %v6704_v18  ;;  %v6935_v29 = vor.u32 %v6934_v17, %v6931_v61  ;;  %v6357_v7 = vrot.slane %v6355_v57, 4  ;;  %v6360_v13 = vrot.slane %v6358_v32, 5  ;;  %v6734_v25 = vrot.slane %v6732_v12, 3 }
 0x3f5   : > { %v6740_v60 = vshrl.u32 %v6459_v59, 16  ;;  %13480 = vmatpush3.bf16.msra.mxu1 %v14472_v20  ;;  %v6737_v63 = vrot.slane %v6735_v62, 4  ;;  %v6743_v49 = vshll.u32 %v6459_v59, 16  ;;  %v6460_v37 = vrot.slane %v17370_v39, 5 }
 0x3f6   : > { %v6936_v31 = vsel %vm1032_vm3, %v6927_v24, %v6935_v29  ;;  %13481 = vmatprep.subr.bf16.mxu1 %v14478_v16  ;;  %v6361_v8 = vor.u32 %v6360_v13, %v6357_v7  ;;  %v6461_v23 = vrot.slane %v14456_v2, 5  ;;  %v12323_v3 = vcombine.low %v6091_v48, %v6092_v38  ;;  %v17499_v16 = vpop.f32.mrf.mxu0  ;;  %v17501_v38 = vld [vmem:[#allocation3 + $0xc8] sm:$0xf]  ;;  %v17503_v24 = vpop.f32.mrf.mxu1  ;;  %v14492_v7 = vld [vmem:[#allocation9 + $0x1c0] sm:$0xff]  }
 0x3f7   : > { %9214 = vmatmul.mubr.bf16.gmra.mxu0 %v6936_v31  ;;  %v6742_v41 = vrot.slane %v6740_v60, 3  ;;  %v6738_v44 = vor.u32 %v6737_v63, %v6734_v25  ;;  %v6745_v26 = vrot.slane %v6743_v49, 4  ;;  %v6775_v33 = vshrl.u32 %v6460_v37, 16  ;;  %19193 = vst [vmem:[#allocation69_spill] sm:$0xff] %v17499_v16  ;;  %v14487_v2 = vld [vmem:[#allocation9 + $0x188] sm:$0xff]   ;;  %19194 = vst [vmem:[#allocation73_spill] sm:$0xff] %v17503_v24 }
 0x3f8   : > { %v6778_v20 = vshll.u32 %v6460_v37, 16  ;;  %v6981_v36 = vshrl.u32 %v6361_v8, 16  ;;  %v6984_v61 = vshll.u32 %v6361_v8, 16  ;;  %v6462_v17 = vsel %vm983_vm7, %v6460_v37, %v6461_v23  ;;  %v6095_v37 = vld [vmem:[#allocation3 + $0xc4] sm:$0xf] }
 0x3f9   : > { %v12324_v39 = vcombine.low %v17474_v27, %v17474_v27  ;;  %13482 = vmatpush3.bf16.msra.mxu1 %v14480_v52  ;;  %v6746_v18 = vor.u32 %v6745_v26, %v6742_v41  ;;  %v6777_v57 = vrot.slane %v6775_v33, 3  ;;  %v6783_v12 = vshrl.u32 %v6462_v17, 16 }
 0x3fa   : > { %v6780_v32 = vrot.slane %v6778_v20, 4  ;;  %13483 = vmatprep.subr.bf16.mxu1 %v14485_v21  ;;  %v6983_v29 = vrot.slane %v6981_v36, 3  ;;  %v6986_v59 = vrot.slane %v6984_v61, 4  ;;  %v6786_v62 = vshll.u32 %v6462_v17, 16  ;;  %v17506_v21 = vpop.f32.mrf.mxu0 }
 0x3fb   : > { %v6964_v48 = vshrl.u32 %v12323_v3, 16  ;;  %v6747_v27 = vsel %vm1032_vm3, %v6738_v44, %v6746_v18  ;;  %v6785_v25 = vrot.slane %v6783_v12, 3  ;;  %v6967_v60 = vshll.u32 %v12323_v3, 16  ;;  %19195 = vst [vmem:[#allocation68_spill] sm:$0xff] %v17506_v21  ;;  %v14495_v44 = vld [vmem:[#allocation9 + $0x180] sm:$0xff]  }
 0x3fc   : > { %v6781_v13 = vor.u32 %v6780_v32, %v6777_v57  ;;  %v6987_v52 = vor.u32 %v6986_v59, %v6983_v29  ;;  %13848 = vmatmul.mubr.bf16.gmra.mxu1 %v6747_v27  ;;  %v6788_v31 = vrot.slane %v6786_v62, 4  ;;  %v6972_v49 = vshrl.u32 %v12324_v39, 16  ;;  %v14464_v61 = vld [vmem:[#allocation3 + $0x8c] ss:$0 sps:$4 sm:$0x11]   ;;  %v17521_v62 = vpop.f32.mrf.mxu0 }
 0x3fd   : > { %v6966_v63 = vrot.slane %v6964_v48, 3  ;;  %v6969_v8 = vrot.slane %v6967_v60, 4  ;;  %v6975_v41 = vshll.u32 %v12324_v39, 16  ;;  %v17509_v23 = vcombine.low %v6095_v37, %v17501_v38  ;;  %13484 = vmatpush3.bf16.msra.mxu1 %v14487_v2  ;;  %v17512_v33 = vpop.f32.mrf.mxu1  ;;  %19198 = vst [vmem:[#allocation71_spill] sm:$0xff] %v17521_v62 }
 0x3fe   : > { %v6463_v26 = vrot.slane %v17382_v10, 5  ;;  %19196 = vst [vmem:[#allocation94_spill] sm:$0xff] %v17512_v33  ;;  %9221 = vmatprep.mubr.bf16.mxu0 %v6987_v52  ;;  %v6789_v3 = vor.u32 %v6788_v31, %v6785_v25  ;;  %v6974_v20 = vrot.slane %v6972_v49, 3  ;;  %v6464_v36 = vrot.slane %v14462_v14, 5  ;;  %13485 = vmatprep.subr.bf16.mxu1 %v14492_v7 }
 0x3ff   : > { %v6466_v17 = vrot.slane %v17400_v19, 5  ;;  %v6970_v18 = vor.u32 %v6969_v8, %v6966_v63  ;;  %v6977_v57 = vrot.slane %v6975_v41, 4  ;;  %v6363_v39 = vshrl.u32 %v17509_v23, 16  ;;  %v17517_v12 = vpop.f32.mrf.mxu1  ;;  %v6094_v8 = vld [vmem:[#allocation3 + $0xc0] sm:$0x8] }
 0x400   : > { %v6366_v32 = vshll.u32 %v17509_v23, 16  ;;  %19197 = vst [vmem:[#allocation96_spill] sm:$0xff] %v17517_v12  ;;  %v6790_v10 = vsel %vm1032_vm3, %v6781_v13, %v6789_v3  ;;  %v6465_v2 = vsel %vm983_vm7, %v6463_v26, %v6464_v36  ;;  %v6818_v29 = vshrl.u32 %v6463_v26, 16 }
 0x401   : > { %v6821_v59 = vshll.u32 %v6463_v26, 16  ;;  %13851 = vmatprep.mubr.bf16.mxu1 %v6790_v10  ;;  %v6978_v14 = vor.u32 %v6977_v57, %v6974_v20  ;;  %v6365_v19 = vrot.slane %v6363_v39, 4  ;;  %v6826_v7 = vshrl.u32 %v6465_v2, 16  ;;  %13486 = vmatpush3.bf16.msra.mxu1 %v14495_v44  ;;  %v17524_v41 = vpop.f32.mrf.mxu1  ;;  %v17527_v57 = vpop.f32.mrf.mxu0 }
 0x402   : > { %v6368_v48 = vrot.slane %v6366_v32, 5  ;;  %v6820_v27 = vrot.slane %v6818_v29, 3  ;;  %v6829_v60 = vshll.u32 %v6465_v2, 16  ;;  %v6467_v52 = vrot.slane %v14464_v61, 5  ;;  %19199 = vst [vmem:[#allocation79_spill] sm:$0xff] %v17524_v41  ;;  %19200 = vst [vmem:[#allocation81_spill] sm:$0xff] %v17527_v57 }
 0x403   : > { %v6823_v25 = vrot.slane %v6821_v59, 4  ;;  %v6979_v31 = vsel %vm1032_vm3, %v6970_v18, %v6978_v14  ;;  %v6828_v13 = vrot.slane %v6826_v7, 3  ;;  %v6861_v49 = vshrl.u32 %v6466_v17, 16  ;;  %v14469_v59 = vld [vmem:[#allocation3 + $0x9c] ss:$0 sps:$4 sm:$0x11]  }
 0x404   : > { %v6369_v63 = vor.u32 %v6368_v48, %v6365_v19  ;;  %9222 = vmatmul.mubr.bf16.gmra.mxu0 %v6979_v31  ;;  %v6831_v3 = vrot.slane %v6829_v60, 4  ;;  %v6468_v20 = vsel %vm983_vm7, %v6466_v17, %v6467_v52  ;;  %v6864_v36 = vshll.u32 %v6466_v17, 16 }
 0x405   : > { %v6824_v26 = vor.u32 %v6823_v25, %v6820_v27  ;;  %v6863_v32 = vrot.slane %v6861_v49, 3  ;;  %v6869_v61 = vshrl.u32 %v6468_v20, 16  ;;  %v6872_v2 = vshll.u32 %v6468_v20, 16  ;;  %v6099_v27 = vld [vmem:[#allocation3 + $0xd8] sm:$0xf]  ;;  %v17531_v25 = vpop.f32.mrf.mxu1 }
 0x406   : > { %v7024_v44 = vshrl.u32 %v6369_v63, 16  ;;  %v7027_v39 = vshll.u32 %v6369_v63, 16  ;;  %v6832_v10 = vor.u32 %v6831_v3, %v6828_v13  ;;  %v6866_v18 = vrot.slane %v6864_v36, 4  ;;  %19201 = vst [vmem:[#allocation97_spill] sm:$0xff] %v17531_v25  ;;  %v6098_v3 = vld [vmem:[#allocation3 + $0xd4] sm:$0xf] }
 0x407   : > { %v12325_v29 = vcombine.low %v6094_v8, %v6095_v37  ;;  %v6871_v48 = vrot.slane %v6869_v61, 3  ;;  %v12326_v7 = vcombine.low %v17501_v38, %v17501_v38  ;;  %v6874_v52 = vrot.slane %v6872_v2, 4 }
 0x408   : > { %v7026_v14 = vrot.slane %v7024_v44, 3  ;;  %v7029_v19 = vrot.slane %v7027_v39, 4  ;;  %v6833_v17 = vsel %vm1032_vm3, %v6824_v26, %v6832_v10  ;;  %v6867_v60 = vor.u32 %v6866_v18, %v6863_v32  ;;  %v17534_v63 = vpop.f32.mrf.mxu0 }
 0x409   : > { %v7007_v31 = vshrl.u32 %v12325_v29, 16  ;;  %19202 = vst [vmem:[#allocation99_spill] sm:$0xff] %v17534_v63  ;;  %13852 = vmatmul.mubr.bf16.gmra.mxu1 %v6833_v17  ;;  %v7010_v37 = vshll.u32 %v12325_v29, 16  ;;  %v7015_v49 = vshrl.u32 %v12326_v7, 16  ;;  %v7018_v8 = vshll.u32 %v12326_v7, 16 }
 0x40a   : > { %v7030_v13 = vor.u32 %v7029_v19, %v7026_v14  ;;  %v6875_v20 = vor.u32 %v6874_v52, %v6871_v48  ;;  %v17536_v44 = vcombine.low %v6098_v3, %v6099_v27  ;;  %v6469_v38 = vrot.slane %v17423_v46, 5  ;;  %v17539_v10 = vpop.f32.mrf.mxu1  ;;  %v14471_v19 = vld [vmem:[#allocation3 + $0xac] ss:$0 sps:$4 sm:$0x11]   ;;  %v17544_v48 = vpop.f32.mrf.mxu0 }
 0x40b   : > { %v7009_v36 = vrot.slane %v7007_v31, 3  ;;  %v7012_v39 = vrot.slane %v7010_v37, 4  ;;  %v7017_v26 = vrot.slane %v7015_v49, 3  ;;  %v7020_v32 = vrot.slane %v7018_v8, 4  ;;  %19203 = vst [vmem:[#allocation83_spill] sm:$0xff] %v17539_v10  ;;  %19204 = vst [vmem:[#allocation78_spill] sm:$0xff] %v17544_v48 }
 0x40c   : > { %9229 = vmatprep.mubr.bf16.mxu0 %v7030_v13  ;;  %v6470_v61 = vrot.slane %v14469_v59, 5  ;;  %v6876_v18 = vsel %vm1032_vm3, %v6867_v60, %v6875_v20  ;;  %v6371_v2 = vshrl.u32 %v17536_v44, 16  ;;  %v6374_v29 = vshll.u32 %v17536_v44, 16  ;;  %v6097_v31 = vld [vmem:[#allocation3 + $0xd0] sm:$0x8]  ;;  %v17547_v59 = vpop.f32.mrf.mxu1 }
 0x40d   : > { %v6904_v14 = vshrl.u32 %v6469_v38, 16  ;;  %13855 = vmatprep.mubr.bf16.mxu1 %v6876_v18  ;;  %v7013_v7 = vor.u32 %v7012_v39, %v7009_v36  ;;  %v7021_v46 = vor.u32 %v7020_v32, %v7017_v26  ;;  %v6907_v52 = vshll.u32 %v6469_v38, 16  ;;  %19205 = vst [vmem:[#allocation85_spill] sm:$0xff] %v17547_v59  ;;  %v17551_v32 = vpop.f32.mrf.mxu0 }
 0x40e   : > { %v6471_v17 = vsel %vm983_vm7, %v6469_v38, %v6470_v61  ;;  %v6373_v13 = vrot.slane %v6371_v2, 4  ;;  %v6376_v37 = vrot.slane %v6374_v29, 5  ;;  %v6472_v16 = vrot.slane %v17451_v54, 5  ;;  %19206 = vst [vmem:[#allocation88_spill] sm:$0xff] %v17551_v32  ;;  %v17553_v38 = vpop.f32.mrf.mxu1 }
 0x40f   : > { %v6906_v60 = vrot.slane %v6904_v14, 3  ;;  %v6912_v49 = vshrl.u32 %v6471_v17, 16  ;;  %v7022_v8 = vsel %vm1032_vm3, %v7013_v7, %v7021_v46  ;;  %v6909_v20 = vrot.slane %v6907_v52, 4  ;;  %19207 = vst [vmem:[#allocation75_spill] sm:$0xff] %v17553_v38 }
 0x410   : > { %v6915_v62 = vshll.u32 %v6471_v17, 16  ;;  %9230 = vmatmul.mubr.bf16.gmra.mxu0 %v7022_v8  ;;  %v6377_v18 = vor.u32 %v6376_v37, %v6373_v13  ;;  %v6473_v39 = vrot.slane %v14471_v19, 5  ;;  %v12327_v26 = vcombine.low %v6097_v31, %v6098_v3  ;;  %v14477_v37 = vld [vmem:[#allocation3 + $0xbc] ss:$0 sps:$4 sm:$0x11]  }
 0x411   : > { %v6914_v36 = vrot.slane %v6912_v49, 3  ;;  %v6910_v61 = vor.u32 %v6909_v20, %v6906_v60  ;;  %v6947_v29 = vshrl.u32 %v6472_v16, 16  ;;  %v6950_v14 = vshll.u32 %v6472_v16, 16  ;;  %v17556_v8 = vld [vmem:[#allocation3 + $0xe8] sm:$0xf]  ;;  %v17558_v60 = vpop.f32.mrf.mxu0 }
 0x412   : > { %v6917_v2 = vrot.slane %v6915_v62, 4  ;;  %v7067_v48 = vshrl.u32 %v6377_v18, 16  ;;  %v7070_v57 = vshll.u32 %v6377_v18, 16  ;;  %v6474_v7 = vsel %vm983_vm7, %v6472_v16, %v6473_v39  ;;  %19208 = vst [vmem:[#allocation87_spill] sm:$0xff] %v17558_v60  ;;  %v17560_v62 = vpop.f32.mrf.mxu1 }
 0x413   : > { %v12328_v46 = vcombine.low %v6099_v27, %v6099_v27  ;;  %v6949_v54 = vrot.slane %v6947_v29, 3  ;;  %v6952_v52 = vrot.slane %v6950_v14, 4  ;;  %v6955_v13 = vshrl.u32 %v6474_v7, 16  ;;  %19209 = vst [vmem:[#allocation89_spill] sm:$0xff] %v17560_v62 }
 0x414   : > { %v6918_v17 = vor.u32 %v6917_v2, %v6914_v36  ;;  %v7069_v19 = vrot.slane %v7067_v48, 3  ;;  %v7072_v3 = vrot.slane %v7070_v57, 4  ;;  %v6958_v31 = vshll.u32 %v6474_v7, 16  ;;  %v6101_v48 = vld [vmem:[#allocation3 + $0xe4] sm:$0xf] }
 0x415   : > { %v7050_v49 = vshrl.u32 %v12327_v26, 16  ;;  %v6953_v18 = vor.u32 %v6952_v52, %v6949_v54  ;;  %v6957_v16 = vrot.slane %v6955_v13, 3  ;;  %v7053_v27 = vshll.u32 %v12327_v26, 16  ;;  %v17568_v54 = vpop.f32.mrf.mxu0 }
 0x416   : > { %v6919_v20 = vsel %vm1032_vm3, %v6910_v61, %v6918_v17  ;;  %v7073_v36 = vor.u32 %v7072_v3, %v7069_v19  ;;  %v6960_v39 = vrot.slane %v6958_v31, 4  ;;  %v7058_v29 = vshrl.u32 %v12328_v46, 16  ;;  %v14479_v17 = vld [vmem:[#allocation3 + $0xcc] ss:$0 sps:$4 sm:$0x11]   ;;  %19210 = vst [vmem:[#allocation101_spill] sm:$0xff] %v17568_v54 }
 0x417   : > { %13856 = vmatmul.mubr.bf16.gmra.mxu1 %v6919_v20  ;;  %v7052_v2 = vrot.slane %v7050_v49, 3  ;;  %v7055_v57 = vrot.slane %v7053_v27, 4  ;;  %v7061_v14 = vshll.u32 %v12328_v46, 16  ;;  %v17564_v7 = vcombine.low %v6101_v48, %v17556_v8  ;;  %v14536_v54 = vld [vmem:[#allocation3 + $0xec] ss:$0 sps:$4 sm:$0x11]  }
 0x418   : > { %v6475_v1 = vrot.slane %v17479_v56, 5  ;;  %9237 = vmatprep.mubr.bf16.mxu0 %v7073_v36  ;;  %v6961_v50 = vor.u32 %v6960_v39, %v6957_v16  ;;  %v7060_v28 = vrot.slane %v7058_v29, 3  ;;  %v6476_v61 = vrot.slane %v14477_v37, 5  ;;  %v17570_v52 = vpop.f32.mrf.mxu1 }
 0x419   : > { %v6478_v26 = vrot.slane %v17509_v23, 5  ;;  %19211 = vst [vmem:[#allocation102_spill] sm:$0xff] %v17570_v52  ;;  %v7056_v13 = vor.u32 %v7055_v57, %v7052_v2  ;;  %v7063_v19 = vrot.slane %v7061_v14, 4  ;;  %v6379_v46 = vshrl.u32 %v17564_v7, 16  ;;  %v17578_v14 = vpop.f32.mrf.mxu0 }
 0x41a   : > { %v6382_v3 = vshll.u32 %v17564_v7, 16  ;;  %v6962_v31 = vsel %vm1032_vm3, %v6953_v18, %v6961_v50  ;;  %v6477_v56 = vsel %vm983_vm7, %v6475_v1, %v6476_v61  ;;  %v6990_v49 = vshrl.u32 %v6475_v1, 16  ;;  %v17576_v37 = vpop.f32.mrf.mxu1  ;;  %19213 = vst [vmem:[#allocation104_spill] sm:$0xff] %v17578_v14 }
 0x41b   : > { %v6993_v20 = vshll.u32 %v6475_v1, 16  ;;  %19212 = vst [vmem:[#allocation90_spill] sm:$0xff] %v17576_v37  ;;  %13859 = vmatprep.mubr.bf16.mxu1 %v6962_v31  ;;  %v7064_v23 = vor.u32 %v7063_v19, %v7060_v28  ;;  %v6381_v16 = vrot.slane %v6379_v46, 4  ;;  %v6998_v36 = vshrl.u32 %v6477_v56, 16 }
 0x41c   : > { %v6384_v27 = vrot.slane %v6382_v3, 5  ;;  %v6992_v39 = vrot.slane %v6990_v49, 3  ;;  %v7001_v29 = vshll.u32 %v6477_v56, 16  ;;  %v6479_v57 = vrot.slane %v14479_v17, 5  ;;  %v17582_v46 = vpop.f32.mrf.mxu1 }
 0x41d   : > { %v6995_v2 = vrot.slane %v6993_v20, 4  ;;  %v7065_v53 = vsel %vm1032_vm3, %v7056_v13, %v7064_v23  ;;  %v7000_v18 = vrot.slane %v6998_v36, 3  ;;  %v7033_v61 = vshrl.u32 %v6478_v26, 16  ;;  %19214 = vst [vmem:[#allocation106_spill] sm:$0xff] %v17582_v46 }
 0x41e   : > { %v6385_v50 = vor.u32 %v6384_v27, %v6381_v16  ;;  %9238 = vmatmul.mubr.bf16.gmra.mxu0 %v7065_v53  ;;  %v7003_v40 = vrot.slane %v7001_v29, 4  ;;  %v6480_v28 = vsel %vm983_vm7, %v6478_v26, %v6479_v57  ;;  %v7036_v19 = vshll.u32 %v6478_v26, 16  ;;  %v14484_v23 = vld [vmem:[#allocation3 + $0xdc] ss:$0 sps:$4 sm:$0x11]   ;;  %v17584_v16 = vpop.f32.mrf.mxu0 }
 0x41f   : > { %v6996_v1 = vor.u32 %v6995_v2, %v6992_v39  ;;  %v7035_v56 = vrot.slane %v7033_v61, 3  ;;  %v7041_v17 = vshrl.u32 %v6480_v28, 16  ;;  %v7044_v62 = vshll.u32 %v6480_v28, 16  ;;  %19215 = vst [vmem:[#allocation108_spill] sm:$0xff] %v17584_v16  ;;  %v6105_v26 = vld [vmem:[#allocation3 + $0xf8] sm:$0xf]  ;;  %v17589_v61 = vpop.f32.mrf.mxu1 }
 0x420   : > { %v7110_v3 = vshrl.u32 %v6385_v50, 16  ;;  %v7113_v31 = vshll.u32 %v6385_v50, 16  ;;  %v7004_v49 = vor.u32 %v7003_v40, %v7000_v18  ;;  %v7038_v20 = vrot.slane %v7036_v19, 4  ;;  %19216 = vst [vmem:[#allocation110_spill] sm:$0xff] %v17589_v61  ;;  %v6104_v28 = vld [vmem:[#allocation3 + $0xf4] sm:$0xf] }
 0x421   : > { %v12329_v13 = vcombine.low %v6100_v22, %v6101_v48  ;;  %v7043_v36 = vrot.slane %v7041_v17, 3  ;;  %v12330_v39 = vcombine.low %v17556_v8, %v17556_v8  ;;  %v7046_v57 = vrot.slane %v7044_v62, 4  ;;  %v17594_v17 = vpop.f32.mrf.mxu0 }
 0x422   : > { %v7112_v27 = vrot.slane %v7110_v3, 3  ;;  %v7115_v53 = vrot.slane %v7113_v31, 4  ;;  %v7005_v2 = vsel %vm1032_vm3, %v6996_v1, %v7004_v49  ;;  %v7039_v29 = vor.u32 %v7038_v20, %v7035_v56  ;;  %19217 = vst [vmem:[#allocation112_spill] sm:$0xff] %v17594_v17 }
 0x423   : > { %v7093_v50 = vshrl.u32 %v12329_v13, 16  ;;  %13860 = vmatmul.mubr.bf16.gmra.mxu1 %v7005_v2  ;;  %v7096_v22 = vshll.u32 %v12329_v13, 16  ;;  %v7101_v48 = vshrl.u32 %v12330_v39, 16  ;;  %v7104_v18 = vshll.u32 %v12330_v39, 16  ;;  %v17599_v39 = vpop.f32.mrf.mxu1 }
 0x424   : > { %v7116_v40 = vor.u32 %v7115_v53, %v7112_v27  ;;  %v7047_v19 = vor.u32 %v7046_v57, %v7043_v36  ;;  %v17591_v31 = vcombine.low %v6104_v28, %v6105_v26  ;;  %v6481_v8 = vrot.slane %v17536_v44, 5  ;;  %v14486_v36 = vld [vmem:[#allocation3 + $0xec] ss:$0 sps:$4 sm:$0x11]   ;;  %19218 = vst [vmem:[#allocation114_spill] sm:$0xff] %v17599_v39 }
 0x425   : > { %v7095_v3 = vrot.slane %v7093_v50, 3  ;;  %v7098_v1 = vrot.slane %v7096_v22, 4  ;;  %v7103_v62 = vrot.slane %v7101_v48, 3  ;;  %v7106_v56 = vrot.slane %v7104_v18, 4 }
 0x426   : > { %9245 = vmatprep.mubr.bf16.mxu0 %v7116_v40  ;;  %v6482_v49 = vrot.slane %v14484_v23, 5  ;;  %v7048_v20 = vsel %vm1032_vm3, %v7039_v29, %v7047_v19  ;;  %v6387_v13 = vshrl.u32 %v17591_v31, 16  ;;  %v6390_v27 = vshll.u32 %v17591_v31, 16  ;;  %v6103_v40 = vld [vmem:[#allocation3 + $0xf0] sm:$0x8] }
 0x427   : > { %v7076_v53 = vshrl.u32 %v6481_v8, 16  ;;  %13863 = vmatprep.mubr.bf16.mxu1 %v7048_v20  ;;  %v7099_v2 = vor.u32 %v7098_v1, %v7095_v3  ;;  %v7107_v44 = vor.u32 %v7106_v56, %v7103_v62  ;;  %v7079_v50 = vshll.u32 %v6481_v8, 16 }
 0x428   : > { %v6483_v57 = vsel %vm983_vm7, %v6481_v8, %v6482_v49  ;;  %v6389_v22 = vrot.slane %v6387_v13, 4  ;;  %v6392_v48 = vrot.slane %v6390_v27, 5  ;;  %v17602_v29 = vpop.f32.mrf.mxu0  ;;  %v6484_v38 = vrot.slane %v17564_v7, 5  ;;  %v17608_v8 = vpop.f32.mrf.mxu1 }
 0x429   : > { %v7078_v23 = vrot.slane %v7076_v53, 3  ;;  %v7084_v18 = vshrl.u32 %v6483_v57, 16  ;;  %19219 = vst [vmem:[#allocation91_spill] sm:$0xff] %v17602_v29  ;;  %v7108_v19 = vsel %vm1032_vm3, %v7099_v2, %v7107_v44  ;;  %v7081_v61 = vrot.slane %v7079_v50, 4  ;;  %19221 = vst [vmem:[#allocation118_spill] sm:$0xff] %v17608_v8 }
 0x42a   : > { %v7087_v46 = vshll.u32 %v6483_v57, 16  ;;  %9246 = vmatmul.mubr.bf16.gmra.mxu0 %v7108_v19  ;;  %v6393_v20 = vor.u32 %v6392_v48, %v6389_v22  ;;  %v6485_v1 = vrot.slane %v14486_v36, 5  ;;  %v12331_v62 = vcombine.low %v6103_v40, %v6104_v28  ;;  %v17606_v56 = vpop.f32.mrf.mxu0  ;;  %v14494_v57 = vld [vmem:[#allocation3 + $0x2c] ss:$0 sps:$4 sm:$0x11]  }
 0x42b   : > { %v7086_v3 = vrot.slane %v7084_v18, 3  ;;  %19220 = vst [vmem:[#allocation116_spill] sm:$0xff] %v17606_v56  ;;  %v7082_v49 = vor.u32 %v7081_v61, %v7078_v23  ;;  %v7119_v27 = vshrl.u32 %v6484_v38, 16  ;;  %v7122_v53 = vshll.u32 %v6484_v38, 16 }
 0x42c   : > { %v7089_v13 = vrot.slane %v7087_v46, 4  ;;  %v7153_v25 = vshrl.u32 %v6393_v20, 16  ;;  %v7156_v41 = vshll.u32 %v6393_v20, 16  ;;  %v6486_v2 = vsel %vm983_vm7, %v6484_v38, %v6485_v1  ;;  %v17611_v7 = vpop.f32.mrf.mxu0  ;;  %v14491_v40 = vld [vmem:[#allocation3 + $0xfc] ss:$0 sps:$4 sm:$0x11]   ;;  %v17613_v46 = vpop.f32.mrf.mxu1 }
 0x42d   : > { %v12332_v44 = vcombine.low %v6105_v26, %v6105_v26  ;;  %19222 = vst [vmem:[#allocation120_spill] sm:$0xff] %v17611_v7  ;;  %v7121_v22 = vrot.slane %v7119_v27, 3  ;;  %v7124_v36 = vrot.slane %v7122_v53, 4  ;;  %v7127_v28 = vshrl.u32 %v6486_v2, 16  ;;  %19223 = vst [vmem:[#allocation122_spill] sm:$0xff] %v17613_v46 }
 0x42e   : > { %v7090_v50 = vor.u32 %v7089_v13, %v7086_v3  ;;  %v7155_v48 = vrot.slane %v7153_v25, 3  ;;  %v7158_v18 = vrot.slane %v7156_v41, 4  ;;  %v7130_v19 = vshll.u32 %v6486_v2, 16  ;;  %v17616_v26 = vld [vmem:[#allocation3 + $0x28] sm:$0xf]  ;;  %v17618_v1 = vpop.f32.mrf.mxu0 }
 0x42f   : > { %v7136_v61 = vshrl.u32 %v12331_v62, 16  ;;  %v7125_v20 = vor.u32 %v7124_v36, %v7121_v22  ;;  %v7129_v24 = vrot.slane %v7127_v28, 3  ;;  %v7139_v38 = vshll.u32 %v12331_v62, 16  ;;  %19224 = vst [vmem:[#allocation126_spill] sm:$0xff] %v17618_v1  ;;  %v9425_v46 = vld [vmem:[#allocation3 + $0x24] sm:$0xf]  ;;  %v17622_v36 = vpop.f32.mrf.mxu1 }
 0x430   : > { %v7091_v23 = vsel %vm1032_vm3, %v7082_v49, %v7090_v50  ;;  %v7159_v3 = vor.u32 %v7158_v18, %v7155_v48  ;;  %v7132_v13 = vrot.slane %v7130_v19, 4  ;;  %v7144_v53 = vshrl.u32 %v12332_v44, 16  ;;  %19225 = vst [vmem:[#allocation128_spill] sm:$0xff] %v17622_v36 }
 0x431   : > { %13864 = vmatmul.mubr.bf16.gmra.mxu1 %v7091_v23  ;;  %v7138_v27 = vrot.slane %v7136_v61, 3  ;;  %v7141_v25 = vrot.slane %v7139_v38, 4  ;;  %v7147_v41 = vshll.u32 %v12332_v44, 16  ;;  %v6487_v2 = vrot.slane %v17591_v31, 5  ;;  %v17632_v36 = vpop.f32.mrf.mxu1 }
 0x432   : > { %v6488_v51 = vrot.slane %v14491_v40, 5  ;;  %9253 = vmatprep.mubr.bf16.mxu0 %v7159_v3  ;;  %v7133_v49 = vor.u32 %v7132_v13, %v7129_v24  ;;  %v7146_v50 = vrot.slane %v7144_v53, 3  ;;  %v12509_v62 = vcombine.low %v9425_v46, %v17616_v26  ;;  %19228 = vst [vmem:[#allocation132_spill] sm:$0xff] %v17632_v36 }
 0x433   : > { %v9809_v22 = vrot.slane %v14494_v57, 5  ;;  %v7142_v28 = vor.u32 %v7141_v25, %v7138_v27  ;;  %v7149_v48 = vrot.slane %v7147_v41, 4  ;;  %v7162_v19 = vshrl.u32 %v6487_v2, 16  ;;  %v17625_v61 = vpop.f32.mrf.mxu0 }
 0x434   : > { %v6489_v18 = vsel %vm983_vm7, %v6487_v2, %v6488_v51  ;;  %19226 = vst [vmem:[#allocation77_spill] sm:$0xff] %v17625_v61  ;;  %v7134_v44 = vsel %vm1032_vm3, %v7125_v20, %v7133_v49  ;;  %v7165_v31 = vshll.u32 %v6487_v2, 16  ;;  %v9808_v3 = vrot.slane %v12509_v62, 5  ;;  %v17630_v51 = vld [vmem:[#allocation3 + $0x38] sm:$0xf] }
 0x435   : > { %v7170_v40 = vshrl.u32 %v6489_v18, 16  ;;  %v7173_v23 = vshll.u32 %v6489_v18, 16  ;;  %13867 = vmatprep.mubr.bf16.mxu1 %v7134_v44  ;;  %v7150_v24 = vor.u32 %v7149_v48, %v7146_v50  ;;  %v7164_v38 = vrot.slane %v7162_v19, 3  ;;  %v17628_v57 = vpop.f32.mrf.mxu0  ;;  %v14497_v50 = vld [vmem:[#allocation3 + $0x3c] ss:$0 sps:$4 sm:$0x11]  }
 0x436   : > { %v9633_v13 = vshrl.u32 %v12509_v62, 16  ;;  %19227 = vst [vmem:[#allocation93_spill] sm:$0xff] %v17628_v57  ;;  %v7167_v53 = vrot.slane %v7165_v31, 4  ;;  %v9636_v41 = vshll.u32 %v12509_v62, 16  ;;  %v9810_v2 = vsel %vm983_vm7, %v9808_v3, %v9809_v22  ;;  %v9424_v62 = vld [vmem:[#allocation3 + $0x20] sm:$0x8] }
 0x437   : > { %v7172_v27 = vrot.slane %v7170_v40, 3  ;;  %v7175_v25 = vrot.slane %v7173_v23, 4  ;;  %v7151_v20 = vsel %vm1032_vm3, %v7142_v28, %v7150_v24  ;;  %v9883_v49 = vshrl.u32 %v9808_v3, 16  ;;  %v17636_v48 = vpop.f32.mrf.mxu0  ;;  %v17638_v23 = vld [vmem:[#allocation3 + $0x34] sm:$0xf] }
 0x438   : > { %v9886_v18 = vshll.u32 %v9808_v3, 16  ;;  %19229 = vst [vmem:[#allocation133_spill] sm:$0xff] %v17636_v48  ;;  %9254 = vmatmul.mubr.bf16.gmra.mxu0 %v7151_v20  ;;  %v7168_v19 = vor.u32 %v7167_v53, %v7164_v38  ;;  %v9891_v31 = vshrl.u32 %v9810_v2, 16  ;;  %v9894_v40 = vshll.u32 %v9810_v2, 16  ;;  %v17640_v28 = vld [vmem:[#allocation3 + $0x48] sm:$0xf]  ;;  %v17649_v53 = vpop.f32.mrf.mxu1 }
 0x439   : > { %v7176_v44 = vor.u32 %v7175_v25, %v7172_v27  ;;  %v9885_v35 = vrot.slane %v9883_v49, 3  ;;  %v9635_v36 = vrot.slane %v9633_v13, 4  ;;  %v9638_v15 = vrot.slane %v9636_v41, 5  ;;  %v17642_v22 = vpop.f32.mrf.mxu0  ;;  %19231 = vst [vmem:[#allocation139_spill] sm:$0xff] %v17649_v53  ;;  %v17651_v41 = vld [vmem:[#allocation3 + $0x44] sm:$0xf] }
 0x43a   : > { %v9888_v58 = vrot.slane %v9886_v18, 4  ;;  %19230 = vst [vmem:[#allocation137_spill] sm:$0xff] %v17642_v22  ;;  %v9893_v3 = vrot.slane %v9891_v31, 3  ;;  %v9896_v45 = vrot.slane %v9894_v40, 4  ;;  %v17647_v38 = vcombine.low %v17638_v23, %v17630_v51  ;;  %v9436_v22 = vld [vmem:[#allocation3 + $0x60] sm:$0x8] }
 0x43b   : > { %v7177_v24 = vsel %vm1032_vm3, %v7168_v19, %v7176_v44  ;;  %v9639_v25 = vor.u32 %v9638_v15, %v9635_v36  ;;  %v9812_v20 = vrot.slane %v14497_v50, 5  ;;  %v12477_v13 = vcombine.low %v9424_v62, %v9425_v46  ;;  %v14501_v50 = vld [vmem:[#allocation3 + $0x4c] ss:$0 sps:$4 sm:$0x11]   ;;  %v17664_v62 = vpop.f32.mrf.mxu1 }
 0x43c   : > { %13868 = vmatmul.mubr.bf16.gmra.mxu1 %v7177_v24  ;;  %v9889_v27 = vor.u32 %v9888_v58, %v9885_v35  ;;  %v9897_v2 = vor.u32 %v9896_v45, %v9893_v3  ;;  %v9811_v49 = vrot.slane %v17647_v38, 5  ;;  %v12478_v18 = vcombine.low %v17616_v26, %v17616_v26  ;;  %v17660_v44 = vpop.f32.mrf.mxu0  ;;  %19233 = vst [vmem:[#allocation144_spill] sm:$0xff] %v17664_v62 }
 0x43d   : > { %v17658_v19 = vcombine.low %v17651_v41, %v17640_v28  ;;  %19232 = vst [vmem:[#allocation142_spill] sm:$0xff] %v17660_v44  ;;  %v9874_v31 = vshrl.u32 %v9639_v25, 16  ;;  %v9877_v40 = vshll.u32 %v9639_v25, 16  ;;  %v9857_v58 = vshrl.u32 %v12477_v13, 16  ;;  %v17671_v5 = vpop.f32.mrf.mxu1 }
 0x43e   : > { %v9860_v15 = vshll.u32 %v12477_v13, 16  ;;  %v9898_v35 = vsel %vm1032_vm3, %v9889_v27, %v9897_v2  ;;  %v9813_v46 = vsel %vm983_vm7, %v9811_v49, %v9812_v20  ;;  %v9926_v45 = vshrl.u32 %v9811_v49, 16  ;;  %v17666_v26 = vpop.f32.mrf.mxu0  ;;  %19236 = vst [vmem:[#allocation154_spill] sm:$0xff] %v17671_v5 }
 0x43f   : > { %v9929_v36 = vshll.u32 %v9811_v49, 16  ;;  %19234 = vst [vmem:[#allocation95_spill] sm:$0xff] %v17666_v26  ;;  %13887 = vmatprep.mubr.bf16.mxu0 %v9898_v35  ;;  %v9876_v24 = vrot.slane %v9874_v31, 3  ;;  %v9879_v3 = vrot.slane %v9877_v40, 4  ;;  %v9934_v53 = vshrl.u32 %v9813_v46, 16 }
 0x440   : > { %v9937_v21 = vshll.u32 %v9813_v46, 16  ;;  %v9928_v8 = vrot.slane %v9926_v45, 3  ;;  %v9859_v39 = vrot.slane %v9857_v58, 3  ;;  %v9862_v13 = vrot.slane %v9860_v15, 4  ;;  %v17668_v11 = vpop.f32.mrf.mxu0  ;;  %v9433_v26 = vld [vmem:[#allocation3 + $0x50] sm:$0x8] }
 0x441   : > { %v9931_v25 = vrot.slane %v9929_v36, 4  ;;  %19235 = vst [vmem:[#allocation100_spill] sm:$0xff] %v17668_v11  ;;  %v9880_v27 = vor.u32 %v9879_v3, %v9876_v24  ;;  %v9936_v20 = vrot.slane %v9934_v53, 3  ;;  %v9865_v49 = vshrl.u32 %v12478_v18, 16  ;;  %v14509_v53 = vld [vmem:[#allocation10 + $0x30] sm:$0xff]  }
 0x442   : > { %v9939_v2 = vrot.slane %v9937_v21, 4  ;;  %v9868_v52 = vshll.u32 %v12478_v18, 16  ;;  %v9814_v62 = vrot.slane %v17658_v19, 5  ;;  %v17673_v31 = vpop.f32.mrf.mxu0  ;;  %v9815_v46 = vrot.slane %v14501_v50, 5  ;;  %v9427_v50 = vld [vmem:[#allocation3 + $0x30] sm:$0x8] }
 0x443   : > { %v9932_v37 = vor.u32 %v9931_v25, %v9928_v8  ;;  %19237 = vst [vmem:[#allocation92_spill] sm:$0xff] %v17673_v31  ;;  %10817 = vmatprep.mubr.bf16.mxu1 %v9880_v27  ;;  %v9867_v35 = vrot.slane %v9865_v49, 3  ;;  %v9641_v58 = vshrl.u32 %v17647_v38, 16  ;;  %v9644_v21 = vshll.u32 %v17647_v38, 16  ;;  %v17679_v25 = vld [vmem:[#allocation3 + $0x54] sm:$0xf] }
 0x444   : > { %v9940_v40 = vor.u32 %v9939_v2, %v9936_v20  ;;  %v9870_v15 = vrot.slane %v9868_v52, 4  ;;  %v9969_v45 = vshrl.u32 %v9814_v62, 16  ;;  %v9972_v36 = vshll.u32 %v9814_v62, 16  ;;  %v17681_v27 = vld [vmem:[#allocation3 + $0x58] sm:$0xf] }
 0x445   : > { %v9863_v18 = vor.u32 %v9862_v13, %v9859_v39  ;;  %v9816_v24 = vsel %vm983_vm7, %v9814_v62, %v9815_v46  ;;  %v9643_v3 = vrot.slane %v9641_v58, 4  ;;  %v14504_v20 = vld [vmem:[#allocation3 + $0x5c] ss:$0 sps:$4 sm:$0x11]   ;;  %v17683_v11 = vld [vmem:[#allocation3 + $0x68] sm:$0xf] }
 0x446   : > { %v9941_v8 = vsel %vm1032_vm3, %v9932_v37, %v9940_v40  ;;  %v9871_v2 = vor.u32 %v9870_v15, %v9867_v35  ;;  %v9971_v52 = vrot.slane %v9969_v45, 3  ;;  %v9974_v49 = vrot.slane %v9972_v36, 4  ;;  %v17685_v38 = vpop.f32.mrf.mxu1  ;;  %v14595_v13 = vld [vmem:[#allocation10 + $0x38] sm:$0xff]   ;;  %v17689_v40 = vld [vmem:[#allocation3 + $0x6c] ss:$0 sps:$4 sm:$0x11]  }
 0x447   : > { %13888 = vmatmul.mubr.bf16.vlgmr.msra.gmra.mxu0 %v9941_v8  ;;  %v9977_v31 = vshrl.u32 %v9816_v24, 16  ;;  %19238 = vst [vmem:[#allocation98_spill] sm:$0xff] %v17685_v38  ;;  %v17687_v37 = vpop.f32.mrf.mxu0  ;;  %v9980_v39 = vshll.u32 %v9816_v24, 16  ;;  %v9646_v62 = vrot.slane %v9644_v21, 5  ;;  %v17694_v35 = vcombine.low %v17679_v25, %v17681_v27  ;;  %v14516_v15 = vld [vmem:[#allocation10 + $0x28] sm:$0xff]  }
 0x448   : > { %19239 = vst [vmem:[#allocation26_spill] sm:$0xff] %v17687_v37  ;;  %13920 = vmatpush3.bf16.msra.mxu0 %v14595_v13  ;;  %v9872_v46 = vsel %vm1032_vm3, %v9863_v18, %v9871_v2  ;;  %v17696_v45 = vpop.f32.mrf.mxu1  ;;  %v9975_v8 = vor.u32 %v9974_v49, %v9971_v52  ;;  %v9818_v13 = vrot.slane %v14504_v20, 5  ;;  %v17700_v38 = vld [vmem:[#allocation3 + $0x64] sm:$0xf]  ;;  %v12480_v2 = vcombine.low %v17630_v51, %v17630_v51 }
 0x449   : > { %v9979_v58 = vrot.slane %v9977_v31, 3  ;;  %13921 = vmatprep.subr.bf16.mxu0 %v14509_v53  ;;  %19240 = vst [vmem:[#allocation158_spill] sm:$0xff] %v17696_v45  ;;  %v17698_v36 = vpop.f32.mrf.mxu0  ;;  %10818 = vmatmul.mubr.bf16.vlgmr.msra.gmra.mxu1 %v9872_v46  ;;  %v9982_v21 = vrot.slane %v9980_v39, 4  ;;  %v9647_v24 = vor.u32 %v9646_v62, %v9643_v3  ;;  %v9817_v18 = vrot.slane %v17694_v35, 5  ;;  %v14523_v51 = vld [vmem:[#allocation10 + $0x20] sm:$0xff]  }
 0x44a   : > { %19241 = vst [vmem:[#allocation161_spill] sm:$0xff] %v17698_v36  ;;  %v12479_v31 = vcombine.low %v9427_v50, %v17638_v23  ;;  %v17708_v5 = vcombine.low %v17700_v38, %v17683_v11  ;;  %v17710_v45 = vpop.f32.mrf.mxu1  ;;  %v9821_v49 = vrot.slane %v17689_v40, 5  ;;  %v9908_v6 = vshrl.u32 %v12480_v2, 16 }
 0x44b   : > { %v17712_v46 = vpop.f32.mrf.mxu0  ;;  %v9983_v52 = vor.u32 %v9982_v21, %v9979_v58  ;;  %v9917_v3 = vshrl.u32 %v9647_v24, 16  ;;  %v9920_v20 = vshll.u32 %v9647_v24, 16  ;;  %v9819_v39 = vsel %vm983_vm7, %v9817_v18, %v9818_v13 }
 0x44c   : > { %19242 = vst [vmem:[#allocation103_spill] sm:$0xff] %v17712_v46  ;;  %13922 = vmatpush3.bf16.msra.mxu0 %v14509_v53  ;;  %v10012_v23 = vshrl.u32 %v9817_v18, 16  ;;  %v10015_v50 = vshll.u32 %v9817_v18, 16  ;;  %v9900_v62 = vshrl.u32 %v12479_v31, 16  ;;  %v17716_v59 = vpop.f32.mrf.mxu1  ;;  %v10020_v46 = vshrl.u32 %v9819_v39, 16 }
 0x44d   : > { %13923 = vmatprep.subr.bf16.mxu0 %v14516_v15  ;;  %v9984_v10 = vsel %vm1032_vm3, %v9975_v8, %v9983_v52  ;;  %v9919_v43 = vrot.slane %v9917_v3, 3  ;;  %v9922_v12 = vrot.slane %v9920_v20, 4  ;;  %v10023_v24 = vshll.u32 %v9819_v39, 16  ;;  %v17721_v13 = vpop.f32.mrf.mxu0 }
 0x44e   : > { %13891 = vmatprep.mubr.bf16.mxu0 %v9984_v10  ;;  %v10014_v58 = vrot.slane %v10012_v23, 3  ;;  %v10017_v21 = vrot.slane %v10015_v50, 4  ;;  %v9902_v40 = vrot.slane %v9900_v62, 3  ;;  %v17719_v53 = vpop.f32.mrf.mxu1  ;;  %19243 = vst [vmem:[#allocation105_spill] sm:$0xff] %v17721_v13  ;;  %v10022_v33 = vrot.slane %v10020_v46, 3  ;;  %v14530_v10 = vld [vmem:[#allocation10 + $0x18] sm:$0xff]  }
 0x44f   : > { %v9923_v18 = vor.u32 %v9922_v12, %v9919_v43  ;;  %v9903_v47 = vshll.u32 %v12479_v31, 16  ;;  %v10025_v0 = vrot.slane %v10023_v24, 4  ;;  %v9911_v8 = vshll.u32 %v12480_v2, 16  ;;  %v17729_v50 = vld [vmem:[#allocation3 + $0x78] sm:$0xf] }
 0x450   : > { %13924 = vmatpush3.bf16.msra.mxu0 %v14516_v15  ;;  %v10018_v55 = vor.u32 %v10017_v21, %v10014_v58  ;;  %v9820_v52 = vrot.slane %v17708_v5, 5  ;;  %v17724_v3 = vpop.f32.mrf.mxu1  ;;  %v9910_v39 = vrot.slane %v9908_v6, 3  ;;  %v9649_v23 = vshrl.u32 %v17658_v19, 16 }
 0x451   : > { %13925 = vmatprep.subr.bf16.mxu0 %v14523_v51  ;;  %10825 = vmatprep.mubr.bf16.mxu1 %v9923_v18  ;;  %v9905_v20 = vrot.slane %v9903_v47, 4  ;;  %v9652_v43 = vshll.u32 %v17658_v19, 16  ;;  %v10026_v12 = vor.u32 %v10025_v0, %v10022_v33  ;;  %v9913_v31 = vrot.slane %v9911_v8, 4  ;;  %v14511_v18 = vld [vmem:[#allocation3 + $0x7c] ss:$0 sps:$4 sm:$0x11]  }
 0x452   : > { %v9822_v15 = vsel %vm983_vm7, %v9820_v52, %v9821_v49  ;;  %v10055_v46 = vshrl.u32 %v9820_v52, 16  ;;  %v10058_v58 = vshll.u32 %v9820_v52, 16  ;;  %v17733_v47 = vpop.f32.mrf.mxu1  ;;  %v9651_v33 = vrot.slane %v9649_v23, 4  ;;  %v9430_v8 = vld [vmem:[#allocation3 + $0x40] sm:$0x8]  ;;  %v14537_v49 = vld [vmem:[#allocation10 + $0x10] sm:$0xff]  }
 0x453   : > { %v17731_v2 = vpop.f32.mrf.mxu0  ;;  %v9906_v62 = vor.u32 %v9905_v20, %v9902_v40  ;;  %v10063_v21 = vshrl.u32 %v9822_v15, 16  ;;  %v10066_v24 = vshll.u32 %v9822_v15, 16  ;;  %v10027_v6 = vsel %vm1032_vm3, %v10018_v55, %v10026_v12  ;;  %v17738_v15 = vld [vmem:[#allocation3 + $0x74] sm:$0xf] }
 0x454   : > { %19244 = vst [vmem:[#allocation148_spill] sm:$0xff] %v17731_v2  ;;  %13926 = vmatpush3.bf16.msra.mxu0 %v14523_v51  ;;  %v9914_v19 = vor.u32 %v9913_v31, %v9910_v39  ;;  %v10057_v0 = vrot.slane %v10055_v46, 3  ;;  %v10060_v2 = vrot.slane %v10058_v58, 4  ;;  %v9654_v20 = vrot.slane %v9652_v43, 5  ;;  %v17745_v46 = vpop.f32.mrf.mxu1 }
 0x455   : > { %13927 = vmatprep.subr.bf16.mxu0 %v14530_v10  ;;  %v17736_v13 = vpop.f32.mrf.mxu0  ;;  %13892 = vmatmul.mubr.bf16.gmra.mxu0 %v10027_v6  ;;  %v10065_v40 = vrot.slane %v10063_v21, 3  ;;  %v10068_v52 = vrot.slane %v10066_v24, 4  ;;  %v17743_v55 = vcombine.low %v17738_v15, %v17729_v50  ;;  %v9824_v31 = vrot.slane %v14511_v18, 5  ;;  %v14544_v21 = vld [vmem:[#allocation10 + $0x8] sm:$0xff]  }
 0x456   : > { %19245 = vst [vmem:[#allocation149_spill] sm:$0xff] %v17736_v13  ;;  %v9915_v51 = vsel %vm1032_vm3, %v9906_v62, %v9914_v19  ;;  %v10061_v39 = vor.u32 %v10060_v2, %v10057_v0  ;;  %v9655_v12 = vor.u32 %v9654_v20, %v9651_v33  ;;  %v12481_v43 = vcombine.low %v9430_v8, %v17651_v41 }
 0x457   : > { %10826 = vmatmul.mubr.bf16.gmra.mxu1 %v9915_v51  ;;  %v10069_v23 = vor.u32 %v10068_v52, %v10065_v40  ;;  %v9823_v58 = vrot.slane %v17743_v55, 5  ;;  %v17749_v24 = vpop.f32.mrf.mxu0  ;;  %v12482_v2 = vcombine.low %v17640_v28, %v17640_v28  ;;  %v14515_v40 = vld [vmem:[#allocation3 + $0x8c] ss:$0 sps:$4 sm:$0x11]   ;;  %v17755_v51 = vld [vmem:[#allocation3 + $0x88] sm:$0xf] }
 0x458   : > { %13928 = vmatpush3.bf16.msra.mxu0 %v14530_v10  ;;  %19246 = vst [vmem:[#allocation107_spill] sm:$0xff] %v17749_v24  ;;  %v9960_v6 = vshrl.u32 %v9655_v12, 16  ;;  %v9963_v19 = vshll.u32 %v9655_v12, 16  ;;  %v9943_v33 = vshrl.u32 %v12481_v43, 16  ;;  %v9946_v28 = vshll.u32 %v12481_v43, 16 }
 0x459   : > { %13929 = vmatprep.subr.bf16.mxu0 %v14537_v49  ;;  %v10070_v62 = vsel %vm1032_vm3, %v10061_v39, %v10069_v23  ;;  %v9825_v10 = vsel %vm983_vm7, %v9823_v58, %v9824_v31  ;;  %v10098_v18 = vshrl.u32 %v9823_v58, 16  ;;  %v10101_v0 = vshll.u32 %v9823_v58, 16  ;;  %v17759_v31 = vpop.f32.mrf.mxu0 }
 0x45a   : > { %13895 = vmatprep.mubr.bf16.mxu0 %v10070_v62  ;;  %v9962_v52 = vrot.slane %v9960_v6, 3  ;;  %v9965_v41 = vrot.slane %v9963_v19, 4  ;;  %v10106_v8 = vshrl.u32 %v9825_v10, 16  ;;  %v10109_v20 = vshll.u32 %v9825_v10, 16  ;;  %v14549_v62 = vld [vmem:[#allocation10] sm:$0xff]   ;;  %19247 = vst [vmem:[#allocation109_spill] sm:$0xff] %v17759_v31 }
 0x45b   : > { %v17757_v39 = vpop.f32.mrf.mxu1  ;;  %v10100_v23 = vrot.slane %v10098_v18, 3  ;;  %v10103_v12 = vrot.slane %v10101_v0, 4  ;;  %v9945_v24 = vrot.slane %v9943_v33, 3  ;;  %v9951_v6 = vshrl.u32 %v12482_v2, 16  ;;  %v17761_v19 = vld [vmem:[#allocation3 + $0x84] sm:$0xf] }
 0x45c   : > { %13930 = vmatpush3.bf16.msra.mxu0 %v14537_v49  ;;  %v9966_v58 = vor.u32 %v9965_v41, %v9962_v52  ;;  %v10108_v13 = vrot.slane %v10106_v8, 3  ;;  %v10111_v36 = vrot.slane %v10109_v20, 4  ;;  %v9948_v49 = vrot.slane %v9946_v28, 4 }
 0x45d   : > { %13931 = vmatprep.subr.bf16.mxu0 %v14544_v21  ;;  %v17763_v10 = vpop.f32.mrf.mxu1  ;;  %v10104_v37 = vor.u32 %v10103_v12, %v10100_v23  ;;  %v9954_v30 = vshll.u32 %v12482_v2, 16  ;;  %v17767_v18 = vcombine.low %v17761_v19, %v17755_v51  ;;  %v9953_v0 = vrot.slane %v9951_v6, 3  ;;  %v14518_v6 = vld [vmem:[#allocation3 + $0x9c] ss:$0 sps:$4 sm:$0x11]  }
 0x45e   : > { %10833 = vmatprep.mubr.bf16.mxu1 %v9966_v58  ;;  %v10112_v43 = vor.u32 %v10111_v36, %v10108_v13  ;;  %v9827_v33 = vrot.slane %v14515_v40, 5  ;;  %v9657_v52 = vshrl.u32 %v17694_v35, 16  ;;  %v9660_v20 = vshll.u32 %v17694_v35, 16  ;;  %v17777_v36 = vld [vmem:[#allocation3 + $0x98] sm:$0xf] }
 0x45f   : > { %v9956_v41 = vrot.slane %v9954_v30, 4  ;;  %v9826_v8 = vrot.slane %v17767_v18, 5  ;;  %v17772_v23 = vpop.f32.mrf.mxu1  ;;  %v9949_v28 = vor.u32 %v9948_v49, %v9945_v24 }
 0x460   : > { %13932 = vmatpush3.bf16.msra.mxu0 %v14544_v21  ;;  %v17774_v2 = vpop.f32.mrf.mxu0  ;;  %v10113_v12 = vsel %vm1032_vm3, %v10104_v37, %v10112_v43  ;;  %v9659_v58 = vrot.slane %v9657_v52, 4  ;;  %v9662_v4 = vrot.slane %v9660_v20, 5  ;;  %v17783_v43 = vld [vmem:[#allocation3 + $0x94] sm:$0xf] }
 0x461   : > { %13933 = vmatprep.subr.bf16.mxu0 %v14549_v62  ;;  %19248 = vst [vmem:[#allocation111_spill] sm:$0xff] %v17774_v2  ;;  %13896 = vmatmul.mubr.bf16.gmra.mxu0 %v10113_v12  ;;  %v9957_v13 = vor.u32 %v9956_v41, %v9953_v0  ;;  %v9828_v21 = vsel %vm983_vm7, %v9826_v8, %v9827_v33  ;;  %v10141_v30 = vshrl.u32 %v9826_v8, 16  ;;  %v10144_v40 = vshll.u32 %v9826_v8, 16  ;;  %v17785_v52 = vpop.f32.mrf.mxu1  ;;  %v17803_v2 = vld [vmem:[#allocation3 + $0xa8] sm:$0xf] }
 0x462   : > { %v17780_v31 = vpop.f32.mrf.mxu0  ;;  %v10149_v35 = vshrl.u32 %v9828_v21, 16  ;;  %v10152_v9 = vshll.u32 %v9828_v21, 16  ;;  %v9663_v8 = vor.u32 %v9662_v4, %v9659_v58  ;;  %v17791_v12 = vcombine.low %v17783_v43, %v17777_v36 }
 0x463   : > { %19249 = vst [vmem:[#allocation113_spill] sm:$0xff] %v17780_v31  ;;  %v9958_v37 = vsel %vm1032_vm3, %v9949_v28, %v9957_v13  ;;  %v10143_v24 = vrot.slane %v10141_v30, 3  ;;  %v10146_v49 = vrot.slane %v10144_v40, 4  ;;  %v12483_v28 = vcombine.low %v9433_v26, %v17679_v25 }
 0x464   : > { %13934 = vmatpush3.bf16.msra.mxu0 %v14549_v62  ;;  %v17787_v0 = vpop.f32.mrf.mxu0  ;;  %10834 = vmatmul.mubr.bf16.gmra.mxu1 %v9958_v37  ;;  %v10151_v33 = vrot.slane %v10149_v35, 3  ;;  %v10154_v41 = vrot.slane %v10152_v9, 4  ;;  %v9830_v62 = vrot.slane %v14518_v6, 5  ;;  %v12484_v13 = vcombine.low %v17681_v27, %v17681_v27  ;;  %v14522_v27 = vld [vmem:[#allocation3 + $0xac] ss:$0 sps:$4 sm:$0x11]  }
 0x465   : > { %19250 = vst [vmem:[#allocation115_spill] sm:$0xff] %v17787_v0  ;;  %v10147_v20 = vor.u32 %v10146_v49, %v10143_v24  ;;  %v10003_v30 = vshrl.u32 %v9663_v8, 16  ;;  %v10006_v40 = vshll.u32 %v9663_v8, 16  ;;  %v9829_v0 = vrot.slane %v17791_v12, 5 }
 0x466   : > { %v10155_v21 = vor.u32 %v10154_v41, %v10151_v33  ;;  %v9986_v37 = vshrl.u32 %v12483_v28, 16  ;;  %v9989_v35 = vshll.u32 %v12483_v28, 16  ;;  %v9994_v9 = vshrl.u32 %v12484_v13, 16  ;;  %v17799_v31 = vpop.f32.mrf.mxu0 }
 0x467   : > { %v9997_v4 = vshll.u32 %v12484_v13, 16  ;;  %v17797_v58 = vpop.f32.mrf.mxu1  ;;  %19251 = vst [vmem:[#allocation117_spill] sm:$0xff] %v17799_v31  ;;  %v10005_v24 = vrot.slane %v10003_v30, 3  ;;  %v10008_v26 = vrot.slane %v10006_v40, 4  ;;  %v9831_v25 = vsel %vm983_vm7, %v9829_v0, %v9830_v62 }
 0x468   : > { %v10156_v6 = vsel %vm1032_vm3, %v10147_v20, %v10155_v21  ;;  %v10184_v49 = vshrl.u32 %v9829_v0, 16  ;;  %v10187_v33 = vshll.u32 %v9829_v0, 16  ;;  %v10192_v41 = vshrl.u32 %v9831_v25, 16  ;;  %v17805_v21 = vld [vmem:[#allocation3 + $0xa4] sm:$0xf] }
 0x469   : > { %13899 = vmatprep.mubr.bf16.mxu0 %v10156_v6  ;;  %v10195_v8 = vshll.u32 %v9831_v25, 16  ;;  %v10009_v28 = vor.u32 %v10008_v26, %v10005_v24  ;;  %v9988_v13 = vrot.slane %v9986_v37, 3  ;;  %v9991_v44 = vrot.slane %v9989_v35, 4  ;;  %v17807_v30 = vpop.f32.mrf.mxu1  ;;  %v17815_v37 = vld [vmem:[#allocation3 + $0xb8] sm:$0xf] }
 0x46a   : > { %v9996_v34 = vrot.slane %v9994_v9, 3  ;;  %v10186_v42 = vrot.slane %v10184_v49, 3  ;;  %v10189_v31 = vrot.slane %v10187_v33, 4  ;;  %v10194_v48 = vrot.slane %v10192_v41, 3 }
 0x46b   : > { %v10197_v20 = vrot.slane %v10195_v8, 4  ;;  %10841 = vmatprep.mubr.bf16.mxu1 %v10009_v28  ;;  %v9999_v0 = vrot.slane %v9997_v4, 4  ;;  %v17813_v40 = vcombine.low %v17805_v21, %v17803_v2  ;;  %v9833_v6 = vrot.slane %v14522_v27, 5  ;;  %v17822_v4 = vld [vmem:[#allocation3 + $0xb4] sm:$0xf] }
 0x46c   : > { %v17809_v62 = vpop.f32.mrf.mxu0  ;;  %v10190_v35 = vor.u32 %v10189_v31, %v10186_v42  ;;  %v9665_v24 = vshrl.u32 %v17708_v5, 16  ;;  %v9668_v26 = vshll.u32 %v17708_v5, 16  ;;  %v9992_v49 = vor.u32 %v9991_v44, %v9988_v13 }
 0x46d   : > { %19252 = vst [vmem:[#allocation119_spill] sm:$0xff] %v17809_v62  ;;  %v10198_v9 = vor.u32 %v10197_v20, %v10194_v48  ;;  %v10000_v33 = vor.u32 %v9999_v0, %v9996_v34  ;;  %v9832_v41 = vrot.slane %v17813_v40, 5  ;;  %v17827_v42 = vcombine.low %v17822_v4, %v17815_v37  ;;  %v17829_v48 = vpop.f32.mrf.mxu1  ;;  %v14525_v20 = vld [vmem:[#allocation3 + $0xbc] ss:$0 sps:$4 sm:$0x11]  }
 0x46e   : > { %v17819_v25 = vpop.f32.mrf.mxu0  ;;  %v9667_v28 = vrot.slane %v9665_v24, 4  ;;  %v9670_v27 = vrot.slane %v9668_v26, 5 }
 0x46f   : > { %19253 = vst [vmem:[#allocation30_spill] sm:$0xff] %v17819_v25  ;;  %v10199_v8 = vsel %vm1032_vm3, %v10190_v35, %v10198_v9  ;;  %v10001_v5 = vsel %vm1032_vm3, %v9992_v49, %v10000_v33  ;;  %v9834_v34 = vsel %vm983_vm7, %v9832_v41, %v9833_v6  ;;  %v10227_v44 = vshrl.u32 %v9832_v41, 16  ;;  %v17838_v33 = vpop.f32.mrf.mxu1 }
 0x470   : > { %v17831_v31 = vpop.f32.mrf.mxu0  ;;  %13900 = vmatmul.mubr.bf16.gmra.mxu0 %v10199_v8  ;;  %v10230_v13 = vshll.u32 %v9832_v41, 16  ;;  %10842 = vmatmul.mubr.bf16.gmra.mxu1 %v10001_v5  ;;  %v10235_v0 = vshrl.u32 %v9834_v34, 16  ;;  %v10238_v35 = vshll.u32 %v9834_v34, 16  ;;  %v9671_v9 = vor.u32 %v9670_v27, %v9667_v28 }
 0x471   : > { %19254 = vst [vmem:[#allocation121_spill] sm:$0xff] %v17831_v31  ;;  %v10229_v26 = vrot.slane %v10227_v44, 3  ;;  %v9835_v62 = vrot.slane %v17827_v42, 5  ;;  %v9836_v41 = vrot.slane %v14525_v20, 5  ;;  %v12485_v27 = vcombine.low %v9436_v22, %v17700_v38  ;;  %v17841_v44 = vld [vmem:[#allocation3 + $0xc8] sm:$0xf] }
 0x472   : > { %v17835_v24 = vpop.f32.mrf.mxu0  ;;  %v10232_v25 = vrot.slane %v10230_v13, 4  ;;  %v10237_v31 = vrot.slane %v10235_v0, 3  ;;  %v10240_v8 = vrot.slane %v10238_v35, 4  ;;  %v10046_v61 = vshrl.u32 %v9671_v9, 16 }
 0x473   : > { %19255 = vst [vmem:[#allocation123_spill] sm:$0xff] %v17835_v24  ;;  %v10049_v49 = vshll.u32 %v9671_v9, 16  ;;  %v10270_v57 = vshrl.u32 %v9835_v62, 16  ;;  %v10273_v5 = vshll.u32 %v9835_v62, 16  ;;  %v9837_v0 = vsel %vm983_vm7, %v9835_v62, %v9836_v41 }
 0x474   : > { %v10233_v6 = vor.u32 %v10232_v25, %v10229_v26  ;;  %v10241_v1 = vor.u32 %v10240_v8, %v10237_v31  ;;  %v10048_v34 = vrot.slane %v10046_v61, 3  ;;  %v12486_v9 = vcombine.low %v17683_v11, %v17683_v11  ;;  %v14529_v25 = vld [vmem:[#allocation3 + $0xcc] ss:$0 sps:$4 sm:$0x11]  }
 0x475   : > { %v10051_v28 = vrot.slane %v10049_v49, 4  ;;  %v10272_v35 = vrot.slane %v10270_v57, 3  ;;  %v10275_v24 = vrot.slane %v10273_v5, 4  ;;  %v10278_v31 = vshrl.u32 %v9837_v0, 16  ;;  %v17853_v57 = vld [vmem:[#allocation3 + $0xc4] sm:$0xf] }
 0x476   : > { %v10242_v20 = vsel %vm1032_vm3, %v10233_v6, %v10241_v1  ;;  %v10281_v61 = vshll.u32 %v9837_v0, 16  ;;  %v10029_v49 = vshrl.u32 %v12485_v27, 16  ;;  %v10037_v62 = vshrl.u32 %v12486_v9, 16 }
 0x477   : > { %v17843_v13 = vpop.f32.mrf.mxu0  ;;  %v10052_v26 = vor.u32 %v10051_v28, %v10048_v34  ;;  %13903 = vmatprep.mubr.bf16.mxu0 %v10242_v20  ;;  %v10276_v38 = vor.u32 %v10275_v24, %v10272_v35  ;;  %v10280_v41 = vrot.slane %v10278_v31, 3  ;;  %v10040_v5 = vshll.u32 %v12486_v9, 16 }
 0x478   : > { %19256 = vst [vmem:[#allocation124_spill] sm:$0xff] %v17843_v13  ;;  %v17849_v8 = vpop.f32.mrf.mxu1  ;;  %v10032_v13 = vshll.u32 %v12485_v27, 16  ;;  %v10283_v11 = vrot.slane %v10281_v61, 4  ;;  %v17857_v1 = vcombine.low %v17853_v57, %v17841_v44  ;;  %v10031_v28 = vrot.slane %v10029_v49, 3 }
 0x479   : > { %19257 = vst [vmem:[#allocation34_spill] sm:$0xff] %v17849_v8  ;;  %v17851_v22 = vpop.f32.mrf.mxu0  ;;  %10849 = vmatprep.mubr.bf16.mxu1 %v10052_v26  ;;  %v10039_v24 = vrot.slane %v10037_v62, 3  ;;  %v9839_v35 = vrot.slane %v14529_v25, 5  ;;  %v10042_v20 = vrot.slane %v10040_v5, 4  ;;  %v9673_v26 = vshrl.u32 %v17743_v55, 16 }
 0x47a   : > { %19258 = vst [vmem:[#allocation156_spill] sm:$0xff] %v17851_v22  ;;  %v17859_v6 = vpop.f32.mrf.mxu1  ;;  %v10034_v0 = vrot.slane %v10032_v13, 4  ;;  %v10284_v27 = vor.u32 %v10283_v11, %v10280_v41  ;;  %v9838_v22 = vrot.slane %v17857_v1, 5  ;;  %v9676_v61 = vshll.u32 %v17743_v55, 16  ;;  %v9439_v62 = vld [vmem:[#allocation3 + $0x70] sm:$0x8] }
 0x47b   : > { %19259 = vst [vmem:[#allocation165_spill] sm:$0xff] %v17859_v6  ;;  %v17861_v34 = vpop.f32.mrf.mxu0  ;;  %v10043_v29 = vor.u32 %v10042_v20, %v10039_v24  ;;  %v14532_v13 = vld [vmem:[#allocation3 + $0xdc] ss:$0 sps:$4 sm:$0x11]   ;;  %v17877_v24 = vld [vmem:[#allocation3 + $0xe8] sm:$0xf] }
 0x47c   : > { %19260 = vst [vmem:[#allocation168_spill] sm:$0xff] %v17861_v34  ;;  %v17865_v31 = vpop.f32.mrf.mxu1  ;;  %v10035_v9 = vor.u32 %v10034_v0, %v10031_v28  ;;  %v10285_v7 = vsel %vm1032_vm3, %v10276_v38, %v10284_v27  ;;  %v9840_v34 = vsel %vm983_vm7, %v9838_v22, %v9839_v35  ;;  %v10313_v49 = vshrl.u32 %v9838_v22, 16  ;;  %v17874_v28 = vld [vmem:[#allocation3 + $0xd8] sm:$0xf] }
 0x47d   : > { %19261 = vst [vmem:[#allocation125_spill] sm:$0xff] %v17865_v31  ;;  %v17872_v41 = vpop.f32.mrf.mxu0  ;;  %13904 = vmatmul.mubr.bf16.gmra.mxu0 %v10285_v7  ;;  %v10316_v11 = vshll.u32 %v9838_v22, 16  ;;  %v10321_v5 = vshrl.u32 %v9840_v34, 16  ;;  %v10324_v56 = vshll.u32 %v9840_v34, 16  ;;  %v9675_v31 = vrot.slane %v9673_v26, 4 }
 0x47e   : > { %v17870_v25 = vpop.f32.mrf.mxu1  ;;  %19263 = vst [vmem:[#allocation129_spill] sm:$0xff] %v17872_v41  ;;  %v10044_v55 = vsel %vm1032_vm3, %v10035_v9, %v10043_v29  ;;  %v10315_v38 = vrot.slane %v10313_v49, 3  ;;  %v9678_v0 = vrot.slane %v9676_v61, 5  ;;  %v17881_v41 = vld [vmem:[#allocation3 + $0xd4] sm:$0xf]  ;;  %v9842_v34 = vrot.slane %v14532_v13, 5 }
 0x47f   : > { %19262 = vst [vmem:[#allocation127_spill] sm:$0xff] %v17870_v25  ;;  %10850 = vmatmul.mubr.bf16.gmra.mxu1 %v10044_v55  ;;  %v10318_v27 = vrot.slane %v10316_v11, 4  ;;  %v10323_v20 = vrot.slane %v10321_v5, 3  ;;  %v10326_v25 = vrot.slane %v10324_v56, 4  ;;  %v17885_v22 = vcombine.low %v17881_v41, %v17874_v28  ;;  %v17888_v26 = vld [vmem:[#allocation3 + $0xe4] sm:$0xf] }
 0x480   : > { %v17879_v35 = vpop.f32.mrf.mxu1  ;;  %v9679_v7 = vor.u32 %v9678_v0, %v9675_v31  ;;  %v12487_v29 = vcombine.low %v9439_v62, %v17738_v15  ;;  %v12488_v11 = vcombine.low %v17729_v50, %v17729_v50  ;;  %v17896_v56 = vcombine.low %v17888_v26, %v17877_v24 }
 0x481   : > { %19264 = vst [vmem:[#allocation150_spill] sm:$0xff] %v17879_v35  ;;  %v10319_v61 = vor.u32 %v10318_v27, %v10315_v38  ;;  %v10327_v49 = vor.u32 %v10326_v25, %v10323_v20  ;;  %v9841_v55 = vrot.slane %v17885_v22, 5  ;;  %v9845_v8 = vrot.slane %v14536_v54, 5 }
 0x482   : > { %v10089_v31 = vshrl.u32 %v9679_v7, 16  ;;  %v10092_v5 = vshll.u32 %v9679_v7, 16  ;;  %v10072_v13 = vshrl.u32 %v12487_v29, 16  ;;  %v17899_v0 = vpop.f32.mrf.mxu1  ;;  %v10075_v38 = vshll.u32 %v12487_v29, 16 }
 0x483   : > { %v17890_v9 = vpop.f32.mrf.mxu0  ;;  %19266 = vst [vmem:[#allocation153_spill] sm:$0xff] %v17899_v0  ;;  %v10328_v62 = vsel %vm1032_vm3, %v10319_v61, %v10327_v49  ;;  %v10080_v25 = vshrl.u32 %v12488_v11, 16  ;;  %v10083_v27 = vshll.u32 %v12488_v11, 16  ;;  %v10356_v16 = vshrl.u32 %v9841_v55, 16 }
 0x484   : > { %19265 = vst [vmem:[#allocation151_spill] sm:$0xff] %v17890_v9  ;;  %13907 = vmatprep.mubr.bf16.mxu0 %v10328_v62  ;;  %v10091_v50 = vrot.slane %v10089_v31, 3  ;;  %v10094_v20 = vrot.slane %v10092_v5, 4  ;;  %v9843_v9 = vsel %vm983_vm7, %v9841_v55, %v9842_v34  ;;  %v10359_v17 = vshll.u32 %v9841_v55, 16  ;;  %v17907_v29 = vpop.f32.mrf.mxu1 }
 0x485   : > { %v17901_v15 = vpop.f32.mrf.mxu0  ;;  %v10364_v14 = vshrl.u32 %v9843_v9, 16  ;;  %v10367_v32 = vshll.u32 %v9843_v9, 16  ;;  %v10074_v0 = vrot.slane %v10072_v13, 3  ;;  %v10077_v6 = vrot.slane %v10075_v38, 4  ;;  %19269 = vst [vmem:[#allocation163_spill] sm:$0xff] %v17907_v29 }
 0x486   : > { %19267 = vst [vmem:[#allocation155_spill] sm:$0xff] %v17901_v15  ;;  %v10095_v35 = vor.u32 %v10094_v20, %v10091_v50  ;;  %v10358_v15 = vrot.slane %v10356_v16, 3  ;;  %v10082_v61 = vrot.slane %v10080_v25, 3  ;;  %v10361_v49 = vrot.slane %v10359_v17, 4  ;;  %v17914_v25 = vld [vmem:[#allocation3 + $0xf8] sm:$0xf] }
 0x487   : > { %v17905_v7 = vpop.f32.mrf.mxu0  ;;  %v10366_v11 = vrot.slane %v10364_v14, 3  ;;  %v10369_v31 = vrot.slane %v10367_v32, 4  ;;  %v10085_v5 = vrot.slane %v10083_v27, 4  ;;  %v10078_v34 = vor.u32 %v10077_v6, %v10074_v0  ;;  %v14539_v6 = vld [vmem:[#allocation3 + $0xfc] ss:$0 sps:$4 sm:$0x11]   ;;  %v17917_v0 = vpop.f32.mrf.mxu1 }
 0x488   : > { %19268 = vst [vmem:[#allocation27_spill] sm:$0xff] %v17905_v7  ;;  %10857 = vmatprep.mubr.bf16.mxu1 %v10095_v35  ;;  %v9844_v62 = vrot.slane %v17896_v56, 5  ;;  %v9681_v55 = vshrl.u32 %v17767_v18, 16  ;;  %v10362_v9 = vor.u32 %v10361_v49, %v10358_v15  ;;  %v9684_v38 = vshll.u32 %v17767_v18, 16  ;;  %19271 = vst [vmem:[#allocation157_spill] sm:$0xff] %v17917_v0 }
 0x489   : > { %v17911_v7 = vpop.f32.mrf.mxu0  ;;  %v10370_v13 = vor.u32 %v10369_v31, %v10366_v11  ;;  %v10086_v16 = vor.u32 %v10085_v5, %v10082_v61  ;;  %v9442_v20 = vld [vmem:[#allocation3 + $0x80] sm:$0x8]  ;;  %v17921_v11 = vld [vmem:[#allocation3 + $0xf4] sm:$0xf] }
 0x48a   : > { %19270 = vst [vmem:[#allocation130_spill] sm:$0xff] %v17911_v7  ;;  %v9846_v14 = vsel %vm983_vm7, %v9844_v62, %v9845_v8  ;;  %v10399_v32 = vshrl.u32 %v9844_v62, 16  ;;  %v10402_v17 = vshll.u32 %v9844_v62, 16  ;;  %v9683_v35 = vrot.slane %v9681_v55, 4  ;;  %v17929_v55 = vld [vmem:[#allocation3 + $0x108] sm:$0xf] }
 0x48b   : > { %v10371_v54 = vsel %vm1032_vm3, %v10362_v9, %v10370_v13  ;;  %v10087_v27 = vsel %vm1032_vm3, %v10078_v34, %v10086_v16  ;;  %v10407_v50 = vshrl.u32 %v9846_v14, 16  ;;  %v10410_v15 = vshll.u32 %v9846_v14, 16 }
 0x48c   : > { %13908 = vmatmul.mubr.bf16.gmra.mxu0 %v10371_v54  ;;  %10858 = vmatmul.mubr.bf16.gmra.mxu1 %v10087_v27  ;;  %v10401_v18 = vrot.slane %v10399_v32, 3  ;;  %v10404_v61 = vrot.slane %v10402_v17, 4  ;;  %v9686_v49 = vrot.slane %v9684_v38, 5  ;;  %v17927_v62 = vcombine.low %v17921_v11, %v17914_v25  ;;  %v17937_v54 = vld [vmem:[#allocation3 + $0x104] sm:$0xf] }
 0x48d   : > { %v10409_v31 = vrot.slane %v10407_v50, 3  ;;  %v10412_v5 = vrot.slane %v10410_v15, 4  ;;  %v9848_v13 = vrot.slane %v14539_v6, 5  ;;  %v12489_v17 = vcombine.low %v9442_v20, %v17761_v19 }
 0x48e   : > { %v10405_v34 = vor.u32 %v10404_v61, %v10401_v18  ;;  %v9687_v9 = vor.u32 %v9686_v49, %v9683_v35  ;;  %v9847_v32 = vrot.slane %v17927_v62, 5  ;;  %v12490_v15 = vcombine.low %v17755_v51, %v17755_v51 }
 0x48f   : > { %v17923_v8 = vpop.f32.mrf.mxu0  ;;  %v10413_v38 = vor.u32 %v10412_v5, %v10409_v31  ;;  %v17943_v35 = vcombine.low %v17937_v54, %v17929_v55  ;;  %v14543_v31 = vld [vmem:[#allocation3 + $0x10c] ss:$0 sps:$4 sm:$0x11]   ;;  %v10115_v0 = vshrl.u32 %v12489_v17, 16 }
 0x490   : > { %19272 = vst [vmem:[#allocation159_spill] sm:$0xff] %v17923_v8  ;;  %v17931_v16 = vpop.f32.mrf.mxu1  ;;  %v10132_v27 = vshrl.u32 %v9687_v9, 16  ;;  %v10135_v50 = vshll.u32 %v9687_v9, 16  ;;  %v9849_v49 = vsel %vm983_vm7, %v9847_v32, %v9848_v13  ;;  %v10442_v19 = vshrl.u32 %v9847_v32, 16 }
 0x491   : > { %19273 = vst [vmem:[#allocation135_spill] sm:$0xff] %v17931_v16  ;;  %v17933_v14 = vpop.f32.mrf.mxu0  ;;  %v10414_v61 = vsel %vm1032_vm3, %v10405_v34, %v10413_v38  ;;  %v10445_v20 = vshll.u32 %v9847_v32, 16  ;;  %v10453_v51 = vshll.u32 %v9849_v49, 16  ;;  %v10123_v34 = vshrl.u32 %v12490_v15, 16 }
 0x492   : > { %19274 = vst [vmem:[#allocation160_spill] sm:$0xff] %v17933_v14  ;;  %v17945_v6 = vpop.f32.mrf.mxu1  ;;  %13911 = vmatprep.mubr.bf16.mxu0 %v10414_v61  ;;  %v10134_v5 = vrot.slane %v10132_v27, 3  ;;  %v10137_v9 = vrot.slane %v10135_v50, 4  ;;  %v10450_v14 = vshrl.u32 %v9849_v49, 16  ;;  %v10444_v7 = vrot.slane %v10442_v19, 3 }
 0x493   : > { %19275 = vst [vmem:[#allocation162_spill] sm:$0xff] %v17945_v6  ;;  %v17947_v18 = vpop.f32.mrf.mxu0  ;;  %v10447_v16 = vrot.slane %v10445_v20, 4  ;;  %v10118_v6 = vshll.u32 %v12489_v17, 16  ;;  %v10455_v63 = vrot.slane %v10453_v51, 4  ;;  %v10117_v61 = vrot.slane %v10115_v0, 3 }
 0x494   : > { %19276 = vst [vmem:[#allocation32_spill] sm:$0xff] %v17947_v18  ;;  %v17951_v8 = vpop.f32.mrf.mxu1  ;;  %v10138_v29 = vor.u32 %v10137_v9, %v10134_v5  ;;  %v10452_v18 = vrot.slane %v10450_v14, 3  ;;  %v10126_v50 = vshll.u32 %v12490_v15, 16  ;;  %v10125_v60 = vrot.slane %v10123_v34, 3 }
 0x495   : > { %19277 = vst [vmem:[#allocation131_spill] sm:$0xff] %v17951_v8  ;;  %v17955_v13 = vpop.f32.mrf.mxu0  ;;  %v10448_v32 = vor.u32 %v10447_v16, %v10444_v7  ;;  %v10120_v27 = vrot.slane %v10118_v6, 4  ;;  %v9850_v19 = vrot.slane %v17943_v35, 5  ;;  %v9851_v20 = vrot.slane %v14543_v31, 5 }
 0x496   : > { %v17953_v38 = vpop.f32.mrf.mxu1  ;;  %19279 = vst [vmem:[#allocation164_spill] sm:$0xff] %v17955_v13  ;;  %10865 = vmatprep.mubr.bf16.mxu1 %v10138_v29  ;;  %v10456_v49 = vor.u32 %v10455_v63, %v10452_v18  ;;  %v10128_v14 = vrot.slane %v10126_v50, 4  ;;  %v9689_v5 = vshrl.u32 %v17791_v12, 16  ;;  %v9692_v9 = vshll.u32 %v17791_v12, 16  ;;  %v17964_v29 = vld [vmem:[#allocation3 + $0x114] sm:$0xf] }
 0x497   : > { %19278 = vst [vmem:[#allocation134_spill] sm:$0xff] %v17953_v38  ;;  %v10121_v17 = vor.u32 %v10120_v27, %v10117_v61  ;;  %v9852_v7 = vsel %vm983_vm7, %v9850_v19, %v9851_v20  ;;  %v10485_v0 = vshrl.u32 %v9850_v19, 16  ;;  %v10488_v16 = vshll.u32 %v9850_v19, 16  ;;  %v17966_v63 = vld [vmem:[#allocation3 + $0x118] sm:$0xf] }
 0x498   : > { %v17958_v8 = vpop.f32.mrf.mxu1  ;;  %v10457_v51 = vsel %vm1032_vm3, %v10448_v32, %v10456_v49  ;;  %v10129_v18 = vor.u32 %v10128_v14, %v10125_v60  ;;  %v10493_v31 = vshrl.u32 %v9852_v7, 16  ;;  %v10496_v34 = vshll.u32 %v9852_v7, 16  ;;  %v14546_v12 = vld [vmem:[#allocation3 + $0x11c] ss:$0 sps:$4 sm:$0x11]  }
 0x499   : > { %19280 = vst [vmem:[#allocation166_spill] sm:$0xff] %v17958_v8  ;;  %13912 = vmatmul.mubr.bf16.gmra.mxu0 %v10457_v51  ;;  %v9691_v61 = vrot.slane %v9689_v5, 4  ;;  %v10487_v27 = vrot.slane %v10485_v0, 3  ;;  %v10490_v32 = vrot.slane %v10488_v16, 4  ;;  %v9694_v50 = vrot.slane %v9692_v9, 5 }
 0x49a   : > { %v17968_v15 = vpop.f32.mrf.mxu1  ;;  %v17970_v6 = vpop.f32.mrf.mxu0  ;;  %v9445_v49 = vld [vmem:[#allocation3 + $0x90] sm:$0x8]  ;;  %v10130_v19 = vsel %vm1032_vm3, %v10121_v17, %v10129_v18  ;;  %v10495_v13 = vrot.slane %v10493_v31, 3  ;;  %v10498_v38 = vrot.slane %v10496_v34, 4  ;;  %v17979_v60 = vcombine.low %v17964_v29, %v17966_v63 }
 0x49b   : > { %19281 = vst [vmem:[#allocation28_spill] sm:$0xff] %v17968_v15  ;;  %19282 = vst [vmem:[#allocation170_spill] sm:$0xff] %v17970_v6  ;;  %10866 = vmatmul.mubr.bf16.gmra.mxu1 %v10130_v19  ;;  %v10491_v6 = vor.u32 %v10490_v32, %v10487_v27  ;;  %v9695_v51 = vor.u32 %v9694_v50, %v9691_v61  ;;  %v9854_v5 = vrot.slane %v14546_v12, 5  ;;  %v9697_v27 = vshrl.u32 %v17813_v40, 16 }
 0x49c   : > { %v17972_v20 = vpop.f32.mrf.mxu1  ;;  %v17975_v8 = vpop.f32.mrf.mxu0  ;;  %v10499_v14 = vor.u32 %v10498_v38, %v10495_v13  ;;  %v12491_v9 = vcombine.low %v9445_v49, %v17783_v43  ;;  %v9853_v17 = vrot.slane %v17979_v60, 5  ;;  %v12492_v18 = vcombine.low %v17777_v36, %v17777_v36 }
 0x49d   : > { %19283 = vst [vmem:[#allocation173_spill] sm:$0xff] %v17972_v20  ;;  %19284 = vst [vmem:[#allocation176_spill] sm:$0xff] %v17975_v8  ;;  %v10175_v0 = vshrl.u32 %v9695_v51, 16  ;;  %v10178_v16 = vshll.u32 %v9695_v51, 16 }
 0x49e   : > { %v17982_v7 = vpop.f32.mrf.mxu1  ;;  %v10500_v31 = vsel %vm1032_vm3, %v10491_v6, %v10499_v14  ;;  %v10158_v34 = vshrl.u32 %v12491_v9, 16  ;;  %v10161_v61 = vshll.u32 %v12491_v9, 16  ;;  %v17989_v32 = vpop.f32.mrf.mxu0  ;;  %v9855_v13 = vsel %vm983_vm7, %v9853_v17, %v9854_v5 }
 0x49f   : > { %19285 = vst [vmem:[#allocation138_spill] sm:$0xff] %v17982_v7  ;;  %19286 = vst [vmem:[#allocation167_spill] sm:$0xff] %v17989_v32  ;;  %13915 = vmatprep.mubr.bf16.mxu0 %v10500_v31  ;;  %v10177_v38 = vrot.slane %v10175_v0, 3  ;;  %v10180_v43 = vrot.slane %v10178_v16, 4  ;;  %v10528_v12 = vshrl.u32 %v9853_v17, 16  ;;  %v10531_v50 = vshll.u32 %v9853_v17, 16 }
 0x4a0   : > { %v10536_v49 = vshrl.u32 %v9855_v13, 16  ;;  %v10539_v19 = vshll.u32 %v9855_v13, 16  ;;  %v10160_v51 = vrot.slane %v10158_v34, 3  ;;  %v10163_v14 = vrot.slane %v10161_v61, 4  ;;  %v9448_v31 = vld [vmem:[#allocation3 + $0xa0] sm:$0x8]  ;;  %v17996_v16 = vpop.f32.mrf.mxu0 }
 0x4a1   : > { %v10181_v36 = vor.u32 %v10180_v43, %v10177_v38  ;;  %v10530_v6 = vrot.slane %v10528_v12, 3  ;;  %v10166_v9 = vshrl.u32 %v12492_v18, 16  ;;  %v10533_v7 = vrot.slane %v10531_v50, 4  ;;  %v14550_v43 = vld [vmem:[#allocation2 + $0x14] sm:$0xff]  }
 0x4a2   : > { %v10538_v20 = vrot.slane %v10536_v49, 3  ;;  %v10541_v15 = vrot.slane %v10539_v19, 4  ;;  %v10169_v32 = vshll.u32 %v12492_v18, 16  ;;  %v9699_v17 = vrot.slane %v9697_v27, 4 }
 0x4a3   : > { %10873 = vmatprep.mubr.bf16.mxu1 %v10181_v36  ;;  %v10168_v5 = vrot.slane %v10166_v9, 3  ;;  %v9700_v34 = vshll.u32 %v17813_v40, 16  ;;  %v10534_v13 = vor.u32 %v10533_v7, %v10530_v6  ;;  %v12493_v50 = vcombine.low %v9448_v31, %v17805_v21 }
 0x4a4   : > { %v17992_v8 = vpop.f32.mrf.mxu1  ;;  %v10171_v38 = vrot.slane %v10169_v32, 4  ;;  %v12494_v18 = vcombine.low %v17803_v2, %v17803_v2  ;;  %v10164_v19 = vor.u32 %v10163_v14, %v10160_v51  ;;  %v9705_v6 = vshrl.u32 %v17827_v42, 16 }
 0x4a5   : > { %19287 = vst [vmem:[#allocation169_spill] sm:$0xff] %v17992_v8  ;;  %v10542_v8 = vor.u32 %v10541_v15, %v10538_v20  ;;  %v9702_v12 = vrot.slane %v9700_v34, 5  ;;  %v10201_v7 = vshrl.u32 %v12493_v50, 16  ;;  %v10204_v15 = vshll.u32 %v12493_v50, 16 }
 0x4a6   : > { %v17994_v0 = vpop.f32.mrf.mxu1  ;;  %v10172_v36 = vor.u32 %v10171_v38, %v10168_v5  ;;  %v10209_v32 = vshrl.u32 %v12494_v18, 16  ;;  %v10212_v21 = vshll.u32 %v12494_v18, 16  ;;  %v9707_v34 = vrot.slane %v9705_v6, 4  ;;  %v9451_v38 = vld [vmem:[#allocation3 + $0xb0] sm:$0x8] }
 0x4a7   : > { %v10543_v49 = vsel %vm1032_vm3, %v10534_v13, %v10542_v8  ;;  %v9703_v40 = vor.u32 %v9702_v12, %v9699_v17  ;;  %v10203_v14 = vrot.slane %v10201_v7, 3  ;;  %v10206_v31 = vrot.slane %v10204_v15, 4 }
 0x4a8   : > { %v17999_v61 = vpop.f32.mrf.mxu1  ;;  %13916 = vmatmul.mubr.bf16.gmra.mxu0 %v10543_v49  ;;  %v10173_v27 = vsel %vm1032_vm3, %v10164_v19, %v10172_v36  ;;  %v10211_v5 = vrot.slane %v10209_v32, 3  ;;  %v10214_v17 = vrot.slane %v10212_v21, 4  ;;  %v9708_v13 = vshll.u32 %v17827_v42, 16 }
 0x4a9   : > { %19288 = vst [vmem:[#allocation141_spill] sm:$0xff] %v17999_v61  ;;  %v18005_v9 = vpop.f32.mrf.mxu0  ;;  %13935 = vmatprep.mubr.bf16.mxu0 %v14550_v43  ;;  %10874 = vmatmul.mubr.bf16.gmra.mxu1 %v10173_v27  ;;  %v10218_v8 = vshrl.u32 %v9703_v40, 16  ;;  %v10221_v51 = vshll.u32 %v9703_v40, 16  ;;  %v14551_v43 = vld [vmem:[#allocation2 + $0x24] sm:$0xff]   ;;  %v10207_v19 = vor.u32 %v10206_v31, %v10203_v14  ;;  %v14554_v61 = vld [vmem:[#allocation2 + $0x34] sm:$0xff]   ;;  %v12495_v7 = vcombine.low %v9451_v38, %v17822_v4 }
 0x4aa   : > { %v18007_v20 = vpop.f32.mrf.mxu1  ;;  %v10215_v36 = vor.u32 %v10214_v17, %v10211_v5  ;;  %v9710_v27 = vrot.slane %v9708_v13, 5  ;;  %v12496_v15 = vcombine.low %v17815_v37, %v17815_v37  ;;  %v9713_v4 = vshrl.u32 %v17857_v1, 16 }
 0x4ab   : > { %19289 = vst [vmem:[#allocation171_spill] sm:$0xff] %v18007_v20  ;;  %v18011_v2 = vpop.f32.mrf.mxu0  ;;  %v10220_v12 = vrot.slane %v10218_v8, 3  ;;  %v10223_v50 = vrot.slane %v10221_v51, 4  ;;  %v10244_v6 = vshrl.u32 %v12495_v7, 16  ;;  %v10247_v8 = vshll.u32 %v12495_v7, 16  ;;  %v14555_v7 = vld [vmem:[#allocation2 + $0x44] sm:$0xff]  }
 0x4ac   : > { %v10216_v42 = vsel %vm1032_vm3, %v10207_v19, %v10215_v36  ;;  %v9711_v21 = vor.u32 %v9710_v27, %v9707_v34  ;;  %v10252_v51 = vshrl.u32 %v12496_v15, 16  ;;  %v10255_v14 = vshll.u32 %v12496_v15, 16 }
 0x4ad   : > { %v18016_v18 = vpop.f32.mrf.mxu0  ;;  %v10224_v40 = vor.u32 %v10223_v50, %v10220_v12  ;;  %v9716_v37 = vshll.u32 %v17857_v1, 16  ;;  %v10246_v13 = vrot.slane %v10244_v6, 3  ;;  %v10249_v38 = vrot.slane %v10247_v8, 4  ;;  %v9454_v50 = vld [vmem:[#allocation3 + $0xc0] sm:$0x8]  ;;  %v14558_v1 = vld [vmem:[#allocation2 + $0x54] sm:$0xff]  }
 0x4ae   : > { %v10261_v5 = vshrl.u32 %v9711_v21, 16  ;;  %v10264_v17 = vshll.u32 %v9711_v21, 16  ;;  %v10254_v12 = vrot.slane %v10252_v51, 3  ;;  %v10257_v34 = vrot.slane %v10255_v14, 4 }
 0x4af   : > { %v18014_v49 = vpop.f32.mrf.mxu1  ;;  %10881 = vmatprep.mubr.bf16.mxu1 %v10224_v40  ;;  %v18024_v31 = vpop.f32.mrf.mxu0  ;;  %v9715_v27 = vrot.slane %v9713_v4, 4  ;;  %v9718_v40 = vrot.slane %v9716_v37, 5  ;;  %v10250_v15 = vor.u32 %v10249_v38, %v10246_v13  ;;  %v12498_v8 = vcombine.low %v17841_v44, %v17841_v44 }
 0x4b0   : > { %19290 = vst [vmem:[#allocation174_spill] sm:$0xff] %v18014_v49  ;;  %13936 = vmatmul.mubr.bf16.vlgmr.msra.gmra.mxu0 %v14551_v43  ;;  %v10263_v19 = vrot.slane %v10261_v5, 3  ;;  %v10266_v36 = vrot.slane %v10264_v17, 4  ;;  %v10258_v21 = vor.u32 %v10257_v34, %v10254_v12  ;;  %v9721_v12 = vshrl.u32 %v17885_v22, 16 }
 0x4b1   : > { %v18021_v32 = vpop.f32.mrf.mxu1  ;;  %13939 = vmatprep.mubr.bf16.mxu0 %v14554_v61  ;;  %10882 = vmatmul.mubr.bf16.gmra.mxu1 %v10216_v42  ;;  %v9719_v49 = vor.u32 %v9718_v40, %v9715_v27  ;;  %v12497_v42 = vcombine.low %v9454_v50, %v17853_v57  ;;  %v10295_v13 = vshrl.u32 %v12498_v8, 16  ;;  %v10298_v38 = vshll.u32 %v12498_v8, 16 }
 0x4b2   : > { %v10267_v20 = vor.u32 %v10266_v36, %v10263_v19  ;;  %v10259_v6 = vsel %vm1032_vm3, %v10250_v15, %v10258_v21  ;;  %v9724_v44 = vshll.u32 %v17885_v22, 16  ;;  %v9457_v19 = vld [vmem:[#allocation3 + $0xd0] sm:$0x8]  ;;  %v9723_v40 = vrot.slane %v9721_v12, 4 }
 0x4b3   : > { %v18028_v43 = vpop.f32.mrf.mxu1  ;;  %v10304_v5 = vshrl.u32 %v9719_v49, 16  ;;  %v10307_v17 = vshll.u32 %v9719_v49, 16  ;;  %v10287_v4 = vshrl.u32 %v12497_v42, 16  ;;  %v10290_v37 = vshll.u32 %v12497_v42, 16  ;;  %v14559_v42 = vld [vmem:[#allocation2 + $0x64] sm:$0xff]  }
 0x4b4   : > { %19291 = vst [vmem:[#allocation31_spill] sm:$0xff] %v18028_v43  ;;  %10889 = vmatprep.mubr.bf16.mxu1 %v10267_v20  ;;  %v10297_v27 = vrot.slane %v10295_v13, 3  ;;  %v10300_v20 = vrot.slane %v10298_v38, 4  ;;  %v9726_v21 = vrot.slane %v9724_v44, 5 }
 0x4b5   : > { %v18036_v51 = vpop.f32.mrf.mxu1  ;;  %v10306_v57 = vrot.slane %v10304_v5, 3  ;;  %v10309_v34 = vrot.slane %v10307_v17, 4  ;;  %v10289_v50 = vrot.slane %v10287_v4, 3  ;;  %v10292_v36 = vrot.slane %v10290_v37, 4 }
 0x4b6   : > { %19292 = vst [vmem:[#allocation24_spill] sm:$0xff] %v18036_v51  ;;  %v10301_v5 = vor.u32 %v10300_v20, %v10297_v27  ;;  %v9727_v22 = vor.u32 %v9726_v21, %v9723_v40  ;;  %v12500_v4 = vcombine.low %v17874_v28, %v17874_v28  ;;  %v9729_v27 = vshrl.u32 %v17896_v56, 16 }
 0x4b7   : > { %v18030_v61 = vpop.f32.mrf.mxu0  ;;  %v10310_v15 = vor.u32 %v10309_v34, %v10306_v57  ;;  %v10293_v8 = vor.u32 %v10292_v36, %v10289_v50  ;;  %v9732_v20 = vshll.u32 %v17896_v56, 16 }
 0x4b8   : > { %13940 = vmatmul.mubr.bf16.gmra.mxu0 %v14555_v7  ;;  %v10347_v57 = vshrl.u32 %v9727_v22, 16  ;;  %v10350_v34 = vshll.u32 %v9727_v22, 16  ;;  %v10338_v50 = vshrl.u32 %v12500_v4, 16  ;;  %v10341_v44 = vshll.u32 %v12500_v4, 16 }
 0x4b9   : > { %v18038_v14 = vpop.f32.mrf.mxu0  ;;  %13943 = vmatprep.mubr.bf16.mxu0 %v14558_v1  ;;  %10890 = vmatmul.mubr.bf16.gmra.mxu1 %v10259_v6  ;;  %v12499_v1 = vcombine.low %v9457_v19, %v17881_v41  ;;  %v14562_v6 = vld [vmem:[#allocation2 + $0x74] sm:$0xff]   ;;  %v10302_v37 = vsel %vm1032_vm3, %v10293_v8, %v10301_v5  ;;  %v9460_v8 = vld [vmem:[#allocation3 + $0xe0] sm:$0x8]  ;;  %v9731_v5 = vrot.slane %v9729_v27, 4 }
 0x4ba   : > { %10897 = vmatprep.mubr.bf16.mxu1 %v10310_v15  ;;  %v10349_v28 = vrot.slane %v10347_v57, 3  ;;  %v10352_v40 = vrot.slane %v10350_v34, 4  ;;  %v10340_v15 = vrot.slane %v10338_v50, 3  ;;  %v10343_v21 = vrot.slane %v10341_v44, 4  ;;  %v14566_v34 = vld [vmem:[#allocation2 + $0x94] sm:$0xff]  }
 0x4bb   : > { %v18044_v7 = vpop.f32.mrf.mxu0  ;;  %v10330_v13 = vshrl.u32 %v12499_v1, 16  ;;  %v10333_v38 = vshll.u32 %v12499_v1, 16  ;;  %v9734_v1 = vrot.slane %v9732_v20, 5  ;;  %v12501_v56 = vcombine.low %v9460_v8, %v17888_v26 }
 0x4bc   : > { %v18042_v49 = vpop.f32.mrf.mxu1  ;;  %v10353_v4 = vor.u32 %v10352_v40, %v10349_v28  ;;  %v9737_v50 = vshrl.u32 %v17927_v62, 16 }
 0x4bd   : > { %19293 = vst [vmem:[#allocation25_spill] sm:$0xff] %v18042_v49  ;;  %v18052_v12 = vpop.f32.mrf.mxu0  ;;  %v10332_v41 = vrot.slane %v10330_v13, 3  ;;  %v10335_v19 = vrot.slane %v10333_v38, 4  ;;  %v14563_v38 = vld [vmem:[#allocation2 + $0x84] sm:$0xff]   ;;  %v9735_v51 = vor.u32 %v9734_v1, %v9731_v5  ;;  %v10376_v27 = vshll.u32 %v12501_v56, 16 }
 0x4be   : > { %v18047_v17 = vpop.f32.mrf.mxu1  ;;  %v9739_v26 = vrot.slane %v9737_v50, 4  ;;  %v9463_v1 = vld [vmem:[#allocation3 + $0xf0] sm:$0x8] }
 0x4bf   : > { %v10390_v44 = vshrl.u32 %v9735_v51, 16  ;;  %v10378_v5 = vrot.slane %v10376_v27, 4 }
 0x4c0   : > { %v18054_v36 = vpop.f32.mrf.mxu1  ;;  %13944 = vmatmul.mubr.bf16.gmra.mxu0 %v14559_v42  ;;  %v10344_v42 = vor.u32 %v10343_v21, %v10340_v15  ;;  %v9740_v15 = vshll.u32 %v17927_v62, 16  ;;  %v12503_v62 = vcombine.low %v9463_v1, %v17921_v11  ;;  %v9466_v1 = vld [vmem:[#allocation3 + $0x100] sm:$0x8] }
 0x4c1   : > { %19294 = vst [vmem:[#allocation136_spill] sm:$0xff] %v18054_v36  ;;  %13947 = vmatprep.mubr.bf16.mxu0 %v14562_v6  ;;  %10898 = vmatmul.mubr.bf16.gmra.mxu1 %v10302_v37  ;;  %v10336_v36 = vor.u32 %v10335_v19, %v10332_v41  ;;  %v12502_v6 = vcombine.low %v17877_v24, %v17877_v24  ;;  %v10393_v41 = vshll.u32 %v9735_v51, 16  ;;  %v10373_v19 = vshrl.u32 %v12501_v56, 16 }
 0x4c2   : > { %v18060_v13 = vpop.f32.mrf.mxu1  ;;  %10905 = vmatprep.mubr.bf16.mxu1 %v10353_v4  ;;  %v10392_v21 = vrot.slane %v10390_v44, 3 }
 0x4c3   : > { %19295 = vst [vmem:[#allocation21_spill] sm:$0xff] %v18060_v13  ;;  %v10345_v37 = vsel %vm1032_vm3, %v10336_v36, %v10344_v42  ;;  %v10381_v28 = vshrl.u32 %v12502_v6, 16  ;;  %v10384_v40 = vshll.u32 %v12502_v6, 16  ;;  %v10395_v8 = vrot.slane %v10393_v41, 4 }
 0x4c4   : > { %v18058_v22 = vpop.f32.mrf.mxu0  ;;  %v10375_v36 = vrot.slane %v10373_v19, 3  ;;  %v9742_v42 = vrot.slane %v9740_v15, 5  ;;  %v12504_v41 = vcombine.low %v17914_v25, %v17914_v25  ;;  %v10416_v15 = vshrl.u32 %v12503_v62, 16 }
 0x4c5   : > { %v10383_v4 = vrot.slane %v10381_v28, 3  ;;  %v10386_v51 = vrot.slane %v10384_v40, 4  ;;  %v10396_v13 = vor.u32 %v10395_v8, %v10392_v21  ;;  %v10419_v21 = vshll.u32 %v12503_v62, 16 }
 0x4c6   : > { %v18065_v57 = vpop.f32.mrf.mxu0  ;;  %v9743_v50 = vor.u32 %v9742_v42, %v9739_v26  ;;  %v10379_v44 = vor.u32 %v10378_v5, %v10375_v36  ;;  %v10424_v8 = vshrl.u32 %v12504_v41, 16  ;;  %v10427_v26 = vshll.u32 %v12504_v41, 16 }
 0x4c7   : > { %v10387_v27 = vor.u32 %v10386_v51, %v10383_v4  ;;  %v10418_v5 = vrot.slane %v10416_v15, 3  ;;  %v9748_v25 = vshll.u32 %v17943_v35, 16  ;;  %v12505_v15 = vcombine.low %v9466_v1, %v17937_v54 }
 0x4c8   : > { %v18069_v20 = vpop.f32.mrf.mxu0  ;;  %13948 = vmatmul.mubr.bf16.gmra.mxu0 %v14563_v38  ;;  %v14567_v38 = vld [vmem:[#allocation2 + $0xa4] sm:$0xff]   ;;  %v10433_v28 = vshrl.u32 %v9743_v50, 16  ;;  %v10436_v40 = vshll.u32 %v9743_v50, 16  ;;  %v10429_v4 = vrot.slane %v10427_v26, 4  ;;  %v9753_v1 = vshrl.u32 %v17979_v60, 16 }
 0x4c9   : > { %v18072_v24 = vpop.f32.mrf.mxu1  ;;  %13951 = vmatprep.mubr.bf16.mxu0 %v14566_v34  ;;  %10906 = vmatmul.mubr.bf16.gmra.mxu1 %v10345_v37  ;;  %v9745_v34 = vshrl.u32 %v17943_v35, 16  ;;  %v14570_v37 = vld [vmem:[#allocation2 + $0xb4] sm:$0xff]   ;;  %v10388_v62 = vsel %vm1032_vm3, %v10379_v44, %v10387_v27 }
 0x4ca   : > { %19296 = vst [vmem:[#allocation175_spill] sm:$0xff] %v18072_v24  ;;  %v18076_v6 = vpop.f32.mrf.mxu0  ;;  %10913 = vmatprep.mubr.bf16.mxu1 %v10396_v13  ;;  %v10435_v13 = vrot.slane %v10433_v28, 3  ;;  %v10438_v36 = vrot.slane %v10436_v40, 4  ;;  %v10421_v24 = vrot.slane %v10419_v21, 4  ;;  %v14571_v21 = vld [vmem:[#allocation2 + $0xc4] sm:$0xff]  }
 0x4cb   : > { %v18074_v56 = vpop.f32.mrf.mxu1  ;;  %v9747_v42 = vrot.slane %v9745_v34, 4  ;;  %v9750_v34 = vrot.slane %v9748_v25, 5  ;;  %v10462_v25 = vshll.u32 %v12505_v15, 16 }
 0x4cc   : > { %19297 = vst [vmem:[#allocation177_spill] sm:$0xff] %v18074_v56  ;;  %v10439_v41 = vor.u32 %v10438_v36, %v10435_v13  ;;  %v10422_v28 = vor.u32 %v10421_v24, %v10418_v5  ;;  %v9469_v36 = vld [vmem:[#allocation3 + $0x110] sm:$0x8] }
 0x4cd   : > { %v18082_v19 = vpop.f32.mrf.mxu1  ;;  %v9751_v35 = vor.u32 %v9750_v34, %v9747_v42 }
 0x4ce   : > { %19298 = vst [vmem:[#allocation33_spill] sm:$0xff] %v18082_v19  ;;  %v10426_v19 = vrot.slane %v10424_v8, 3 }
 0x4cf   : > { %v18087_v51 = vpop.f32.mrf.mxu1  ;;  %v10476_v44 = vshrl.u32 %v9751_v35, 16  ;;  %v10479_v27 = vshll.u32 %v9751_v35, 16 }
 0x4d0   : > { %v18084_v11 = vpop.f32.mrf.mxu0  ;;  %13952 = vmatmul.mubr.bf16.gmra.mxu0 %v14567_v38  ;;  %19299 = vst [vmem:[#allocation20_spill] sm:$0xff] %v18087_v51  ;;  %v10430_v40 = vor.u32 %v10429_v4, %v10426_v19  ;;  %v12506_v38 = vcombine.low %v17929_v55, %v17929_v55  ;;  %v10459_v19 = vshrl.u32 %v12505_v15, 16  ;;  %v9756_v4 = vshll.u32 %v17979_v60, 16 }
 0x4d1   : > { %13955 = vmatprep.mubr.bf16.mxu0 %v14570_v37  ;;  %10914 = vmatmul.mubr.bf16.gmra.mxu1 %v10388_v62  ;;  %v14574_v37 = vld [vmem:[#allocation2 + $0xd4] sm:$0xff]   ;;  %v10478_v42 = vrot.slane %v10476_v44, 3  ;;  %v10481_v5 = vrot.slane %v10479_v27, 4  ;;  %v10464_v44 = vrot.slane %v10462_v25, 4 }
 0x4d2   : > { %v18089_v50 = vpop.f32.mrf.mxu0  ;;  %10921 = vmatprep.mubr.bf16.mxu1 %v10439_v41  ;;  %v10431_v8 = vsel %vm1032_vm3, %v10422_v28, %v10430_v40  ;;  %v10467_v13 = vshrl.u32 %v12506_v38, 16  ;;  %v10470_v24 = vshll.u32 %v12506_v38, 16  ;;  %v12507_v28 = vcombine.low %v9469_v36, %v17964_v29  ;;  %v14578_v36 = vld [vmem:[#allocation2 + $0xf4] sm:$0xff]  }
 0x4d3   : > { %v10482_v41 = vor.u32 %v10481_v5, %v10478_v42  ;;  %v12508_v40 = vcombine.low %v17966_v63, %v17966_v63  ;;  %v10461_v15 = vrot.slane %v10459_v19, 3  ;;  %v9755_v38 = vrot.slane %v9753_v1, 4 }
 0x4d4   : > { %v18098_v51 = vpop.f32.mrf.mxu0  ;;  %v10469_v55 = vrot.slane %v10467_v13, 3  ;;  %v10472_v34 = vrot.slane %v10470_v24, 4  ;;  %v10502_v27 = vshrl.u32 %v12507_v28, 16  ;;  %v10505_v60 = vshll.u32 %v12507_v28, 16 }
 0x4d5   : > { %v10510_v13 = vshrl.u32 %v12508_v40, 16  ;;  %v10465_v25 = vor.u32 %v10464_v44, %v10461_v15  ;;  %v13271_v15 = vadd.f32 %v17724_v3, %v17719_v53  ;;  %v13413_v53 = vadd.f32 %v18038_v14, %v18030_v61  ;;  %v19308_v61 = vld [vmem:[#allocation104_spill] sm:$0xff] }
 0x4d6   : > { %v18104_v62 = vpop.f32.mrf.mxu0  ;;  %v10473_v29 = vor.u32 %v10472_v34, %v10469_v55  ;;  %v10504_v5 = vrot.slane %v10502_v27, 3  ;;  %v10507_v63 = vrot.slane %v10505_v60, 4  ;;  %v13268_v60 = vadd.f32 %v17716_v59, %v17710_v45 }
 0x4d7   : > { %v18096_v26 = vpop.f32.mrf.mxu1  ;;  %v10512_v43 = vrot.slane %v10510_v13, 3  ;;  %v13277_v13 = vadd.f32 %v17763_v10, %v17757_v39  ;;  %v13280_v59 = vadd.f32 %v17785_v52, %v17772_v23  ;;  %v13283_v45 = vadd.f32 %v17807_v30, %v17797_v58  ;;  %v19301_v39 = vld [vmem:[#allocation87_spill] sm:$0xff]  ;;  %v19305_v52 = vld [vmem:[#allocation150_spill] sm:$0xff]  ;;  %v19307_v30 = vld [vmem:[#allocation88_spill] sm:$0xff] }
 0x4d8   : > { %13956 = vmatmul.mubr.bf16.gmra.mxu0 %v14571_v21  ;;  %v9758_v21 = vrot.slane %v9756_v4, 5  ;;  %v13286_v3 = vadd.f32 %v17838_v33, %v17829_v48  ;;  %v8898_v10 = vadd.f32 %v13268_v60, %v19301_v39  ;;  %v19309_v48 = vld [vmem:[#allocation167_spill] sm:$0xff] }
 0x4d9   : > { %v18100_v54 = vpop.f32.mrf.mxu1  ;;  %13959 = vmatprep.mubr.bf16.mxu0 %v14574_v37  ;;  %10922 = vmatmul.mubr.bf16.gmra.mxu1 %v10431_v8  ;;  %v10513_v37 = vshll.u32 %v12508_v40, 16  ;;  %v8911_v14 = vadd.f32 %v13277_v13, %v19308_v61  ;;  %v13404_v33 = vadd.f32 %v17996_v16, %v19309_v48  ;;  %v19316_v60 = vld [vmem:[#allocation127_spill] sm:$0xff]  ;;  %v19317_v13 = vld [vmem:[#allocation116_spill] sm:$0xff] }
 0x4da   : > { %19300 = vst [vmem:[#allocation22_spill] sm:$0xff] %v18100_v54  ;;  %10929 = vmatprep.mubr.bf16.mxu1 %v10482_v41  ;;  %v14575_v54 = vld [vmem:[#allocation2 + $0xe4] sm:$0xff]   ;;  %v9759_v42 = vor.u32 %v9758_v21, %v9755_v38  ;;  %v10508_v41 = vor.u32 %v10507_v63, %v10504_v5  ;;  %v10474_v21 = vsel %vm1032_vm3, %v10465_v25, %v10473_v29  ;;  %v19306_v29 = vld [vmem:[#allocation153_spill] sm:$0xff]  ;;  %v19310_v5 = vld [vmem:[#allocation112_spill] sm:$0xff] }
 0x4db   : > { %v18109_v35 = vpop.f32.mrf.mxu1  ;;  %v10515_v1 = vrot.slane %v10513_v37, 4  ;;  %v13295_v58 = vadd.f32 %v19306_v29, %v19305_v52  ;;  %v8914_v63 = vadd.f32 %v13280_v59, %v19310_v5  ;;  %v19313_v25 = vld [vmem:[#allocation157_spill] sm:$0xff]  ;;  %v19318_v59 = vld [vmem:[#allocation91_spill] sm:$0xff] }
 0x4dc   : > { %v10519_v8 = vshrl.u32 %v9759_v42, 16  ;;  %v10522_v19 = vshll.u32 %v9759_v42, 16  ;;  %v13410_v42 = vadd.f32 %v18024_v31, %v18016_v18  ;;  %v19303_v18 = vld [vmem:[#allocation34_spill] sm:$0xff]  ;;  %v19304_v31 = vld [vmem:[#allocation165_spill] sm:$0xff] }
 0x4dd   : > { %v18113_v56 = vpop.f32.mrf.mxu1  ;;  %v10516_v38 = vor.u32 %v10515_v1, %v10512_v43  ;;  %v13274_v43 = vadd.f32 %v17745_v46, %v17733_v47  ;;  %v13416_v47 = vadd.f32 %v18052_v12, %v18044_v7  ;;  %v13289_v23 = vadd.f32 %v19304_v31, %v19303_v18  ;;  %v19312_v1 = vld [vmem:[#allocation163_spill] sm:$0xff] }
 0x4de   : > { %v18111_v24 = vpop.f32.mrf.mxu0  ;;  %v10521_v28 = vrot.slane %v10519_v8, 3  ;;  %v10524_v49 = vrot.slane %v10522_v19, 4  ;;  %v13419_v7 = vadd.f32 %v18065_v57, %v18058_v22  ;;  %v19311_v8 = vld [vmem:[#allocation101_spill] sm:$0xff]  ;;  %v13425_v22 = vadd.f32 %v18089_v50, %v18084_v11 }
 0x4df   : > { %v10517_v27 = vsel %vm1032_vm3, %v10508_v41, %v10516_v38  ;;  %v8919_v19 = vadd.f32 %v19311_v8, %v13283_v45  ;;  %v13298_v41 = vadd.f32 %v19313_v25, %v19312_v1  ;;  %v19314_v38 = vld [vmem:[#allocation108_spill] sm:$0xff]  ;;  %v8935_v45 = vadd.f32 %v19318_v59, %v13295_v58  ;;  %v19336_v25 = vld [vmem:[#allocation131_spill] sm:$0xff] }
 0x4e0   : > { %v13430_v4 = vpop.f32.mrf.mxu0  ;;  %13960 = vmatmul.mubr.bf16.gmra.mxu0 %v14575_v54  ;;  %v10525_v34 = vor.u32 %v10524_v49, %v10521_v28  ;;  %v13407_v54 = vadd.f32 %v18011_v2, %v18005_v9  ;;  %v14579_v49 = vld [vmem:[#allocation2 + $0x104] sm:$0xff]   ;;  %v13422_v28 = vadd.f32 %v18076_v6, %v18069_v20  ;;  %v13428_v20 = vadd.f32 %v18104_v62, %v18098_v51 }
 0x4e1   : > { %13963 = vmatprep.mubr.bf16.mxu0 %v14578_v36  ;;  %10930 = vmatmul.mubr.bf16.gmra.mxu1 %v10474_v21  ;;  %v19302_v9 = vld [vmem:[#allocation99_spill] sm:$0xff]  ;;  %v8906_v36 = vadd.f32 %v19307_v30, %v13274_v43  ;;  %v8922_v21 = vadd.f32 %v19314_v38, %v13286_v3  ;;  %v9203_v3 = vadd.f32 %v13404_v33, %v8898_v10 }
 0x4e2   : > { %v13432_v40 = vpop.f32.mrf.mxu0  ;;  %10937 = vmatprep.mubr.bf16.mxu1 %v10525_v34  ;;  %v8903_v2 = vadd.f32 %v19302_v9, %v13271_v15  ;;  %v19315_v34 = vld [vmem:[#allocation125_spill] sm:$0xff]  ;;  %v9224_v9 = vadd.f32 %v13419_v7, %v8919_v19  ;;  %v9216_v18 = vadd.f32 %v13413_v53, %v8911_v14  ;;  %v19331_v14 = vld [vmem:[#allocation162_spill] sm:$0xff] }
 0x4e3   : > { %v13861_v55 = vpop.f32.mrf.mxu1  ;;  %v13292_v15 = vadd.f32 %v19316_v60, %v19315_v34  ;;  %v9211_v39 = vadd.f32 %v13410_v42, %v8906_v36  ;;  %v9227_v31 = vadd.f32 %v13422_v28, %v8922_v21  ;;  %v18175_v42 = vadd.f32 %v18113_v56, %v9203_v3  ;;  %v19326_v36 = vld [vmem:[#allocation126_spill] sm:$0xff]  ;;  %v19335_v19 = vld [vmem:[#allocation93_spill] sm:$0xff] }
 0x4e4   : > { %v13433_v37 = vpop.f32.mrf.mxu0  ;;  %v9208_v16 = vadd.f32 %v13407_v54, %v8903_v2  ;;  %v19319_v2 = vld [vmem:[#allocation120_spill] sm:$0xff]  ;;  %v19332_v7 = vld [vmem:[#allocation166_spill] sm:$0xff]  ;;  %v19338_v21 = vld [vmem:[#allocation77_spill] sm:$0xff] }
 0x4e5   : > { %v9376_v44 = vpop.f32.mrf.mxu1  ;;  %v8938_v11 = vadd.f32 %v19319_v2, %v13298_v41  ;;  %v18172_v50 = vadd.f32 %v18109_v35, %v9211_v39  ;;  %19321 = vst [vmem:[#allocation145_spill] sm:$0xff] %v18175_v42  ;;  %v13434_v51 = vadd.f32 %v13433_v37, %v13432_v40  ;;  %v8930_v56 = vadd.f32 %v13292_v15, %v19326_v36  ;;  %v19337_v41 = vld [vmem:[#allocation134_spill] sm:$0xff]  ;;  %v19339_v60 = vld [vmem:[#allocation173_spill] sm:$0xff]  ;;  %v19350_v36 = vld [vmem:[#allocation95_spill] sm:$0xff] }
 0x4e6   : > { %v18167_v6 = vadd.f32 %v18096_v26, %v9208_v16  ;;  %v9219_v26 = vadd.f32 %v13416_v47, %v8914_v63  ;;  %v18179_v52 = vadd.f32 %v9376_v44, %v9216_v18  ;;  %v13304_v28 = vadd.f32 %v19337_v41, %v19336_v25  ;;  %v19340_v15 = vld [vmem:[#allocation138_spill] sm:$0xff]  ;;  %v19352_v25 = vld [vmem:[#allocation52_spill] sm:$0xff] }
 0x4e7   : > { %v13862_v46 = vpop.f32.mrf.mxu1  ;;  %19320 = vst [vmem:[#allocation140_spill] sm:$0xff] %v18172_v50  ;;  %v9235_v44 = vadd.f32 %v13428_v20, %v8930_v56  ;;  %v13310_v16 = vadd.f32 %v19340_v15, %v19339_v60  ;;  %v19353_v41 = vld [vmem:[#allocation76_spill] sm:$0xff] }
 0x4e8   : > { %13964 = vmatmul.mubr.bf16.gmra.mxu0 %v14579_v49  ;;  %v8927_v49 = vadd.f32 %v13289_v23, %v19317_v13  ;;  %v18177_v23 = vadd.f32 %v13861_v55, %v9224_v9  ;;  %19323 = vst [vmem:[#allocation29_spill] sm:$0xff] %v18179_v52  ;;  %v9243_v55 = vadd.f32 %v13434_v51, %v8938_v11  ;;  %v19343_v9 = vld [vmem:[#allocation133_spill] sm:$0xff]  ;;  %v19423_v50 = vld [vmem:[#allocation100_spill] sm:$0xff]  ;;  %v19440_v52 = vld [vmem:[#allocation130_spill] sm:$0xff] }
 0x4e9   : > { %10938 = vmatmul.mubr.bf16.gmra.mxu1 %v10517_v27  ;;  %v9379_v57 = vpop.f32.mrf.mxu1  ;;  %v13431_v27 = vadd.f32 %v13430_v4, %v18111_v24  ;;  %v18181_v24 = vadd.f32 %v13862_v46, %v9227_v31  ;;  %v19330_v46 = vld [vmem:[#allocation135_spill] sm:$0xff] }
 0x4ea   : > { %v13435_v12 = vpop.f32.mrf.mxu0  ;;  %19322 = vst [vmem:[#allocation23_spill] sm:$0xff] %v18177_v23  ;;  %v18183_v58 = vadd.f32 %v9379_v57, %v9219_v26  ;;  %v9232_v35 = vadd.f32 %v13425_v22, %v8927_v49  ;;  %v13301_v48 = vadd.f32 %v19331_v14, %v19330_v46 }
 0x4eb   : > { %19324 = vst [vmem:[#allocation36_spill] sm:$0xff] %v18181_v24  ;;  %v9240_v4 = vadd.f32 %v13431_v27, %v8935_v45  ;;  %v19341_v45 = vld [vmem:[#allocation137_spill] sm:$0xff]  ;;  %v8954_v27 = vadd.f32 %v19343_v9, %v13310_v16 }
 0x4ec   : > { %v13436_v43 = vpop.f32.mrf.mxu0  ;;  %19325 = vst [vmem:[#allocation147_spill] sm:$0xff] %v18183_v58  ;;  %v8943_v1 = vadd.f32 %v13301_v48, %v19335_v19  ;;  %v8946_v39 = vadd.f32 %v13304_v28, %v19341_v45  ;;  %v13223_v28 = vadd.f32 %v19353_v41, %v19352_v25  ;;  %v19363_v41 = vld [vmem:[#allocation94_spill] sm:$0xff]  ;;  %v19400_v24 = vld [vmem:[#allocation97_spill] sm:$0xff] }
 0x4ed   : > { %v13437_v29 = vadd.f32 %v13436_v43, %v13435_v12  ;;  %v19333_v12 = vld [vmem:[#allocation28_spill] sm:$0xff]  ;;  %v19402_v58 = vld [vmem:[#allocation89_spill] sm:$0xff] }
 0x4ee   : > { %v13438_v54 = vpop.f32.mrf.mxu0  ;;  %v13307_v5 = vadd.f32 %v19333_v12, %v19332_v7 }
 0x4ef   : > { %v9248_v43 = vadd.f32 %v13437_v29, %v8943_v1 }
 0x4f0   : > { %v13439_v10 = vpop.f32.mrf.mxu0  ;;  %v8951_v34 = vadd.f32 %v19338_v21, %v13307_v5  ;;  %v19354_v21 = vld [vmem:[#allocation26_spill] sm:$0xff] }
 0x4f1   : > { %v13865_v62 = vpop.f32.mrf.mxu1  ;;  %v13440_v30 = vadd.f32 %v13439_v10, %v13438_v54  ;;  %v19347_v10 = vld [vmem:[#allocation63_spill] sm:$0xff] }
 0x4f2   : > { %v18186_v61 = vadd.f32 %v13865_v62, %v9240_v4  ;;  %v19348_v4 = vld [vmem:[#allocation66_spill] sm:$0xff] }
 0x4f3   : > { %v9392_v53 = vpop.f32.mrf.mxu1  ;;  %v9251_v18 = vadd.f32 %v13440_v30, %v8946_v39  ;;  %v13217_v29 = vadd.f32 %v19348_v4, %v19347_v10  ;;  %v19360_v10 = vld [vmem:[#allocation148_spill] sm:$0xff]  ;;  %v19361_v4 = vld [vmem:[#allocation149_spill] sm:$0xff] }
 0x4f4   : > { %19327 = vst [vmem:[#allocation143_spill] sm:$0xff] %v18186_v61  ;;  %v18188_v40 = vadd.f32 %v9392_v53, %v9232_v35  ;;  %v19349_v53 = vld [vmem:[#allocation142_spill] sm:$0xff] }
 0x4f5   : > { %v13866_v37 = vpop.f32.mrf.mxu1  ;;  %v13353_v56 = vadd.f32 %v19350_v36, %v19349_v53 }
 0x4f6   : > { %19328 = vst [vmem:[#allocation35_spill] sm:$0xff] %v18188_v40  ;;  %v18190_v47 = vadd.f32 %v13866_v37, %v9243_v55  ;;  %v19399_v40 = vld [vmem:[#allocation79_spill] sm:$0xff] }
 0x4f7   : > { %v9395_v33 = vpop.f32.mrf.mxu1 }
 0x4f8   : > { %19329 = vst [vmem:[#allocation146_spill] sm:$0xff] %v18190_v47  ;;  %v18196_v63 = vadd.f32 %v9395_v33, %v9235_v44  ;;  %v13441_v8 = vpop.f32.mrf.mxu0  ;;  %v19351_v44 = vld [vmem:[#allocation64_spill] sm:$0xff] }
 0x4f9   : > { %v8831_v46 = vadd.f32 %v13217_v29, %v19351_v44  ;;  %v13365_v29 = vadd.f32 %v19361_v4, %v19360_v10 }
 0x4fa   : > { %19334 = vst [vmem:[#allocation172_spill] sm:$0xff] %v18196_v63  ;;  %v13442_v38 = vpop.f32.mrf.mxu0 }
 0x4fb   : > { %v13443_v57 = vadd.f32 %v13442_v38, %v13441_v8  ;;  %v9136_v48 = vadd.f32 %v13353_v56, %v8831_v46  ;;  %v19362_v56 = vld [vmem:[#allocation50_spill] sm:$0xff] }
 0x4fc   : > { %v13869_v22 = vpop.f32.mrf.mxu1  ;;  %v13444_v13 = vpop.f32.mrf.mxu0 }
 0x4fd   : > { %v9256_v49 = vadd.f32 %v13443_v57, %v8951_v34  ;;  %v9297_v7 = vadd.f32 %v17994_v0, %v9136_v48  ;;  %v19355_v34 = vld [vmem:[#allocation161_spill] sm:$0xff] }
 0x4fe   : > { %v9408_v59 = vpop.f32.mrf.mxu1  ;;  %v13445_v3 = vpop.f32.mrf.mxu0  ;;  %v13359_v60 = vadd.f32 %v19355_v34, %v19354_v21  ;;  %v19365_v34 = vld [vmem:[#allocation111_spill] sm:$0xff] }
 0x4ff   : > { %v18205_v20 = vadd.f32 %v9408_v59, %v9248_v43  ;;  %v18208_v54 = vadd.f32 %v13869_v22, %v9256_v49  ;;  %v13446_v11 = vadd.f32 %v13445_v3, %v13444_v13  ;;  %v19356_v22 = vld [vmem:[#allocation48_spill] sm:$0xff]  ;;  %v19357_v59 = vld [vmem:[#allocation169_spill] sm:$0xff] }
 0x500   : > { %v13870_v2 = vpop.f32.mrf.mxu1  ;;  %v8839_v0 = vadd.f32 %v19356_v22, %v13223_v28  ;;  %v19364_v28 = vld [vmem:[#allocation96_spill] sm:$0xff] }
 0x501   : > { %19342 = vst [vmem:[#allocation37_spill] sm:$0xff] %v18205_v20  ;;  %19344 = vst [vmem:[#allocation39_spill] sm:$0xff] %v18208_v54  ;;  %v9259_v31 = vadd.f32 %v13446_v11, %v8954_v27  ;;  %v19358_v11 = vld [vmem:[#allocation58_spill] sm:$0xff]  ;;  %v13235_v21 = vadd.f32 %v19364_v28, %v19363_v41  ;;  %v19396_v20 = vld [vmem:[#allocation80_spill] sm:$0xff] }
 0x502   : > { %v9411_v51 = vpop.f32.mrf.mxu1  ;;  %v9144_v43 = vadd.f32 %v13359_v60, %v8839_v0  ;;  %v19366_v60 = vld [vmem:[#allocation113_spill] sm:$0xff] }
 0x503   : > { %v18210_v26 = vadd.f32 %v9411_v51, %v9251_v18  ;;  %v18212_v62 = vadd.f32 %v13870_v2, %v9259_v31  ;;  %v19359_v18 = vld [vmem:[#allocation65_spill] sm:$0xff] }
 0x504   : > { %v9305_v45 = vadd.f32 %v19357_v59, %v9144_v43  ;;  %v13229_v31 = vadd.f32 %v19359_v18, %v19358_v11 }
 0x505   : > { %19345 = vst [vmem:[#allocation38_spill] sm:$0xff] %v18210_v26  ;;  %19346 = vst [vmem:[#allocation40_spill] sm:$0xff] %v18212_v62  ;;  %v19395_v26 = vld [vmem:[#allocation56_spill] sm:$0xff] }
 0x506   : > { %v13226_v47 = vadd.f32 %v19396_v20, %v19395_v26  ;;  %v19407_v20 = vld [vmem:[#allocation70_spill] sm:$0xff] }
 0x507   : > { %v13889_v35 = vpop.f32.mrf.mxu0 }
 0x509   : > { %v13487_v55 = vpop.f32.mrf.mxu1  ;;  %v10980_v37 = vpop.f32.mrf.mxu0 }
 0x50b   : > { %v13488_v14 = vpop.f32.mrf.mxu1  ;;  %v18219_v33 = vpop.f32.mrf.mxu0 }
 0x50c   : > { %v13489_v30 = vadd.f32 %v13488_v14, %v13487_v55  ;;  %v8847_v55 = vadd.f32 %v13229_v31, %v19362_v56  ;;  %v19370_v56 = vld [vmem:[#allocation85_spill] sm:$0xff] }
 0x50d   : > { %v18222_v5 = vpop.f32.mrf.mxu1  ;;  %v18226_v19 = vpop.f32.mrf.mxu0 }
 0x50e   : > { %v10981_v12 = vadd.f32 %v13489_v30, %v10980_v37  ;;  %v9152_v37 = vadd.f32 %v13365_v29, %v8847_v55 }
 0x50f   : > { %v18228_v1 = vpop.f32.mrf.mxu1 }
 0x510   : > { %v18224_v8 = vadd.f32 %v10981_v12, %v9297_v7  ;;  %v9313_v14 = vadd.f32 %v18021_v32, %v9152_v37  ;;  %v19371_v37 = vld [vmem:[#allocation119_spill] sm:$0xff] }
 0x515   : > { %v13893_v38 = vpop.f32.mrf.mxu0 }
 0x517   : > { %v13493_v15 = vpop.f32.mrf.mxu1  ;;  %v10996_v16 = vpop.f32.mrf.mxu0 }
 0x519   : > { %v13494_v57 = vpop.f32.mrf.mxu1  ;;  %v18235_v49 = vpop.f32.mrf.mxu0 }
 0x51a   : > { %v13495_v13 = vadd.f32 %v13494_v57, %v13493_v15  ;;  %v13371_v15 = vadd.f32 %v19366_v60, %v19365_v34  ;;  %v19367_v57 = vld [vmem:[#allocation51_spill] sm:$0xff] }
 0x51b   : > { %v18238_v3 = vpop.f32.mrf.mxu1  ;;  %v18242_v27 = vpop.f32.mrf.mxu0  ;;  %v8855_v32 = vadd.f32 %v19367_v57, %v13235_v21 }
 0x51c   : > { %v10989_v39 = vadd.f32 %v13889_v35, %v13495_v13 }
 0x51d   : > { %v18244_v2 = vpop.f32.mrf.mxu1  ;;  %v9160_v13 = vadd.f32 %v13371_v15, %v8855_v32 }
 0x51e   : > { %v18240_v9 = vadd.f32 %v10989_v39, %v9305_v45  ;;  %v19368_v45 = vld [vmem:[#allocation174_spill] sm:$0xff] }
 0x51f   : > { %v9321_v39 = vadd.f32 %v19368_v45, %v9160_v13  ;;  %v19376_v45 = vld [vmem:[#allocation102_spill] sm:$0xff] }
 0x521   : > { %v13897_v51 = vpop.f32.mrf.mxu0 }
 0x523   : > { %v11012_v36 = vpop.f32.mrf.mxu0 }
 0x524   : > { %v13499_v53 = vpop.f32.mrf.mxu1 }
 0x525   : > { %v18251_v46 = vpop.f32.mrf.mxu0 }
 0x526   : > { %v13500_v35 = vpop.f32.mrf.mxu1 }
 0x527   : > { %v13501_v44 = vadd.f32 %v13500_v35, %v13499_v53  ;;  %v18258_v12 = vpop.f32.mrf.mxu0  ;;  %v19369_v53 = vld [vmem:[#allocation83_spill] sm:$0xff] }
 0x528   : > { %v18254_v30 = vpop.f32.mrf.mxu1  ;;  %v13241_v55 = vadd.f32 %v19370_v56, %v19369_v53  ;;  %v19378_v53 = vld [vmem:[#allocation124_spill] sm:$0xff] }
 0x529   : > { %v10997_v48 = vadd.f32 %v13501_v44, %v10996_v16  ;;  %v19372_v44 = vld [vmem:[#allocation30_spill] sm:$0xff]  ;;  %v19379_v56 = vld [vmem:[#allocation156_spill] sm:$0xff] }
 0x52a   : > { %v18260_v25 = vpop.f32.mrf.mxu1 }
 0x52b   : > { %v18256_v7 = vadd.f32 %v10997_v48, %v9313_v14  ;;  %v13377_v14 = vadd.f32 %v19372_v44, %v19371_v37 }
 0x530   : > { %v18266_v22 = vpop.f32.mrf.mxu0  ;;  %v13505_v0 = vpop.f32.mrf.mxu1 }
 0x532   : > { %v11028_v16 = vpop.f32.mrf.mxu0  ;;  %v13506_v43 = vpop.f32.mrf.mxu1 }
 0x533   : > { %v13507_v59 = vadd.f32 %v13506_v43, %v13505_v0 }
 0x534   : > { %v18270_v18 = vpop.f32.mrf.mxu0  ;;  %v18274_v10 = vpop.f32.mrf.mxu1 }
 0x535   : > { %v11005_v11 = vadd.f32 %v13893_v38, %v13507_v59  ;;  %v19373_v38 = vld [vmem:[#allocation82_spill] sm:$0xff] }
 0x536   : > { %v18276_v4 = vpop.f32.mrf.mxu0  ;;  %v18278_v29 = vpop.f32.mrf.mxu1  ;;  %v8863_v41 = vadd.f32 %v13241_v55, %v19373_v38  ;;  %v13383_v55 = vadd.f32 %v19379_v56, %v19378_v53  ;;  %v19386_v56 = vld [vmem:[#allocation114_spill] sm:$0xff] }
 0x537   : > { %v18272_v31 = vadd.f32 %v11005_v11, %v9321_v39  ;;  %v19377_v39 = vld [vmem:[#allocation90_spill] sm:$0xff] }
 0x538   : > { %v9168_v34 = vadd.f32 %v13377_v14, %v8863_v41  ;;  %v13247_v11 = vadd.f32 %v19377_v39, %v19376_v45 }
 0x53a   : > { %v9329_v15 = vadd.f32 %v18047_v17, %v9168_v34 }
 0x53d   : > { %v18282_v35 = vpop.f32.mrf.mxu0 }
 0x53f   : > { %v13511_v48 = vpop.f32.mrf.mxu1  ;;  %v18287_v28 = vpop.f32.mrf.mxu0 }
 0x541   : > { %v13512_v21 = vpop.f32.mrf.mxu1  ;;  %v18290_v57 = vpop.f32.mrf.mxu0 }
 0x542   : > { %v13513_v60 = vadd.f32 %v13512_v21, %v13511_v48  ;;  %19374 = vst [vmem:[#allocation42_spill] sm:$0xff] %v18290_v57  ;;  %v19383_v21 = vld [vmem:[#allocation25_spill] sm:$0xff]  ;;  %v19442_v57 = vld [vmem:[#allocation160_spill] sm:$0xff] }
 0x543   : > { %v18292_v32 = vpop.f32.mrf.mxu1  ;;  %v18296_v13 = vpop.f32.mrf.mxu0 }
 0x544   : > { %v11013_v0 = vadd.f32 %v13513_v60, %v11012_v36  ;;  %19375 = vst [vmem:[#allocation152_spill] sm:$0xff] %v18296_v13  ;;  %v19381_v36 = vld [vmem:[#allocation60_spill] sm:$0xff]  ;;  %v19425_v13 = vld [vmem:[#allocation103_spill] sm:$0xff] }
 0x545   : > { %v18298_v59 = vpop.f32.mrf.mxu1  ;;  %v8871_v44 = vadd.f32 %v19381_v36, %v13247_v11  ;;  %v19387_v11 = vld [vmem:[#allocation118_spill] sm:$0xff] }
 0x546   : > { %v18294_v43 = vadd.f32 %v11013_v0, %v9329_v15  ;;  %v13253_v36 = vadd.f32 %v19387_v11, %v19386_v56  ;;  %v19397_v56 = vld [vmem:[#allocation86_spill] sm:$0xff]  ;;  %v19398_v11 = vld [vmem:[#allocation73_spill] sm:$0xff] }
 0x547   : > { %v9176_v38 = vadd.f32 %v13383_v55, %v8871_v44  ;;  %v19389_v55 = vld [vmem:[#allocation151_spill] sm:$0xff] }
 0x549   : > { %v9337_v34 = vadd.f32 %v19383_v21, %v9176_v38  ;;  %v19392_v38 = vld [vmem:[#allocation68_spill] sm:$0xff] }
 0x54a   : > { %v19393_v21 = vld [vmem:[#allocation72_spill] sm:$0xff] }
 0x54c   : > { %v18304_v37 = vpop.f32.mrf.mxu0  ;;  %v13517_v17 = vpop.f32.mrf.mxu1 }
 0x54d   : > { %19380 = vst [vmem:[#allocation44_spill] sm:$0xff] %v18304_v37 }
 0x54e   : > { %v18307_v14 = vpop.f32.mrf.mxu0  ;;  %v13518_v48 = vpop.f32.mrf.mxu1 }
 0x54f   : > { %19382 = vst [vmem:[#allocation41_spill] sm:$0xff] %v18307_v14  ;;  %v13519_v41 = vadd.f32 %v13518_v48, %v13517_v17  ;;  %v19390_v17 = vld [vmem:[#allocation155_spill] sm:$0xff] }
 0x550   : > { %v18310_v15 = vpop.f32.mrf.mxu0  ;;  %v18314_v45 = vpop.f32.mrf.mxu1  ;;  %v13389_v44 = vadd.f32 %v19390_v17, %v19389_v55  ;;  %v13238_v55 = vadd.f32 %v19400_v24, %v19399_v40  ;;  %v19401_v17 = vld [vmem:[#allocation75_spill] sm:$0xff]  ;;  %v19411_v40 = vld [vmem:[#allocation132_spill] sm:$0xff] }
 0x551   : > { %v11021_v60 = vadd.f32 %v13897_v51, %v13519_v41  ;;  %19384 = vst [vmem:[#allocation46_spill] sm:$0xff] %v18310_v15  ;;  %v8879_v41 = vadd.f32 %v13253_v36, %v19392_v38  ;;  %v19404_v36 = vld [vmem:[#allocation106_spill] sm:$0xff] }
 0x552   : > { %v18316_v39 = vpop.f32.mrf.mxu0  ;;  %v18318_v53 = vpop.f32.mrf.mxu1  ;;  %v19405_v38 = vld [vmem:[#allocation110_spill] sm:$0xff] }
 0x553   : > { %v18312_v0 = vadd.f32 %v11021_v60, %v9337_v34  ;;  %19385 = vst [vmem:[#allocation47_spill] sm:$0xff] %v18316_v39  ;;  %v19394_v34 = vld [vmem:[#allocation53_spill] sm:$0xff]  ;;  %v9184_v61 = vadd.f32 %v13389_v44, %v8879_v41  ;;  %v19409_v44 = vld [vmem:[#allocation128_spill] sm:$0xff] }
 0x554   : > { %v13220_v60 = vadd.f32 %v19394_v34, %v19393_v21  ;;  %v13250_v21 = vadd.f32 %v19405_v38, %v19404_v36  ;;  %v19406_v34 = vld [vmem:[#allocation177_spill] sm:$0xff]  ;;  %v19416_v36 = vld [vmem:[#allocation54_spill] sm:$0xff] }
 0x555   : > { %v9345_v39 = vadd.f32 %v19406_v34, %v9184_v61  ;;  %v19419_v34 = vld [vmem:[#allocation98_spill] sm:$0xff] }
 0x556   : > { %v8834_v26 = vadd.f32 %v13220_v60, %v19407_v20  ;;  %v19418_v60 = vld [vmem:[#allocation84_spill] sm:$0xff]  ;;  %v19420_v20 = vld [vmem:[#allocation158_spill] sm:$0xff] }
 0x559   : > { %v18322_v62 = vpop.f32.mrf.mxu0 }
 0x55a   : > { %19388 = vst [vmem:[#allocation49_spill] sm:$0xff] %v18322_v62  ;;  %v13232_v62 = vadd.f32 %v19398_v11, %v19397_v56  ;;  %v19410_v56 = vld [vmem:[#allocation67_spill] sm:$0xff] }
 0x55b   : > { %v13523_v48 = vpop.f32.mrf.mxu1  ;;  %v18326_v51 = vpop.f32.mrf.mxu0  ;;  %v8842_v24 = vadd.f32 %v19410_v56, %v13226_v47  ;;  %v19412_v11 = vld [vmem:[#allocation139_spill] sm:$0xff]  ;;  %v19422_v47 = vld [vmem:[#allocation62_spill] sm:$0xff] }
 0x55c   : > { %19391 = vst [vmem:[#allocation43_spill] sm:$0xff] %v18326_v51  ;;  %v13244_v51 = vadd.f32 %v19402_v58, %v19401_v17  ;;  %v13259_v58 = vadd.f32 %v19412_v11, %v19411_v40  ;;  %v19413_v17 = vld [vmem:[#allocation144_spill] sm:$0xff]  ;;  %v8850_v61 = vadd.f32 %v13232_v62, %v19416_v36  ;;  %v8874_v56 = vadd.f32 %v19422_v47, %v13250_v21 }
 0x55d   : > { %v13524_v54 = vpop.f32.mrf.mxu1  ;;  %v18339_v15 = vpop.f32.mrf.mxu0  ;;  %v19424_v40 = vld [vmem:[#allocation92_spill] sm:$0xff]  ;;  %v13492_v62 = vadd.f32 %v18228_v1, %v18222_v5  ;;  %v13498_v21 = vadd.f32 %v18244_v2, %v18238_v3  ;;  %v13504_v1 = vadd.f32 %v18260_v25, %v18254_v30  ;;  %v19441_v2 = vld [vmem:[#allocation159_spill] sm:$0xff] }
 0x55e   : > { %v13525_v63 = vadd.f32 %v13524_v54, %v13523_v48  ;;  %19403 = vst [vmem:[#allocation59_spill] sm:$0xff] %v18339_v15  ;;  %v19408_v54 = vld [vmem:[#allocation122_spill] sm:$0xff]  ;;  %v8866_v38 = vadd.f32 %v13244_v51, %v19418_v60  ;;  %v13356_v11 = vadd.f32 %v19424_v40, %v19423_v50  ;;  %v19429_v51 = vld [vmem:[#allocation109_spill] sm:$0xff]  ;;  %v19433_v40 = vld [vmem:[#allocation71_spill] sm:$0xff]  ;;  %v13395_v14 = vadd.f32 %v19442_v57, %v19441_v2 }
 0x55f   : > { %v13256_v48 = vadd.f32 %v19409_v44, %v19408_v54  ;;  %v18347_v41 = vpop.f32.mrf.mxu1  ;;  %v19414_v15 = vld [vmem:[#allocation154_spill] sm:$0xff]  ;;  %v13265_v54 = vadd.f32 %v19420_v20, %v19419_v34  ;;  %v18361_v44 = vpop.f32.mrf.mxu0  ;;  %v19431_v60 = vld [vmem:[#allocation117_spill] sm:$0xff]  ;;  %v10984_v30 = vadd.f32 %v13492_v62, %v18226_v19 }
 0x560   : > { %v11029_v23 = vadd.f32 %v13525_v63, %v11028_v16  ;;  %v13262_v37 = vadd.f32 %v19414_v15, %v19413_v17  ;;  %v19417_v63 = vld [vmem:[#allocation74_spill] sm:$0xff]  ;;  %19421 = vst [vmem:[#allocation45_spill] sm:$0xff] %v18361_v44  ;;  %v19426_v15 = vld [vmem:[#allocation105_spill] sm:$0xff]  ;;  %v19428_v17 = vld [vmem:[#allocation107_spill] sm:$0xff] }
 0x561   : > { %v8858_v16 = vadd.f32 %v19417_v63, %v13238_v55  ;;  %v13368_v36 = vadd.f32 %v19429_v51, %v19428_v17  ;;  %v19430_v63 = vld [vmem:[#allocation115_spill] sm:$0xff]  ;;  %v18377_v20 = vpop.f32.mrf.mxu1  ;;  %v19432_v50 = vld [vmem:[#allocation69_spill] sm:$0xff]  ;;  %v19446_v57 = vld [vmem:[#allocation170_spill] sm:$0xff] }
 0x562   : > { %v18354_v42 = vadd.f32 %v11029_v23, %v9345_v39  ;;  %v13362_v23 = vadd.f32 %v19426_v15, %v19425_v13  ;;  %v19427_v39 = vld [vmem:[#allocation81_spill] sm:$0xff]  ;;  %v13374_v34 = vadd.f32 %v19431_v60, %v19430_v63  ;;  %v8887_v47 = vadd.f32 %v19432_v50, %v13259_v58  ;;  %v19434_v15 = vld [vmem:[#allocation168_spill] sm:$0xff]  ;;  %v19438_v51 = vld [vmem:[#allocation123_spill] sm:$0xff] }
 0x563   : > { %v8882_v55 = vadd.f32 %v13256_v48, %v19427_v39  ;;  %v8890_v13 = vadd.f32 %v19433_v40, %v13262_v37  ;;  %v19435_v44 = vld [vmem:[#allocation129_spill] sm:$0xff]  ;;  %v19436_v48 = vld [vmem:[#allocation78_spill] sm:$0xff]  ;;  %v19439_v60 = vld [vmem:[#allocation27_spill] sm:$0xff] }
 0x564   : > { %19415 = vst [vmem:[#allocation55_spill] sm:$0xff] %v18354_v42  ;;  %v13386_v5 = vadd.f32 %v19435_v44, %v19434_v15  ;;  %v8895_v39 = vadd.f32 %v13265_v54, %v19436_v48  ;;  %v19437_v17 = vld [vmem:[#allocation121_spill] sm:$0xff]  ;;  %v13392_v3 = vadd.f32 %v19440_v52, %v19439_v60  ;;  %v19444_v37 = vld [vmem:[#allocation32_spill] sm:$0xff]  ;;  %v9147_v44 = vadd.f32 %v13362_v23, %v8842_v24 }
 0x565   : > { %v13380_v63 = vadd.f32 %v19438_v51, %v19437_v17  ;;  %v19445_v50 = vld [vmem:[#allocation164_spill] sm:$0xff]  ;;  %v9139_v15 = vadd.f32 %v13356_v11, %v8834_v26  ;;  %v9163_v25 = vadd.f32 %v13374_v34, %v8858_v16  ;;  %v9155_v54 = vadd.f32 %v13368_v36, %v8850_v61  ;;  %v19449_v24 = vld [vmem:[#allocation141_spill] sm:$0xff]  ;;  %v19450_v16 = vld [vmem:[#allocation31_spill] sm:$0xff] }
 0x566   : > { %v13398_v40 = vadd.f32 %v19445_v50, %v19444_v37  ;;  %v10992_v48 = vadd.f32 %v18219_v33, %v13498_v21  ;;  %v13510_v17 = vadd.f32 %v18278_v29, %v18274_v10  ;;  %v19447_v60 = vld [vmem:[#allocation176_spill] sm:$0xff]  ;;  %v9179_v37 = vadd.f32 %v13386_v5, %v8874_v56  ;;  %v18417_v56 = vld [vmem:[%s18725_s5] ss:$0 sm:$0xff] }
 0x567   : > { %v13401_v2 = vadd.f32 %v19447_v60, %v19446_v57  ;;  %v11000_v26 = vadd.f32 %v13504_v1, %v18242_v27  ;;  %v9308_v19 = vadd.f32 %v19449_v24, %v9147_v44  ;;  %v9324_v61 = vadd.f32 %v19450_v16, %v9163_v25  ;;  %v19451_v11 = vld [vmem:[#allocation24_spill] sm:$0xff] }
 0x568   : > { %v18392_v58 = vpop.f32.mrf.mxu0  ;;  %v9316_v33 = vadd.f32 %v19451_v11, %v9155_v54  ;;  %v9171_v23 = vadd.f32 %v13380_v63, %v8866_v38  ;;  %v19452_v29 = vld [vmem:[#allocation136_spill] sm:$0xff]  ;;  %v9192_v34 = vadd.f32 %v13395_v14, %v8887_v47  ;;  %v9195_v5 = vadd.f32 %v13398_v40, %v8890_v13  ;;  %v18427_v14 = vld [vmem:[%s18728_s8] ss:$0 sm:$0xff]  ;;  %v19453_v47 = vld [vmem:[#allocation175_spill] sm:$0xff] }
 0x569   : > { %19443 = vst [vmem:[#allocation57_spill] sm:$0xff] %v18392_v58  ;;  %v13529_v52 = vpop.f32.mrf.mxu1  ;;  %v19448_v58 = vld [vmem:[#allocation171_spill] sm:$0xff]  ;;  %v18412_v36 = vadd.f32 %v19452_v29, %v9179_v37  ;;  %v9187_v1 = vadd.f32 %v13392_v3, %v8882_v55  ;;  %v11008_v50 = vadd.f32 %v18235_v49, %v13510_v17  ;;  %v19454_v13 = vld [vmem:[#allocation21_spill] sm:$0xff]  ;;  %v11146_v54 = vmul.f32 %v18417_v56, %v18224_v8  ;;  %v18456_v8 = vld [vmem:[%s18729_s9] ss:$0 sm:$0xff] }
 0x56a   : > { %v18400_v51 = vpop.f32.mrf.mxu0  ;;  %v9300_v42 = vadd.f32 %v19448_v58, %v9139_v15  ;;  %v11110_v58 = vadd.f32 %v10992_v48, %v9308_v19  ;;  %v9353_v44 = vadd.f32 %v19453_v47, %v9192_v34  ;;  %v11112_v15 = vadd.f32 %v11000_v26, %v9316_v33  ;;  %v19455_v49 = vld [vmem:[#allocation33_spill] sm:$0xff] }
 0x56b   : > { %v13530_v62 = vpop.f32.mrf.mxu1  ;;  %v9332_v3 = vadd.f32 %v19454_v13, %v9171_v23  ;;  %v18435_v40 = vadd.f32 %v19455_v49, %v9195_v5  ;;  %v9200_v60 = vadd.f32 %v13401_v2, %v8895_v39  ;;  %v11114_v26 = vadd.f32 %v11008_v50, %v9324_v61 }
 0x56c   : > { %v18409_v10 = vpop.f32.mrf.mxu0  ;;  %v11108_v27 = vadd.f32 %v10984_v30, %v9300_v42  ;;  %v13531_v21 = vadd.f32 %v13530_v62, %v13529_v52  ;;  %v13516_v42 = vadd.f32 %v18298_v59, %v18292_v32  ;;  %v19456_v30 = vld [vmem:[#allocation20_spill] sm:$0xff]  ;;  %v11148_v32 = vmul.f32 %v18417_v56, %v18240_v9  ;;  %v19457_v62 = vld [vmem:[#allocation22_spill] sm:$0xff] }
 0x56d   : > { %v18420_v38 = vpop.f32.mrf.mxu1  ;;  %v18438_v25 = vadd.f32 %v19456_v30, %v9187_v1  ;;  %v11149_v37 = vmul.f32 %v18417_v56, %v11110_v58  ;;  %v11150_v9 = vmul.f32 %v18417_v56, %v18256_v7  ;;  %v11151_v16 = vmul.f32 %v18417_v56, %v11112_v15 }
 0x56e   : > { %v18422_v63 = vpop.f32.mrf.mxu0  ;;  %v11037_v55 = vadd.f32 %v18266_v22, %v13531_v21  ;;  %v11147_v52 = vmul.f32 %v18417_v56, %v11108_v27  ;;  %v18450_v22 = vld [vmem:[%s18726_s6] ss:$0 sm:$0xff]  ;;  %v11016_v11 = vadd.f32 %v13516_v42, %v18258_v12  ;;  %v13522_v33 = vadd.f32 %v18318_v53, %v18314_v45 }
 0x56f   : > { %v13533_v48 = vpop.f32.mrf.mxu1  ;;  %v9361_v29 = vadd.f32 %v19457_v62, %v9200_v60  ;;  %v11152_v39 = vmul.f32 %v18417_v56, %v18272_v31  ;;  %v11185_v7 = vadd.f32 %v18450_v22, %v11146_v54  ;;  %v11187_v27 = vadd.f32 %v18450_v22, %v11148_v32 }
 0x570   : > { %v13937_v17 = vpop.f32.mrf.mxu0  ;;  %v18445_v59 = vadd.f32 %v11037_v55, %v9353_v44  ;;  %v11186_v45 = vadd.f32 %v18450_v22, %v11147_v52  ;;  %v11153_v53 = vmul.f32 %v18417_v56, %v11114_v26  ;;  %v11188_v5 = vadd.f32 %v18450_v22, %v11149_v37 }
 0x571   : > { %v11579_v57 = vmul.f32 %v13937_v17, %v18427_v14  ;;  %v13535_v24 = vpop.f32.mrf.mxu1  ;;  %v11189_v50 = vadd.f32 %v18450_v22, %v11150_v9  ;;  %v11116_v47 = vadd.f32 %v11016_v11, %v9332_v3  ;;  %v11024_v44 = vadd.f32 %v18251_v46, %v13522_v33 }
 0x572   : > { %v11443_v19 = vpop.f32.mrf.mxu0  ;;  %v18483_v42 = vadd.f32 %v18450_v22, %v11151_v16  ;;  %v11191_v54 = vadd.f32 %v18450_v22, %v11152_v39  ;;  %v13528_v3 = vadd.f32 %v18377_v20, %v18347_v41  ;;  %v11154_v32 = vmul.f32 %v18417_v56, %v18294_v43 }
 0x573   : > { %v11577_v23 = vmul.f32 %v18427_v14, %v11443_v19  ;;  %v11618_v2 = vadd.f32 %v18456_v8, %v11579_v57  ;;  %v13536_v61 = vpop.f32.mrf.mxu1  ;;  %v11192_v26 = vadd.f32 %v18450_v22, %v11153_v53  ;;  %v11118_v19 = vadd.f32 %v11024_v44, %v18412_v36 }
 0x574   : > { %v13938_v34 = vpop.f32.mrf.mxu0  ;;  %v13537_v21 = vadd.f32 %v13536_v61, %v13535_v24  ;;  %v11155_v24 = vmul.f32 %v18417_v56, %v11116_v47  ;;  %v13534_v41 = vadd.f32 %v13533_v48, %v18420_v38  ;;  %v11032_v39 = vadd.f32 %v13528_v3, %v18276_v4 }
 0x575   : > { %v11616_v12 = vadd.f32 %v18456_v8, %v11577_v23  ;;  %v11580_v1 = vmul.f32 %v13938_v34, %v18427_v14  ;;  %v18477_v31 = vpop.f32.mrf.mxu1  ;;  %v11650_v55 = vadd.f32 %v11618_v2, %v11187_v27 }
 0x576   : > { %v11446_v58 = vpop.f32.mrf.mxu0  ;;  %v11045_v15 = vadd.f32 %v13537_v21, %v18287_v28  ;;  %v11040_v21 = vadd.f32 %v18270_v18, %v13534_v41  ;;  %v11120_v18 = vadd.f32 %v11032_v39, %v18438_v25  ;;  %v19459_v39 = vld [vmem:[#allocation41_spill] sm:$0xff] }
 0x577   : > { %v11619_v13 = vadd.f32 %v18456_v8, %v11580_v1  ;;  %v11578_v49 = vmul.f32 %v18427_v14, %v11446_v58  ;;  %v18487_v30 = vpop.f32.mrf.mxu1  ;;  %v11648_v52 = vadd.f32 %v11616_v12, %v11185_v7  ;;  %v11682_v16 = vmax.f32 %v11650_v55, 0.0 }
 0x578   : > { %v13941_v17 = vpop.f32.mrf.mxu0  ;;  %v18492_v46 = vadd.f32 %v11045_v15, %v9361_v29  ;;  %v11156_v29 = vmul.f32 %v18417_v56, %v18312_v0  ;;  %v11157_v12 = vmul.f32 %v18417_v56, %v11118_v19  ;;  %v11193_v0 = vadd.f32 %v18450_v22, %v11154_v32 }
 0x579   : > { %v11583_v28 = vmul.f32 %v13941_v17, %v18427_v14  ;;  %v11651_v57 = vadd.f32 %v11619_v13, %v11188_v5  ;;  %v11617_v60 = vadd.f32 %v18456_v8, %v11578_v49  ;;  %v13541_v37 = vpop.f32.mrf.mxu1  ;;  %v11680_v2 = vmax.f32 %v11648_v52, 0.0  ;;  %v19458_v52 = vld [vmem:[#allocation55_spill] sm:$0xff] }
 0x57a   : > { %v11459_v9 = vpop.f32.mrf.mxu0  ;;  %v11194_v15 = vadd.f32 %v18450_v22, %v11155_v24  ;;  %v11122_v25 = vadd.f32 %v11040_v21, %v18435_v40  ;;  %v11196_v32 = vadd.f32 %v18450_v22, %v11157_v12  ;;  %v11159_v24 = vmul.f32 %v18417_v56, %v11120_v18 }
 0x57b   : > { %v11581_v20 = vmul.f32 %v18427_v14, %v11459_v9  ;;  %v11683_v11 = vmax.f32 %v11651_v57, 0.0  ;;  %v11649_v33 = vadd.f32 %v11617_v60, %v11186_v45  ;;  %v11622_v43 = vadd.f32 %v18456_v8, %v11583_v28  ;;  %v13542_v23 = vpop.f32.mrf.mxu1 }
 0x57c   : > { %v13942_v62 = vpop.f32.mrf.mxu0  ;;  %v13543_v7 = vadd.f32 %v13542_v23, %v13541_v37  ;;  %v11158_v28 = vmul.f32 %v18417_v56, %v19458_v52 }
 0x57d   : > { %v12704_v36 = vpack.c.bf16 %v11683_v11, %v11682_v16  ;;  %v11681_v61 = vmax.f32 %v11649_v33, 0.0  ;;  %v11620_v38 = vadd.f32 %v18456_v8, %v11581_v20  ;;  %v11584_v48 = vmul.f32 %v13942_v62, %v18427_v14  ;;  %v13544_v34 = vpop.f32.mrf.mxu1 }
 0x57e   : > { %v11462_v27 = vpop.f32.mrf.mxu0  ;;  %v11053_v45 = vadd.f32 %v18282_v35, %v13543_v7  ;;  %v11654_v53 = vadd.f32 %v11622_v43, %v11191_v54  ;;  %v11195_v54 = vadd.f32 %v18450_v22, %v11156_v29  ;;  %v11161_v62 = vmul.f32 %v18417_v56, %v11122_v25  ;;  %v19463_v25 = vld [vmem:[#allocation140_spill] sm:$0xff] }
 0x57f   : > { %12776 = vst [vmem:[%s18515_s30 + $0x8] sm:$0xff] %v12704_v36   ;;  %v12699_v4 = vpack.c.bf16 %v11681_v61, %v11680_v2  ;;  %v11623_v5 = vadd.f32 %v18456_v8, %v11584_v48  ;;  %v11582_v1 = vmul.f32 %v18427_v14, %v11462_v27  ;;  %v13545_v58 = vpop.f32.mrf.mxu1  ;;  %v11652_v55 = vadd.f32 %v11620_v38, %v11189_v50  ;;  %v19460_v27 = vld [vmem:[#allocation42_spill] sm:$0xff] }
 0x580   : > { %v13945_v47 = vpop.f32.mrf.mxu0  ;;  %v18522_v35 = vadd.f32 %v11053_v45, %v18167_v6  ;;  %v11686_v57 = vmax.f32 %v11654_v53, 0.0  ;;  %v13546_v19 = vadd.f32 %v13545_v58, %v13544_v34  ;;  %v13540_v29 = vadd.f32 %v18487_v30, %v18477_v31 }
 0x581   : > { %v11587_v44 = vmul.f32 %v13945_v47, %v18427_v14  ;;  %12700 = vst [vmem:[%s18515_s30] sm:$0xff] %v12699_v4   ;;  %v11655_v13 = vadd.f32 %v11623_v5, %v11192_v26  ;;  %v11621_v49 = vadd.f32 %v18456_v8, %v11582_v1  ;;  %v13547_v17 = vpop.f32.mrf.mxu1  ;;  %v11684_v40 = vmax.f32 %v11652_v55, 0.0  ;;  %v19462_v47 = vld [vmem:[#allocation152_spill] sm:$0xff] }
 0x582   : > { %v11475_v3 = vpop.f32.mrf.mxu0  ;;  %v11056_v12 = vadd.f32 %v19460_v27, %v13546_v19  ;;  %v11197_v5 = vadd.f32 %v18450_v22, %v11158_v28  ;;  %v11198_v58 = vadd.f32 %v18450_v22, %v11159_v24  ;;  %v11048_v18 = vadd.f32 %v13540_v29, %v19462_v47  ;;  %v19464_v24 = vld [vmem:[#allocation145_spill] sm:$0xff] }
 0x583   : > { %v11585_v6 = vmul.f32 %v18427_v14, %v11475_v3  ;;  %v11687_v60 = vmax.f32 %v11655_v13, 0.0  ;;  %v11653_v50 = vadd.f32 %v11621_v49, %v18483_v42  ;;  %v11626_v37 = vadd.f32 %v18456_v8, %v11587_v44  ;;  %v13548_v9 = vpop.f32.mrf.mxu1 }
 0x584   : > { %v13946_v26 = vpop.f32.mrf.mxu0  ;;  %v13549_v20 = vadd.f32 %v13548_v9, %v13547_v17  ;;  %v11160_v42 = vmul.f32 %v18417_v56, %v18445_v59  ;;  %v19461_v59 = vld [vmem:[#allocation29_spill] sm:$0xff]  ;;  %v11200_v55 = vadd.f32 %v18450_v22, %v11161_v62  ;;  %v11162_v28 = vmul.f32 %v18417_v56, %v18492_v46  ;;  %v19465_v46 = vld [vmem:[#allocation44_spill] sm:$0xff] }
 0x585   : > { %v11624_v41 = vadd.f32 %v18456_v8, %v11585_v6  ;;  %v12714_v16 = vpack.c.bf16 %v11687_v60, %v11686_v57  ;;  %v11685_v11 = vmax.f32 %v11653_v50, 0.0  ;;  %v11588_v33 = vmul.f32 %v13946_v26, %v18427_v14  ;;  %v13550_v43 = vpop.f32.mrf.mxu1 }
 0x586   : > { %v11478_v23 = vpop.f32.mrf.mxu0  ;;  %v11061_v2 = vadd.f32 %v13549_v20, %v19459_v39  ;;  %v11658_v36 = vadd.f32 %v11626_v37, %v11195_v54  ;;  %v11199_v44 = vadd.f32 %v18450_v22, %v11160_v42  ;;  %v11126_v6 = vadd.f32 %v11056_v12, %v19463_v25  ;;  %v19466_v39 = vld [vmem:[#allocation23_spill] sm:$0xff] }
 0x587   : > { %12778 = vst [vmem:[%s18515_s30 + $0x18] sm:$0xff] %v12714_v16   ;;  %v12709_v7 = vpack.c.bf16 %v11685_v11, %v11684_v40  ;;  %v11627_v61 = vadd.f32 %v18456_v8, %v11588_v33  ;;  %v11586_v38 = vmul.f32 %v18427_v14, %v11478_v23  ;;  %v13551_v48 = vpop.f32.mrf.mxu1  ;;  %v11656_v21 = vadd.f32 %v11624_v41, %v11193_v0  ;;  %v19467_v12 = vld [vmem:[#allocation47_spill] sm:$0xff] }
 0x588   : > { %v13949_v34 = vpop.f32.mrf.mxu0  ;;  %v18550_v45 = vadd.f32 %v11061_v2, %v19461_v59  ;;  %v11690_v13 = vmax.f32 %v11658_v36, 0.0  ;;  %v11124_v19 = vadd.f32 %v11048_v18, %v19464_v24  ;;  %v11164_v41 = vmul.f32 %v18417_v56, %v18522_v35  ;;  %v19468_v59 = vld [vmem:[#allocation46_spill] sm:$0xff] }
 0x589   : > { %v11591_v4 = vmul.f32 %v13949_v34, %v18427_v14  ;;  %12777 = vst [vmem:[%s18515_s30 + $0x10] sm:$0xff] %v12709_v7   ;;  %v11659_v31 = vadd.f32 %v11627_v61, %v11196_v32  ;;  %v11625_v30 = vadd.f32 %v18456_v8, %v11586_v38  ;;  %v13553_v53 = vpop.f32.mrf.mxu1  ;;  %v11688_v32 = vmax.f32 %v11656_v21, 0.0 }
 0x58a   : > { %v11491_v1 = vpop.f32.mrf.mxu0  ;;  %v13552_v20 = vadd.f32 %v13551_v48, %v13550_v43  ;;  %v11165_v29 = vmul.f32 %v18417_v56, %v11126_v6  ;;  %v11201_v48 = vadd.f32 %v18450_v22, %v11162_v28  ;;  %v11163_v27 = vmul.f32 %v18417_v56, %v11124_v19 }
 0x58b   : > { %v11589_v0 = vmul.f32 %v18427_v14, %v11491_v1  ;;  %v11691_v49 = vmax.f32 %v11659_v31, 0.0  ;;  %v11657_v54 = vadd.f32 %v11625_v30, %v11194_v15  ;;  %v11630_v17 = vadd.f32 %v18456_v8, %v11591_v4  ;;  %v13554_v3 = vpop.f32.mrf.mxu1 }
 0x58c   : > { %v13950_v52 = vpop.f32.mrf.mxu0  ;;  %v13555_v57 = vadd.f32 %v13554_v3, %v13553_v53  ;;  %v11064_v21 = vadd.f32 %v13552_v20, %v19467_v12  ;;  %v19472_v20 = vld [vmem:[#allocation35_spill] sm:$0xff] }
 0x58d   : > { %v12724_v60 = vpack.c.bf16 %v11691_v49, %v11690_v13  ;;  %v11689_v50 = vmax.f32 %v11657_v54, 0.0  ;;  %v11628_v37 = vadd.f32 %v18456_v8, %v11589_v0  ;;  %v11592_v9 = vmul.f32 %v13950_v52, %v18427_v14  ;;  %v13556_v26 = vpop.f32.mrf.mxu1 }
 0x58e   : > { %v11494_v15 = vpop.f32.mrf.mxu0  ;;  %v11069_v40 = vadd.f32 %v19465_v46, %v13555_v57  ;;  %v11662_v11 = vadd.f32 %v11630_v17, %v11199_v44  ;;  %v11203_v44 = vadd.f32 %v18450_v22, %v11164_v41  ;;  %v11204_v13 = vadd.f32 %v18450_v22, %v11165_v29 }
 0x58f   : > { %12780 = vst [vmem:[%s18515_s30 + $0x28] sm:$0xff] %v12724_v60   ;;  %v12719_v16 = vpack.c.bf16 %v11689_v50, %v11688_v32  ;;  %v11631_v33 = vadd.f32 %v18456_v8, %v11592_v9  ;;  %v11590_v23 = vmul.f32 %v18427_v14, %v11494_v15  ;;  %v13557_v42 = vpop.f32.mrf.mxu1  ;;  %v11660_v35 = vadd.f32 %v11628_v37, %v11197_v5  ;;  %v19470_v32 = vld [vmem:[#allocation36_spill] sm:$0xff]  ;;  %v19471_v60 = vld [vmem:[#allocation43_spill] sm:$0xff] }
 0x590   : > { %v13953_v62 = vpop.f32.mrf.mxu0  ;;  %v11129_v2 = vadd.f32 %v11069_v40, %v19466_v39  ;;  %v13558_v7 = vadd.f32 %v13557_v42, %v13556_v26  ;;  %v11694_v30 = vmax.f32 %v11662_v11, 0.0  ;;  %v11166_v29 = vmul.f32 %v18417_v56, %v18550_v45 }
 0x591   : > { %v11595_v36 = vmul.f32 %v13953_v62, %v18427_v14  ;;  %12779 = vst [vmem:[%s18515_s30 + $0x20] sm:$0xff] %v12719_v16   ;;  %v11663_v43 = vadd.f32 %v11631_v33, %v11200_v55  ;;  %v11629_v61 = vadd.f32 %v18456_v8, %v11590_v23  ;;  %v13559_v38 = vpop.f32.mrf.mxu1  ;;  %v11692_v49 = vmax.f32 %v11660_v35, 0.0 }
 0x592   : > { %v11507_v34 = vpop.f32.mrf.mxu0  ;;  %v11072_v4 = vadd.f32 %v19468_v59, %v13558_v7  ;;  %v11168_v6 = vmul.f32 %v18417_v56, %v11129_v2  ;;  %v11202_v33 = vadd.f32 %v18450_v22, %v11163_v27  ;;  %v19473_v2 = vld [vmem:[#allocation45_spill] sm:$0xff] }
 0x593   : > { %v11593_v31 = vmul.f32 %v18427_v14, %v11507_v34  ;;  %v11695_v53 = vmax.f32 %v11663_v43, 0.0  ;;  %v11661_v1 = vadd.f32 %v11629_v61, %v11198_v58  ;;  %v11634_v5 = vadd.f32 %v18456_v8, %v11595_v36  ;;  %v13560_v47 = vpop.f32.mrf.mxu1  ;;  %v19469_v58 = vld [vmem:[#allocation147_spill] sm:$0xff] }
 0x594   : > { %v13954_v18 = vpop.f32.mrf.mxu0  ;;  %v13561_v55 = vadd.f32 %v13560_v47, %v13559_v38  ;;  %v11128_v25 = vadd.f32 %v11064_v21, %v19469_v58  ;;  %v11130_v57 = vadd.f32 %v11072_v4, %v19470_v32  ;;  %v11207_v21 = vadd.f32 %v18450_v22, %v11168_v6 }
 0x595   : > { %v11632_v0 = vadd.f32 %v18456_v8, %v11593_v31  ;;  %v12734_v54 = vpack.c.bf16 %v11695_v53, %v11694_v30  ;;  %v11693_v17 = vmax.f32 %v11661_v1, 0.0  ;;  %v11596_v3 = vmul.f32 %v13954_v18, %v18427_v14  ;;  %v13562_v52 = vpop.f32.mrf.mxu1 }
 0x596   : > { %v11510_v28 = vpop.f32.mrf.mxu0  ;;  %v11077_v50 = vadd.f32 %v13561_v55, %v19471_v60  ;;  %v11666_v9 = vadd.f32 %v11634_v5, %v11203_v44  ;;  %v11169_v39 = vmul.f32 %v18417_v56, %v11130_v57  ;;  %v11167_v27 = vmul.f32 %v18417_v56, %v11128_v25  ;;  %v19474_v5 = vld [vmem:[#allocation172_spill] sm:$0xff]  ;;  %v19475_v44 = vld [vmem:[#allocation49_spill] sm:$0xff] }
 0x597   : > { %12782 = vst [vmem:[%s18515_s30 + $0x38] sm:$0xff] %v12734_v54   ;;  %v12729_v37 = vpack.c.bf16 %v11693_v17, %v11692_v49  ;;  %v11635_v26 = vadd.f32 %v18456_v8, %v11596_v3  ;;  %v11594_v15 = vmul.f32 %v18427_v14, %v11510_v28  ;;  %v13563_v24 = vpop.f32.mrf.mxu1  ;;  %v11664_v41 = vadd.f32 %v11632_v0, %v11201_v48  ;;  %v19476_v28 = vld [vmem:[#allocation143_spill] sm:$0xff] }
 0x598   : > { %v13957_v19 = vpop.f32.mrf.mxu0  ;;  %v11131_v46 = vadd.f32 %v11077_v50, %v19472_v20  ;;  %v13564_v40 = vadd.f32 %v13563_v24, %v13562_v52  ;;  %v11698_v35 = vmax.f32 %v11666_v9, 0.0  ;;  %v11205_v18 = vadd.f32 %v18450_v22, %v11166_v29 }
 0x599   : > { %v11599_v16 = vmul.f32 %v13957_v19, %v18427_v14  ;;  %12781 = vst [vmem:[%s18515_s30 + $0x30] sm:$0xff] %v12729_v37   ;;  %v11667_v11 = vadd.f32 %v11635_v26, %v11204_v13  ;;  %v11633_v23 = vadd.f32 %v18456_v8, %v11594_v15  ;;  %v13565_v42 = vpop.f32.mrf.mxu1  ;;  %v11696_v12 = vmax.f32 %v11664_v41, 0.0  ;;  %v19477_v19 = vld [vmem:[#allocation59_spill] sm:$0xff] }
 0x59a   : > { %v11523_v62 = vpop.f32.mrf.mxu0  ;;  %v11080_v7 = vadd.f32 %v13564_v40, %v19473_v2  ;;  %v11208_v55 = vadd.f32 %v18450_v22, %v11169_v39  ;;  %v11206_v25 = vadd.f32 %v18450_v22, %v11167_v27  ;;  %v11170_v57 = vmul.f32 %v18417_v56, %v11131_v46 }
 0x59b   : > { %v11597_v36 = vmul.f32 %v18427_v14, %v11523_v62  ;;  %v11699_v43 = vmax.f32 %v11667_v11, 0.0  ;;  %v11665_v61 = vadd.f32 %v11633_v23, %v11202_v33  ;;  %v11638_v38 = vadd.f32 %v18456_v8, %v11599_v16  ;;  %v13566_v48 = vpop.f32.mrf.mxu1 }
 0x59c   : > { %v13958_v34 = vpop.f32.mrf.mxu0  ;;  %v13567_v45 = vadd.f32 %v13566_v48, %v13565_v42  ;;  %v11132_v47 = vadd.f32 %v11080_v7, %v19474_v5  ;;  %v19478_v42 = vld [vmem:[#allocation146_spill] sm:$0xff] }
 0x59d   : > { %v12744_v59 = vpack.c.bf16 %v11699_v43, %v11698_v35  ;;  %v11697_v4 = vmax.f32 %v11665_v61, 0.0  ;;  %v11636_v31 = vadd.f32 %v18456_v8, %v11597_v36  ;;  %v11600_v30 = vmul.f32 %v13958_v34, %v18427_v14  ;;  %v13568_v53 = vpop.f32.mrf.mxu1 }
 0x59e   : > { %v11526_v1 = vpop.f32.mrf.mxu0  ;;  %v11085_v0 = vadd.f32 %v19475_v44, %v13567_v45  ;;  %v11670_v49 = vadd.f32 %v11638_v38, %v11207_v21  ;;  %v11171_v15 = vmul.f32 %v18417_v56, %v11132_v47  ;;  %v11209_v34 = vadd.f32 %v18450_v22, %v11170_v57 }
 0x59f   : > { %12784 = vst [vmem:[%s18515_s30 + $0x48] sm:$0xff] %v12744_v59   ;;  %v12739_v13 = vpack.c.bf16 %v11697_v4, %v11696_v12  ;;  %v11639_v54 = vadd.f32 %v18456_v8, %v11600_v30  ;;  %v11598_v17 = vmul.f32 %v18427_v14, %v11526_v1  ;;  %v13569_v3 = vpop.f32.mrf.mxu1  ;;  %v11668_v60 = vadd.f32 %v11636_v31, %v11205_v18 }
 0x5a0   : > { %v13961_v52 = vpop.f32.mrf.mxu0  ;;  %v11133_v58 = vadd.f32 %v11085_v0, %v19476_v28  ;;  %v13570_v6 = vadd.f32 %v13569_v3, %v13568_v53  ;;  %v11702_v40 = vmax.f32 %v11670_v49, 0.0  ;;  %v19479_v53 = vld [vmem:[#allocation37_spill] sm:$0xff]  ;;  %v11210_v47 = vadd.f32 %v18450_v22, %v11171_v15 }
 0x5a1   : > { %v11603_v32 = vmul.f32 %v13961_v52, %v18427_v14  ;;  %12783 = vst [vmem:[%s18515_s30 + $0x40] sm:$0xff] %v12739_v13   ;;  %v11671_v50 = vadd.f32 %v11639_v54, %v11208_v55  ;;  %v11637_v37 = vadd.f32 %v18456_v8, %v11598_v17  ;;  %v13571_v9 = vpop.f32.mrf.mxu1  ;;  %v11700_v7 = vmax.f32 %v11668_v60, 0.0 }
 0x5a2   : > { %v11539_v26 = vpop.f32.mrf.mxu0  ;;  %v11172_v24 = vmul.f32 %v18417_v56, %v11133_v58  ;;  %v11088_v41 = vadd.f32 %v19477_v19, %v13570_v6 }
 0x5a3   : > { %v11601_v20 = vmul.f32 %v18427_v14, %v11539_v26  ;;  %v11703_v16 = vmax.f32 %v11671_v50, 0.0  ;;  %v11669_v11 = vadd.f32 %v11637_v37, %v11206_v25  ;;  %v11642_v46 = vadd.f32 %v18456_v8, %v11603_v32  ;;  %v13572_v33 = vpop.f32.mrf.mxu1  ;;  %v19480_v37 = vld [vmem:[#allocation38_spill] sm:$0xff] }
 0x5a4   : > { %v13962_v23 = vpop.f32.mrf.mxu0  ;;  %v11134_v62 = vadd.f32 %v11088_v41, %v19478_v42  ;;  %v11211_v29 = vadd.f32 %v18450_v22, %v11172_v24  ;;  %v13573_v2 = vadd.f32 %v13572_v33, %v13571_v9  ;;  %v19481_v41 = vld [vmem:[#allocation57_spill] sm:$0xff] }
 0x5a5   : > { %v11640_v39 = vadd.f32 %v18456_v8, %v11601_v20  ;;  %v12754_v36 = vpack.c.bf16 %v11703_v16, %v11702_v40  ;;  %v11701_v35 = vmax.f32 %v11669_v11, 0.0  ;;  %v11604_v43 = vmul.f32 %v13962_v23, %v18427_v14  ;;  %v13574_v61 = vpop.f32.mrf.mxu1  ;;  %v19482_v23 = vld [vmem:[#allocation39_spill] sm:$0xff] }
 0x5a6   : > { %v11542_v38 = vpop.f32.mrf.mxu0  ;;  %v11173_v48 = vmul.f32 %v18417_v56, %v11134_v62  ;;  %v11093_v27 = vadd.f32 %v13573_v2, %v18400_v51  ;;  %v11674_v21 = vadd.f32 %v11642_v46, %v11211_v29 }
 0x5a7   : > { %12786 = vst [vmem:[%s18515_s30 + $0x58] sm:$0xff] %v12754_v36   ;;  %v12749_v12 = vpack.c.bf16 %v11701_v35, %v11700_v7  ;;  %v11643_v45 = vadd.f32 %v18456_v8, %v11604_v43  ;;  %v11602_v59 = vmul.f32 %v18427_v14, %v11542_v38  ;;  %v13575_v4 = vpop.f32.mrf.mxu1  ;;  %v11672_v30 = vadd.f32 %v11640_v39, %v11209_v34  ;;  %v19483_v43 = vld [vmem:[#allocation40_spill] sm:$0xff] }
 0x5a8   : > { %v13965_v31 = vpop.f32.mrf.mxu0  ;;  %v11135_v1 = vadd.f32 %v11093_v27, %v19479_v53  ;;  %v11212_v5 = vadd.f32 %v18450_v22, %v11173_v48  ;;  %v13576_v51 = vadd.f32 %v13575_v4, %v13574_v61  ;;  %v11706_v17 = vmax.f32 %v11674_v21, 0.0 }
 0x5a9   : > { %12785 = vst [vmem:[%s18515_s30 + $0x50] sm:$0xff] %v12749_v12   ;;  %v11641_v18 = vadd.f32 %v18456_v8, %v11602_v59  ;;  %v11607_v44 = vmul.f32 %v13965_v31, %v18427_v14  ;;  %v13577_v0 = vpop.f32.mrf.mxu1  ;;  %v11704_v6 = vmax.f32 %v11672_v30, 0.0 }
 0x5aa   : > { %v11555_v55 = vpop.f32.mrf.mxu0  ;;  %v11174_v13 = vmul.f32 %v18417_v56, %v11135_v1  ;;  %v11675_v49 = vadd.f32 %v11643_v45, %v11212_v5  ;;  %v11096_v52 = vadd.f32 %v13576_v51, %v18422_v63 }
 0x5ab   : > { %v11605_v54 = vmul.f32 %v18427_v14, %v11555_v55  ;;  %v11673_v3 = vadd.f32 %v11641_v18, %v11210_v47  ;;  %v11646_v28 = vadd.f32 %v18456_v8, %v11607_v44  ;;  %v13578_v58 = vpop.f32.mrf.mxu1 }
 0x5ac   : > { %v13966_v25 = vpop.f32.mrf.mxu0  ;;  %v11707_v32 = vmax.f32 %v11675_v49, 0.0  ;;  %v11213_v57 = vadd.f32 %v18450_v22, %v11174_v13  ;;  %v13579_v60 = vadd.f32 %v13578_v58, %v13577_v0  ;;  %v11136_v9 = vadd.f32 %v11096_v52, %v19480_v37 }
 0x5ad   : > { %v11705_v50 = vmax.f32 %v11673_v3, 0.0  ;;  %v11644_v26 = vadd.f32 %v18456_v8, %v11605_v54  ;;  %v11608_v15 = vmul.f32 %v13966_v25, %v18427_v14  ;;  %v13580_v24 = vpop.f32.mrf.mxu1 }
 0x5ae   : > { %v11558_v63 = vpop.f32.mrf.mxu0  ;;  %v12764_v19 = vpack.c.bf16 %v11707_v32, %v11706_v17  ;;  %v11101_v20 = vadd.f32 %v19481_v41, %v13579_v60  ;;  %v11175_v11 = vmul.f32 %v18417_v56, %v11136_v9 }
 0x5af   : > { %v11606_v40 = vmul.f32 %v18427_v14, %v11558_v63  ;;  %v12759_v16 = vpack.c.bf16 %v11705_v50, %v11704_v6  ;;  %v11647_v46 = vadd.f32 %v18456_v8, %v11608_v15  ;;  %v13581_v33 = vpop.f32.mrf.mxu1  ;;  %v11676_v39 = vadd.f32 %v11644_v26, %v11213_v57 }
 0x5b0   : > { %12788 = vst [vmem:[%s18515_s30 + $0x68] sm:$0xff] %v12764_v19   ;;  %v11137_v42 = vadd.f32 %v11101_v20, %v19482_v23  ;;  %v13582_v29 = vadd.f32 %v13581_v33, %v13580_v24  ;;  %v11214_v2 = vadd.f32 %v18450_v22, %v11175_v11 }
 0x5b1   : > { %v11645_v62 = vadd.f32 %v18456_v8, %v11606_v40  ;;  %12787 = vst [vmem:[%s18515_s30 + $0x60] sm:$0xff] %v12759_v16   ;;  %v11708_v38 = vmax.f32 %v11676_v39, 0.0 }
 0x5b2   : > { %v11176_v14 = vmul.f32 %v18417_v56, %v11137_v42  ;;  %v11104_v7 = vadd.f32 %v18409_v10, %v13582_v29 }
 0x5b3   : > { %v11677_v36 = vadd.f32 %v11645_v62, %v11214_v2 }
 0x5b4   : > { %v11215_v35 = vadd.f32 %v18450_v22, %v11176_v14  ;;  %v11138_v61 = vadd.f32 %v11104_v7, %v19483_v43 }
 0x5b5   : > { %v11709_v8 = vmax.f32 %v11677_v36, 0.0 }
 0x5b6   : > { %v11678_v48 = vadd.f32 %v11646_v28, %v11215_v35  ;;  %v11177_v34 = vmul.f32 %v18417_v56, %v11138_v61 }
 0x5b7   : > { %v12769_v27 = vpack.c.bf16 %v11709_v8, %v11708_v38 }
 0x5b8   : > { %v11216_v12 = vadd.f32 %v18450_v22, %v11177_v34  ;;  %v11710_v10 = vmax.f32 %v11678_v48, 0.0 }
 0x5b9   : > { %12789 = vst [vmem:[%s18515_s30 + $0x70] sm:$0xff] %v12769_v27  }
 0x5ba   : > { %v11679_v21 = vadd.f32 %v11647_v46, %v11216_v12 }
 0x5bc   : > { %v11711_v45 = vmax.f32 %v11679_v21, 0.0 }
 0x5be   : > { %v12774_v56 = vpack.c.bf16 %v11711_v45, %v11710_v10 }
 0x5c0   : > { %12790 = vst [vmem:[%s18515_s30 + $0x78] sm:$0xff] %v12774_v56  }
 0x5c1   : > { %14715 = shalt.err (!%p14712_p10)
}
 0x5c2   : > { %s14716_s11 = scalar_lea.hbm %s18674_s27, 2048  ;;  %s14720_s21 = scalar_lea.hbm %s18730_s10, 4096 }
 0x5c3   : > { %p14717_p6 = scmp.ne.s32.totalorder %s18674_s27, %s14716_s11  ;;  %p14721_p3 = scmp.lt.s32.totalorder %s18674_s27, %s18730_s10 }
 0x5c4   : > { %p14722_p11 = scmp.lt.s32.totalorder %s14720_s21, %s14716_s11 }
 0x5c5   : > { %p14718_p4 = pnand %p14717_p6, %p19484_p1 }
 0x5c6   : > { %p14723_p5 = por %p14722_p11, %p14721_p3 }
 0x5c7   : > { %p14719_p8 = pneg %p14718_p4 }
 0x5c9   : > { %p14724_p7 = pnand %p14723_p5, %p14719_p8 }
 0x5cb   : > { %14727 = shalt.err (!%p14724_p7)
}
 0x5cc   : > { %s14784_s12 = smov 64   ;;  %s14785_s24 = smov 4  }
 0x5cd   : > { %13997 = dma.vmem_to_hbm [thread:$0]  (%p19484_p1), %s18676_s18, 2048, %s18674_s27, %s11873_s23, %s14784_s12, %s14784_s12, %s14785_s24  }
 0x5ce PF: > { %s11901_s4 = sand.u32 1, %s14762_s13   ;;  %p19485_p12 = scmp.ne.s32.totalorder %s18750_s20, 0 }
 0x5cf   : > { %p19486_p9 = scmp.ge.s32.totalorder %s14774_s16, 2  ;;  %s11902_s17 = scalar_lea.sflag [#allocation6], %s11901_s4 }
 0x5d1   : > { %p14014_p13 = pnand %p19486_p9, %p19485_p12 }
 0x5d3   : > { %p14015_p0 = pneg %p14014_p13 }
 0x5d5   : > { %14757 = dma.done.wait (%p14015_p0), %s11902_s17, 2048  }
 0x5d6   : > { %14759 = vsyncadd (%p14015_p0), %s11902_s17, 4294965248  ;;  %s19487_s29 = sld [smem:[#allocation17_spill]]  ;;  %p25_p2 = scmp.ge.s32.totalorder %s14930_s26, 4  }
 0x5d7   : > { %s19488_s13 = smov %s14766_s14  ;;  %s19489_s14 = smov %s14770_s15 }
 0x5d8   : > { %s19491_s16 = smov %s14930_s26  ;;  %27 = sbr.rel (!%p25_p2) target bundleno = 11 (0xb), region = 127 }
 0x5dc   : > { %s19490_s15 = smov %s19487_s29 }
 0x5dd   :  { %11907 = vsyncpa [#allocation5], 1 }
 0x5de   :  { %11909 = vsyncpa [#allocation5 + $0x1], 1 }
 0x5df   :  { %11910 = vsyncpa [#allocation8], 1 }
 0x5e0   :  { %11911 = vsyncpa [#allocation11], 1 }
 0x5e1   :  { %11912 = vsyncpa [#allocation6], 1 }
 0x5e2   :  { %11914 = vsyncpa [#allocation6 + $0x1], 1 }

</bundles_post_ra>
